<compile_context>
chip_gen: v5e
topology: v5e:2x2
jax: 0.10.0
libtpu: 0.0.40
codegen_flags: <defaults>
</compile_context>

<pallas_src>
import jax
import jax.numpy as jnp
from jax import lax
from jax.experimental import pallas as pl
from jax.experimental.pallas import tpu as pltpu

EPS = 1e-5
_VMEM_LIMIT = 32 * 1024 * 1024  # explicit scoped-VMEM budget (safe on v5e/v6e/v7x)


# --------------------------------------------------------------------------
# in-kernel helpers
# --------------------------------------------------------------------------
def _zero_halo(pad_ref, C):
    """Zero only the 1-pixel halo strips of a (1, H+2, W+2, C) VMEM scratch."""
    _, Hp, Wp, _ = pad_ref.shape
    zrow = jnp.zeros((1, 1, Wp, C), jnp.float32)
    zcol = jnp.zeros((1, Hp, 1, C), jnp.float32)
    pad_ref[:, 0:1, :, :] = zrow
    pad_ref[:, Hp - 1:Hp, :, :] = zrow
    pad_ref[:, :, 0:1, :] = zcol
    pad_ref[:, :, Wp - 1:Wp, :] = zcol


def _im2col_into(imcol_ref, pad_ref, H, W, C):
    """Fill the (H*W, 9*C) im2col patch matrix from the padded slab."""
    xp = pad_ref[...]
    t = 0
    for ky in range(3):
        for kx in range(3):
            patch = xp[:, ky:ky + H, kx:kx + W, :].reshape(H * W, C)
            imcol_ref[:, t * C:(t + 1) * C] = patch
            t += 1


def _conv_from_im2col(imcol_ref, w_ref, b_ref):
    """One fused MXU matmul: (H*W, 9*Cin) @ (9*Cin, Cout), bf16 in / f32 out."""
    return jnp.dot(imcol_ref[...].astype(jnp.bfloat16), w_ref[...],
                   preferred_element_type=jnp.float32) + b_ref[...]


def _write_partial_stats(st_ref, y, Cout):
    """One-pass partial BN stats (sum, sum of squares) for this batch tile."""
    st_ref[:, 0:1, :] = jnp.sum(y, axis=0, keepdims=True).reshape(1, 1, Cout)
    st_ref[:, 1:2, :] = jnp.sum(y * y, axis=0, keepdims=True).reshape(1, 1, Cout)


# --------------------------------------------------------------------------
# kernels (each grid step = one batch tile)
# --------------------------------------------------------------------------
def conv1_stats_kernel(x_ref, w_ref, b_ref, y_ref, st_ref, xpad_ref, imcol_ref):
    _, H, W, Cin = x_ref.shape
    Cout = y_ref.shape[3]

    # fold padding=1 into the kernel
    _zero_halo(xpad_ref, Cin)
    xpad_ref[:, 1:H + 1, 1:W + 1, :] = x_ref[...].astype(jnp.float32)

    _im2col_into(imcol_ref, xpad_ref, H, W, Cin)
    y = _conv_from_im2col(imcol_ref, w_ref, b_ref)        # (H*W, Cout) f32

    y_ref[...] = y.reshape(1, H, W, Cout)
    _write_partial_stats(st_ref, y, Cout)


def bn1_conv2_stats_kernel(y1_ref, a1_ref, c1_ref, w_ref, b_ref,
                           y2_ref, st_ref, zpad_ref, imcol_ref):
    _, H, W, C = y1_ref.shape
    Cout = y2_ref.shape[3]

    # BN1 (affine form: y*a + c) + ReLU, in f32
    a = a1_ref[...].reshape(1, 1, 1, C)
    c = c1_ref[...].reshape(1, 1, 1, C)
    z = jnp.maximum(y1_ref[...] * a + c, 0.0)

    _zero_halo(zpad_ref, C)
    zpad_ref[:, 1:H + 1, 1:W + 1, :] = z

    _im2col_into(imcol_ref, zpad_ref, H, W, C)
    y2 = _conv_from_im2col(imcol_ref, w_ref, b_ref)       # (H*W, Cout) f32

    y2_ref[...] = y2.reshape(1, H, W, Cout)
    _write_partial_stats(st_ref, y2, Cout)


def bn2_relu_kernel(y2_ref, a2_ref, c2_ref, o_ref):
    _, H, W, C = y2_ref.shape
    a = a2_ref[...].reshape(1, 1, 1, C)
    c = c2_ref[...].reshape(1, 1, 1, C)
    o_ref[...] = jnp.maximum(y2_ref[...] * a + c, 0.0).astype(o_ref.dtype)


# --------------------------------------------------------------------------
# parameters
# --------------------------------------------------------------------------
def init_params(key, in_channels, out_channels):
    k1, k2, k3, k4 = jax.random.split(key, 4)
    # Conv weights in fused im2col layout (9*Cin, Cout); row = (ky*3+kx)*Cin + ci.
    # (To import PyTorch weights (Cout,Cin,3,3): transpose to (3,3,Cin,Cout) and
    #  reshape to (9*Cin, Cout).)
    w1 = jax.random.normal(k1, (9 * in_channels, out_channels), jnp.float32) * 0.1
    cb1 = jax.random.normal(k2, (1, out_channels), jnp.float32) * 0.01
    w2 = jax.random.normal(k3, (9 * out_channels, out_channels), jnp.float32) * 0.1
    cb2 = jax.random.normal(k4, (1, out_channels), jnp.float32) * 0.01
    # BatchNorm default init: gamma=1, beta=0
    g1 = jnp.ones((1, out_channels), jnp.float32)
    b1 = jnp.zeros((1, out_channels), jnp.float32)
    g2 = jnp.ones((1, out_channels), jnp.float32)
    b2 = jnp.zeros((1, out_channels), jnp.float32)
    return dict(w1=w1, cb1=cb1, g1=g1, b1=b1, w2=w2, cb2=cb2, g2=g2, b2=b2)


def _finalize_bn(partial_stats, gamma, beta, count):
    """Reduce per-tile (sum, sumsq) to per-channel scale/shift for BN."""
    s = jnp.sum(partial_stats[:, 0, :], axis=0)
    ss = jnp.sum(partial_stats[:, 1, :], axis=0)
    mean = s / count
    var = jnp.maximum(ss / count - mean * mean, 0.0)   # biased var, clamped
    inv = lax.rsqrt(var + EPS)
    g = gamma.reshape(-1)
    a = g * inv
    c = beta.reshape(-1) - g * mean * inv
    C = a.shape[0]
    return a.reshape(1, C), c.reshape(1, C)


# --------------------------------------------------------------------------
# wrapper
# --------------------------------------------------------------------------
def double_conv(x_nchw, p):
    N, Cin, H, W = x_nchw.shape
    Cout = p["g1"].shape[-1]
    count = jnp.float32(N * H * W)

    # NCHW -> NHWC (channels last = lane dim for the channel contraction)
    # TODO(synk): fold these boundary transposes into the kernels as well.
    x = jnp.transpose(x_nchw, (0, 2, 3, 1)).astype(jnp.float32)

    # bf16 operands for the MXU, f32 accumulation inside the kernels
    w1 = p["w1"].astype(jnp.bfloat16)
    w2 = p["w2"].astype(jnp.bfloat16)

    cparams = pltpu.CompilerParams(dimension_semantics=("parallel",),
                                   vmem_limit_bytes=_VMEM_LIMIT)

    def tile4(C):
        return pl.BlockSpec((1, H, W, C), lambda n: (n, 0, 0, 0))

    def rep(shape):
        nd = len(shape)
        return pl.BlockSpec(shape, lambda n, _nd=nd: (0,) * _nd)

    stats_spec = pl.BlockSpec((1, 2, Cout), lambda n: (n, 0, 0))

    # ---- pass 1: conv1 + partial BN1 stats ------------------------------
    y1, st1 = pl.pallas_call(
        conv1_stats_kernel,
        out_shape=(jax.ShapeDtypeStruct((N, H, W, Cout), jnp.float32),
                   jax.ShapeDtypeStruct((N, 2, Cout), jnp.float32)),
        grid_spec=pltpu.PrefetchScalarGridSpec(
            num_scalar_prefetch=0, grid=(N,),
            in_specs=[tile4(Cin), rep(w1.shape), rep(p["cb1"].shape)],
            out_specs=(tile4(Cout), stats_spec),
            scratch_shapes=[pltpu.VMEM((1, H + 2, W + 2, Cin), jnp.float32),
                            pltpu.VMEM((H * W, 9 * Cin), jnp.float32)]),
        compiler_params=cparams,
    )(x, w1, p["cb1"])

    a1, c1 = _finalize_bn(st1, p["g1"], p["b1"], count)

    # ---- pass 2: BN1 + ReLU + conv2 + partial BN2 stats ------------------
    y2, st2 = pl.pallas_call(
        bn1_conv2_stats_kernel,
        out_shape=(jax.ShapeDtypeStruct((N, H, W, Cout), jnp.float32),
                   jax.ShapeDtypeStruct((N, 2, Cout), jnp.float32)),
        grid_spec=pltpu.PrefetchScalarGridSpec(
            num_scalar_prefetch=0, grid=(N,),
            in_specs=[tile4(Cout), rep(a1.shape), rep(c1.shape),
                      rep(w2.shape), rep(p["cb2"].shape)],
            out_specs=(tile4(Cout), stats_spec),
            scratch_shapes=[pltpu.VMEM((1, H + 2, W + 2, Cout), jnp.float32),
                            pltpu.VMEM((H * W, 9 * Cout), jnp.float32)]),
        compiler_params=cparams,
    )(y1, a1, c1, w2, p["cb2"])

    a2, c2 = _finalize_bn(st2, p["g2"], p["b2"], count)

    # ---- pass 3: BN2 + ReLU ----------------------------------------------
    out_nhwc = pl.pallas_call(
        bn2_relu_kernel,
        out_shape=jax.ShapeDtypeStruct((N, H, W, Cout), x_nchw.dtype),
        grid_spec=pltpu.PrefetchScalarGridSpec(
            num_scalar_prefetch=0, grid=(N,),
            in_specs=[tile4(Cout), rep(a2.shape), rep(c2.shape)],
            out_specs=tile4(Cout)),
        compiler_params=cparams,
    )(y2, a2, c2)

    return jnp.transpose(out_nhwc, (0, 3, 1, 2))            # NHWC -> NCHW


if __name__ == "__main__":
    key = jax.random.PRNGKey(0)
    kx, kp = jax.random.split(key)

    N, Cin, Cout, H, W = 2, 4, 8, 16, 16
    x = jax.random.normal(kx, (N, Cin, H, W), jnp.float32)
    params = init_params(kp, Cin, Cout)

    fwd = jax.jit(double_conv)
    out = jax.block_until_ready(fwd(x, params))

    assert out.shape == (N, Cout, H, W), out.shape
    assert bool(jnp.all(out >= 0.0)), "ReLU output must be non-negative"
    assert bool(jnp.all(jnp.isfinite(out))), "non-finite values in output"
    print("KERNEL_OK")
</pallas_src>

<mosaic_0001>
module attributes {stable_mosaic.version = 11 : i64} {
  func.func @conv1_stats_kernel(%arg0: i32, %arg1: memref<1x16x16x4xf32, #tpu.memory_space<vmem>>, %arg2: memref<36x8xbf16, #tpu.memory_space<vmem>>, %arg3: memref<1x8xf32, #tpu.memory_space<vmem>>, %arg4: memref<1x16x16x8xf32, #tpu.memory_space<vmem>>, %arg5: memref<1x2x8xf32, #tpu.memory_space<vmem>>, %arg6: memref<1x18x18x4xf32, #tpu.memory_space<vmem>>, %arg7: memref<256x36xf32, #tpu.memory_space<vmem>>) attributes {dimension_semantics = [#tpu.dimension_semantics<parallel>], iteration_bounds = array<i64: 2>, scalar_prefetch = 0 : i64, scratch_operands = 2 : i64, tpu.core_type = #tpu.core_type<tc>, window_params = [{transform_indices = @transform_0, window_bounds = array<i64: 1, 16, 16, 4>}, {pipeline_mode = #tpu.pipeline_mode<synchronous>, transform_indices = @transform_1, window_bounds = array<i64: 36, 8>}, {pipeline_mode = #tpu.pipeline_mode<synchronous>, transform_indices = @transform_2, window_bounds = array<i64: 1, 8>}, {transform_indices = @transform_3, window_bounds = array<i64: 1, 16, 16, 8>}, {transform_indices = @transform_4, window_bounds = array<i64: 1, 2, 8>}]} {
    %cst = arith.constant 0.000000e+00 : f32
    %0 = vector.broadcast %cst : f32 to vector<1x1x18x4xf32>
    %cst_0 = arith.constant 0.000000e+00 : f32
    %1 = vector.broadcast %cst_0 : f32 to vector<1x18x1x4xf32>
    %c0 = arith.constant 0 : index
    %c0_1 = arith.constant 0 : index
    %c0_2 = arith.constant 0 : index
    %c0_3 = arith.constant 0 : index
    %2 = vector.load %arg6[%c0, %c0_1, %c0_2, %c0_3] : memref<1x18x18x4xf32, #tpu.memory_space<vmem>>, vector<1x1x18x4xf32>
    tpu.vector_store %arg6[%c0, %c0_1, %c0_2, %c0_3], %0 {strides = array<i32>} : memref<1x18x18x4xf32, #tpu.memory_space<vmem>>, vector<1x1x18x4xf32>,
    %c0_4 = arith.constant 0 : index
    %c17 = arith.constant 17 : index
    %c0_5 = arith.constant 0 : index
    %c0_6 = arith.constant 0 : index
    %3 = vector.load %arg6[%c0_4, %c17, %c0_5, %c0_6] : memref<1x18x18x4xf32, #tpu.memory_space<vmem>>, vector<1x1x18x4xf32>
    tpu.vector_store %arg6[%c0_4, %c17, %c0_5, %c0_6], %0 {strides = array<i32>} : memref<1x18x18x4xf32, #tpu.memory_space<vmem>>, vector<1x1x18x4xf32>,
    %c0_7 = arith.constant 0 : index
    %c0_8 = arith.constant 0 : index
    %c0_9 = arith.constant 0 : index
    %c0_10 = arith.constant 0 : index
    %4 = vector.load %arg6[%c0_7, %c0_8, %c0_9, %c0_10] : memref<1x18x18x4xf32, #tpu.memory_space<vmem>>, vector<1x18x1x4xf32>
    tpu.vector_store %arg6[%c0_7, %c0_8, %c0_9, %c0_10], %1 {strides = array<i32>} : memref<1x18x18x4xf32, #tpu.memory_space<vmem>>, vector<1x18x1x4xf32>,
    %c0_11 = arith.constant 0 : index
    %c0_12 = arith.constant 0 : index
    %c17_13 = arith.constant 17 : index
    %c0_14 = arith.constant 0 : index
    %5 = vector.load %arg6[%c0_11, %c0_12, %c17_13, %c0_14] : memref<1x18x18x4xf32, #tpu.memory_space<vmem>>, vector<1x18x1x4xf32>
    tpu.vector_store %arg6[%c0_11, %c0_12, %c17_13, %c0_14], %1 {strides = array<i32>} : memref<1x18x18x4xf32, #tpu.memory_space<vmem>>, vector<1x18x1x4xf32>,
    %c0_15 = arith.constant 0 : index
    %c0_16 = arith.constant 0 : index
    %c0_17 = arith.constant 0 : index
    %c0_18 = arith.constant 0 : index
    %6 = vector.load %arg1[%c0_15, %c0_16, %c0_17, %c0_18] : memref<1x16x16x4xf32, #tpu.memory_space<vmem>>, vector<1x16x16x4xf32>
    %c0_19 = arith.constant 0 : index
    %c1 = arith.constant 1 : index
    %c1_20 = arith.constant 1 : index
    %c0_21 = arith.constant 0 : index
    %7 = vector.load %arg6[%c0_19, %c1, %c1_20, %c0_21] : memref<1x18x18x4xf32, #tpu.memory_space<vmem>>, vector<1x16x16x4xf32>
    tpu.vector_store %arg6[%c0_19, %c1, %c1_20, %c0_21], %6 {strides = array<i32>} : memref<1x18x18x4xf32, #tpu.memory_space<vmem>>, vector<1x16x16x4xf32>,
    %c0_22 = arith.constant 0 : index
    %c0_23 = arith.constant 0 : index
    %c0_24 = arith.constant 0 : index
    %c0_25 = arith.constant 0 : index
    %8 = vector.load %arg6[%c0_22, %c0_23, %c0_24, %c0_25] : memref<1x18x18x4xf32, #tpu.memory_space<vmem>>, vector<1x18x18x4xf32>
    %9 = vector.extract_strided_slice %8 {offsets = [0, 0, 0, 0], sizes = [1, 16, 16, 4], strides = [1, 1, 1, 1]} : vector<1x18x18x4xf32> to vector<1x16x16x4xf32>
    %10 = vector.shape_cast %9 : vector<1x16x16x4xf32> to vector<256x4xf32>
    %c0_26 = arith.constant 0 : index
    %c0_27 = arith.constant 0 : index
    %11 = vector.load %arg7[%c0_26, %c0_27] : memref<256x36xf32, #tpu.memory_space<vmem>>, vector<256x4xf32>
    tpu.vector_store %arg7[%c0_26, %c0_27], %10 {strides = array<i32>} : memref<256x36xf32, #tpu.memory_space<vmem>>, vector<256x4xf32>,
    %12 = vector.extract_strided_slice %8 {offsets = [0, 0, 1, 0], sizes = [1, 16, 16, 4], strides = [1, 1, 1, 1]} : vector<1x18x18x4xf32> to vector<1x16x16x4xf32>
    %13 = vector.shape_cast %12 : vector<1x16x16x4xf32> to vector<256x4xf32>
    %c0_28 = arith.constant 0 : index
    %c4 = arith.constant 4 : index
    %14 = vector.load %arg7[%c0_28, %c4] : memref<256x36xf32, #tpu.memory_space<vmem>>, vector<256x4xf32>
    tpu.vector_store %arg7[%c0_28, %c4], %13 {strides = array<i32>} : memref<256x36xf32, #tpu.memory_space<vmem>>, vector<256x4xf32>,
    %15 = vector.extract_strided_slice %8 {offsets = [0, 0, 2, 0], sizes = [1, 16, 16, 4], strides = [1, 1, 1, 1]} : vector<1x18x18x4xf32> to vector<1x16x16x4xf32>
    %16 = vector.shape_cast %15 : vector<1x16x16x4xf32> to vector<256x4xf32>
    %c0_29 = arith.constant 0 : index
    %c8 = arith.constant 8 : index
    %17 = vector.load %arg7[%c0_29, %c8] : memref<256x36xf32, #tpu.memory_space<vmem>>, vector<256x4xf32>
    tpu.vector_store %arg7[%c0_29, %c8], %16 {strides = array<i32>} : memref<256x36xf32, #tpu.memory_space<vmem>>, vector<256x4xf32>,
    %18 = vector.extract_strided_slice %8 {offsets = [0, 1, 0, 0], sizes = [1, 16, 16, 4], strides = [1, 1, 1, 1]} : vector<1x18x18x4xf32> to vector<1x16x16x4xf32>
    %19 = vector.shape_cast %18 : vector<1x16x16x4xf32> to vector<256x4xf32>
    %c0_30 = arith.constant 0 : index
    %c12 = arith.constant 12 : index
    %20 = vector.load %arg7[%c0_30, %c12] : memref<256x36xf32, #tpu.memory_space<vmem>>, vector<256x4xf32>
    tpu.vector_store %arg7[%c0_30, %c12], %19 {strides = array<i32>} : memref<256x36xf32, #tpu.memory_space<vmem>>, vector<256x4xf32>,
    %21 = vector.extract_strided_slice %8 {offsets = [0, 1, 1, 0], sizes = [1, 16, 16, 4], strides = [1, 1, 1, 1]} : vector<1x18x18x4xf32> to vector<1x16x16x4xf32>
    %22 = vector.shape_cast %21 : vector<1x16x16x4xf32> to vector<256x4xf32>
    %c0_31 = arith.constant 0 : index
    %c16 = arith.constant 16 : index
    %23 = vector.load %arg7[%c0_31, %c16] : memref<256x36xf32, #tpu.memory_space<vmem>>, vector<256x4xf32>
    tpu.vector_store %arg7[%c0_31, %c16], %22 {strides = array<i32>} : memref<256x36xf32, #tpu.memory_space<vmem>>, vector<256x4xf32>,
    %24 = vector.extract_strided_slice %8 {offsets = [0, 1, 2, 0], sizes = [1, 16, 16, 4], strides = [1, 1, 1, 1]} : vector<1x18x18x4xf32> to vector<1x16x16x4xf32>
    %25 = vector.shape_cast %24 : vector<1x16x16x4xf32> to vector<256x4xf32>
    %c0_32 = arith.constant 0 : index
    %c20 = arith.constant 20 : index
    %26 = vector.load %arg7[%c0_32, %c20] : memref<256x36xf32, #tpu.memory_space<vmem>>, vector<256x4xf32>
    tpu.vector_store %arg7[%c0_32, %c20], %25 {strides = array<i32>} : memref<256x36xf32, #tpu.memory_space<vmem>>, vector<256x4xf32>,
    %27 = vector.extract_strided_slice %8 {offsets = [0, 2, 0, 0], sizes = [1, 16, 16, 4], strides = [1, 1, 1, 1]} : vector<1x18x18x4xf32> to vector<1x16x16x4xf32>
    %28 = vector.shape_cast %27 : vector<1x16x16x4xf32> to vector<256x4xf32>
    %c0_33 = arith.constant 0 : index
    %c24 = arith.constant 24 : index
    %29 = vector.load %arg7[%c0_33, %c24] : memref<256x36xf32, #tpu.memory_space<vmem>>, vector<256x4xf32>
    tpu.vector_store %arg7[%c0_33, %c24], %28 {strides = array<i32>} : memref<256x36xf32, #tpu.memory_space<vmem>>, vector<256x4xf32>,
    %30 = vector.extract_strided_slice %8 {offsets = [0, 2, 1, 0], sizes = [1, 16, 16, 4], strides = [1, 1, 1, 1]} : vector<1x18x18x4xf32> to vector<1x16x16x4xf32>
    %31 = vector.shape_cast %30 : vector<1x16x16x4xf32> to vector<256x4xf32>
    %c0_34 = arith.constant 0 : index
    %c28 = arith.constant 28 : index
    %32 = vector.load %arg7[%c0_34, %c28] : memref<256x36xf32, #tpu.memory_space<vmem>>, vector<256x4xf32>
    tpu.vector_store %arg7[%c0_34, %c28], %31 {strides = array<i32>} : memref<256x36xf32, #tpu.memory_space<vmem>>, vector<256x4xf32>,
    %33 = vector.extract_strided_slice %8 {offsets = [0, 2, 2, 0], sizes = [1, 16, 16, 4], strides = [1, 1, 1, 1]} : vector<1x18x18x4xf32> to vector<1x16x16x4xf32>
    %34 = vector.shape_cast %33 : vector<1x16x16x4xf32> to vector<256x4xf32>
    %c0_35 = arith.constant 0 : index
    %c32 = arith.constant 32 : index
    %35 = vector.load %arg7[%c0_35, %c32] : memref<256x36xf32, #tpu.memory_space<vmem>>, vector<256x4xf32>
    tpu.vector_store %arg7[%c0_35, %c32], %34 {strides = array<i32>} : memref<256x36xf32, #tpu.memory_space<vmem>>, vector<256x4xf32>,
    %c0_36 = arith.constant 0 : index
    %c0_37 = arith.constant 0 : index
    %36 = vector.load %arg7[%c0_36, %c0_37] : memref<256x36xf32, #tpu.memory_space<vmem>>, vector<256x36xf32>
    %37 = arith.truncf %36 : vector<256x36xf32> to vector<256x36xbf16>
    %c0_38 = arith.constant 0 : index
    %c0_39 = arith.constant 0 : index
    %38 = vector.load %arg2[%c0_38, %c0_39] : memref<36x8xbf16, #tpu.memory_space<vmem>>, vector<36x8xbf16>
    %cst_40 = arith.constant dense<0.000000e+00> : vector<256x8xf32>
    %39 = tpu.matmul %37, %38, %cst_40 {dimension_numbers = #tpu.dot_dimension_numbers<[1], [0], [0], [1], [0, 0, 1, 1], [], []>} : vector<256x36xbf16>, vector<36x8xbf16>, vector<256x8xf32> -> vector<256x8xf32>
    %c0_41 = arith.constant 0 : index
    %c0_42 = arith.constant 0 : index
    %40 = vector.load %arg3[%c0_41, %c0_42] : memref<1x8xf32, #tpu.memory_space<vmem>>, vector<1x8xf32>
    %41 = vector.broadcast %40 : vector<1x8xf32> to vector<256x8xf32>
    %42 = arith.addf %39, %41 : vector<256x8xf32>
    %43 = vector.shape_cast %42 : vector<256x8xf32> to vector<1x16x16x8xf32>
    %c0_43 = arith.constant 0 : index
    %c0_44 = arith.constant 0 : index
    %c0_45 = arith.constant 0 : index
    %c0_46 = arith.constant 0 : index
    %44 = vector.load %arg4[%c0_43, %c0_44, %c0_45, %c0_46] : memref<1x16x16x8xf32, #tpu.memory_space<vmem>>, vector<1x16x16x8xf32>
    tpu.vector_store %arg4[%c0_43, %c0_44, %c0_45, %c0_46], %43 {strides = array<i32>} : memref<1x16x16x8xf32, #tpu.memory_space<vmem>>, vector<1x16x16x8xf32>,
    %cst_47 = arith.constant dense<0.000000e+00> : vector<8xf32>
    %45 = vector.multi_reduction <add>, %42, %cst_47 [0] : vector<256x8xf32> to vector<8xf32>
    %46 = vector.shape_cast %45 : vector<8xf32> to vector<1x8xf32>
    %47 = vector.shape_cast %46 : vector<1x8xf32> to vector<1x1x8xf32>
    %c0_48 = arith.constant 0 : index
    %c0_49 = arith.constant 0 : index
    %c0_50 = arith.constant 0 : index
    %48 = vector.load %arg5[%c0_48, %c0_49, %c0_50] : memref<1x2x8xf32, #tpu.memory_space<vmem>>, vector<1x1x8xf32>
    tpu.vector_store %arg5[%c0_48, %c0_49, %c0_50], %47 {strides = array<i32>} : memref<1x2x8xf32, #tpu.memory_space<vmem>>, vector<1x1x8xf32>,
    %49 = arith.mulf %42, %42 : vector<256x8xf32>
    %cst_51 = arith.constant dense<0.000000e+00> : vector<8xf32>
    %50 = vector.multi_reduction <add>, %49, %cst_51 [0] : vector<256x8xf32> to vector<8xf32>
    %51 = vector.shape_cast %50 : vector<8xf32> to vector<1x8xf32>
    %52 = vector.shape_cast %51 : vector<1x8xf32> to vector<1x1x8xf32>
    %c0_52 = arith.constant 0 : index
    %c1_53 = arith.constant 1 : index
    %c0_54 = arith.constant 0 : index
    %53 = vector.load %arg5[%c0_52, %c1_53, %c0_54] : memref<1x2x8xf32, #tpu.memory_space<vmem>>, vector<1x1x8xf32>
    tpu.vector_store %arg5[%c0_52, %c1_53, %c0_54], %52 {strides = array<i32>} : memref<1x2x8xf32, #tpu.memory_space<vmem>>, vector<1x1x8xf32>,
    return
  }
  func.func @transform_0(%arg0: i32) -> (i32, i32, i32, i32) {
    %c0_i32 = arith.constant 0 : i32
    %c0_i32_0 = arith.constant 0 : i32
    %c0_i32_1 = arith.constant 0 : i32
    %c0_i32_2 = arith.constant 0 : i32
    return %arg0, %c0_i32, %c0_i32_0, %c0_i32_1 : i32, i32, i32, i32
  }
  func.func @transform_1(%arg0: i32) -> (i32, i32) {
    %c0_i32 = arith.constant 0 : i32
    %c0_i32_0 = arith.constant 0 : i32
    %c0_i32_1 = arith.constant 0 : i32
    return %c0_i32, %c0_i32_0 : i32, i32
  }
  func.func @transform_2(%arg0: i32) -> (i32, i32) {
    %c0_i32 = arith.constant 0 : i32
    %c0_i32_0 = arith.constant 0 : i32
    %c0_i32_1 = arith.constant 0 : i32
    return %c0_i32, %c0_i32_0 : i32, i32
  }
  func.func @transform_3(%arg0: i32) -> (i32, i32, i32, i32) {
    %c0_i32 = arith.constant 0 : i32
    %c0_i32_0 = arith.constant 0 : i32
    %c0_i32_1 = arith.constant 0 : i32
    %c0_i32_2 = arith.constant 0 : i32
    return %arg0, %c0_i32, %c0_i32_0, %c0_i32_1 : i32, i32, i32, i32
  }
  func.func @transform_4(%arg0: i32) -> (i32, i32, i32) {
    %c0_i32 = arith.constant 0 : i32
    %c0_i32_0 = arith.constant 0 : i32
    %c0_i32_1 = arith.constant 0 : i32
    return %arg0, %c0_i32, %c0_i32_0 : i32, i32, i32
  }
}

module attributes {stable_mosaic.version = 11 : i64} {
  func.func @bn2_relu_kernel(%arg0: i32, %arg1: memref<1x16x16x8xf32, #tpu.memory_space<vmem>>, %arg2: memref<1x8xf32, #tpu.memory_space<vmem>>, %arg3: memref<1x8xf32, #tpu.memory_space<vmem>>, %arg4: memref<1x16x16x8xf32, #tpu.memory_space<vmem>>) attributes {dimension_semantics = [#tpu.dimension_semantics<parallel>], iteration_bounds = array<i64: 2>, scalar_prefetch = 0 : i64, scratch_operands = 0 : i64, tpu.core_type = #tpu.core_type<tc>, window_params = [{transform_indices = @transform_0, window_bounds = array<i64: 1, 16, 16, 8>}, {pipeline_mode = #tpu.pipeline_mode<synchronous>, transform_indices = @transform_1, window_bounds = array<i64: 1, 8>}, {pipeline_mode = #tpu.pipeline_mode<synchronous>, transform_indices = @transform_2, window_bounds = array<i64: 1, 8>}, {transform_indices = @transform_3, window_bounds = array<i64: 1, 16, 16, 8>}]} {
    %c0 = arith.constant 0 : index
    %c0_0 = arith.constant 0 : index
    %0 = vector.load %arg2[%c0, %c0_0] : memref<1x8xf32, #tpu.memory_space<vmem>>, vector<1x8xf32>
    %1 = vector.shape_cast %0 : vector<1x8xf32> to vector<1x1x1x8xf32>
    %c0_1 = arith.constant 0 : index
    %c0_2 = arith.constant 0 : index
    %2 = vector.load %arg3[%c0_1, %c0_2] : memref<1x8xf32, #tpu.memory_space<vmem>>, vector<1x8xf32>
    %3 = vector.shape_cast %2 : vector<1x8xf32> to vector<1x1x1x8xf32>
    %c0_3 = arith.constant 0 : index
    %c0_4 = arith.constant 0 : index
    %c0_5 = arith.constant 0 : index
    %c0_6 = arith.constant 0 : index
    %4 = vector.load %arg1[%c0_3, %c0_4, %c0_5, %c0_6] : memref<1x16x16x8xf32, #tpu.memory_space<vmem>>, vector<1x16x16x8xf32>
    %5 = vector.broadcast %1 : vector<1x1x1x8xf32> to vector<1x16x16x8xf32>
    %6 = arith.mulf %4, %5 : vector<1x16x16x8xf32>
    %7 = vector.broadcast %3 : vector<1x1x1x8xf32> to vector<1x16x16x8xf32>
    %8 = arith.addf %6, %7 : vector<1x16x16x8xf32>
    %cst = arith.constant 0.000000e+00 : f32
    %9 = vector.broadcast %cst : f32 to vector<1x16x16x8xf32>
    %10 = arith.maximumf %8, %9 : vector<1x16x16x8xf32>
    %c0_7 = arith.constant 0 : index
    %c0_8 = arith.constant 0 : index
    %c0_9 = arith.constant 0 : index
    %c0_10 = arith.constant 0 : index
    %11 = vector.load %arg4[%c0_7, %c0_8, %c0_9, %c0_10] : memref<1x16x16x8xf32, #tpu.memory_space<vmem>>, vector<1x16x16x8xf32>
    tpu.vector_store %arg4[%c0_7, %c0_8, %c0_9, %c0_10], %10 {strides = array<i32>} : memref<1x16x16x8xf32, #tpu.memory_space<vmem>>, vector<1x16x16x8xf32>,
    return
  }
  func.func @transform_0(%arg0: i32) -> (i32, i32, i32, i32) {
    %c0_i32 = arith.constant 0 : i32
    %c0_i32_0 = arith.constant 0 : i32
    %c0_i32_1 = arith.constant 0 : i32
    %c0_i32_2 = arith.constant 0 : i32
    return %arg0, %c0_i32, %c0_i32_0, %c0_i32_1 : i32, i32, i32, i32
  }
  func.func @transform_1(%arg0: i32) -> (i32, i32) {
    %c0_i32 = arith.constant 0 : i32
    %c0_i32_0 = arith.constant 0 : i32
    %c0_i32_1 = arith.constant 0 : i32
    return %c0_i32, %c0_i32_0 : i32, i32
  }
  func.func @transform_2(%arg0: i32) -> (i32, i32) {
    %c0_i32 = arith.constant 0 : i32
    %c0_i32_0 = arith.constant 0 : i32
    %c0_i32_1 = arith.constant 0 : i32
    return %c0_i32, %c0_i32_0 : i32, i32
  }
  func.func @transform_3(%arg0: i32) -> (i32, i32, i32, i32) {
    %c0_i32 = arith.constant 0 : i32
    %c0_i32_0 = arith.constant 0 : i32
    %c0_i32_1 = arith.constant 0 : i32
    %c0_i32_2 = arith.constant 0 : i32
    return %arg0, %c0_i32, %c0_i32_0, %c0_i32_1 : i32, i32, i32, i32
  }
}

module attributes {stable_mosaic.version = 11 : i64} {
  func.func @bn1_conv2_stats_kernel(%arg0: i32, %arg1: memref<1x16x16x8xf32, #tpu.memory_space<vmem>>, %arg2: memref<1x8xf32, #tpu.memory_space<vmem>>, %arg3: memref<1x8xf32, #tpu.memory_space<vmem>>, %arg4: memref<72x8xbf16, #tpu.memory_space<vmem>>, %arg5: memref<1x8xf32, #tpu.memory_space<vmem>>, %arg6: memref<1x16x16x8xf32, #tpu.memory_space<vmem>>, %arg7: memref<1x2x8xf32, #tpu.memory_space<vmem>>, %arg8: memref<1x18x18x8xf32, #tpu.memory_space<vmem>>, %arg9: memref<256x72xf32, #tpu.memory_space<vmem>>) attributes {dimension_semantics = [#tpu.dimension_semantics<parallel>], iteration_bounds = array<i64: 2>, scalar_prefetch = 0 : i64, scratch_operands = 2 : i64, tpu.core_type = #tpu.core_type<tc>, window_params = [{transform_indices = @transform_0, window_bounds = array<i64: 1, 16, 16, 8>}, {pipeline_mode = #tpu.pipeline_mode<synchronous>, transform_indices = @transform_1, window_bounds = array<i64: 1, 8>}, {pipeline_mode = #tpu.pipeline_mode<synchronous>, transform_indices = @transform_2, window_bounds = array<i64: 1, 8>}, {pipeline_mode = #tpu.pipeline_mode<synchronous>, transform_indices = @transform_3, window_bounds = array<i64: 72, 8>}, {pipeline_mode = #tpu.pipeline_mode<synchronous>, transform_indices = @transform_4, window_bounds = array<i64: 1, 8>}, {transform_indices = @transform_5, window_bounds = array<i64: 1, 16, 16, 8>}, {transform_indices = @transform_6, window_bounds = array<i64: 1, 2, 8>}]} {
    %c0 = arith.constant 0 : index
    %c0_0 = arith.constant 0 : index
    %0 = vector.load %arg2[%c0, %c0_0] : memref<1x8xf32, #tpu.memory_space<vmem>>, vector<1x8xf32>
    %1 = vector.shape_cast %0 : vector<1x8xf32> to vector<1x1x1x8xf32>
    %c0_1 = arith.constant 0 : index
    %c0_2 = arith.constant 0 : index
    %2 = vector.load %arg3[%c0_1, %c0_2] : memref<1x8xf32, #tpu.memory_space<vmem>>, vector<1x8xf32>
    %3 = vector.shape_cast %2 : vector<1x8xf32> to vector<1x1x1x8xf32>
    %c0_3 = arith.constant 0 : index
    %c0_4 = arith.constant 0 : index
    %c0_5 = arith.constant 0 : index
    %c0_6 = arith.constant 0 : index
    %4 = vector.load %arg1[%c0_3, %c0_4, %c0_5, %c0_6] : memref<1x16x16x8xf32, #tpu.memory_space<vmem>>, vector<1x16x16x8xf32>
    %5 = vector.broadcast %1 : vector<1x1x1x8xf32> to vector<1x16x16x8xf32>
    %6 = arith.mulf %4, %5 : vector<1x16x16x8xf32>
    %7 = vector.broadcast %3 : vector<1x1x1x8xf32> to vector<1x16x16x8xf32>
    %8 = arith.addf %6, %7 : vector<1x16x16x8xf32>
    %cst = arith.constant 0.000000e+00 : f32
    %9 = vector.broadcast %cst : f32 to vector<1x16x16x8xf32>
    %10 = arith.maximumf %8, %9 : vector<1x16x16x8xf32>
    %cst_7 = arith.constant 0.000000e+00 : f32
    %11 = vector.broadcast %cst_7 : f32 to vector<1x1x18x8xf32>
    %cst_8 = arith.constant 0.000000e+00 : f32
    %12 = vector.broadcast %cst_8 : f32 to vector<1x18x1x8xf32>
    %c0_9 = arith.constant 0 : index
    %c0_10 = arith.constant 0 : index
    %c0_11 = arith.constant 0 : index
    %c0_12 = arith.constant 0 : index
    %13 = vector.load %arg8[%c0_9, %c0_10, %c0_11, %c0_12] : memref<1x18x18x8xf32, #tpu.memory_space<vmem>>, vector<1x1x18x8xf32>
    tpu.vector_store %arg8[%c0_9, %c0_10, %c0_11, %c0_12], %11 {strides = array<i32>} : memref<1x18x18x8xf32, #tpu.memory_space<vmem>>, vector<1x1x18x8xf32>,
    %c0_13 = arith.constant 0 : index
    %c17 = arith.constant 17 : index
    %c0_14 = arith.constant 0 : index
    %c0_15 = arith.constant 0 : index
    %14 = vector.load %arg8[%c0_13, %c17, %c0_14, %c0_15] : memref<1x18x18x8xf32, #tpu.memory_space<vmem>>, vector<1x1x18x8xf32>
    tpu.vector_store %arg8[%c0_13, %c17, %c0_14, %c0_15], %11 {strides = array<i32>} : memref<1x18x18x8xf32, #tpu.memory_space<vmem>>, vector<1x1x18x8xf32>,
    %c0_16 = arith.constant 0 : index
    %c0_17 = arith.constant 0 : index
    %c0_18 = arith.constant 0 : index
    %c0_19 = arith.constant 0 : index
    %15 = vector.load %arg8[%c0_16, %c0_17, %c0_18, %c0_19] : memref<1x18x18x8xf32, #tpu.memory_space<vmem>>, vector<1x18x1x8xf32>
    tpu.vector_store %arg8[%c0_16, %c0_17, %c0_18, %c0_19], %12 {strides = array<i32>} : memref<1x18x18x8xf32, #tpu.memory_space<vmem>>, vector<1x18x1x8xf32>,
    %c0_20 = arith.constant 0 : index
    %c0_21 = arith.constant 0 : index
    %c17_22 = arith.constant 17 : index
    %c0_23 = arith.constant 0 : index
    %16 = vector.load %arg8[%c0_20, %c0_21, %c17_22, %c0_23] : memref<1x18x18x8xf32, #tpu.memory_space<vmem>>, vector<1x18x1x8xf32>
    tpu.vector_store %arg8[%c0_20, %c0_21, %c17_22, %c0_23], %12 {strides = array<i32>} : memref<1x18x18x8xf32, #tpu.memory_space<vmem>>, vector<1x18x1x8xf32>,
    %c0_24 = arith.constant 0 : index
    %c1 = arith.constant 1 : index
    %c1_25 = arith.constant 1 : index
    %c0_26 = arith.constant 0 : index
    %17 = vector.load %arg8[%c0_24, %c1, %c1_25, %c0_26] : memref<1x18x18x8xf32, #tpu.memory_space<vmem>>, vector<1x16x16x8xf32>
    tpu.vector_store %arg8[%c0_24, %c1, %c1_25, %c0_26], %10 {strides = array<i32>} : memref<1x18x18x8xf32, #tpu.memory_space<vmem>>, vector<1x16x16x8xf32>,
    %c0_27 = arith.constant 0 : index
    %c0_28 = arith.constant 0 : index
    %c0_29 = arith.constant 0 : index
    %c0_30 = arith.constant 0 : index
    %18 = vector.load %arg8[%c0_27, %c0_28, %c0_29, %c0_30] : memref<1x18x18x8xf32, #tpu.memory_space<vmem>>, vector<1x18x18x8xf32>
    %19 = vector.extract_strided_slice %18 {offsets = [0, 0, 0, 0], sizes = [1, 16, 16, 8], strides = [1, 1, 1, 1]} : vector<1x18x18x8xf32> to vector<1x16x16x8xf32>
    %20 = vector.shape_cast %19 : vector<1x16x16x8xf32> to vector<256x8xf32>
    %c0_31 = arith.constant 0 : index
    %c0_32 = arith.constant 0 : index
    %21 = vector.load %arg9[%c0_31, %c0_32] : memref<256x72xf32, #tpu.memory_space<vmem>>, vector<256x8xf32>
    tpu.vector_store %arg9[%c0_31, %c0_32], %20 {strides = array<i32>} : memref<256x72xf32, #tpu.memory_space<vmem>>, vector<256x8xf32>,
    %22 = vector.extract_strided_slice %18 {offsets = [0, 0, 1, 0], sizes = [1, 16, 16, 8], strides = [1, 1, 1, 1]} : vector<1x18x18x8xf32> to vector<1x16x16x8xf32>
    %23 = vector.shape_cast %22 : vector<1x16x16x8xf32> to vector<256x8xf32>
    %c0_33 = arith.constant 0 : index
    %c8 = arith.constant 8 : index
    %24 = vector.load %arg9[%c0_33, %c8] : memref<256x72xf32, #tpu.memory_space<vmem>>, vector<256x8xf32>
    tpu.vector_store %arg9[%c0_33, %c8], %23 {strides = array<i32>} : memref<256x72xf32, #tpu.memory_space<vmem>>, vector<256x8xf32>,
    %25 = vector.extract_strided_slice %18 {offsets = [0, 0, 2, 0], sizes = [1, 16, 16, 8], strides = [1, 1, 1, 1]} : vector<1x18x18x8xf32> to vector<1x16x16x8xf32>
    %26 = vector.shape_cast %25 : vector<1x16x16x8xf32> to vector<256x8xf32>
    %c0_34 = arith.constant 0 : index
    %c16 = arith.constant 16 : index
    %27 = vector.load %arg9[%c0_34, %c16] : memref<256x72xf32, #tpu.memory_space<vmem>>, vector<256x8xf32>
    tpu.vector_store %arg9[%c0_34, %c16], %26 {strides = array<i32>} : memref<256x72xf32, #tpu.memory_space<vmem>>, vector<256x8xf32>,
    %28 = vector.extract_strided_slice %18 {offsets = [0, 1, 0, 0], sizes = [1, 16, 16, 8], strides = [1, 1, 1, 1]} : vector<1x18x18x8xf32> to vector<1x16x16x8xf32>
    %29 = vector.shape_cast %28 : vector<1x16x16x8xf32> to vector<256x8xf32>
    %c0_35 = arith.constant 0 : index
    %c24 = arith.constant 24 : index
    %30 = vector.load %arg9[%c0_35, %c24] : memref<256x72xf32, #tpu.memory_space<vmem>>, vector<256x8xf32>
    tpu.vector_store %arg9[%c0_35, %c24], %29 {strides = array<i32>} : memref<256x72xf32, #tpu.memory_space<vmem>>, vector<256x8xf32>,
    %31 = vector.extract_strided_slice %18 {offsets = [0, 1, 1, 0], sizes = [1, 16, 16, 8], strides = [1, 1, 1, 1]} : vector<1x18x18x8xf32> to vector<1x16x16x8xf32>
    %32 = vector.shape_cast %31 : vector<1x16x16x8xf32> to vector<256x8xf32>
    %c0_36 = arith.constant 0 : index
    %c32 = arith.constant 32 : index
    %33 = vector.load %arg9[%c0_36, %c32] : memref<256x72xf32, #tpu.memory_space<vmem>>, vector<256x8xf32>
    tpu.vector_store %arg9[%c0_36, %c32], %32 {strides = array<i32>} : memref<256x72xf32, #tpu.memory_space<vmem>>, vector<256x8xf32>,
    %34 = vector.extract_strided_slice %18 {offsets = [0, 1, 2, 0], sizes = [1, 16, 16, 8], strides = [1, 1, 1, 1]} : vector<1x18x18x8xf32> to vector<1x16x16x8xf32>
    %35 = vector.shape_cast %34 : vector<1x16x16x8xf32> to vector<256x8xf32>
    %c0_37 = arith.constant 0 : index
    %c40 = arith.constant 40 : index
    %36 = vector.load %arg9[%c0_37, %c40] : memref<256x72xf32, #tpu.memory_space<vmem>>, vector<256x8xf32>
    tpu.vector_store %arg9[%c0_37, %c40], %35 {strides = array<i32>} : memref<256x72xf32, #tpu.memory_space<vmem>>, vector<256x8xf32>,
    %37 = vector.extract_strided_slice %18 {offsets = [0, 2, 0, 0], sizes = [1, 16, 16, 8], strides = [1, 1, 1, 1]} : vector<1x18x18x8xf32> to vector<1x16x16x8xf32>
    %38 = vector.shape_cast %37 : vector<1x16x16x8xf32> to vector<256x8xf32>
    %c0_38 = arith.constant 0 : index
    %c48 = arith.constant 48 : index
    %39 = vector.load %arg9[%c0_38, %c48] : memref<256x72xf32, #tpu.memory_space<vmem>>, vector<256x8xf32>
    tpu.vector_store %arg9[%c0_38, %c48], %38 {strides = array<i32>} : memref<256x72xf32, #tpu.memory_space<vmem>>, vector<256x8xf32>,
    %40 = vector.extract_strided_slice %18 {offsets = [0, 2, 1, 0], sizes = [1, 16, 16, 8], strides = [1, 1, 1, 1]} : vector<1x18x18x8xf32> to vector<1x16x16x8xf32>
    %41 = vector.shape_cast %40 : vector<1x16x16x8xf32> to vector<256x8xf32>
    %c0_39 = arith.constant 0 : index
    %c56 = arith.constant 56 : index
    %42 = vector.load %arg9[%c0_39, %c56] : memref<256x72xf32, #tpu.memory_space<vmem>>, vector<256x8xf32>
    tpu.vector_store %arg9[%c0_39, %c56], %41 {strides = array<i32>} : memref<256x72xf32, #tpu.memory_space<vmem>>, vector<256x8xf32>,
    %43 = vector.extract_strided_slice %18 {offsets = [0, 2, 2, 0], sizes = [1, 16, 16, 8], strides = [1, 1, 1, 1]} : vector<1x18x18x8xf32> to vector<1x16x16x8xf32>
    %44 = vector.shape_cast %43 : vector<1x16x16x8xf32> to vector<256x8xf32>
    %c0_40 = arith.constant 0 : index
    %c64 = arith.constant 64 : index
    %45 = vector.load %arg9[%c0_40, %c64] : memref<256x72xf32, #tpu.memory_space<vmem>>, vector<256x8xf32>
    tpu.vector_store %arg9[%c0_40, %c64], %44 {strides = array<i32>} : memref<256x72xf32, #tpu.memory_space<vmem>>, vector<256x8xf32>,
    %c0_41 = arith.constant 0 : index
    %c0_42 = arith.constant 0 : index
    %46 = vector.load %arg9[%c0_41, %c0_42] : memref<256x72xf32, #tpu.memory_space<vmem>>, vector<256x72xf32>
    %47 = arith.truncf %46 : vector<256x72xf32> to vector<256x72xbf16>
    %c0_43 = arith.constant 0 : index
    %c0_44 = arith.constant 0 : index
    %48 = vector.load %arg4[%c0_43, %c0_44] : memref<72x8xbf16, #tpu.memory_space<vmem>>, vector<72x8xbf16>
    %cst_45 = arith.constant dense<0.000000e+00> : vector<256x8xf32>
    %49 = tpu.matmul %47, %48, %cst_45 {dimension_numbers = #tpu.dot_dimension_numbers<[1], [0], [0], [1], [0, 0, 1, 1], [], []>} : vector<256x72xbf16>, vector<72x8xbf16>, vector<256x8xf32> -> vector<256x8xf32>
    %c0_46 = arith.constant 0 : index
    %c0_47 = arith.constant 0 : index
    %50 = vector.load %arg5[%c0_46, %c0_47] : memref<1x8xf32, #tpu.memory_space<vmem>>, vector<1x8xf32>
    %51 = vector.broadcast %50 : vector<1x8xf32> to vector<256x8xf32>
    %52 = arith.addf %49, %51 : vector<256x8xf32>
    %53 = vector.shape_cast %52 : vector<256x8xf32> to vector<1x16x16x8xf32>
    %c0_48 = arith.constant 0 : index
    %c0_49 = arith.constant 0 : index
    %c0_50 = arith.constant 0 : index
    %c0_51 = arith.constant 0 : index
    %54 = vector.load %arg6[%c0_48, %c0_49, %c0_50, %c0_51] : memref<1x16x16x8xf32, #tpu.memory_space<vmem>>, vector<1x16x16x8xf32>
    tpu.vector_store %arg6[%c0_48, %c0_49, %c0_50, %c0_51], %53 {strides = array<i32>} : memref<1x16x16x8xf32, #tpu.memory_space<vmem>>, vector<1x16x16x8xf32>,
    %cst_52 = arith.constant dense<0.000000e+00> : vector<8xf32>
    %55 = vector.multi_reduction <add>, %52, %cst_52 [0] : vector<256x8xf32> to vector<8xf32>
    %56 = vector.shape_cast %55 : vector<8xf32> to vector<1x8xf32>
    %57 = vector.shape_cast %56 : vector<1x8xf32> to vector<1x1x8xf32>
    %c0_53 = arith.constant 0 : index
    %c0_54 = arith.constant 0 : index
    %c0_55 = arith.constant 0 : index
    %58 = vector.load %arg7[%c0_53, %c0_54, %c0_55] : memref<1x2x8xf32, #tpu.memory_space<vmem>>, vector<1x1x8xf32>
    tpu.vector_store %arg7[%c0_53, %c0_54, %c0_55], %57 {strides = array<i32>} : memref<1x2x8xf32, #tpu.memory_space<vmem>>, vector<1x1x8xf32>,
    %59 = arith.mulf %52, %52 : vector<256x8xf32>
    %cst_56 = arith.constant dense<0.000000e+00> : vector<8xf32>
    %60 = vector.multi_reduction <add>, %59, %cst_56 [0] : vector<256x8xf32> to vector<8xf32>
    %61 = vector.shape_cast %60 : vector<8xf32> to vector<1x8xf32>
    %62 = vector.shape_cast %61 : vector<1x8xf32> to vector<1x1x8xf32>
    %c0_57 = arith.constant 0 : index
    %c1_58 = arith.constant 1 : index
    %c0_59 = arith.constant 0 : index
    %63 = vector.load %arg7[%c0_57, %c1_58, %c0_59] : memref<1x2x8xf32, #tpu.memory_space<vmem>>, vector<1x1x8xf32>
    tpu.vector_store %arg7[%c0_57, %c1_58, %c0_59], %62 {strides = array<i32>} : memref<1x2x8xf32, #tpu.memory_space<vmem>>, vector<1x1x8xf32>,
    return
  }
  func.func @transform_0(%arg0: i32) -> (i32, i32, i32, i32) {
    %c0_i32 = arith.constant 0 : i32
    %c0_i32_0 = arith.constant 0 : i32
    %c0_i32_1 = arith.constant 0 : i32
    %c0_i32_2 = arith.constant 0 : i32
    return %arg0, %c0_i32, %c0_i32_0, %c0_i32_1 : i32, i32, i32, i32
  }
  func.func @transform_1(%arg0: i32) -> (i32, i32) {
    %c0_i32 = arith.constant 0 : i32
    %c0_i32_0 = arith.constant 0 : i32
    %c0_i32_1 = arith.constant 0 : i32
    return %c0_i32, %c0_i32_0 : i32, i32
  }
  func.func @transform_2(%arg0: i32) -> (i32, i32) {
    %c0_i32 = arith.constant 0 : i32
    %c0_i32_0 = arith.constant 0 : i32
    %c0_i32_1 = arith.constant 0 : i32
    return %c0_i32, %c0_i32_0 : i32, i32
  }
  func.func @transform_3(%arg0: i32) -> (i32, i32) {
    %c0_i32 = arith.constant 0 : i32
    %c0_i32_0 = arith.constant 0 : i32
    %c0_i32_1 = arith.constant 0 : i32
    return %c0_i32, %c0_i32_0 : i32, i32
  }
  func.func @transform_4(%arg0: i32) -> (i32, i32) {
    %c0_i32 = arith.constant 0 : i32
    %c0_i32_0 = arith.constant 0 : i32
    %c0_i32_1 = arith.constant 0 : i32
    return %c0_i32, %c0_i32_0 : i32, i32
  }
  func.func @transform_5(%arg0: i32) -> (i32, i32, i32, i32) {
    %c0_i32 = arith.constant 0 : i32
    %c0_i32_0 = arith.constant 0 : i32
    %c0_i32_1 = arith.constant 0 : i32
    %c0_i32_2 = arith.constant 0 : i32
    return %arg0, %c0_i32, %c0_i32_0, %c0_i32_1 : i32, i32, i32, i32
  }
  func.func @transform_6(%arg0: i32) -> (i32, i32, i32) {
    %c0_i32 = arith.constant 0 : i32
    %c0_i32_0 = arith.constant 0 : i32
    %c0_i32_1 = arith.constant 0 : i32
    return %arg0, %c0_i32, %c0_i32_0 : i32, i32, i32
  }
}

</mosaic_0001>

<bundles_post_ra>
// kernel: double_conv.5
= control target key start
LH: loop header
LB: loop body
LE: loop exit
PB: predicated region body
PF: predicated region fallthrough
CT: control target
= control target key end

     0   :  { %s446_s12 = smov 0   ;;  %s637_s0 = inlined_call_operand.vmem [shape: f32[2,16,16,8], index: 0, kind: input, shape index: {}]   ;;  %s638_s1 = inlined_call_operand.vmem [shape: f32[1,8], index: 1, kind: input, shape index: {}]   ;;  %s639_s2 = inlined_call_operand.vmem [shape: f32[1,8], index: 2, kind: input, shape index: {}]   ;;  %s640_s3 = inlined_call_operand.vmem [shape: f32[2,16,16,8], index: 3, kind: output, shape index: {}]  }
   0x1 LB: > { %s395_s13 = sadd.s32 4294967295, %s424_s12   ;;  %p399_p0 = scmp.ge.s32.totalorder %s424_s12, 1  ;;  %s424_s12 = sphi %s446_s12, %s13_s12  }
   0x2   : > { %p137_p1 = scmp.lt.s32.totalorder %s424_s12, 3 }
   0x4   : > { %p138_p2 = pnand %p399_p0, %p137_p1 }
   0x5   : > { %p161_p3 = scmp.lt.s32.totalorder (!%p138_p2), %s395_s13, 1 }
   0x6   : > { %141 = sbr.rel (%p138_p2) target bundleno = 53 (0x35), region = 32 }
   0xb   : > { %s642_s13 = smov (!%p161_p3, %s395_s13), 1  ;;  %v457_v0 = vld [vmem:[%s638_s1] ss:$0 sm:$0xff]  ;;  %vm307_vm0 = vcmask 64512  }
   0xc   : > { %s406_s16 = sshll.u32 %s642_s13, 8  ;;  %v467_v1 = vld [vmem:[%s639_s2] ss:$0 sm:$0xff] }
   0xd   : > { %s462_s19 = scalar_lea.vmem %s637_s0, %s406_s16  ;;  %s490_s24 = scalar_lea.vmem %s640_s3, %s406_s16 }
   0xe   : > { %v173_v2 = vld [vmem:[%s462_s19] sm:$0xff]  ;;  %v174_v3 = vld [vmem:[%s462_s19 + $0x8] sm:$0xff]  ;;  %v175_v4 = vld [vmem:[%s462_s19 + $0x10] sm:$0xff] }
   0xf   : > { %v208_v5 = vmul.f32 %v457_v0, %v173_v2  ;;  %v209_v6 = vmul.f32 %v457_v0, %v174_v3  ;;  %v210_v7 = vmul.f32 %v457_v0, %v175_v4  ;;  %v176_v8 = vld [vmem:[%s462_s19 + $0x18] sm:$0xff]  ;;  %v177_v9 = vld [vmem:[%s462_s19 + $0x20] sm:$0xff]  ;;  %v178_v10 = vld [vmem:[%s462_s19 + $0x28] sm:$0xff] }
  0x10   : > { %v211_v11 = vmul.f32 %v457_v0, %v176_v8  ;;  %v212_v12 = vmul.f32 %v457_v0, %v177_v9  ;;  %v213_v13 = vmul.f32 %v457_v0, %v178_v10  ;;  %v179_v14 = vld [vmem:[%s462_s19 + $0x30] sm:$0xff]  ;;  %v180_v15 = vld [vmem:[%s462_s19 + $0x38] sm:$0xff]  ;;  %v181_v24 = vld [vmem:[%s462_s19 + $0x40] sm:$0xff] }
  0x11   : > { %v243_v16 = vadd.f32 %v467_v1, %v208_v5  ;;  %v244_v17 = vadd.f32 %v467_v1, %v209_v6  ;;  %v245_v18 = vadd.f32 %v467_v1, %v210_v7  ;;  %v214_v19 = vmul.f32 %v457_v0, %v179_v14  ;;  %v182_v25 = vld [vmem:[%s462_s19 + $0x48] sm:$0xff]  ;;  %v183_v26 = vld [vmem:[%s462_s19 + $0x50] sm:$0xff]  ;;  %v184_v31 = vld [vmem:[%s462_s19 + $0x58] sm:$0xff] }
  0x12   : > { %v246_v20 = vadd.f32 %v467_v1, %v211_v11  ;;  %v247_v21 = vadd.f32 %v467_v1, %v212_v12  ;;  %v248_v22 = vadd.f32 %v467_v1, %v213_v13  ;;  %v215_v23 = vmul.f32 %v457_v0, %v180_v15  ;;  %v185_v32 = vld [vmem:[%s462_s19 + $0x60] sm:$0xff]  ;;  %v186_v33 = vld [vmem:[%s462_s19 + $0x68] sm:$0xff]  ;;  %v187_v37 = vld [vmem:[%s462_s19 + $0x70] sm:$0xff] }
  0x13   : > { %v275_v27 = vmax.f32 %v243_v16, 0.0  ;;  %v276_v28 = vmax.f32 %v244_v17, 0.0  ;;  %v277_v29 = vmax.f32 %v245_v18, 0.0  ;;  %v249_v30 = vadd.f32 %v467_v1, %v214_v19  ;;  %v188_v42 = vld [vmem:[%s462_s19 + $0x78] sm:$0xff]  ;;  %v189_v54 = vld [vmem:[%s462_s19 + $0x80] sm:$0xff]  ;;  %v190_v55 = vld [vmem:[%s462_s19 + $0x88] sm:$0xff] }
  0x14   : > { %v278_v34 = vmax.f32 %v246_v20, 0.0  ;;  %v279_v35 = vmax.f32 %v247_v21, 0.0  ;;  %v250_v36 = vadd.f32 %v467_v1, %v215_v23  ;;  %v280_v38 = vmax.f32 %v248_v22, 0.0  ;;  %v191_v56 = vld [vmem:[%s462_s19 + $0x90] sm:$0xff]  ;;  %v192_v59 = vld [vmem:[%s462_s19 + $0x98] sm:$0xff]  ;;  %v193_v63 = vld [vmem:[%s462_s19 + $0xa0] sm:$0xff] }
  0x15   : > { %308 = vst.msk [vmem:[%s490_s24] sm:$0xff] %vm307_vm0, %v275_v27  ;;  %v216_v39 = vmul.f32 %v457_v0, %v181_v24  ;;  %v217_v40 = vmul.f32 %v457_v0, %v182_v25  ;;  %v218_v41 = vmul.f32 %v457_v0, %v183_v26  ;;  %v281_v43 = vmax.f32 %v249_v30, 0.0  ;;  %v194_v6 = vld [vmem:[%s462_s19 + $0xa8] sm:$0xff]  ;;  %v195_v10 = vld [vmem:[%s462_s19 + $0xb0] sm:$0xff]  ;;  %v196_v14 = vld [vmem:[%s462_s19 + $0xb8] sm:$0xff] }
  0x16   : > { %309 = vst.msk [vmem:[%s490_s24 + $0x8] sm:$0xff] %vm307_vm0, %v276_v28  ;;  %v219_v44 = vmul.f32 %v457_v0, %v184_v31  ;;  %v220_v45 = vmul.f32 %v457_v0, %v185_v32  ;;  %v221_v46 = vmul.f32 %v457_v0, %v186_v33  ;;  %v222_v50 = vmul.f32 %v457_v0, %v187_v37  ;;  %v197_v18 = vld [vmem:[%s462_s19 + $0xc0] sm:$0xff]  ;;  %v198_v22 = vld [vmem:[%s462_s19 + $0xc8] sm:$0xff]  ;;  %v199_v26 = vld [vmem:[%s462_s19 + $0xd0] sm:$0xff] }
  0x17   : > { %310 = vst.msk [vmem:[%s490_s24 + $0x10] sm:$0xff] %vm307_vm0, %v277_v29  ;;  %v251_v47 = vadd.f32 %v467_v1, %v216_v39  ;;  %v252_v48 = vadd.f32 %v467_v1, %v217_v40  ;;  %v253_v49 = vadd.f32 %v467_v1, %v218_v41  ;;  %v282_v51 = vmax.f32 %v250_v36, 0.0  ;;  %v200_v30 = vld [vmem:[%s462_s19 + $0xd8] sm:$0xff] }
  0x18   : > { %311 = vst.msk [vmem:[%s490_s24 + $0x18] sm:$0xff] %vm307_vm0, %v278_v34  ;;  %v254_v52 = vadd.f32 %v467_v1, %v219_v44  ;;  %v223_v53 = vmul.f32 %v457_v0, %v188_v42  ;;  %v255_v58 = vadd.f32 %v467_v1, %v220_v45  ;;  %v256_v62 = vadd.f32 %v467_v1, %v221_v46  ;;  %v201_v34 = vld [vmem:[%s462_s19 + $0xe0] sm:$0xff]  ;;  %v203_v42 = vld [vmem:[%s462_s19 + $0xf0] sm:$0xff]  ;;  %v204_v46 = vld [vmem:[%s462_s19 + $0xf8] sm:$0xff] }
  0x19   : > { %312 = vst.msk [vmem:[%s490_s24 + $0x20] sm:$0xff] %vm307_vm0, %v279_v35  ;;  %v283_v57 = vmax.f32 %v251_v47, 0.0  ;;  %v284_v60 = vmax.f32 %v252_v48, 0.0  ;;  %v285_v61 = vmax.f32 %v253_v49, 0.0  ;;  %v257_v2 = vadd.f32 %v467_v1, %v222_v50 }
  0x1a   : > { %313 = vst.msk [vmem:[%s490_s24 + $0x28] sm:$0xff] %vm307_vm0, %v280_v38  ;;  %v224_v3 = vmul.f32 %v457_v0, %v189_v54  ;;  %v225_v4 = vmul.f32 %v457_v0, %v190_v55  ;;  %v226_v5 = vmul.f32 %v457_v0, %v191_v56  ;;  %v286_v7 = vmax.f32 %v254_v52, 0.0  ;;  %v202_v38 = vld [vmem:[%s462_s19 + $0xe8] sm:$0xff] }
  0x1b   : > { %314 = vst.msk [vmem:[%s490_s24 + $0x30] sm:$0xff] %vm307_vm0, %v281_v43  ;;  %v258_v8 = vadd.f32 %v467_v1, %v223_v53  ;;  %v227_v9 = vmul.f32 %v457_v0, %v192_v59  ;;  %v287_v11 = vmax.f32 %v255_v58, 0.0  ;;  %v228_v13 = vmul.f32 %v457_v0, %v193_v63 }
  0x1c   : > { %315 = vst.msk [vmem:[%s490_s24 + $0x38] sm:$0xff] %vm307_vm0, %v282_v51  ;;  %v259_v12 = vadd.f32 %v467_v1, %v224_v3  ;;  %v288_v15 = vmax.f32 %v256_v62, 0.0  ;;  %v260_v16 = vadd.f32 %v467_v1, %v225_v4  ;;  %v229_v17 = vmul.f32 %v457_v0, %v194_v6 }
  0x1d   : > { %316 = vst.msk [vmem:[%s490_s24 + $0x40] sm:$0xff] %vm307_vm0, %v283_v57  ;;  %v289_v19 = vmax.f32 %v257_v2, 0.0  ;;  %v261_v20 = vadd.f32 %v467_v1, %v226_v5  ;;  %v230_v21 = vmul.f32 %v457_v0, %v195_v10  ;;  %v290_v23 = vmax.f32 %v258_v8, 0.0 }
  0x1e   : > { %317 = vst.msk [vmem:[%s490_s24 + $0x48] sm:$0xff] %vm307_vm0, %v284_v60  ;;  %v262_v24 = vadd.f32 %v467_v1, %v227_v9  ;;  %v231_v25 = vmul.f32 %v457_v0, %v196_v14  ;;  %v291_v27 = vmax.f32 %v259_v12, 0.0  ;;  %v263_v28 = vadd.f32 %v467_v1, %v228_v13 }
  0x1f   : > { %318 = vst.msk [vmem:[%s490_s24 + $0x50] sm:$0xff] %vm307_vm0, %v285_v61  ;;  %v232_v29 = vmul.f32 %v457_v0, %v197_v18  ;;  %v292_v31 = vmax.f32 %v260_v16, 0.0  ;;  %v264_v32 = vadd.f32 %v467_v1, %v229_v17  ;;  %v233_v33 = vmul.f32 %v457_v0, %v198_v22 }
  0x20   : > { %319 = vst.msk [vmem:[%s490_s24 + $0x58] sm:$0xff] %vm307_vm0, %v286_v7  ;;  %v293_v35 = vmax.f32 %v261_v20, 0.0  ;;  %v265_v36 = vadd.f32 %v467_v1, %v230_v21  ;;  %v234_v37 = vmul.f32 %v457_v0, %v199_v26  ;;  %v294_v39 = vmax.f32 %v262_v24, 0.0 }
  0x21   : > { %320 = vst.msk [vmem:[%s490_s24 + $0x60] sm:$0xff] %vm307_vm0, %v287_v11  ;;  %v266_v40 = vadd.f32 %v467_v1, %v231_v25  ;;  %v235_v41 = vmul.f32 %v457_v0, %v200_v30  ;;  %v295_v43 = vmax.f32 %v263_v28, 0.0  ;;  %v267_v44 = vadd.f32 %v467_v1, %v232_v29 }
  0x22   : > { %321 = vst.msk [vmem:[%s490_s24 + $0x68] sm:$0xff] %vm307_vm0, %v288_v15  ;;  %v236_v45 = vmul.f32 %v457_v0, %v201_v34  ;;  %v296_v47 = vmax.f32 %v264_v32, 0.0  ;;  %v268_v48 = vadd.f32 %v467_v1, %v233_v33  ;;  %v237_v49 = vmul.f32 %v457_v0, %v202_v38 }
  0x23   : > { %322 = vst.msk [vmem:[%s490_s24 + $0x70] sm:$0xff] %vm307_vm0, %v289_v19  ;;  %v297_v50 = vmax.f32 %v265_v36, 0.0  ;;  %v269_v51 = vadd.f32 %v467_v1, %v234_v37  ;;  %v238_v52 = vmul.f32 %v457_v0, %v203_v42  ;;  %v298_v53 = vmax.f32 %v266_v40, 0.0 }
  0x24   : > { %323 = vst.msk [vmem:[%s490_s24 + $0x78] sm:$0xff] %vm307_vm0, %v290_v23  ;;  %v270_v54 = vadd.f32 %v467_v1, %v235_v41  ;;  %v239_v55 = vmul.f32 %v457_v0, %v204_v46  ;;  %v299_v56 = vmax.f32 %v267_v44, 0.0  ;;  %v271_v57 = vadd.f32 %v467_v1, %v236_v45 }
  0x25   : > { %324 = vst.msk [vmem:[%s490_s24 + $0x80] sm:$0xff] %vm307_vm0, %v291_v27  ;;  %v300_v58 = vmax.f32 %v268_v48, 0.0  ;;  %v272_v59 = vadd.f32 %v467_v1, %v237_v49  ;;  %v301_v60 = vmax.f32 %v269_v51, 0.0  ;;  %v273_v0 = vadd.f32 %v467_v1, %v238_v52 }
  0x26   : > { %325 = vst.msk [vmem:[%s490_s24 + $0x88] sm:$0xff] %vm307_vm0, %v292_v31  ;;  %v302_v61 = vmax.f32 %v270_v54, 0.0  ;;  %v274_v62 = vadd.f32 %v467_v1, %v239_v55  ;;  %v303_v63 = vmax.f32 %v271_v57, 0.0 }
  0x27   : > { %326 = vst.msk [vmem:[%s490_s24 + $0x90] sm:$0xff] %vm307_vm0, %v293_v35  ;;  %v304_v2 = vmax.f32 %v272_v59, 0.0  ;;  %v305_v3 = vmax.f32 %v273_v0, 0.0 }
  0x28   : > { %327 = vst.msk [vmem:[%s490_s24 + $0x98] sm:$0xff] %vm307_vm0, %v294_v39  ;;  %v306_v4 = vmax.f32 %v274_v62, 0.0 }
  0x29   : > { %328 = vst.msk [vmem:[%s490_s24 + $0xa0] sm:$0xff] %vm307_vm0, %v295_v43 }
  0x2a   : > { %329 = vst.msk [vmem:[%s490_s24 + $0xa8] sm:$0xff] %vm307_vm0, %v296_v47 }
  0x2b   : > { %330 = vst.msk [vmem:[%s490_s24 + $0xb0] sm:$0xff] %vm307_vm0, %v297_v50 }
  0x2c   : > { %331 = vst.msk [vmem:[%s490_s24 + $0xb8] sm:$0xff] %vm307_vm0, %v298_v53 }
  0x2d   : > { %332 = vst.msk [vmem:[%s490_s24 + $0xc0] sm:$0xff] %vm307_vm0, %v299_v56 }
  0x2e   : > { %333 = vst.msk [vmem:[%s490_s24 + $0xc8] sm:$0xff] %vm307_vm0, %v300_v58 }
  0x2f   : > { %334 = vst.msk [vmem:[%s490_s24 + $0xd0] sm:$0xff] %vm307_vm0, %v301_v60 }
  0x30   : > { %335 = vst.msk [vmem:[%s490_s24 + $0xd8] sm:$0xff] %vm307_vm0, %v302_v61 }
  0x31   : > { %336 = vst.msk [vmem:[%s490_s24 + $0xe0] sm:$0xff] %vm307_vm0, %v303_v63 }
  0x32   : > { %337 = vst.msk [vmem:[%s490_s24 + $0xe8] sm:$0xff] %vm307_vm0, %v304_v2 }
  0x33   : > { %338 = vst.msk [vmem:[%s490_s24 + $0xf0] sm:$0xff] %vm307_vm0, %v305_v3 }
  0x34   : > { %339 = vst.msk [vmem:[%s490_s24 + $0xf8] sm:$0xff] %vm307_vm0, %v306_v4 }
  0x35 PF: > { %s13_s12 = sadd.s32 1, %s424_s12  }
  0x36   : > { %p10_p4 = scmp.ge.s32.totalorder %s13_s12, 4  }
  0x38   :  { %12 = sbr.rel (!%p10_p4) target bundleno = 1 (0x1), region = 62 }

// kernel: double_conv.3
= control target key start
LH: loop header
LB: loop body
LE: loop exit
PB: predicated region body
PF: predicated region fallthrough
CT: control target
= control target key end

     0   :  { %s2290_s15 = smov 0   ;;  %s3914_s0 = inlined_call_operand.vmem [shape: f32[2,16,16,4], index: 0, kind: input, shape index: {}]   ;;  %s3915_s1 = inlined_call_operand.vmem [shape: bf16[36,8], index: 1, kind: input, shape index: {}]   ;;  %s3916_s2 = inlined_call_operand.vmem [shape: f32[1,8], index: 2, kind: input, shape index: {}]   ;;  %s3917_s3 = inlined_call_operand.vmem [shape: f32[2,16,16,8], index: 3, kind: output, shape index: {0}]   ;;  %s3918_s4 = inlined_call_operand.vmem [shape: f32[2,2,8], index: 4, kind: output, shape index: {1}]  }
   0x1 LB: > { %s2181_s16 = sadd.s32 4294967295, %s2254_s15   ;;  %p2185_p0 = scmp.ge.s32.totalorder %s2254_s15, 1  ;;  %s2254_s15 = sphi %s2290_s15, %s15_s15  }
   0x2   : > { %p165_p1 = scmp.lt.s32.totalorder %s2254_s15, 3 }
   0x4   : > { %p166_p2 = pnand %p2185_p0, %p165_p1 }
   0x6   : > { %169 = sbr.rel (%p166_p2) target bundleno = 1035 (0x40b), region = 32 }
   0xb   : > { %vm210_vm0 = vcmask 31744   ;;  %vm219_vm1 = vcmask 24576   ;;  %v2256_v0 = vmov 0.0   ;;  %vm455_vm2 = vcmask 1046528   ;;  %s2257_s17 = smov 4   ;;  %p195_p3 = scmp.lt.s32.totalorder %s2181_s16, 1 }
   0xc   : > { %211 = vst.msk [vmem:[#allocation2] sm:$0xff] %vm210_vm0, %v2256_v0  ;;  %vm213_vm3 = vcmask 25600   ;;  %vm632_vm4 = vcmask 64544   ;;  %vm665_vm5 = vcmask 1045504   ;;  %s2258_s22 = smov 8   ;;  %s2259_s23 = smov 12  }
   0xd   : > { %212 = vst.msk [vmem:[#allocation2 + $0x8] sm:$0xff] %vm210_vm0, %v2256_v0  ;;  %s4133_s16 = smov (!%p195_p3, %s2181_s16), 1  ;;  %vm842_vm6 = vcmask 97344   ;;  %s2260_s24 = smov 16   ;;  %vm973_vm7 = vcmask 130144   ;;  %vm1108_vm8 = vcmask 162944  }
   0xe   : > { %220 = vst.msk [vmem:[#allocation2] sm:$0x1] %vm219_vm1, %v2256_v0  ;;  %s2217_s18 = sshll.u32 %s4133_s16, 8  ;;  %s2261_s25 = smov 20   ;;  %vm1242_vm9 = vcmask 195744   ;;  %vm1796_vm10 = vcmask 1041408  }
   0xf   : > { %216 = vst.msk [vmem:[#allocation2 + $0x198] sm:$0xff] %vm210_vm0, %v2256_v0  ;;  %s2354_s21 = scalar_lea.vmem %s3914_s0, %s2217_s18  ;;  %s2262_s26 = smov 24   ;;  %vm1373_vm11 = vcmask 228544   ;;  %vm1508_vm12 = vcmask 261344   ;;  %vm1642_vm13 = vcmask 294144   ;;  %vm1747_vm14 = vcmask 293888  }
  0x10   : > { %217 = vst.msk [vmem:[#allocation2 + $0x1a0] sm:$0xff] %vm210_vm0, %v2256_v0  ;;  %v256_v6 = vld [vmem:[%s2354_s21] sm:$0xff]  ;;  %v257_v7 = vld [vmem:[%s2354_s21 + $0x8] sm:$0xff]  ;;  %v262_v13 = vld [vmem:[%s2354_s21 + $0x30] sm:$0xff]  ;;  %s2263_s27 = smov 28   ;;  %s2264_s28 = smov 32  }
  0x11   : > { %221 = vst.msk [vmem:[#allocation2 + $0x18] sm:$0x1] %vm219_vm1, %v2256_v0  ;;  %v260_v8 = vld [vmem:[%s2354_s21 + $0x20] sm:$0xff]  ;;  %v261_v10 = vld [vmem:[%s2354_s21 + $0x28] sm:$0xff]  ;;  %v263_v15 = vld [vmem:[%s2354_s21 + $0x38] sm:$0xff]  ;;  %s3617_s13 = scalar_lea.vmem %s3917_s3, %s2217_s18  ;;  %vm1889_vm15 = vcmask 64512  }
  0x12   : > { %222 = vst.msk [vmem:[#allocation2 + $0x30] sm:$0x1] %vm219_vm1, %v2256_v0  ;;  %v258_v17 = vld [vmem:[%s2354_s21 + $0x10] sm:$0xff]  ;;  %v259_v20 = vld [vmem:[%s2354_s21 + $0x18] sm:$0xff]  ;;  %v264_v23 = vld [vmem:[%s2354_s21 + $0x40] sm:$0xff]  ;;  %s2190_s14 = sshll.u32 %s4133_s16, 1 }
  0x13   : > { %223 = vst.msk [vmem:[#allocation2 + $0x48] sm:$0x1] %vm219_vm1, %v2256_v0  ;;  %v265_v26 = vld [vmem:[%s2354_s21 + $0x48] sm:$0xff]  ;;  %v266_v28 = vld [vmem:[%s2354_s21 + $0x50] sm:$0xff]  ;;  %v267_v36 = vld [vmem:[%s2354_s21 + $0x58] sm:$0xff]  ;;  %s208_s19 = scalar_lea.vmem %s3918_s4, %s2190_s14 }
  0x14   : > { %v2306_v1 = vld [vmem:[#allocation2 + $0x8] sm:$0xff]  ;;  %224 = vst.msk [vmem:[#allocation2 + $0x60] sm:$0x1] %vm219_vm1, %v2256_v0  ;;  %v268_v44 = vld [vmem:[%s2354_s21 + $0x60] sm:$0xff]  ;;  %v270_v53 = vld [vmem:[%s2354_s21 + $0x70] sm:$0xff] }
  0x15   : > { %v2309_v2 = vld [vmem:[#allocation2] sm:$0xff]  ;;  %v457_v3 = vrot.slane %v2306_v1, 1  ;;  %225 = vst.msk [vmem:[#allocation2 + $0x78] sm:$0x1] %vm219_vm1, %v2256_v0  ;;  %v269_v50 = vld [vmem:[%s2354_s21 + $0x68] sm:$0xff]  ;;  %v271_v58 = vld [vmem:[%s2354_s21 + $0x78] sm:$0xff] }
  0x16   : > { %v456_v4 = vrot.slane %v2309_v2, 1  ;;  %226 = vst.msk [vmem:[#allocation2 + $0x90] sm:$0x1] %vm219_vm1, %v2256_v0  ;;  %v272_v61 = vld [vmem:[%s2354_s21 + $0x80] sm:$0xff]  ;;  %v273_v62 = vld [vmem:[%s2354_s21 + $0x88] sm:$0xff] }
  0x17   : > { %227 = vst.msk [vmem:[#allocation2 + $0xa8] sm:$0x1] %vm219_vm1, %v2256_v0 }
  0x18   : > { %v458_v5 = vsel %vm455_vm2, %v456_v4, %v457_v3  ;;  %228 = vst.msk [vmem:[#allocation2 + $0xc0] sm:$0x1] %vm219_vm1, %v2256_v0 }
  0x19   : > { %536 = vrot.lane.b32.xlu0 %v458_v5, %s2257_s17  ;;  %229 = vst.msk [vmem:[#allocation2 + $0xd8] sm:$0x1] %vm219_vm1, %v2256_v0 }
  0x1a   : > { %230 = vst.msk [vmem:[#allocation2 + $0xf0] sm:$0x1] %vm219_vm1, %v2256_v0 }
  0x1b   : > { %231 = vst.msk [vmem:[#allocation2 + $0x108] sm:$0x1] %vm219_vm1, %v2256_v0 }
  0x1c   : > { %232 = vst.msk [vmem:[#allocation2 + $0x120] sm:$0x1] %vm219_vm1, %v2256_v0 }
  0x1d   : > { %233 = vst.msk [vmem:[#allocation2 + $0x138] sm:$0x1] %vm219_vm1, %v2256_v0 }
  0x1e   : > { %234 = vst.msk [vmem:[#allocation2 + $0x150] sm:$0x1] %vm219_vm1, %v2256_v0 }
  0x1f   : > { %235 = vst.msk [vmem:[#allocation2 + $0x168] sm:$0x1] %vm219_vm1, %v2256_v0 }
  0x20   : > { %236 = vst.msk [vmem:[#allocation2 + $0x180] sm:$0x1] %vm219_vm1, %v2256_v0 }
  0x21   : > { %239 = vst.msk [vmem:[#allocation2 + $0x29] sm:$0x1] %vm219_vm1, %v2256_v0 }
  0x22   : > { %240 = vst.msk [vmem:[#allocation2 + $0x41] sm:$0x1] %vm219_vm1, %v2256_v0 }
  0x23   : > { %241 = vst.msk [vmem:[#allocation2 + $0x59] sm:$0x1] %vm219_vm1, %v2256_v0 }
  0x24   : > { %242 = vst.msk [vmem:[#allocation2 + $0x71] sm:$0x1] %vm219_vm1, %v2256_v0 }
  0x25   : > { %243 = vst.msk [vmem:[#allocation2 + $0x89] sm:$0x1] %vm219_vm1, %v2256_v0 }
  0x26   : > { %244 = vst.msk [vmem:[#allocation2 + $0xa1] sm:$0x1] %vm219_vm1, %v2256_v0 }
  0x27   : > { %245 = vst.msk [vmem:[#allocation2 + $0xb9] sm:$0x1] %vm219_vm1, %v2256_v0 }
  0x28   : > { %246 = vst.msk [vmem:[#allocation2 + $0xd1] sm:$0x1] %vm219_vm1, %v2256_v0 }
  0x29   : > { %247 = vst.msk [vmem:[#allocation2 + $0xe9] sm:$0x1] %vm219_vm1, %v2256_v0 }
  0x2a   : > { %248 = vst.msk [vmem:[#allocation2 + $0x101] sm:$0x1] %vm219_vm1, %v2256_v0 }
  0x2b   : > { %249 = vst.msk [vmem:[#allocation2 + $0x119] sm:$0x1] %vm219_vm1, %v2256_v0 }
  0x2c   : > { %250 = vst.msk [vmem:[#allocation2 + $0x131] sm:$0x1] %vm219_vm1, %v2256_v0 }
  0x2d   : > { %251 = vst.msk [vmem:[#allocation2 + $0x149] sm:$0x1] %vm219_vm1, %v2256_v0 }
  0x2e   : > { %252 = vst.msk [vmem:[#allocation2 + $0x161] sm:$0x1] %vm219_vm1, %v2256_v0 }
  0x2f   : > { %253 = vst.msk [vmem:[#allocation2 + $0x179] sm:$0x1] %vm219_vm1, %v2256_v0 }
  0x30   : > { %254 = vst.msk [vmem:[#allocation2 + $0x191] sm:$0x1] %vm219_vm1, %v2256_v0 }
  0x31   : > { %375 = vst.msk [vmem:[#allocation3] sm:$0xff] %vm210_vm0, %v2309_v2 }
  0x32   : > { %376 = vst.msk [vmem:[#allocation3 + $0x8] sm:$0xff] %vm210_vm0, %v2306_v1 }
  0x33   : > { %289 = vst.msk [vmem:[#allocation2 + $0x19] sm:$0xff] %vm210_vm0, %v256_v6 }
  0x34   : > { %290 = vst.msk [vmem:[#allocation2 + $0x21] sm:$0xff] %vm210_vm0, %v257_v7  ;;  %v275_v7 = vld [vmem:[%s2354_s21 + $0x98] sm:$0xff] }
  0x35   : > { %237 = vst.msk [vmem:[#allocation2 + $0x198] sm:$0x1] %vm219_vm1, %v2256_v0 }
  0x36   : > { %214 = vst.msk [vmem:[#allocation2 + $0x10] sm:$0x3] %vm213_vm3, %v2256_v0 }
  0x37   : > { %238 = vst.msk [vmem:[#allocation2 + $0x11] sm:$0x1] %vm219_vm1, %v2256_v0 }
  0x38   : > { %218 = vst.msk [vmem:[#allocation2 + $0x1a8] sm:$0x3] %vm213_vm3, %v2256_v0 }
  0x39   : > { %255 = vst.msk [vmem:[#allocation2 + $0x1a9] sm:$0x1] %vm219_vm1, %v2256_v0 }
  0x3a   : > { %v2371_v9 = vld [vmem:[#allocation2 + $0x18] sm:$0xff]  ;;  %293 = vst.msk [vmem:[#allocation2 + $0x49] sm:$0xff] %vm210_vm0, %v260_v8 }
  0x3b   : > { %v2375_v11 = vld [vmem:[#allocation2 + $0x20] sm:$0xff]  ;;  %v461_v12 = vrot.slane %v2371_v9, 1  ;;  %377 = vst.msk [vmem:[#allocation3 + $0x10] sm:$0xff] %vm210_vm0, %v2371_v9  ;;  %v2385_v16 = vld [vmem:[#allocation2 + $0x28] sm:$0x3] }
  0x3c   : > { %v462_v14 = vrot.slane %v2375_v11, 1  ;;  %378 = vst.msk [vmem:[#allocation3 + $0x18] sm:$0xff] %vm210_vm0, %v2375_v11  ;;  %v464_v22 = vrot.slane %v2385_v16, 1 }
  0x3d   : > { %294 = vst.msk [vmem:[#allocation2 + $0x51] sm:$0xff] %vm210_vm0, %v261_v10 }
  0x3e   : > { %v2390_v18 = vsel %vm455_vm2, %v461_v12, %v462_v14  ;;  %v2392_v19 = vld [vmem:[#allocation2 + $0x10] sm:$0x3]  ;;  %295 = vst.msk [vmem:[#allocation2 + $0x61] sm:$0xff] %vm210_vm0, %v262_v13  ;;  %v2417_v29 = vsel %vm455_vm2, %v462_v14, %v464_v22 }
  0x3f   : > { %540 = vrot.lane.b32.xlu1 %v2390_v18, %s2257_s17  ;;  %v459_v21 = vrot.slane %v2392_v19, 1  ;;  %296 = vst.msk [vmem:[#allocation2 + $0x69] sm:$0xff] %vm210_vm0, %v263_v15 }
  0x40   : > { %291 = vst.msk [vmem:[#allocation2 + $0x31] sm:$0xff] %vm210_vm0, %v258_v17 }
  0x41   : > { %v460_v24 = vsel %vm455_vm2, %v457_v3, %v459_v21  ;;  %v2406_v25 = vld [vmem:[#allocation2 + $0x48] sm:$0xff]  ;;  %292 = vst.msk [vmem:[#allocation2 + $0x39] sm:$0xff] %vm210_vm0, %v259_v20  ;;  %v274_v3 = vld [vmem:[%s2354_s21 + $0x90] sm:$0xff] }
  0x42   : > { %538 = vrot.lane.b32.xlu0 %v460_v24, %s2257_s17  ;;  %381 = vst.msk [vmem:[#allocation3 + $0x30] sm:$0xff] %vm210_vm0, %v2406_v25  ;;  %v471_v27 = vrot.slane %v2406_v25, 1 }
  0x43   : > { %297 = vst.msk [vmem:[#allocation2 + $0x79] sm:$0xff] %vm210_vm0, %v264_v23 }
  0x44   : > { %v2419_v30 = vld [vmem:[#allocation2 + $0x50] sm:$0xff]  ;;  %298 = vst.msk [vmem:[#allocation2 + $0x81] sm:$0xff] %vm210_vm0, %v265_v26  ;;  %v2425_v32 = vld [vmem:[#allocation2 + $0x58] sm:$0x3]  ;;  %v276_v26 = vld [vmem:[%s2354_s21 + $0xa0] sm:$0xff] }
  0x45   : > { %v472_v31 = vrot.slane %v2419_v30, 1  ;;  %382 = vst.msk [vmem:[#allocation3 + $0x38] sm:$0xff] %vm210_vm0, %v2419_v30  ;;  %v474_v37 = vrot.slane %v2425_v32, 1  ;;  %v2489_v55 = vld [vmem:[#allocation2 + $0x60] sm:$0xff] }
  0x46   : > { %v2427_v33 = vld [vmem:[#allocation2 + $0x68] sm:$0xff]  ;;  %299 = vst.msk [vmem:[#allocation2 + $0x91] sm:$0xff] %vm210_vm0, %v266_v28  ;;  %v2441_v38 = vld [vmem:[#allocation2 + $0x70] sm:$0x3]  ;;  %v476_v6 = vrot.slane %v2489_v55, 1 }
  0x47   : > { %542 = vrot.lane.b32.xlu1 %v2417_v29, %s2257_s17  ;;  %v2433_v34 = vsel %vm455_vm2, %v471_v27, %v472_v31  ;;  %384 = vst.msk [vmem:[#allocation3 + $0x48] sm:$0xff] %vm210_vm0, %v2427_v33  ;;  %v2437_v35 = vld [vmem:[#allocation2 + $0x30] sm:$0xff]  ;;  %v477_v45 = vrot.slane %v2427_v33, 1  ;;  %v479_v46 = vrot.slane %v2441_v38, 1  ;;  %v2469_v49 = vsel %vm455_vm2, %v472_v31, %v474_v37  ;;  %v277_v31 = vld [vmem:[%s2354_s21 + $0xa8] sm:$0xff] }
  0x48   : > { %v2443_v39 = vld [vmem:[#allocation2 + $0x38] sm:$0xff]  ;;  %v466_v40 = vrot.slane %v2437_v35, 1  ;;  %379 = vst.msk [vmem:[#allocation3 + $0x20] sm:$0xff] %vm210_vm0, %v2437_v35  ;;  %v2456_v43 = vld [vmem:[#allocation2 + $0x40] sm:$0x3]  ;;  %v278_v37 = vld [vmem:[%s2354_s21 + $0xb0] sm:$0xff] }
  0x49   : > { %v467_v41 = vrot.slane %v2443_v39, 1  ;;  %380 = vst.msk [vmem:[#allocation3 + $0x28] sm:$0xff] %vm210_vm0, %v2443_v39  ;;  %v469_v52 = vrot.slane %v2456_v43, 1  ;;  %v2486_v54 = vsel %vm455_vm2, %v477_v45, %v479_v46  ;;  %v2540_v15 = vsel %vm455_vm2, %v476_v6, %v477_v45 }
  0x4a   : > { %548 = vrot.lane.b32.xlu0 %v2433_v34, %s2257_s17  ;;  %v2453_v42 = vld [vmem:[#allocation2 + $0x78] sm:$0xff]  ;;  %300 = vst.msk [vmem:[#allocation2 + $0x99] sm:$0xff] %vm210_vm0, %v267_v36 }
  0x4b   : > { %v2462_v47 = vsel %vm455_vm2, %v466_v40, %v467_v41  ;;  %v2464_v48 = vld [vmem:[#allocation2 + $0x80] sm:$0xff]  ;;  %385 = vst.msk [vmem:[#allocation3 + $0x50] sm:$0xff] %vm210_vm0, %v2453_v42  ;;  %v481_v56 = vrot.slane %v2453_v42, 1  ;;  %v2499_v60 = vsel %vm455_vm2, %v467_v41, %v469_v52  ;;  %v2550_v21 = vld [vmem:[#allocation2 + $0x88] sm:$0x3] }
  0x4c   : > { %4013 = vst [vmem:[#allocation4_spill] sm:$0xff] %v2462_v47  ;;  %544 = vrot.lane.b32.xlu2 %v2462_v47, %s2257_s17  ;;  %v482_v57 = vrot.slane %v2464_v48, 1  ;;  %v484_v36 = vrot.slane %v2550_v21, 1  ;;  %v669_v47 = vrot.slane %v2392_v19, 2  ;;  %v672_v19 = vrot.slane %v2375_v11, 2 }
  0x4d   : > { %4014 = vst [vmem:[#allocation5_spill] sm:$0xff] %v2469_v49  ;;  %v2476_v51 = vld [vmem:[#allocation2 + $0x90] sm:$0xff] }
  0x4e   : > { %386 = vst.msk [vmem:[#allocation3 + $0x58] sm:$0xff] %vm210_vm0, %v2464_v48  ;;  %v486_v63 = vrot.slane %v2476_v51, 1  ;;  %v2513_v4 = vsel %vm455_vm2, %v481_v56, %v482_v57  ;;  %v2591_v52 = vsel %vm455_vm2, %v482_v57, %v484_v36 }
  0x4f   : > { %301 = vst.msk [vmem:[#allocation2 + $0xa9] sm:$0xff] %vm210_vm0, %v268_v44  ;;  %550 = vrot.lane.b32.xlu1 %v2469_v49, %s2257_s17  ;;  %v279_v44 = vld [vmem:[%s2354_s21 + $0xb8] sm:$0xff] }
  0x50   : > { %387 = vst.msk [vmem:[#allocation3 + $0x60] sm:$0xff] %vm210_vm0, %v2476_v51 }
  0x51   : > { %4015 = vst [vmem:[#allocation6_spill] sm:$0xff] %v2486_v54  ;;  %v2496_v59 = vld [vmem:[#allocation2 + $0x98] sm:$0xff]  ;;  %v2518_v5 = vld [vmem:[#allocation2 + $0xa0] sm:$0x3] }
  0x52   : > { %302 = vst.msk [vmem:[#allocation2 + $0xb1] sm:$0xff] %vm210_vm0, %v269_v50  ;;  %554 = vrot.lane.b32.xlu0 %v2486_v54, %s2257_s17  ;;  %v487_v0 = vrot.slane %v2496_v59, 1  ;;  %v489_v12 = vrot.slane %v2518_v5, 1  ;;  %v280_v50 = vld [vmem:[%s2354_s21 + $0xc0] sm:$0xff] }
  0x53   : > { %383 = vst.msk [vmem:[#allocation3 + $0x40] sm:$0xff] %vm210_vm0, %v2489_v55 }
  0x54   : > { %303 = vst.msk [vmem:[#allocation2 + $0xc1] sm:$0xff] %vm210_vm0, %v270_v53  ;;  %546 = vrot.lane.b32.xlu2 %v2499_v60, %s2257_s17  ;;  %v2529_v10 = vsel %vm455_vm2, %v486_v63, %v487_v0  ;;  %v2562_v27 = vsel %vm455_vm2, %v487_v0, %v489_v12  ;;  %v281_v53 = vld [vmem:[%s2354_s21 + $0xc8] sm:$0xff] }
  0x55   : > { %388 = vst.msk [vmem:[#allocation3 + $0x68] sm:$0xff] %vm210_vm0, %v2496_v59 }
  0x56   : > { %304 = vst.msk [vmem:[#allocation2 + $0xc9] sm:$0xff] %vm210_vm0, %v271_v58  ;;  %v2544_v17 = vld [vmem:[#allocation2 + $0xa8] sm:$0xff] }
  0x57   : > { %4016 = vst [vmem:[#allocation7_spill] sm:$0xff] %v2513_v4  ;;  %556 = vrot.lane.b32.xlu1 %v2513_v4, %s2257_s17  ;;  %v491_v63 = vrot.slane %v2544_v17, 1 }
  0x58   : > { %305 = vst.msk [vmem:[#allocation2 + $0xd9] sm:$0xff] %vm210_vm0, %v272_v61 }
  0x59   : > { %306 = vst.msk [vmem:[#allocation2 + $0xe1] sm:$0xff] %vm210_vm0, %v273_v62  ;;  %v2523_v8 = vld [vmem:[#allocation2 + $0xb0] sm:$0xff]  ;;  %v2534_v13 = vld [vmem:[#allocation2 + $0xb8] sm:$0x3] }
  0x5a   : > { %307 = vst.msk [vmem:[#allocation2 + $0xf1] sm:$0xff] %vm210_vm0, %v274_v3  ;;  %560 = vrot.lane.b32.xlu0 %v2529_v10, %s2257_s17  ;;  %v492_v22 = vrot.slane %v2523_v8, 1  ;;  %v494_v23 = vrot.slane %v2534_v13, 1  ;;  %v282_v3 = vld [vmem:[%s2354_s21 + $0xd0] sm:$0xff] }
  0x5b   : > { %4017 = vst [vmem:[#allocation8_spill] sm:$0xff] %v2529_v10  ;;  %v2536_v14 = vld [vmem:[#allocation2 + $0xc0] sm:$0xff] }
  0x5c   : > { %390 = vst.msk [vmem:[#allocation3 + $0x78] sm:$0xff] %vm210_vm0, %v2523_v8  ;;  %552 = vrot.lane.b32.xlu2 %v2540_v15, %s2257_s17  ;;  %v2579_v40 = vsel %vm455_vm2, %v492_v22, %v494_v23  ;;  %v496_v45 = vrot.slane %v2536_v14, 1  ;;  %v2636_v36 = vsel %vm455_vm2, %v491_v63, %v492_v22 }
  0x5d   : > { %308 = vst.msk [vmem:[#allocation2 + $0xf9] sm:$0xff] %vm210_vm0, %v275_v7  ;;  %v2548_v20 = vld [vmem:[#allocation2 + $0xc8] sm:$0xff] }
  0x5e   : > { %4018 = vst [vmem:[#allocation9_spill] sm:$0xff] %v2540_v15  ;;  %v497_v46 = vrot.slane %v2548_v20, 1 }
  0x5f   : > { %391 = vst.msk [vmem:[#allocation3 + $0x80] sm:$0xff] %vm210_vm0, %v2536_v14  ;;  %v2558_v24 = vld [vmem:[#allocation2 + $0xd8] sm:$0xff]  ;;  %562 = vrot.lane.b32.xlu1 %v2562_v27, %s2257_s17 }
  0x60   : > { %389 = vst.msk [vmem:[#allocation3 + $0x70] sm:$0xff] %vm210_vm0, %v2544_v17  ;;  %v2566_v28 = vld [vmem:[#allocation2 + $0xe0] sm:$0xff]  ;;  %v501_v56 = vrot.slane %v2558_v24, 1  ;;  %v2602_v61 = vsel %vm455_vm2, %v496_v45, %v497_v46  ;;  %v2609_v62 = vld [vmem:[#allocation2 + $0xe8] sm:$0x3] }
  0x61   : > { %392 = vst.msk [vmem:[#allocation3 + $0x88] sm:$0xff] %vm210_vm0, %v2548_v20  ;;  %v502_v58 = vrot.slane %v2566_v28, 1  ;;  %v2607_v57 = vld [vmem:[#allocation2 + $0xf0] sm:$0xff]  ;;  %v504_v12 = vrot.slane %v2609_v62, 1  ;;  %v284_v45 = vld [vmem:[%s2354_s21 + $0xe0] sm:$0xff] }
  0x62   : > { %4019 = vst [vmem:[#allocation10_spill] sm:$0xff] %v2558_v24  ;;  %566 = vrot.lane.b32.xlu0 %v2579_v40, %s2257_s17 }
  0x63   : > { %4020 = vst [vmem:[#allocation11_spill] sm:$0xff] %v2562_v27  ;;  %v2624_v7 = vsel %vm455_vm2, %v501_v56, %v502_v58  ;;  %v285_v56 = vld [vmem:[%s2354_s21 + $0xe8] sm:$0xff]  ;;  %v2656_v63 = vsel %vm455_vm2, %v502_v58, %v504_v12 }
  0x64   : > { %4021 = vst [vmem:[#allocation12_spill] sm:$0xff] %v2566_v28  ;;  %v2581_v41 = vld [vmem:[#allocation2 + $0xf8] sm:$0xff]  ;;  %558 = vrot.lane.b32.xlu2 %v2591_v52, %s2257_s17  ;;  %v2629_v23 = vld [vmem:[#allocation2 + $0x100] sm:$0x3] }
  0x65   : > { %393 = vst.msk [vmem:[#allocation3 + $0x90] sm:$0xff] %vm210_vm0, %v2558_v24 }
  0x66   : > { %394 = vst.msk [vmem:[#allocation3 + $0x98] sm:$0xff] %vm210_vm0, %v2566_v28 }
  0x67   : > { %309 = vst.msk [vmem:[#allocation2 + $0x109] sm:$0xff] %vm210_vm0, %v276_v26  ;;  %568 = vrot.lane.b32.xlu1 %v2602_v61, %s2257_s17 }
  0x68   : > { %4022 = vst [vmem:[#allocation13_spill] sm:$0xff] %v2579_v40 }
  0x69   : > { %310 = vst.msk [vmem:[#allocation2 + $0x111] sm:$0xff] %vm210_vm0, %v277_v31  ;;  %v283_v31 = vld [vmem:[%s2354_s21 + $0xd8] sm:$0xff] }
  0x6a   : > { %396 = vst.msk [vmem:[#allocation3 + $0xa8] sm:$0xff] %vm210_vm0, %v2581_v41  ;;  %572 = vrot.lane.b32.xlu0 %v2624_v7, %s2257_s17 }
  0x6b   : > { %4023 = vst [vmem:[#allocation14_spill] sm:$0xff] %v2591_v52 }
  0x6c   : > { %311 = vst.msk [vmem:[#allocation2 + $0x121] sm:$0xff] %vm210_vm0, %v278_v37  ;;  %564 = vrot.lane.b32.xlu2 %v2636_v36, %s2257_s17 }
  0x6d   : > { %312 = vst.msk [vmem:[#allocation2 + $0x129] sm:$0xff] %vm210_vm0, %v279_v44  ;;  %v2646_v44 = vld [vmem:[#allocation2 + $0xd0] sm:$0x3] }
  0x6e   : > { %313 = vst.msk [vmem:[#allocation2 + $0x139] sm:$0xff] %vm210_vm0, %v280_v50  ;;  %v2612_v0 = vld [vmem:[#allocation2 + $0x108] sm:$0xff]  ;;  %v507_v50 = vrot.slane %v2581_v41, 1 }
  0x6f   : > { %4024 = vst [vmem:[#allocation15_spill] sm:$0xff] %v2602_v61  ;;  %574 = vrot.lane.b32.xlu1 %v2656_v63, %s2257_s17  ;;  %v511_v12 = vrot.slane %v2612_v0, 1 }
  0x70   : > { %314 = vst.msk [vmem:[#allocation2 + $0x141] sm:$0xff] %vm210_vm0, %v281_v53  ;;  %v2617_v6 = vld [vmem:[#allocation2 + $0x110] sm:$0xff]  ;;  %v509_v53 = vrot.slane %v2629_v23, 1  ;;  %v2720_v10 = vld [vmem:[#allocation2 + $0x118] sm:$0x3] }
  0x71   : > { %395 = vst.msk [vmem:[#allocation3 + $0xa0] sm:$0xff] %vm210_vm0, %v2607_v57  ;;  %v512_v61 = vrot.slane %v2617_v6, 1 }
  0x72   : > { %397 = vst.msk [vmem:[#allocation3 + $0xb0] sm:$0xff] %vm210_vm0, %v2612_v0 }
  0x73   : > { %4025 = vst [vmem:[#allocation16_spill] sm:$0xff] %v2624_v7  ;;  %v2631_v26 = vld [vmem:[#allocation2 + $0x120] sm:$0xff]  ;;  %v2690_v27 = vsel %vm455_vm2, %v511_v12, %v512_v61 }
  0x74   : > { %398 = vst.msk [vmem:[#allocation3 + $0xb8] sm:$0xff] %vm210_vm0, %v2617_v6  ;;  %v2638_v37 = vld [vmem:[#allocation2 + $0x128] sm:$0xff] }
  0x75   : > { %4026 = vst [vmem:[#allocation17_spill] sm:$0xff] %v2631_v26 }
  0x76   : > { %315 = vst.msk [vmem:[#allocation2 + $0x151] sm:$0xff] %vm210_vm0, %v282_v3  ;;  %v499_v3 = vrot.slane %v2646_v44, 1 }
  0x77   : > { %4027 = vst [vmem:[#allocation18_spill] sm:$0xff] %v2636_v36  ;;  %v2651_v22 = vld [vmem:[#allocation2 + $0x140] sm:$0xff]  ;;  %580 = vrot.lane.b32.xlu1 %v2690_v27, %s2257_s17  ;;  %v2713_v4 = vld [vmem:[#allocation2 + $0x148] sm:$0x3] }
  0x78   : > { %4028 = vst [vmem:[#allocation19_spill] sm:$0xff] %v2638_v37  ;;  %v2677_v7 = vsel %vm455_vm2, %v497_v46, %v499_v3  ;;  %v2698_v3 = vld [vmem:[#allocation2 + $0x130] sm:$0x3]  ;;  %v522_v49 = vrot.slane %v2651_v22, 1  ;;  %v524_v52 = vrot.slane %v2713_v4, 1 }
  0x79   : > { %399 = vst.msk [vmem:[#allocation3 + $0xc0] sm:$0xff] %vm210_vm0, %v2631_v26  ;;  %570 = vrot.lane.b32.xlu2 %v2677_v7, %s2257_s17 }
  0x7a   : > { %400 = vst.msk [vmem:[#allocation3 + $0xc8] sm:$0xff] %vm210_vm0, %v2638_v37 }
  0x7b   : > { %4029 = vst [vmem:[#allocation20_spill] sm:$0xff] %v2651_v22 }
  0x7c   : > { %316 = vst.msk [vmem:[#allocation2 + $0x159] sm:$0xff] %vm210_vm0, %v283_v31  ;;  %v2668_v31 = vsel %vm455_vm2, %v507_v50, %v509_v53  ;;  %v516_v53 = vrot.slane %v2631_v26, 1 }
  0x7d   : > { %4030 = vst [vmem:[#allocation21_spill] sm:$0xff] %v2656_v63  ;;  %v2670_v58 = vld [vmem:[#allocation2 + $0x150] sm:$0xff]  ;;  %578 = vrot.lane.b32.xlu0 %v2668_v31, %s2257_s17  ;;  %v2687_v63 = vld [vmem:[#allocation2 + $0x138] sm:$0xff] }
  0x7e   : > { %402 = vst.msk [vmem:[#allocation3 + $0xd8] sm:$0xff] %vm210_vm0, %v2651_v22 }
  0x7f   : > { %317 = vst.msk [vmem:[#allocation2 + $0x169] sm:$0xff] %vm210_vm0, %v284_v45 }
  0x80   : > { %318 = vst.msk [vmem:[#allocation2 + $0x171] sm:$0xff] %vm210_vm0, %v285_v56  ;;  %v517_v56 = vrot.slane %v2638_v37, 1 }
  0x81   : > { %4031 = vst [vmem:[#allocation22_spill] sm:$0xff] %v2668_v31  ;;  %v506_v31 = vrot.slane %v2607_v57, 1 }
  0x82   : > { %403 = vst.msk [vmem:[#allocation3 + $0xe0] sm:$0xff] %vm210_vm0, %v2670_v58  ;;  %v2710_v12 = vsel %vm455_vm2, %v516_v53, %v517_v56  ;;  %v514_v53 = vrot.slane %v2720_v10, 1 }
  0x83   : > { %4032 = vst [vmem:[#allocation23_spill] sm:$0xff] %v2677_v7  ;;  %v2681_v45 = vld [vmem:[#allocation2 + $0x158] sm:$0xff]  ;;  %v519_v7 = vrot.slane %v2698_v3, 1  ;;  %v2716_v36 = vsel %vm455_vm2, %v506_v31, %v507_v50  ;;  %v2733_v50 = vsel %vm455_vm2, %v522_v49, %v524_v52  ;;  %v526_v31 = vrot.slane %v2670_v58, 1 }
  0x84   : > { %404 = vst.msk [vmem:[#allocation3 + $0xe8] sm:$0xff] %vm210_vm0, %v2681_v45  ;;  %576 = vrot.lane.b32.xlu2 %v2716_v36, %s2257_s17  ;;  %v2738_v54 = vsel %vm455_vm2, %v512_v61, %v514_v53 }
  0x85   : > { %4033 = vst [vmem:[#allocation24_spill] sm:$0xff] %v2687_v63  ;;  %584 = vrot.lane.b32.xlu0 %v2710_v12, %s2257_s17 }
  0x86   : > { %4034 = vst [vmem:[#allocation25_spill] sm:$0xff] %v2690_v27  ;;  %v2694_v46 = vld [vmem:[#allocation2 + $0x168] sm:$0xff]  ;;  %v2725_v27 = vsel %vm455_vm2, %v517_v56, %v519_v7 }
  0x87   : > { %4035 = vst [vmem:[#allocation26_spill] sm:$0xff] %v2694_v46  ;;  %v2701_v40 = vld [vmem:[#allocation2 + $0x170] sm:$0xff]  ;;  %586 = vrot.lane.b32.xlu1 %v2725_v27, %s2257_s17  ;;  %v531_v7 = vrot.slane %v2694_v46, 1  ;;  %v2749_v52 = vld [vmem:[#allocation2 + $0x178] sm:$0x3] }
  0x88   : > { %401 = vst.msk [vmem:[#allocation3 + $0xd0] sm:$0xff] %vm210_vm0, %v2687_v63  ;;  %v532_v56 = vrot.slane %v2701_v40, 1  ;;  %v534_v53 = vrot.slane %v2749_v52, 1 }
  0x89   : > { %4036 = vst [vmem:[#allocation27_spill] sm:$0xff] %v2701_v40 }
  0x8a   : > { %405 = vst.msk [vmem:[#allocation3 + $0xf0] sm:$0xff] %vm210_vm0, %v2694_v46  ;;  %v2755_v61 = vsel %vm455_vm2, %v531_v7, %v532_v56 }
  0x8b   : > { %406 = vst.msk [vmem:[#allocation3 + $0xf8] sm:$0xff] %vm210_vm0, %v2701_v40  ;;  %v537_v15 = vpop.permute.xlu0 %536 }
  0x8c   : > { %4037 = vst [vmem:[#allocation28_spill] sm:$0xff] %v2710_v12  ;;  %v527_v12 = vrot.slane %v2681_v45, 1  ;;  %582 = vrot.lane.b32.xlu2 %v2738_v54, %s2257_s17 }
  0x8d   : > { %4038 = vst [vmem:[#allocation29_spill] sm:$0xff] %v2716_v36  ;;  %590 = vrot.lane.b32.xlu0 %v2733_v50, %s2257_s17 }
  0x8e   : > { %4039 = vst [vmem:[#allocation30_spill] sm:$0xff] %v2725_v27  ;;  %v2745_v36 = vsel %vm455_vm2, %v526_v31, %v527_v12  ;;  %v521_v27 = vrot.slane %v2687_v63, 1  ;;  %v2763_v31 = vld [vmem:[#allocation2 + $0x160] sm:$0x3] }
  0x8f   : > { %4040 = vst [vmem:[#allocation31_spill] sm:$0xff] %v2733_v50  ;;  %592 = vrot.lane.b32.xlu1 %v2745_v36, %s2257_s17 }
  0x90   : > { %4041 = vst [vmem:[#allocation32_spill] sm:$0xff] %v2738_v54  ;;  %v2759_v50 = vsel %vm455_vm2, %v521_v27, %v522_v49  ;;  %v667_v54 = vrot.slane %v2306_v1, 2  ;;  %v529_v49 = vrot.slane %v2763_v31, 1  ;;  %v671_v1 = vrot.slane %v2371_v9, 2 }
  0x91   : > { %4042 = vst [vmem:[#allocation33_spill] sm:$0xff] %v2745_v36  ;;  %v2768_v36 = vsel %vm455_vm2, %v532_v56, %v534_v53  ;;  %v676_v56 = vrot.slane %v2437_v35, 2 }
  0x92   : > { %4043 = vst [vmem:[#allocation34_spill] sm:$0xff] %v2755_v61  ;;  %v670_v27 = vsel %vm665_vm5, %v667_v54, %v669_v47  ;;  %v2780_v7 = vsel %vm455_vm2, %v527_v12, %v529_v49  ;;  %v2786_v53 = vsel %vm665_vm5, %v671_v1, %v672_v19  ;;  %v666_v47 = vrot.slane %v2309_v2, 2 }
  0x93   : > { %4044 = vst [vmem:[#allocation35_spill] sm:$0xff] %v2759_v50  ;;  %v679_v49 = vrot.slane %v2456_v43, 2  ;;  %v682_v1 = vrot.slane %v2419_v30, 2  ;;  %v674_v2 = vrot.slane %v2385_v16, 2  ;;  %v692_v16 = vrot.slane %v2464_v48, 2 }
  0x94   : > { %4045 = vst [vmem:[#allocation36_spill] sm:$0xff] %v2768_v36  ;;  %588 = vrot.lane.b32.xlu2 %v2759_v50, %s2257_s17 }
  0x95   : > { %596 = vrot.lane.b32.xlu0 %v2755_v61, %s2257_s17  ;;  %633 = vst.msk [vmem:[#allocation3] sm:$0xff] %vm632_vm4, %v537_v15  ;;  %v677_v15 = vrot.slane %v2443_v39, 2 }
  0x97   : > { %598 = vrot.lane.b32.xlu1 %v2768_v36, %s2257_s17  ;;  %v2794_v12 = vsel %vm665_vm5, %v676_v56, %v677_v15  ;;  %v684_v36 = vrot.slane %v2425_v32, 2  ;;  %v2803_v61 = vsel %vm665_vm5, %v677_v15, %v679_v49  ;;  %v687_v56 = vrot.slane %v2427_v33, 2 }
  0x98   : > { %4046 = vst [vmem:[#allocation37_spill] sm:$0xff] %v2803_v61  ;;  %v691_v32 = vrot.slane %v2453_v42, 2 }
  0x99   : > { %v2810_v43 = vsel %vm665_vm5, %v682_v1, %v684_v36  ;;  %v681_v36 = vrot.slane %v2406_v25, 2 }
  0x9a   : > { %4047 = vst [vmem:[#allocation38_spill] sm:$0xff] %v2810_v43 }
  0x9c   : > { %594 = vrot.lane.b32.xlu2 %v2780_v7, %s2257_s17 }
  0x9d   : > { %748 = vrot.lane.b32.xlu0 %v670_v27, %s2258_s22  ;;  %v668_v27 = vsel %vm665_vm5, %v666_v47, %v667_v54  ;;  %v686_v54 = vrot.slane %v2489_v55, 2  ;;  %v2815_v47 = vsel %vm665_vm5, %v672_v19, %v674_v2  ;;  %v2830_v19 = vsel %vm665_vm5, %v691_v32, %v692_v16 }
  0x9e   : > { %v2835_v2 = vsel %vm665_vm5, %v681_v36, %v682_v1  ;;  %v689_v32 = vrot.slane %v2441_v38, 2  ;;  %v701_v1 = vrot.slane %v2544_v17, 2  ;;  %v706_v38 = vrot.slane %v2536_v14, 2 }
  0x9f   : > { %750 = vrot.lane.b32.xlu1 %v2786_v53, %s2258_s22  ;;  %v2822_v15 = vsel %vm665_vm5, %v686_v54, %v687_v56  ;;  %v697_v54 = vrot.slane %v2496_v59, 2 }
  0xa0   : > { %4048 = vst [vmem:[#allocation39_spill] sm:$0xff] %v2822_v15  ;;  %v2856_v36 = vsel %vm665_vm5, %v687_v56, %v689_v32  ;;  %v696_v56 = vrot.slane %v2476_v51, 2 }
  0xa4   : > { %746 = vrot.lane.b32.xlu2 %v668_v27, %s2258_s22  ;;  %v694_v27 = vrot.slane %v2550_v21, 2 }
  0xa5   : > { %754 = vrot.lane.b32.xlu0 %v2794_v12, %s2258_s22 }
  0xa6   : > { %v545_v49 = vpop.permute.xlu2 %544 }
  0xa7   : > { %756 = vrot.lane.b32.xlu1 %v2803_v61, %s2258_s22  ;;  %637 = vst.msk [vmem:[#allocation3 + $0x20] sm:$0xff] %vm632_vm4, %v545_v49  ;;  %v699_v61 = vrot.slane %v2518_v5, 2  ;;  %v702_v5 = vrot.slane %v2523_v8, 2 }
  0xa9   : > { %v2850_v21 = vsel %vm665_vm5, %v697_v54, %v699_v61  ;;  %v707_v61 = vrot.slane %v2548_v20, 2 }
  0xaa   : > { %4050 = vst [vmem:[#allocation41_spill] sm:$0xff] %v2850_v21 }
  0xac   : > { %752 = vrot.lane.b32.xlu2 %v2815_v47, %s2258_s22 }
  0xad   : > { %760 = vrot.lane.b32.xlu0 %v2810_v43, %s2258_s22  ;;  %v2842_v43 = vsel %vm665_vm5, %v692_v16, %v694_v27 }
  0xae   : > { %4049 = vst [vmem:[#allocation40_spill] sm:$0xff] %v2842_v43  ;;  %v547_v49 = vpop.permute.xlu2 %546 }
  0xaf   : > { %762 = vrot.lane.b32.xlu1 %v2822_v15, %s2258_s22  ;;  %638 = vst.msk [vmem:[#allocation3 + $0x28] sm:$0xff] %vm632_vm4, %v547_v49  ;;  %v2864_v49 = vsel %vm665_vm5, %v701_v1, %v702_v5 }
  0xb0   : > { %4051 = vst [vmem:[#allocation42_spill] sm:$0xff] %v2864_v49 }
  0xb1   : > { %v541_v16 = vpop.permute.xlu1 %540 }
  0xb2   : > { %635 = vst.msk [vmem:[#allocation3 + $0x10] sm:$0xff] %vm632_vm4, %v541_v16  ;;  %v2873_v16 = vsel %vm665_vm5, %v706_v38, %v707_v61 }
  0xb4   : > { %758 = vrot.lane.b32.xlu2 %v2835_v2, %s2258_s22  ;;  %v539_v27 = vpop.permute.xlu0 %538 }
  0xb5   : > { %766 = vrot.lane.b32.xlu0 %v2830_v19, %s2258_s22  ;;  %634 = vst.msk [vmem:[#allocation3 + $0x8] sm:$0xff] %vm632_vm4, %v539_v27  ;;  %v712_v27 = vrot.slane %v2566_v28, 2 }
  0xb6   : > { %v553_v32 = vpop.permute.xlu2 %552 }
  0xb7   : > { %768 = vrot.lane.b32.xlu1 %v2842_v43, %s2258_s22  ;;  %641 = vst.msk [vmem:[#allocation3 + $0x40] sm:$0xff] %vm632_vm4, %v553_v32  ;;  %v709_v43 = vrot.slane %v2646_v44, 2  ;;  %v704_v44 = vrot.slane %v2534_v13, 2  ;;  %v721_v13 = vrot.slane %v2612_v0, 2 }
  0xb9   : > { %v543_v1 = vpop.permute.xlu1 %542  ;;  %v2886_v38 = vsel %vm665_vm5, %v707_v61, %v709_v43  ;;  %v717_v43 = vrot.slane %v2581_v41, 2  ;;  %v2901_v32 = vsel %vm665_vm5, %v702_v5, %v704_v44  ;;  %v711_v5 = vrot.slane %v2558_v24, 2 }
  0xba   : > { %636 = vst.msk [vmem:[#allocation3 + $0x18] sm:$0xff] %vm632_vm4, %v543_v1 }
  0xbb   : > { %4052 = vst [vmem:[#allocation43_spill] sm:$0xff] %v2886_v38 }
  0xbc   : > { %764 = vrot.lane.b32.xlu2 %v2856_v36, %s2258_s22  ;;  %v549_v15 = vpop.permute.xlu0 %548 }
  0xbd   : > { %772 = vrot.lane.b32.xlu0 %v2850_v21, %s2258_s22  ;;  %v2878_v21 = vsel %vm665_vm5, %v696_v56, %v697_v54  ;;  %639 = vst.msk [vmem:[#allocation3 + $0x30] sm:$0xff] %vm632_vm4, %v549_v15  ;;  %v722_v15 = vrot.slane %v2617_v6, 2 }
  0xbe   : > { %v559_v54 = vpop.permute.xlu2 %558 }
  0xbf   : > { %774 = vrot.lane.b32.xlu1 %v2864_v49, %s2258_s22  ;;  %v714_v49 = vrot.slane %v2609_v62, 2  ;;  %644 = vst.msk [vmem:[#allocation3 + $0x58] sm:$0xff] %vm632_vm4, %v559_v54  ;;  %v716_v62 = vrot.slane %v2607_v57, 2  ;;  %v2918_v54 = vsel %vm665_vm5, %v721_v13, %v722_v15 }
  0xc1   : > { %v2895_v56 = vsel %vm665_vm5, %v712_v27, %v714_v49  ;;  %v551_v61 = vpop.permute.xlu1 %550  ;;  %v2909_v1 = vsel %vm665_vm5, %v716_v62, %v717_v43 }
  0xc2   : > { %4053 = vst [vmem:[#allocation44_spill] sm:$0xff] %v2895_v56 }
  0xc3   : > { %640 = vst.msk [vmem:[#allocation3 + $0x38] sm:$0xff] %vm632_vm4, %v551_v61  ;;  %v724_v61 = vrot.slane %v2720_v10, 2  ;;  %v719_v10 = vrot.slane %v2629_v23, 2  ;;  %v736_v23 = vrot.slane %v2670_v58, 2 }
  0xc4   : > { %770 = vrot.lane.b32.xlu2 %v2878_v21, %s2258_s22  ;;  %v555_v49 = vpop.permute.xlu0 %554  ;;  %4054 = vst [vmem:[#allocation45_spill] sm:$0xff] %v2909_v1 }
  0xc5   : > { %778 = vrot.lane.b32.xlu0 %v2873_v16, %s2258_s22  ;;  %642 = vst.msk [vmem:[#allocation3 + $0x48] sm:$0xff] %vm632_vm4, %v555_v49  ;;  %v727_v49 = vrot.slane %v2638_v37, 2  ;;  %v2931_v13 = vsel %vm665_vm5, %v722_v15, %v724_v61  ;;  %v732_v15 = vrot.slane %v2651_v22, 2  ;;  %v2946_v61 = vsel %vm665_vm5, %v717_v43, %v719_v10 }
  0xc6   : > { %v565_v44 = vpop.permute.xlu2 %564  ;;  %4056 = vst [vmem:[#allocation47_spill] sm:$0xff] %v2931_v13  ;;  %v726_v43 = vrot.slane %v2631_v26, 2 }
  0xc7   : > { %780 = vrot.lane.b32.xlu1 %v2886_v38, %s2258_s22  ;;  %647 = vst.msk [vmem:[#allocation3 + $0x70] sm:$0xff] %vm632_vm4, %v565_v44  ;;  %v2923_v38 = vsel %vm665_vm5, %v711_v5, %v712_v27 }
  0xc8   : > { %4055 = vst [vmem:[#allocation46_spill] sm:$0xff] %v2923_v38 }
  0xc9   : > { %v557_v62 = vpop.permute.xlu1 %556 }
  0xca   : > { %643 = vst.msk [vmem:[#allocation3 + $0x50] sm:$0xff] %vm632_vm4, %v557_v62 }
  0xcc   : > { %776 = vrot.lane.b32.xlu2 %v2901_v32, %s2258_s22 }
  0xcd   : > { %784 = vrot.lane.b32.xlu0 %v2895_v56, %s2258_s22  ;;  %v561_v56 = vpop.permute.xlu0 %560 }
  0xce   : > { %645 = vst.msk [vmem:[#allocation3 + $0x60] sm:$0xff] %vm632_vm4, %v561_v56  ;;  %v737_v56 = vrot.slane %v2681_v45, 2 }
  0xcf   : > { %786 = vrot.lane.b32.xlu1 %v2909_v1, %s2258_s22  ;;  %v729_v1 = vrot.slane %v2698_v3, 2  ;;  %v731_v3 = vrot.slane %v2687_v63, 2 }
  0xd1   : > { %v2940_v5 = vsel %vm665_vm5, %v727_v49, %v729_v1  ;;  %v563_v44 = vpop.permute.xlu1 %562  ;;  %v2954_v62 = vsel %vm665_vm5, %v731_v3, %v732_v15 }
  0xd2   : > { %4057 = vst [vmem:[#allocation48_spill] sm:$0xff] %v2940_v5 }
  0xd3   : > { %v571_v27 = vpop.permute.xlu2 %570  ;;  %646 = vst.msk [vmem:[#allocation3 + $0x68] sm:$0xff] %vm632_vm4, %v563_v44  ;;  %v739_v44 = vrot.slane %v2763_v31, 2  ;;  %v734_v31 = vrot.slane %v2713_v4, 2  ;;  %v741_v4 = vrot.slane %v2694_v46, 2 }
  0xd4   : > { %782 = vrot.lane.b32.xlu2 %v2923_v38, %s2258_s22  ;;  %650 = vst.msk [vmem:[#allocation3 + $0x88] sm:$0xff] %vm632_vm4, %v571_v27  ;;  %v2963_v27 = vsel %vm665_vm5, %v736_v23, %v737_v56 }
  0xd5   : > { %790 = vrot.lane.b32.xlu0 %v2918_v54, %s2258_s22  ;;  %v567_v1 = vpop.permute.xlu0 %566  ;;  %4058 = vst [vmem:[#allocation49_spill] sm:$0xff] %v2954_v62  ;;  %v2976_v23 = vsel %vm665_vm5, %v737_v56, %v739_v44  ;;  %v2989_v56 = vsel %vm665_vm5, %v732_v15, %v734_v31 }
  0xd6   : > { %648 = vst.msk [vmem:[#allocation3 + $0x78] sm:$0xff] %vm632_vm4, %v567_v1  ;;  %v742_v1 = vrot.slane %v2701_v40, 2 }
  0xd7   : > { %792 = vrot.lane.b32.xlu1 %v2931_v13, %s2258_s22  ;;  %v2968_v13 = vsel %vm665_vm5, %v726_v43, %v727_v49 }
  0xd8   : > { %4059 = vst [vmem:[#allocation50_spill] sm:$0xff] %v2968_v13 }
  0xd9   : > { %v569_v3 = vpop.permute.xlu1 %568 }
  0xda   : > { %649 = vst.msk [vmem:[#allocation3 + $0x80] sm:$0xff] %vm632_vm4, %v569_v3 }
  0xdc   : > { %788 = vrot.lane.b32.xlu2 %v2946_v61, %s2258_s22 }
  0xdd   : > { %796 = vrot.lane.b32.xlu0 %v2940_v5, %s2258_s22  ;;  %v573_v5 = vpop.permute.xlu0 %572 }
  0xde   : > { %v577_v10 = vpop.permute.xlu2 %576  ;;  %651 = vst.msk [vmem:[#allocation3 + $0x90] sm:$0xff] %vm632_vm4, %v573_v5 }
  0xdf   : > { %798 = vrot.lane.b32.xlu1 %v2954_v62, %s2258_s22  ;;  %653 = vst.msk [vmem:[#allocation3 + $0xa0] sm:$0xff] %vm632_vm4, %v577_v10  ;;  %v744_v62 = vrot.slane %v2749_v52, 2  ;;  %v3002_v10 = vsel %vm665_vm5, %v741_v4, %v742_v1 }
  0xe0   : > { %4061 = vst [vmem:[#allocation52_spill] sm:$0xff] %v3002_v10 }
  0xe1   : > { %v2985_v43 = vsel %vm665_vm5, %v742_v1, %v744_v62  ;;  %v575_v52 = vpop.permute.xlu1 %574 }
  0xe2   : > { %4060 = vst [vmem:[#allocation51_spill] sm:$0xff] %v2985_v43 }
  0xe3   : > { %652 = vst.msk [vmem:[#allocation3 + $0x98] sm:$0xff] %vm632_vm4, %v575_v52 }
  0xe4   : > { %794 = vrot.lane.b32.xlu2 %v2968_v13, %s2258_s22 }
  0xe5   : > { %802 = vrot.lane.b32.xlu0 %v2963_v27, %s2258_s22 }
  0xe6   : > { %v583_v49 = vpop.permute.xlu2 %582 }
  0xe7   : > { %804 = vrot.lane.b32.xlu1 %v2976_v23, %s2258_s22  ;;  %656 = vst.msk [vmem:[#allocation3 + $0xb8] sm:$0xff] %vm632_vm4, %v583_v49 }
  0xe9   : > { %v581_v15 = vpop.permute.xlu1 %580 }
  0xea   : > { %655 = vst.msk [vmem:[#allocation3 + $0xb0] sm:$0xff] %vm632_vm4, %v581_v15 }
  0xec   : > { %800 = vrot.lane.b32.xlu2 %v2989_v56, %s2258_s22 }
  0xed   : > { %808 = vrot.lane.b32.xlu0 %v2985_v43, %s2258_s22  ;;  %v4074_v43 = vld [vmem:[#allocation11_spill] sm:$0xff] }
  0xee   : > { %v589_v62 = vpop.permute.xlu2 %588 }
  0xef   : > { %v579_v5 = vpop.permute.xlu0 %578  ;;  %877 = vrot.lane.b32.xlu1 %v2371_v9, %s2259_s23  ;;  %659 = vst.msk [vmem:[#allocation3 + $0xd0] sm:$0xff] %vm632_vm4, %v589_v62 }
  0xf0   : > { %654 = vst.msk [vmem:[#allocation3 + $0xa8] sm:$0xff] %vm632_vm4, %v579_v5 }
  0xf4   : > { %806 = vrot.lane.b32.xlu2 %v3002_v10, %s2258_s22  ;;  %v4077_v10 = vld [vmem:[#allocation15_spill] sm:$0xff] }
  0xf5   : > { %881 = vrot.lane.b32.xlu0 %v2437_v35, %s2259_s23 }
  0xf6   : > { %v595_v3 = vpop.permute.xlu2 %594 }
  0xf7   : > { %v585_v44 = vpop.permute.xlu0 %584  ;;  %883 = vrot.lane.b32.xlu1 %v2443_v39, %s2259_s23  ;;  %662 = vst.msk [vmem:[#allocation3 + $0xe8] sm:$0xff] %vm632_vm4, %v595_v3 }
  0xf8   : > { %657 = vst.msk [vmem:[#allocation3 + $0xc0] sm:$0xff] %vm632_vm4, %v585_v44 }
  0xf9   : > { %v587_v9 = vpop.permute.xlu1 %586 }
  0xfa   : > { %658 = vst.msk [vmem:[#allocation3 + $0xc8] sm:$0xff] %vm632_vm4, %v587_v9  ;;  %v286_v9 = vld [vmem:[%s2354_s21 + $0xf0] sm:$0xff] }
  0xfb   : > { %319 = vst.msk [vmem:[#allocation2 + $0x181] sm:$0xff] %vm210_vm0, %v286_v9 }
  0xfc   : > { %879 = vrot.lane.b32.xlu2 %v2375_v11, %s2259_s23 }
  0xfd   : > { %887 = vrot.lane.b32.xlu0 %v2419_v30, %s2259_s23 }
  0xfe   : > { %v747_v31 = vpop.permute.xlu2 %746 }
  0xff   : > { %v591_v1 = vpop.permute.xlu0 %590  ;;  %889 = vrot.lane.b32.xlu1 %v2489_v55, %s2259_s23  ;;  %843 = vst.msk [vmem:[#allocation3] sm:$0xff] %vm842_vm6, %v747_v31 }
 0x100   : > { %660 = vst.msk [vmem:[#allocation3 + $0xd8] sm:$0xff] %vm632_vm4, %v591_v1 }
 0x101   : > { %v593_v49 = vpop.permute.xlu1 %592 }
 0x102   : > { %661 = vst.msk [vmem:[#allocation3 + $0xe0] sm:$0xff] %vm632_vm4, %v593_v49 }
 0x104   : > { %885 = vrot.lane.b32.xlu2 %v2406_v25, %s2259_s23 }
 0x105   : > { %893 = vrot.lane.b32.xlu0 %v2453_v42, %s2259_s23 }
 0x106   : > { %v753_v11 = vpop.permute.xlu2 %752 }
 0x107   : > { %v597_v52 = vpop.permute.xlu0 %596  ;;  %895 = vrot.lane.b32.xlu1 %v2464_v48, %s2259_s23  ;;  %846 = vst.msk [vmem:[#allocation3 + $0x18] sm:$0xff] %vm842_vm6, %v753_v11 }
 0x108   : > { %663 = vst.msk [vmem:[#allocation3 + $0xf0] sm:$0xff] %vm632_vm4, %v597_v52 }
 0x109   : > { %v599_v5 = vpop.permute.xlu1 %598 }
 0x10a   : > { %664 = vst.msk [vmem:[#allocation3 + $0xf8] sm:$0xff] %vm632_vm4, %v599_v5 }
 0x10c   : > { %891 = vrot.lane.b32.xlu2 %v2427_v33, %s2259_s23 }
 0x10d   : > { %899 = vrot.lane.b32.xlu0 %v2496_v59, %s2259_s23 }
 0x10e   : > { %v759_v62 = vpop.permute.xlu2 %758 }
 0x10f   : > { %v749_v4 = vpop.permute.xlu0 %748  ;;  %901 = vrot.lane.b32.xlu1 %v2544_v17, %s2259_s23  ;;  %849 = vst.msk [vmem:[#allocation3 + $0x30] sm:$0xff] %vm842_vm6, %v759_v62 }
 0x110   : > { %844 = vst.msk [vmem:[#allocation3 + $0x8] sm:$0xff] %vm842_vm6, %v749_v4 }
 0x111   : > { %v751_v15 = vpop.permute.xlu1 %750 }
 0x112   : > { %845 = vst.msk [vmem:[#allocation3 + $0x10] sm:$0xff] %vm842_vm6, %v751_v15 }
 0x114   : > { %897 = vrot.lane.b32.xlu2 %v2476_v51, %s2259_s23 }
 0x115   : > { %905 = vrot.lane.b32.xlu0 %v2536_v14, %s2259_s23 }
 0x116   : > { %v765_v3 = vpop.permute.xlu2 %764 }
 0x117   : > { %v755_v44 = vpop.permute.xlu0 %754  ;;  %907 = vrot.lane.b32.xlu1 %v2548_v20, %s2259_s23  ;;  %852 = vst.msk [vmem:[#allocation3 + $0x48] sm:$0xff] %vm842_vm6, %v765_v3 }
 0x118   : > { %847 = vst.msk [vmem:[#allocation3 + $0x20] sm:$0xff] %vm842_vm6, %v755_v44  ;;  %v287_v44 = vld [vmem:[%s2354_s21 + $0xf8] sm:$0xff] }
 0x119   : > { %v757_v1 = vpop.permute.xlu1 %756  ;;  %320 = vst.msk [vmem:[#allocation2 + $0x189] sm:$0xff] %vm210_vm0, %v287_v44  ;;  %vm1991_vm0 = vcmask 57344  }
 0x11a   : > { %848 = vst.msk [vmem:[#allocation3 + $0x28] sm:$0xff] %vm842_vm6, %v757_v1 }
 0x11c   : > { %903 = vrot.lane.b32.xlu2 %v2523_v8, %s2259_s23 }
 0x11d   : > { %911 = vrot.lane.b32.xlu0 %v2566_v28, %s2259_s23 }
 0x11e   : > { %v771_v49 = vpop.permute.xlu2 %770 }
 0x11f   : > { %v761_v31 = vpop.permute.xlu0 %760  ;;  %913 = vrot.lane.b32.xlu1 %v2607_v57, %s2259_s23  ;;  %855 = vst.msk [vmem:[#allocation3 + $0x60] sm:$0xff] %vm842_vm6, %v771_v49 }
 0x120   : > { %850 = vst.msk [vmem:[#allocation3 + $0x38] sm:$0xff] %vm842_vm6, %v761_v31  ;;  %v3109_v44 = vld [vmem:[#allocation2 + $0x188] sm:$0xff] }
 0x121   : > { %v763_v52 = vpop.permute.xlu1 %762  ;;  %4063 = vst [vmem:[#allocation54_spill] sm:$0xff] %v3109_v44 }
 0x122   : > { %851 = vst.msk [vmem:[#allocation3 + $0x40] sm:$0xff] %vm842_vm6, %v763_v52  ;;  %v3092_v52 = vld [vmem:[#allocation2 + $0x180] sm:$0xff] }
 0x123   : > { %4062 = vst [vmem:[#allocation53_spill] sm:$0xff] %v3092_v52 }
 0x124   : > { %909 = vrot.lane.b32.xlu2 %v2558_v24, %s2259_s23 }
 0x125   : > { %917 = vrot.lane.b32.xlu0 %v2612_v0, %s2259_s23 }
 0x126   : > { %v777_v5 = vpop.permute.xlu2 %776 }
 0x127   : > { %v767_v11 = vpop.permute.xlu0 %766  ;;  %919 = vrot.lane.b32.xlu1 %v2617_v6, %s2259_s23  ;;  %858 = vst.msk [vmem:[#allocation3 + $0x78] sm:$0xff] %vm842_vm6, %v777_v5 }
 0x128   : > { %853 = vst.msk [vmem:[#allocation3 + $0x50] sm:$0xff] %vm842_vm6, %v767_v11 }
 0x129   : > { %v769_v4 = vpop.permute.xlu1 %768 }
 0x12a   : > { %854 = vst.msk [vmem:[#allocation3 + $0x58] sm:$0xff] %vm842_vm6, %v769_v4 }
 0x12c   : > { %915 = vrot.lane.b32.xlu2 %v2581_v41, %s2259_s23 }
 0x12d   : > { %923 = vrot.lane.b32.xlu0 %v2638_v37, %s2259_s23 }
 0x12e   : > { %v783_v15 = vpop.permute.xlu2 %782 }
 0x12f   : > { %v773_v62 = vpop.permute.xlu0 %772  ;;  %925 = vrot.lane.b32.xlu1 %v2687_v63, %s2259_s23  ;;  %861 = vst.msk [vmem:[#allocation3 + $0x90] sm:$0xff] %vm842_vm6, %v783_v15 }
 0x130   : > { %856 = vst.msk [vmem:[#allocation3 + $0x68] sm:$0xff] %vm842_vm6, %v773_v62 }
 0x131   : > { %v775_v3 = vpop.permute.xlu1 %774 }
 0x132   : > { %857 = vst.msk [vmem:[#allocation3 + $0x70] sm:$0xff] %vm842_vm6, %v775_v3 }
 0x134   : > { %921 = vrot.lane.b32.xlu2 %v2631_v26, %s2259_s23 }
 0x135   : > { %929 = vrot.lane.b32.xlu0 %v2670_v58, %s2259_s23 }
 0x136   : > { %v789_v1 = vpop.permute.xlu2 %788 }
 0x137   : > { %v779_v9 = vpop.permute.xlu0 %778  ;;  %931 = vrot.lane.b32.xlu1 %v2681_v45, %s2259_s23  ;;  %864 = vst.msk [vmem:[#allocation3 + $0xa8] sm:$0xff] %vm842_vm6, %v789_v1 }
 0x138   : > { %859 = vst.msk [vmem:[#allocation3 + $0x80] sm:$0xff] %vm842_vm6, %v779_v9  ;;  %v4064_v9 = vld [vmem:[#allocation9_spill] sm:$0xff] }
 0x139   : > { %v781_v31 = vpop.permute.xlu1 %780 }
 0x13a   : > { %860 = vst.msk [vmem:[#allocation3 + $0x88] sm:$0xff] %vm842_vm6, %v781_v31  ;;  %v4065_v31 = vld [vmem:[#allocation4_spill] sm:$0xff] }
 0x13c   : > { %927 = vrot.lane.b32.xlu2 %v2651_v22, %s2259_s23 }
 0x13d   : > { %935 = vrot.lane.b32.xlu0 %v2701_v40, %s2259_s23  ;;  %v4080_v40 = vld [vmem:[#allocation21_spill] sm:$0xff] }
 0x13e   : > { %v795_v11 = vpop.permute.xlu2 %794 }
 0x13f   : > { %v785_v49 = vpop.permute.xlu0 %784  ;;  %937 = vrot.lane.b32.xlu1 %v3092_v52, %s2259_s23  ;;  %867 = vst.msk [vmem:[#allocation3 + $0xc0] sm:$0xff] %vm842_vm6, %v795_v11  ;;  %v4066_v11 = vld [vmem:[#allocation6_spill] sm:$0xff] }
 0x140   : > { %862 = vst.msk [vmem:[#allocation3 + $0x98] sm:$0xff] %vm842_vm6, %v785_v49 }
 0x141   : > { %v787_v5 = vpop.permute.xlu1 %786 }
 0x142   : > { %863 = vst.msk [vmem:[#allocation3 + $0xa0] sm:$0xff] %vm842_vm6, %v787_v5 }
 0x144   : > { %933 = vrot.lane.b32.xlu2 %v2694_v46, %s2259_s23 }
 0x145   : > { %1012 = vrot.lane.b32.xlu0 %v2390_v18, %s2260_s24 }
 0x146   : > { %v801_v62 = vpop.permute.xlu2 %800 }
 0x147   : > { %v791_v4 = vpop.permute.xlu0 %790  ;;  %1014 = vrot.lane.b32.xlu1 %v2417_v29, %s2260_s24  ;;  %870 = vst.msk [vmem:[#allocation3 + $0xd8] sm:$0xff] %vm842_vm6, %v801_v62 }
 0x148   : > { %865 = vst.msk [vmem:[#allocation3 + $0xb0] sm:$0xff] %vm842_vm6, %v791_v4  ;;  %v4067_v4 = vld [vmem:[#allocation14_spill] sm:$0xff] }
 0x149   : > { %v793_v15 = vpop.permute.xlu1 %792 }
 0x14a   : > { %866 = vst.msk [vmem:[#allocation3 + $0xb8] sm:$0xff] %vm842_vm6, %v793_v15  ;;  %v4068_v15 = vld [vmem:[#allocation5_spill] sm:$0xff] }
 0x14c   : > { %939 = vrot.lane.b32.xlu2 %v3109_v44, %s2259_s23 }
 0x14d   : > { %1018 = vrot.lane.b32.xlu0 %v2499_v60, %s2260_s24 }
 0x14e   : > { %v807_v3 = vpop.permute.xlu2 %806 }
 0x14f   : > { %v797_v18 = vpop.permute.xlu0 %796  ;;  %1020 = vrot.lane.b32.xlu1 %v2433_v34, %s2260_s24  ;;  %873 = vst.msk [vmem:[#allocation3 + $0xf0] sm:$0xff] %vm842_vm6, %v807_v3  ;;  %v4069_v3 = vld [vmem:[#allocation8_spill] sm:$0xff] }
 0x150   : > { %868 = vst.msk [vmem:[#allocation3 + $0xc8] sm:$0xff] %vm842_vm6, %v797_v18 }
 0x151   : > { %v799_v29 = vpop.permute.xlu1 %798 }
 0x152   : > { %869 = vst.msk [vmem:[#allocation3 + $0xd0] sm:$0xff] %vm842_vm6, %v799_v29 }
 0x154   : > { %1016 = vrot.lane.b32.xlu2 %v4065_v31, %s2260_s24 }
 0x155   : > { %1024 = vrot.lane.b32.xlu0 %v4064_v9, %s2260_s24 }
 0x156   : > { %v880_v49 = vpop.permute.xlu2 %879 }
 0x157   : > { %v803_v1 = vpop.permute.xlu0 %802  ;;  %1026 = vrot.lane.b32.xlu1 %v4066_v11, %s2260_s24  ;;  %975 = vst.msk [vmem:[#allocation3 + $0x8] sm:$0xff] %vm973_vm7, %v880_v49 }
 0x158   : > { %871 = vst.msk [vmem:[#allocation3 + $0xe0] sm:$0xff] %vm842_vm6, %v803_v1  ;;  %v4070_v1 = vld [vmem:[#allocation18_spill] sm:$0xff] }
 0x159   : > { %v805_v5 = vpop.permute.xlu1 %804 }
 0x15a   : > { %872 = vst.msk [vmem:[#allocation3 + $0xe8] sm:$0xff] %vm842_vm6, %v805_v5  ;;  %v4071_v5 = vld [vmem:[#allocation7_spill] sm:$0xff] }
 0x15c   : > { %1022 = vrot.lane.b32.xlu2 %v4068_v15, %s2260_s24 }
 0x15d   : > { %1030 = vrot.lane.b32.xlu0 %v4067_v4, %s2260_s24  ;;  %v4084_v4 = vld [vmem:[#allocation30_spill] sm:$0xff] }
 0x15e   : > { %v886_v18 = vpop.permute.xlu2 %885 }
 0x15f   : > { %v809_v62 = vpop.permute.xlu0 %808  ;;  %1032 = vrot.lane.b32.xlu1 %v4069_v3, %s2260_s24  ;;  %978 = vst.msk [vmem:[#allocation3 + $0x20] sm:$0xff] %vm973_vm7, %v886_v18  ;;  %v4073_v18 = vld [vmem:[#allocation23_spill] sm:$0xff] }
 0x160   : > { %874 = vst.msk [vmem:[#allocation3 + $0xf8] sm:$0xff] %vm842_vm6, %v809_v62  ;;  %v4072_v62 = vld [vmem:[#allocation13_spill] sm:$0xff] }
 0x161   : > { %v878_v29 = vpop.permute.xlu1 %877 }
 0x162   : > { %974 = vst.msk [vmem:[#allocation3] sm:$0xff] %vm973_vm7, %v878_v29 }
 0x164   : > { %1028 = vrot.lane.b32.xlu2 %v4071_v5, %s2260_s24 }
 0x165   : > { %1036 = vrot.lane.b32.xlu0 %v4070_v1, %s2260_s24 }
 0x166   : > { %v892_v63 = vpop.permute.xlu2 %891 }
 0x167   : > { %v882_v49 = vpop.permute.xlu0 %881  ;;  %1038 = vrot.lane.b32.xlu1 %v4072_v62, %s2260_s24  ;;  %981 = vst.msk [vmem:[#allocation3 + $0x38] sm:$0xff] %vm973_vm7, %v892_v63 }
 0x168   : > { %976 = vst.msk [vmem:[#allocation3 + $0x10] sm:$0xff] %vm973_vm7, %v882_v49  ;;  %v4075_v49 = vld [vmem:[#allocation16_spill] sm:$0xff] }
 0x169   : > { %v884_v22 = vpop.permute.xlu1 %883 }
 0x16a   : > { %977 = vst.msk [vmem:[#allocation3 + $0x18] sm:$0xff] %vm973_vm7, %v884_v22  ;;  %v4076_v22 = vld [vmem:[#allocation29_spill] sm:$0xff] }
 0x16c   : > { %1034 = vrot.lane.b32.xlu2 %v4074_v43, %s2260_s24 }
 0x16d   : > { %1042 = vrot.lane.b32.xlu0 %v4073_v18, %s2260_s24  ;;  %v4089_v18 = vld [vmem:[#allocation33_spill] sm:$0xff] }
 0x16e   : > { %v898_v28 = vpop.permute.xlu2 %897 }
 0x16f   : > { %v888_v29 = vpop.permute.xlu0 %887  ;;  %1044 = vrot.lane.b32.xlu1 %v4075_v49, %s2260_s24  ;;  %984 = vst.msk [vmem:[#allocation3 + $0x50] sm:$0xff] %vm973_vm7, %v898_v28 }
 0x170   : > { %979 = vst.msk [vmem:[#allocation3 + $0x28] sm:$0xff] %vm973_vm7, %v888_v29  ;;  %v4078_v29 = vld [vmem:[#allocation22_spill] sm:$0xff] }
 0x171   : > { %v890_v24 = vpop.permute.xlu1 %889 }
 0x172   : > { %980 = vst.msk [vmem:[#allocation3 + $0x30] sm:$0xff] %vm973_vm7, %v890_v24  ;;  %v4079_v24 = vld [vmem:[#allocation32_spill] sm:$0xff] }
 0x174   : > { %1040 = vrot.lane.b32.xlu2 %v4077_v10, %s2260_s24 }
 0x175   : > { %1048 = vrot.lane.b32.xlu0 %v4076_v22, %s2260_s24 }
 0x176   : > { %v904_v46 = vpop.permute.xlu2 %903 }
 0x177   : > { %v894_v63 = vpop.permute.xlu0 %893  ;;  %1050 = vrot.lane.b32.xlu1 %v4078_v29, %s2260_s24  ;;  %987 = vst.msk [vmem:[#allocation3 + $0x68] sm:$0xff] %vm973_vm7, %v904_v46 }
 0x178   : > { %982 = vst.msk [vmem:[#allocation3 + $0x40] sm:$0xff] %vm973_vm7, %v894_v63  ;;  %v4081_v63 = vld [vmem:[#allocation28_spill] sm:$0xff] }
 0x179   : > { %v896_v49 = vpop.permute.xlu1 %895 }
 0x17a   : > { %983 = vst.msk [vmem:[#allocation3 + $0x48] sm:$0xff] %vm973_vm7, %v896_v49  ;;  %v4082_v49 = vld [vmem:[#allocation25_spill] sm:$0xff] }
 0x17c   : > { %1046 = vrot.lane.b32.xlu2 %v4080_v40, %s2260_s24 }
 0x17d   : > { %1054 = vrot.lane.b32.xlu0 %v4079_v24, %s2260_s24 }
 0x17e   : > { %v910_v37 = vpop.permute.xlu2 %909 }
 0x17f   : > { %v900_v28 = vpop.permute.xlu0 %899  ;;  %1056 = vrot.lane.b32.xlu1 %v4081_v63, %s2260_s24  ;;  %990 = vst.msk [vmem:[#allocation3 + $0x80] sm:$0xff] %vm973_vm7, %v910_v37  ;;  %v1008_v37 = vrot.slane %v3109_v44, 1 }
 0x180   : > { %985 = vst.msk [vmem:[#allocation3 + $0x58] sm:$0xff] %vm973_vm7, %v900_v28  ;;  %v4083_v28 = vld [vmem:[#allocation31_spill] sm:$0xff] }
 0x181   : > { %v902_v26 = vpop.permute.xlu1 %901 }
 0x182   : > { %986 = vst.msk [vmem:[#allocation3 + $0x60] sm:$0xff] %vm973_vm7, %v902_v26  ;;  %v1007_v26 = vrot.slane %v3092_v52, 1 }
 0x184   : > { %1052 = vrot.lane.b32.xlu2 %v4082_v49, %s2260_s24 }
 0x185   : > { %1060 = vrot.lane.b32.xlu0 %v2759_v50, %s2260_s24 }
 0x186   : > { %v916_v40 = vpop.permute.xlu2 %915 }
 0x187   : > { %v906_v46 = vpop.permute.xlu0 %905  ;;  %1062 = vrot.lane.b32.xlu1 %v4083_v28, %s2260_s24  ;;  %993 = vst.msk [vmem:[#allocation3 + $0x98] sm:$0xff] %vm973_vm7, %v916_v40  ;;  %v4086_v40 = vld [vmem:[#allocation34_spill] sm:$0xff] }
 0x188   : > { %988 = vst.msk [vmem:[#allocation3 + $0x70] sm:$0xff] %vm973_vm7, %v906_v46  ;;  %v3191_v46 = vld [vmem:[#allocation2 + $0x190] sm:$0x3] }
 0x189   : > { %v908_v63 = vpop.permute.xlu1 %907  ;;  %4085 = vst [vmem:[#allocation9_spill] sm:$0xff] %v3191_v46  ;;  %v1010_v52 = vrot.slane %v3191_v46, 1 }
 0x18a   : > { %989 = vst.msk [vmem:[#allocation3 + $0x78] sm:$0xff] %vm973_vm7, %v908_v63  ;;  %v3196_v63 = vsel %vm455_vm2, %v1007_v26, %v1008_v37 }
 0x18b   : > { %4087 = vst [vmem:[#allocation4_spill] sm:$0xff] %v3196_v63 }
 0x18c   : > { %1058 = vrot.lane.b32.xlu2 %v4084_v4, %s2260_s24  ;;  %v3204_v4 = vsel %vm455_vm2, %v1008_v37, %v1010_v52 }
 0x18d   : > { %1066 = vrot.lane.b32.xlu0 %v2780_v7, %s2260_s24  ;;  %4088 = vst [vmem:[#allocation6_spill] sm:$0xff] %v3204_v4 }
 0x18e   : > { %v922_v28 = vpop.permute.xlu2 %921 }
 0x18f   : > { %v912_v50 = vpop.permute.xlu0 %911  ;;  %1068 = vrot.lane.b32.xlu1 %v4086_v40, %s2260_s24  ;;  %996 = vst.msk [vmem:[#allocation3 + $0xb0] sm:$0xff] %vm973_vm7, %v922_v28 }
 0x190   : > { %991 = vst.msk [vmem:[#allocation3 + $0x88] sm:$0xff] %vm973_vm7, %v912_v50 }
 0x191   : > { %v914_v44 = vpop.permute.xlu1 %913 }
 0x192   : > { %992 = vst.msk [vmem:[#allocation3 + $0x90] sm:$0xff] %vm973_vm7, %v914_v44  ;;  %v4090_v44 = vld [vmem:[#allocation36_spill] sm:$0xff] }
 0x194   : > { %1064 = vrot.lane.b32.xlu2 %v4089_v18, %s2260_s24 }
 0x195   : > { %1072 = vrot.lane.b32.xlu0 %v3196_v63, %s2260_s24  ;;  %v4094_v63 = vld [vmem:[#allocation41_spill] sm:$0xff] }
 0x196   : > { %v928_v26 = vpop.permute.xlu2 %927 }
 0x197   : > { %v918_v50 = vpop.permute.xlu0 %917  ;;  %1074 = vrot.lane.b32.xlu1 %v3204_v4, %s2260_s24  ;;  %999 = vst.msk [vmem:[#allocation3 + $0xc8] sm:$0xff] %vm973_vm7, %v928_v26 }
 0x198   : > { %994 = vst.msk [vmem:[#allocation3 + $0xa0] sm:$0xff] %vm973_vm7, %v918_v50 }
 0x199   : > { %v920_v28 = vpop.permute.xlu1 %919 }
 0x19a   : > { %995 = vst.msk [vmem:[#allocation3 + $0xa8] sm:$0xff] %vm973_vm7, %v920_v28  ;;  %v4091_v28 = vld [vmem:[#allocation38_spill] sm:$0xff] }
 0x19c   : > { %1070 = vrot.lane.b32.xlu2 %v4090_v44, %s2260_s24 }
 0x19d   : > { %1148 = vrot.lane.b32.xlu0 %v2815_v47, %s2261_s25 }
 0x19e   : > { %v934_v37 = vpop.permute.xlu2 %933 }
 0x19f   : > { %v924_v52 = vpop.permute.xlu0 %923  ;;  %1150 = vrot.lane.b32.xlu1 %v2794_v12, %s2261_s25  ;;  %1002 = vst.msk [vmem:[#allocation3 + $0xe0] sm:$0xff] %vm973_vm7, %v934_v37 }
 0x1a0   : > { %997 = vst.msk [vmem:[#allocation3 + $0xb8] sm:$0xff] %vm973_vm7, %v924_v52 }
 0x1a1   : > { %v926_v50 = vpop.permute.xlu1 %925 }
 0x1a2   : > { %998 = vst.msk [vmem:[#allocation3 + $0xc0] sm:$0xff] %vm973_vm7, %v926_v50  ;;  %v4092_v50 = vld [vmem:[#allocation37_spill] sm:$0xff] }
 0x1a4   : > { %1146 = vrot.lane.b32.xlu2 %v2786_v53, %s2261_s25 }
 0x1a5   : > { %1154 = vrot.lane.b32.xlu0 %v2835_v2, %s2261_s25 }
 0x1a6   : > { %v940_v47 = vpop.permute.xlu2 %939 }
 0x1a7   : > { %v930_v26 = vpop.permute.xlu0 %929  ;;  %1156 = vrot.lane.b32.xlu1 %v4091_v28, %s2261_s25  ;;  %1005 = vst.msk [vmem:[#allocation3 + $0xf8] sm:$0xff] %vm973_vm7, %v940_v47 }
 0x1a8   : > { %1000 = vst.msk [vmem:[#allocation3 + $0xd0] sm:$0xff] %vm973_vm7, %v930_v26 }
 0x1a9   : > { %v932_v52 = vpop.permute.xlu1 %931 }
 0x1aa   : > { %1001 = vst.msk [vmem:[#allocation3 + $0xd8] sm:$0xff] %vm973_vm7, %v932_v52  ;;  %v4093_v52 = vld [vmem:[#allocation39_spill] sm:$0xff] }
 0x1ac   : > { %1152 = vrot.lane.b32.xlu2 %v4092_v50, %s2261_s25 }
 0x1ad   : > { %1160 = vrot.lane.b32.xlu0 %v2856_v36, %s2261_s25 }
 0x1ae   : > { %v1017_v53 = vpop.permute.xlu2 %1016 }
 0x1af   : > { %v936_v37 = vpop.permute.xlu0 %935  ;;  %1162 = vrot.lane.b32.xlu1 %v2830_v19, %s2261_s25  ;;  %1111 = vst.msk [vmem:[#allocation3 + $0x10] sm:$0xff] %vm1108_vm8, %v1017_v53 }
 0x1b0   : > { %1003 = vst.msk [vmem:[#allocation3 + $0xe8] sm:$0xff] %vm973_vm7, %v936_v37 }
 0x1b1   : > { %v938_v26 = vpop.permute.xlu1 %937 }
 0x1b2   : > { %1004 = vst.msk [vmem:[#allocation3 + $0xf0] sm:$0xff] %vm973_vm7, %v938_v26  ;;  %v4095_v26 = vld [vmem:[#allocation40_spill] sm:$0xff] }
 0x1b4   : > { %1158 = vrot.lane.b32.xlu2 %v4093_v52, %s2261_s25 }
 0x1b5   : > { %1166 = vrot.lane.b32.xlu0 %v2878_v21, %s2261_s25 }
 0x1b6   : > { %v1023_v37 = vpop.permute.xlu2 %1022 }
 0x1b7   : > { %v1013_v47 = vpop.permute.xlu0 %1012  ;;  %1168 = vrot.lane.b32.xlu1 %v4094_v63, %s2261_s25  ;;  %1114 = vst.msk [vmem:[#allocation3 + $0x28] sm:$0xff] %vm1108_vm8, %v1023_v37  ;;  %v4096_v37 = vld [vmem:[#allocation42_spill] sm:$0xff] }
 0x1b8   : > { %1109 = vst.msk [vmem:[#allocation3] sm:$0xff] %vm1108_vm8, %v1013_v47 }
 0x1b9   : > { %v1015_v46 = vpop.permute.xlu1 %1014 }
 0x1ba   : > { %1110 = vst.msk [vmem:[#allocation3 + $0x8] sm:$0xff] %vm1108_vm8, %v1015_v46 }
 0x1bc   : > { %1164 = vrot.lane.b32.xlu2 %v4095_v26, %s2261_s25 }
 0x1bd   : > { %1172 = vrot.lane.b32.xlu0 %v2901_v32, %s2261_s25 }
 0x1be   : > { %v1029_v4 = vpop.permute.xlu2 %1028 }
 0x1bf   : > { %v1019_v53 = vpop.permute.xlu0 %1018  ;;  %1174 = vrot.lane.b32.xlu1 %v2873_v16, %s2261_s25  ;;  %1117 = vst.msk [vmem:[#allocation3 + $0x40] sm:$0xff] %vm1108_vm8, %v1029_v4 }
 0x1c0   : > { %1112 = vst.msk [vmem:[#allocation3 + $0x18] sm:$0xff] %vm1108_vm8, %v1019_v53  ;;  %v4097_v53 = vld [vmem:[#allocation44_spill] sm:$0xff] }
 0x1c1   : > { %v1021_v47 = vpop.permute.xlu1 %1020 }
 0x1c2   : > { %1113 = vst.msk [vmem:[#allocation3 + $0x20] sm:$0xff] %vm1108_vm8, %v1021_v47  ;;  %v4098_v47 = vld [vmem:[#allocation43_spill] sm:$0xff] }
 0x1c4   : > { %1170 = vrot.lane.b32.xlu2 %v4096_v37, %s2261_s25 }
 0x1c5   : > { %1178 = vrot.lane.b32.xlu0 %v2923_v38, %s2261_s25 }
 0x1c6   : > { %v1035_v44 = vpop.permute.xlu2 %1034 }
 0x1c7   : > { %v1025_v46 = vpop.permute.xlu0 %1024  ;;  %1180 = vrot.lane.b32.xlu1 %v4097_v53, %s2261_s25  ;;  %1120 = vst.msk [vmem:[#allocation3 + $0x58] sm:$0xff] %vm1108_vm8, %v1035_v44  ;;  %v4099_v44 = vld [vmem:[#allocation45_spill] sm:$0xff] }
 0x1c8   : > { %1115 = vst.msk [vmem:[#allocation3 + $0x30] sm:$0xff] %vm1108_vm8, %v1025_v46 }
 0x1c9   : > { %v1027_v40 = vpop.permute.xlu1 %1026 }
 0x1ca   : > { %1116 = vst.msk [vmem:[#allocation3 + $0x38] sm:$0xff] %vm1108_vm8, %v1027_v40 }
 0x1cc   : > { %1176 = vrot.lane.b32.xlu2 %v4098_v47, %s2261_s25 }
 0x1cd   : > { %1184 = vrot.lane.b32.xlu0 %v2946_v61, %s2261_s25 }
 0x1ce   : > { %v1041_v38 = vpop.permute.xlu2 %1040 }
 0x1cf   : > { %v1031_v4 = vpop.permute.xlu0 %1030  ;;  %1186 = vrot.lane.b32.xlu1 %v2918_v54, %s2261_s25  ;;  %1123 = vst.msk [vmem:[#allocation3 + $0x70] sm:$0xff] %vm1108_vm8, %v1041_v38 }
 0x1d0   : > { %1118 = vst.msk [vmem:[#allocation3 + $0x48] sm:$0xff] %vm1108_vm8, %v1031_v4  ;;  %v4100_v4 = vld [vmem:[#allocation48_spill] sm:$0xff] }
 0x1d1   : > { %v1033_v46 = vpop.permute.xlu1 %1032 }
 0x1d2   : > { %1119 = vst.msk [vmem:[#allocation3 + $0x50] sm:$0xff] %vm1108_vm8, %v1033_v46  ;;  %v4101_v46 = vld [vmem:[#allocation47_spill] sm:$0xff] }
 0x1d4   : > { %1182 = vrot.lane.b32.xlu2 %v4099_v44, %s2261_s25 }
 0x1d5   : > { %1190 = vrot.lane.b32.xlu0 %v2968_v13, %s2261_s25 }
 0x1d6   : > { %v1047_v53 = vpop.permute.xlu2 %1046 }
 0x1d7   : > { %v1037_v40 = vpop.permute.xlu0 %1036  ;;  %1192 = vrot.lane.b32.xlu1 %v4100_v4, %s2261_s25  ;;  %1126 = vst.msk [vmem:[#allocation3 + $0x88] sm:$0xff] %vm1108_vm8, %v1047_v53 }
 0x1d8   : > { %1121 = vst.msk [vmem:[#allocation3 + $0x60] sm:$0xff] %vm1108_vm8, %v1037_v40 }
 0x1d9   : > { %v1039_v47 = vpop.permute.xlu1 %1038 }
 0x1da   : > { %1122 = vst.msk [vmem:[#allocation3 + $0x68] sm:$0xff] %vm1108_vm8, %v1039_v47  ;;  %v4102_v47 = vld [vmem:[#allocation49_spill] sm:$0xff] }
 0x1dc   : > { %1188 = vrot.lane.b32.xlu2 %v4101_v46, %s2261_s25 }
 0x1dd   : > { %1196 = vrot.lane.b32.xlu0 %v2989_v56, %s2261_s25 }
 0x1de   : > { %v1053_v13 = vpop.permute.xlu2 %1052 }
 0x1df   : > { %v1043_v38 = vpop.permute.xlu0 %1042  ;;  %1198 = vrot.lane.b32.xlu1 %v2963_v27, %s2261_s25  ;;  %1129 = vst.msk [vmem:[#allocation3 + $0xa0] sm:$0xff] %vm1108_vm8, %v1053_v13 }
 0x1e0   : > { %1124 = vst.msk [vmem:[#allocation3 + $0x78] sm:$0xff] %vm1108_vm8, %v1043_v38 }
 0x1e1   : > { %v1045_v40 = vpop.permute.xlu1 %1044 }
 0x1e2   : > { %1125 = vst.msk [vmem:[#allocation3 + $0x80] sm:$0xff] %vm1108_vm8, %v1045_v40 }
 0x1e4   : > { %1194 = vrot.lane.b32.xlu2 %v4102_v47, %s2261_s25 }
 0x1e5   : > { %1277 = vrot.lane.b32.xlu0 %v2437_v35, %s2262_s26 }
 0x1e6   : > { %v1059_v38 = vpop.permute.xlu2 %1058 }
 0x1e7   : > { %v1049_v53 = vpop.permute.xlu0 %1048  ;;  %1279 = vrot.lane.b32.xlu1 %v2443_v39, %s2262_s26  ;;  %1132 = vst.msk [vmem:[#allocation3 + $0xb8] sm:$0xff] %vm1108_vm8, %v1059_v38 }
 0x1e8   : > { %1127 = vst.msk [vmem:[#allocation3 + $0x90] sm:$0xff] %vm1108_vm8, %v1049_v53 }
 0x1e9   : > { %v1051_v13 = vpop.permute.xlu1 %1050 }
 0x1ea   : > { %1128 = vst.msk [vmem:[#allocation3 + $0x98] sm:$0xff] %vm1108_vm8, %v1051_v13 }
 0x1ec   : > { %1200 = vrot.lane.b32.xlu2 %v2976_v23, %s2261_s25 }
 0x1ed   : > { %1414 = vrot.lane.b32.xlu0 %v2499_v60, %s2263_s27 }
 0x1ee   : > { %v1065_v40 = vpop.permute.xlu2 %1064 }
 0x1ef   : > { %v1055_v35 = vpop.permute.xlu0 %1054  ;;  %1546 = vrot.lane.b32.xlu1 %v2794_v12, %s2264_s28  ;;  %1135 = vst.msk [vmem:[#allocation3 + $0xd0] sm:$0xff] %vm1108_vm8, %v1065_v40 }
 0x1f0   : > { %1130 = vst.msk [vmem:[#allocation3 + $0xa8] sm:$0xff] %vm1108_vm8, %v1055_v35 }
 0x1f1   : > { %v1057_v39 = vpop.permute.xlu1 %1056 }
 0x1f2   : > { %1131 = vst.msk [vmem:[#allocation3 + $0xb0] sm:$0xff] %vm1108_vm8, %v1057_v39 }
 0x1f4   : > { %1412 = vrot.lane.b32.xlu2 %v4065_v31, %s2263_s27 }
 0x1f5   : > { %1281 = vrot.lane.b32.xlu0 %v2406_v25, %s2262_s26 }
 0x1f6   : > { %v1071_v53 = vpop.permute.xlu2 %1070 }
 0x1f7   : > { %v1061_v60 = vpop.permute.xlu0 %1060  ;;  %1283 = vrot.lane.b32.xlu1 %v2419_v30, %s2262_s26  ;;  %1138 = vst.msk [vmem:[#allocation3 + $0xe8] sm:$0xff] %vm1108_vm8, %v1071_v53 }
 0x1f8   : > { %1133 = vst.msk [vmem:[#allocation3 + $0xc0] sm:$0xff] %vm1108_vm8, %v1061_v60 }
 0x1f9   : > { %v1063_v12 = vpop.permute.xlu1 %1062 }
 0x1fa   : > { %1134 = vst.msk [vmem:[#allocation3 + $0xc8] sm:$0xff] %vm1108_vm8, %v1063_v12 }
 0x1fc   : > { %1548 = vrot.lane.b32.xlu2 %v4092_v50, %s2264_s28 }
 0x1fd   : > { %1295 = vrot.lane.b32.xlu0 %v2496_v59, %s2262_s26 }
 0x1fe   : > { %v1147_v25 = vpop.permute.xlu2 %1146 }
 0x1ff   : > { %v1067_v38 = vpop.permute.xlu0 %1066  ;;  %1416 = vrot.lane.b32.xlu1 %v2433_v34, %s2263_s27  ;;  %1243 = vst.msk [vmem:[#allocation3] sm:$0xff] %vm1242_vm9, %v1147_v25  ;;  %v4103_v25 = vld [vmem:[#allocation23_spill] sm:$0xff] }
 0x200   : > { %1136 = vst.msk [vmem:[#allocation3 + $0xd8] sm:$0xff] %vm1108_vm8, %v1067_v38 }
 0x201   : > { %v1069_v30 = vpop.permute.xlu1 %1068 }
 0x202   : > { %1137 = vst.msk [vmem:[#allocation3 + $0xe0] sm:$0xff] %vm1108_vm8, %v1069_v30 }
 0x204   : > { %1293 = vrot.lane.b32.xlu2 %v2476_v51, %s2262_s26 }
 0x205   : > { %1428 = vrot.lane.b32.xlu0 %v4069_v3, %s2263_s27 }
 0x206   : > { %v1153_v31 = vpop.permute.xlu2 %1152 }
 0x207   : > { %v1073_v59 = vpop.permute.xlu0 %1072  ;;  %1430 = vrot.lane.b32.xlu1 %v4074_v43, %s2263_s27  ;;  %1246 = vst.msk [vmem:[#allocation3 + $0x18] sm:$0xff] %vm1242_vm9, %v1153_v31  ;;  %v4105_v31 = vld [vmem:[#allocation17_spill] sm:$0xff] }
 0x208   : > { %1139 = vst.msk [vmem:[#allocation3 + $0xf0] sm:$0xff] %vm1108_vm8, %v1073_v59 }
 0x209   : > { %v1075_v34 = vpop.permute.xlu1 %1074 }
 0x20a   : > { %1140 = vst.msk [vmem:[#allocation3 + $0xf8] sm:$0xff] %vm1108_vm8, %v1075_v34 }
 0x20c   : > { %1418 = vrot.lane.b32.xlu2 %v4068_v15, %s2263_s27 }
 0x20d   : > { %1552 = vrot.lane.b32.xlu0 %v4091_v28, %s2264_s28 }
 0x20e   : > { %v1159_v51 = vpop.permute.xlu2 %1158 }
 0x20f   : > { %v1149_v50 = vpop.permute.xlu0 %1148  ;;  %1562 = vrot.lane.b32.xlu1 %v2878_v21, %s2264_s28  ;;  %1249 = vst.msk [vmem:[#allocation3 + $0x30] sm:$0xff] %vm1242_vm9, %v1159_v51 }
 0x210   : > { %1244 = vst.msk [vmem:[#allocation3 + $0x8] sm:$0xff] %vm1242_vm9, %v1149_v50 }
 0x211   : > { %v1151_v43 = vpop.permute.xlu1 %1150 }
 0x212   : > { %1245 = vst.msk [vmem:[#allocation3 + $0x10] sm:$0xff] %vm1242_vm9, %v1151_v43 }
 0x214   : > { %1550 = vrot.lane.b32.xlu2 %v2835_v2, %s2264_s28 }
 0x215   : > { %1309 = vrot.lane.b32.xlu0 %v2607_v57, %s2262_s26 }
 0x216   : > { %v1165_v15 = vpop.permute.xlu2 %1164 }
 0x217   : > { %v1155_v3 = vpop.permute.xlu0 %1154  ;;  %1311 = vrot.lane.b32.xlu1 %v2581_v41, %s2262_s26  ;;  %1252 = vst.msk [vmem:[#allocation3 + $0x48] sm:$0xff] %vm1242_vm9, %v1165_v15 }
 0x218   : > { %1247 = vst.msk [vmem:[#allocation3 + $0x20] sm:$0xff] %vm1242_vm9, %v1155_v3 }
 0x219   : > { %v1157_v21 = vpop.permute.xlu1 %1156 }
 0x21a   : > { %1248 = vst.msk [vmem:[#allocation3 + $0x28] sm:$0xff] %vm1242_vm9, %v1157_v21 }
 0x21c   : > { %1564 = vrot.lane.b32.xlu2 %v4094_v63, %s2264_s28 }
 0x21d   : > { %1446 = vrot.lane.b32.xlu0 %v4078_v29, %s2263_s27 }
 0x21e   : > { %v1171_v57 = vpop.permute.xlu2 %1170 }
 0x21f   : > { %v1161_v28 = vpop.permute.xlu0 %1160  ;;  %1578 = vrot.lane.b32.xlu1 %v4099_v44, %s2264_s28  ;;  %1255 = vst.msk [vmem:[#allocation3 + $0x60] sm:$0xff] %vm1242_vm9, %v1171_v57 }
 0x220   : > { %1250 = vst.msk [vmem:[#allocation3 + $0x38] sm:$0xff] %vm1242_vm9, %v1161_v28  ;;  %v4107_v28 = vld [vmem:[#allocation27_spill] sm:$0xff] }
 0x221   : > { %v1163_v41 = vpop.permute.xlu1 %1162 }
 0x222   : > { %1251 = vst.msk [vmem:[#allocation3 + $0x40] sm:$0xff] %vm1242_vm9, %v1163_v41  ;;  %v4108_v41 = vld [vmem:[#allocation43_spill] sm:$0xff] }
 0x224   : > { %1444 = vrot.lane.b32.xlu2 %v4076_v22, %s2263_s27 }
 0x225   : > { %1285 = vrot.lane.b32.xlu0 %v2489_v55, %s2262_s26 }
 0x226   : > { %v1177_v29 = vpop.permute.xlu2 %1176 }
 0x227   : > { %v1167_v2 = vpop.permute.xlu0 %1166  ;;  %1287 = vrot.lane.b32.xlu1 %v2427_v33, %s2262_s26  ;;  %1258 = vst.msk [vmem:[#allocation3 + $0x78] sm:$0xff] %vm1242_vm9, %v1177_v29  ;;  %v4109_v29 = vld [vmem:[#allocation28_spill] sm:$0xff] }
 0x228   : > { %1253 = vst.msk [vmem:[#allocation3 + $0x50] sm:$0xff] %vm1242_vm9, %v1167_v2 }
 0x229   : > { %v1169_v63 = vpop.permute.xlu1 %1168 }
 0x22a   : > { %1254 = vst.msk [vmem:[#allocation3 + $0x58] sm:$0xff] %vm1242_vm9, %v1169_v63 }
 0x22c   : > { %1580 = vrot.lane.b32.xlu2 %v2946_v61, %s2264_s28 }
 0x22d   : > { %1299 = vrot.lane.b32.xlu0 %v2523_v8, %s2262_s26 }
 0x22e   : > { %v1183_v55 = vpop.permute.xlu2 %1182 }
 0x22f   : > { %v1173_v44 = vpop.permute.xlu0 %1172  ;;  %1420 = vrot.lane.b32.xlu1 %v4064_v9, %s2263_s27  ;;  %1261 = vst.msk [vmem:[#allocation3 + $0x90] sm:$0xff] %vm1242_vm9, %v1183_v55  ;;  %v1727_v9 = vld [vmem:[%s3915_s1 + $0x10] sm:$0x3] }
 0x230   : > { %1256 = vst.msk [vmem:[#allocation3 + $0x68] sm:$0xff] %vm1242_vm9, %v1173_v44  ;;  %v4110_v44 = vld [vmem:[#allocation34_spill] sm:$0xff] }
 0x231   : > { %v1175_v33 = vpop.permute.xlu1 %1174 }
 0x232   : > { %1257 = vst.msk [vmem:[#allocation3 + $0x70] sm:$0xff] %vm1242_vm9, %v1175_v33  ;;  %v4111_v33 = vld [vmem:[#allocation26_spill] sm:$0xff] }
 0x234   : > { %1297 = vrot.lane.b32.xlu2 %v2544_v17, %s2262_s26  ;;  %v1741_v17 = vunpack.c.l.b16 %v1727_v9 }
 0x235   : > { %1432 = vrot.lane.b32.xlu0 %v4070_v1, %s2263_s27 }
 0x236   : > { %v1189_v8 = vpop.permute.xlu2 %1188  ;;  %v1744_v13 = vpack.c.b16 %v1741_v17, %v1741_v17 }
 0x237   : > { %v1179_v22 = vpop.permute.xlu0 %1178  ;;  %1434 = vrot.lane.b32.xlu1 %v4072_v62, %s2263_s27  ;;  %1264 = vst.msk [vmem:[#allocation3 + $0xa8] sm:$0xff] %vm1242_vm9, %v1189_v8  ;;  %v4112_v8 = vld [vmem:[#allocation36_spill] sm:$0xff] }
 0x238   : > { %1259 = vst.msk [vmem:[#allocation3 + $0x80] sm:$0xff] %vm1242_vm9, %v1179_v22 }
 0x239   : > { %v1181_v61 = vpop.permute.xlu1 %1180 }
 0x23a   : > { %1260 = vst.msk [vmem:[#allocation3 + $0x88] sm:$0xff] %vm1242_vm9, %v1181_v61 }
 0x23c   : > { %1422 = vrot.lane.b32.xlu2 %v4066_v11, %s2263_s27  ;;  %v2220_v11 = vld [vmem:[%s3915_s1 + $0x8] sm:$0xff] }
 0x23d   : > { %1556 = vrot.lane.b32.xlu0 %v2856_v36, %s2264_s28  ;;  %v1798_v36 = vsel %vm1796_vm10, %v1744_v13, 0  ;;  %v4113_v13 = vld [vmem:[#allocation30_spill] sm:$0xff] }
 0x23e   : > { %v1195_v62 = vpop.permute.xlu2 %1194  ;;  %1805 = vmatpush.bf16.msra.mxu0 %v1798_v36  ;;  %2221 = vmatpush.bf16.msra.mxu1 %v1798_v36 }
 0x23f   : > { %v1185_v1 = vpop.permute.xlu0 %1184  ;;  %1566 = vrot.lane.b32.xlu1 %v4096_v37, %s2264_s28  ;;  %1267 = vst.msk [vmem:[#allocation3 + $0xc0] sm:$0xff] %vm1242_vm9, %v1195_v62  ;;  %2222 = vmatpush.bf16.msra.mxu2 %v1798_v36 }
 0x240   : > { %1262 = vst.msk [vmem:[#allocation3 + $0x98] sm:$0xff] %vm1242_vm9, %v1185_v1  ;;  %2223 = vmatpush.bf16.msra.mxu3 %v1798_v36 }
 0x241   : > { %v1187_v35 = vpop.permute.xlu1 %1186 }
 0x242   : > { %1263 = vst.msk [vmem:[#allocation3 + $0xa0] sm:$0xff] %vm1242_vm9, %v1187_v35  ;;  %1806 = vmatpush.bf16.msra.mxu0 %v2220_v11  ;;  %2224 = vmatpush.bf16.msra.mxu1 %v2220_v11  ;;  %v4114_v35 = vld [vmem:[#allocation52_spill] sm:$0xff] }
 0x243   : > { %2225 = vmatpush.bf16.msra.mxu2 %v2220_v11 }
 0x244   : > { %1554 = vrot.lane.b32.xlu2 %v4093_v52, %s2264_s28  ;;  %2226 = vmatpush.bf16.msra.mxu3 %v2220_v11 }
 0x245   : > { %1313 = vrot.lane.b32.xlu0 %v2612_v0, %s2262_s26  ;;  %v2219_v0 = vld [vmem:[%s3915_s1] sm:$0xff] }
 0x246   : > { %v1201_v37 = vpop.permute.xlu2 %1200  ;;  %1807 = vmatpush.bf16.msra.mxu0 %v2219_v0  ;;  %2227 = vmatpush.bf16.msra.mxu1 %v2219_v0 }
 0x247   : > { %v1191_v40 = vpop.permute.xlu0 %1190  ;;  %1315 = vrot.lane.b32.xlu1 %v2617_v6, %s2262_s26  ;;  %1270 = vst.msk [vmem:[#allocation3 + $0xd8] sm:$0xff] %vm1242_vm9, %v1201_v37  ;;  %2228 = vmatpush.bf16.msra.mxu2 %v2219_v0  ;;  %v4116_v37 = vld [vmem:[#allocation50_spill] sm:$0xff] }
 0x248   : > { %1265 = vst.msk [vmem:[#allocation3 + $0xb0] sm:$0xff] %vm1242_vm9, %v1191_v40  ;;  %2229 = vmatpush.bf16.msra.mxu3 %v2219_v0 }
 0x249   : > { %v1193_v39 = vpop.permute.xlu1 %1192 }
 0x24a   : > { %1266 = vst.msk [vmem:[#allocation3 + $0xb8] sm:$0xff] %vm1242_vm9, %v1193_v39  ;;  %v4117_v39 = vld [vmem:[#allocation12_spill] sm:$0xff] }
 0x24c   : > { %1568 = vrot.lane.b32.xlu2 %v2901_v32, %s2264_s28 }
 0x24d   : > { %1327 = vrot.lane.b32.xlu0 %v2681_v45, %s2262_s26 }
 0x24e   : > { %v1413_v6 = vpop.permute.xlu2 %1412 }
 0x24f   : > { %v1197_v52 = vpop.permute.xlu0 %1196  ;;  %1448 = vrot.lane.b32.xlu1 %v4082_v49, %s2263_s27 }
 0x250   : > { %1268 = vst.msk [vmem:[#allocation3 + $0xc8] sm:$0xff] %vm1242_vm9, %v1197_v52 }
 0x251   : > { %v1199_v60 = vpop.permute.xlu1 %1198 }
 0x252   : > { %1269 = vst.msk [vmem:[#allocation3 + $0xd0] sm:$0xff] %vm1242_vm9, %v1199_v60 }
 0x254   : > { %1325 = vrot.lane.b32.xlu2 %v2670_v58, %s2262_s26 }
 0x255   : > { %1460 = vrot.lane.b32.xlu0 %v4089_v18, %s2263_s27 }
 0x256   : > { %v1549_v32 = vpop.permute.xlu2 %1548 }
 0x257   : > { %v1278_v45 = vpop.permute.xlu0 %1277  ;;  %1462 = vrot.lane.b32.xlu1 %v2780_v7, %s2263_s27 }
 0x258   : > { %1374 = vst.msk [vmem:[#allocation3] sm:$0xff] %vm1373_vm11, %v1278_v45  ;;  %v4119_v45 = vld [vmem:[#allocation51_spill] sm:$0xff] }
 0x259   : > { %1509 = vst.msk [vmem:[#allocation3] sm:$0xff] %vm1508_vm12, %v1413_v6  ;;  %v1280_v49 = vpop.permute.xlu1 %1279  ;;  %v4118_v6 = vld [vmem:[#allocation21_spill] sm:$0xff] }
 0x25a   : > { %1375 = vst.msk [vmem:[#allocation3 + $0x8] sm:$0xff] %vm1373_vm11, %v1280_v49  ;;  %v4120_v49 = vld [vmem:[#allocation46_spill] sm:$0xff] }
 0x25c   : > { %1450 = vrot.lane.b32.xlu2 %v4079_v24, %s2263_s27 }
 0x25d   : > { %1584 = vrot.lane.b32.xlu0 %v4101_v46, %s2264_s28 }
 0x25e   : > { %v1294_v58 = vpop.permute.xlu2 %1293 }
 0x25f   : > { %v1415_v18 = vpop.permute.xlu0 %1414  ;;  %1594 = vrot.lane.b32.xlu1 %v2963_v27, %s2264_s28  ;;  %1382 = vst.msk [vmem:[#allocation3 + $0x40] sm:$0xff] %vm1373_vm11, %v1294_v58 }
 0x260   : > { %1510 = vst.msk [vmem:[#allocation3 + $0x8] sm:$0xff] %vm1508_vm12, %v1415_v18 }
 0x261   : > { %1644 = vst.msk [vmem:[#allocation3 + $0x8] sm:$0xff] %vm1642_vm13, %v1549_v32  ;;  %v1547_v7 = vpop.permute.xlu1 %1546 }
 0x262   : > { %1643 = vst.msk [vmem:[#allocation3] sm:$0xff] %vm1642_vm13, %v1547_v7 }
 0x264   : > { %1582 = vrot.lane.b32.xlu2 %v2918_v54, %s2264_s28 }
 0x265   : > { %1289 = vrot.lane.b32.xlu0 %v2453_v42, %s2262_s26 }
 0x266   : > { %v1419_v24 = vpop.permute.xlu2 %1418 }
 0x267   : > { %v1282_v46 = vpop.permute.xlu0 %1281  ;;  %1291 = vrot.lane.b32.xlu1 %v2464_v48, %s2262_s26 }
 0x268   : > { %1376 = vst.msk [vmem:[#allocation3 + $0x10] sm:$0xff] %vm1373_vm11, %v1282_v46  ;;  %v1676_v53 = vld [vmem:[#allocation3 + $0x8] sm:$0xff] }
 0x269   : > { %v1284_v27 = vpop.permute.xlu1 %1283  ;;  %v1675_v12 = vld [vmem:[#allocation3] sm:$0xff] }
 0x26a   : > { %1377 = vst.msk [vmem:[#allocation3 + $0x18] sm:$0xff] %vm1373_vm11, %v1284_v27  ;;  %v1707_v42 = vpack.c.bf16 %v1676_v53, %v1675_v12 }
 0x26b   : > { %1512 = vst.msk [vmem:[#allocation3 + $0x18] sm:$0xff] %vm1508_vm12, %v1419_v24  ;;  %v4121_v24 = vld [vmem:[#allocation16_spill] sm:$0xff] }
 0x26c   : > { %2199 = vmatmul.msk.bf16.vlgmr.msra.gmra.mxu0 %vm1747_vm14, %v1707_v42  ;;  %1596 = vrot.lane.b32.xlu2 %v2976_v23, %s2264_s28 }
 0x26d   : > { %1303 = vrot.lane.b32.xlu0 %v2548_v20, %s2262_s26 }
 0x26e   : > { %v1551_v48 = vpop.permute.xlu2 %1550 }
 0x26f   : > { %v1296_v38 = vpop.permute.xlu0 %1295  ;;  %1424 = vrot.lane.b32.xlu1 %v4071_v5, %s2263_s27  ;;  %v4104_v5 = vld [vmem:[#allocation14_spill] sm:$0xff] }
 0x270   : > { %1383 = vst.msk [vmem:[#allocation3 + $0x48] sm:$0xff] %vm1373_vm11, %v1296_v38 }
 0x271   : > { %v1417_v54 = vpop.permute.xlu1 %1416 }
 0x272   : > { %1511 = vst.msk [vmem:[#allocation3 + $0x10] sm:$0xff] %vm1508_vm12, %v1417_v54 }
 0x273   : > { %1645 = vst.msk [vmem:[#allocation3 + $0x10] sm:$0xff] %vm1642_vm13, %v1551_v48  ;;  %v4122_v48 = vld [vmem:[#allocation20_spill] sm:$0xff] }
 0x274   : > { %1301 = vrot.lane.b32.xlu2 %v2536_v14, %s2262_s26 }
 0x275   : > { %1436 = vrot.lane.b32.xlu0 %v4077_v10, %s2263_s27 }
 0x276   : > { %v1565_v23 = vpop.permute.xlu2 %1564 }
 0x277   : > { %v1429_v20 = vpop.permute.xlu0 %1428  ;;  %1438 = vrot.lane.b32.xlu1 %v4103_v25, %s2263_s27 }
 0x278   : > { %1517 = vst.msk [vmem:[#allocation3 + $0x40] sm:$0xff] %vm1508_vm12, %v1429_v20 }
 0x279   : > { %v1431_v30 = vpop.permute.xlu1 %1430 }
 0x27a   : > { %1518 = vst.msk [vmem:[#allocation3 + $0x48] sm:$0xff] %vm1508_vm12, %v1431_v30  ;;  %v1677_v34 = vld [vmem:[#allocation3 + $0x10] sm:$0xff]  ;;  %v4124_v30 = vld [vmem:[#allocation53_spill] sm:$0xff] }
 0x27b   : > { %1652 = vst.msk [vmem:[#allocation3 + $0x48] sm:$0xff] %vm1642_vm13, %v1565_v23  ;;  %v4123_v23 = vld [vmem:[#allocation44_spill] sm:$0xff] }
 0x27c   : > { %1426 = vrot.lane.b32.xlu2 %v4104_v5, %s2263_s27  ;;  %v4125_v5 = vld [vmem:[#allocation35_spill] sm:$0xff] }
 0x27d   : > { %1560 = vrot.lane.b32.xlu0 %v4095_v26, %s2264_s28 }
 0x27e   : > { %v1445_v14 = vpop.permute.xlu2 %1444 }
 0x27f   : > { %v1553_v10 = vpop.permute.xlu0 %1552  ;;  %1570 = vrot.lane.b32.xlu1 %v2873_v16, %s2264_s28  ;;  %v4106_v16 = vld [vmem:[#allocation19_spill] sm:$0xff] }
 0x280   : > { %1646 = vst.msk [vmem:[#allocation3 + $0x18] sm:$0xff] %vm1642_vm13, %v1553_v10 }
 0x281   : > { %v1563_v59 = vpop.permute.xlu1 %1562 }
 0x282   : > { %1651 = vst.msk [vmem:[#allocation3 + $0x40] sm:$0xff] %vm1642_vm13, %v1563_v59  ;;  %v1684_v3 = vld [vmem:[#allocation3 + $0x48] sm:$0xff]  ;;  %v4126_v59 = vld [vmem:[#allocation24_spill] sm:$0xff] }
 0x284   : > { %1558 = vrot.lane.b32.xlu2 %v2830_v19, %s2264_s28 }
 0x285   : > { %1317 = vrot.lane.b32.xlu0 %v4105_v31, %s2262_s26 }
 0x286   : > { %v1581_v43 = vpop.permute.xlu2 %1580 }
 0x287   : > { %v1310_v26 = vpop.permute.xlu0 %1309  ;;  %v1678_v50 = vld [vmem:[#allocation3 + $0x18] sm:$0xff]  ;;  %1319 = vrot.lane.b32.xlu1 %v4106_v16, %s2262_s26 }
 0x288   : > { %1390 = vst.msk [vmem:[#allocation3 + $0x80] sm:$0xff] %vm1373_vm11, %v1310_v26  ;;  %v1708_v51 = vpack.c.bf16 %v1678_v50, %v1677_v34  ;;  %v4127_v34 = vld [vmem:[#allocation31_spill] sm:$0xff]  ;;  %v4128_v50 = vld [vmem:[#allocation6_spill] sm:$0xff] }
 0x289   : > { %1525 = vst.msk [vmem:[#allocation3 + $0x80] sm:$0xff] %vm1508_vm12, %v1445_v14  ;;  %v1312_v15 = vpop.permute.xlu1 %1311  ;;  %v1683_v21 = vld [vmem:[#allocation3 + $0x40] sm:$0xff] }
 0x28a   : > { %2200 = vmatmul.msk.bf16.gmra.mxu0 %vm1747_vm14, %v1708_v51  ;;  %1391 = vst.msk [vmem:[#allocation3 + $0x88] sm:$0xff] %vm1373_vm11, %v1312_v15  ;;  %v1711_v19 = vpack.c.bf16 %v1684_v3, %v1683_v21  ;;  %v1141_v51 = vrot.slane %v4124_v30, 2 }
 0x28c   : > { %2203 = vmatmul.msk.bf16.vlgmr.msra.gmra.mxu1 %vm1747_vm14, %v1711_v19  ;;  %1572 = vrot.lane.b32.xlu2 %v4108_v41, %s2264_s28 }
 0x28d   : > { %1331 = vrot.lane.b32.xlu0 %v4107_v28, %s2262_s26  ;;  %v4130_v28 = vld [vmem:[#allocation9_spill] sm:$0xff] }
 0x28e   : > { %v1298_v2 = vpop.permute.xlu2 %1297  ;;  %v1144_v19 = vrot.slane %v4130_v28, 2 }
 0x28f   : > { %v1447_v57 = vpop.permute.xlu0 %1446  ;;  %1452 = vrot.lane.b32.xlu1 %v4109_v29, %s2263_s27  ;;  %1384 = vst.msk [vmem:[#allocation3 + $0x50] sm:$0xff] %vm1373_vm11, %v1298_v2 }
 0x290   : > { %1526 = vst.msk [vmem:[#allocation3 + $0x88] sm:$0xff] %vm1508_vm12, %v1447_v57 }
 0x291   : > { %1660 = vst.msk [vmem:[#allocation3 + $0x88] sm:$0xff] %vm1642_vm13, %v1581_v43  ;;  %v1579_v63 = vpop.permute.xlu1 %1578  ;;  %v4129_v43 = vld [vmem:[#allocation54_spill] sm:$0xff] }
 0x292   : > { %1659 = vst.msk [vmem:[#allocation3 + $0x80] sm:$0xff] %vm1642_vm13, %v1579_v63  ;;  %v1142_v16 = vrot.slane %v4129_v43, 2 }
 0x294   : > { %1329 = vrot.lane.b32.xlu2 %v4111_v33, %s2262_s26  ;;  %v1143_v21 = vsel %vm665_vm5, %v1141_v51, %v1142_v16  ;;  %v1145_v29 = vsel %vm665_vm5, %v1142_v16, %v1144_v19 }
 0x295   : > { %1464 = vrot.lane.b32.xlu0 %v4110_v44, %s2263_s27  ;;  %v4131_v44 = vld [vmem:[#allocation4_spill] sm:$0xff] }
 0x296   : > { %v1423_v22 = vpop.permute.xlu2 %1422 }
 0x297   : > { %v1286_v55 = vpop.permute.xlu0 %1285  ;;  %1466 = vrot.lane.b32.xlu1 %v4112_v8, %s2263_s27  ;;  %v373_v8 = vld [vmem:[#allocation2 + $0x1a0] sm:$0xff] }
 0x298   : > { %1378 = vst.msk [vmem:[#allocation3 + $0x20] sm:$0xff] %vm1373_vm11, %v1286_v55  ;;  %v1692_v61 = vld [vmem:[#allocation3 + $0x88] sm:$0xff] }
 0x299   : > { %v1288_v9 = vpop.permute.xlu1 %1287  ;;  %v1691_v1 = vld [vmem:[#allocation3 + $0x80] sm:$0xff] }
 0x29a   : > { %1379 = vst.msk [vmem:[#allocation3 + $0x28] sm:$0xff] %vm1373_vm11, %v1288_v9  ;;  %v1715_v17 = vpack.c.bf16 %v1692_v61, %v1691_v1 }
 0x29b   : > { %1514 = vst.msk [vmem:[#allocation3 + $0x28] sm:$0xff] %vm1508_vm12, %v1423_v22  ;;  %v372_v22 = vld [vmem:[#allocation2 + $0x198] sm:$0xff] }
 0x29c   : > { %2207 = vmatmul.msk.bf16.vlgmr.msra.gmra.mxu2 %vm1747_vm14, %v1715_v17  ;;  %1454 = vrot.lane.b32.xlu2 %v4113_v13, %s2263_s27  ;;  %v1407_v17 = vrot.slane %v372_v22, 1 }
 0x29d   : > { %1588 = vrot.lane.b32.xlu0 %v4100_v4, %s2264_s28  ;;  %v4115_v4 = vld [vmem:[#allocation10_spill] sm:$0xff] }
 0x29e   : > { %v1555_v36 = vpop.permute.xlu2 %1554 }
 0x29f   : > { %v1300_v62 = vpop.permute.xlu0 %1299  ;;  %1598 = vrot.lane.b32.xlu1 %v4114_v35, %s2264_s28 }
 0x2a0   : > { %1385 = vst.msk [vmem:[#allocation3 + $0x58] sm:$0xff] %vm1373_vm11, %v1300_v62  ;;  %v1408_v62 = vrot.slane %v373_v8, 1 }
 0x2a1   : > { %v1421_v11 = vpop.permute.xlu1 %1420 }
 0x2a2   : > { %1513 = vst.msk [vmem:[#allocation3 + $0x20] sm:$0xff] %vm1508_vm12, %v1421_v11  ;;  %v1409_v11 = vsel %vm455_vm2, %v1407_v17, %v1408_v62 }
 0x2a3   : > { %1647 = vst.msk [vmem:[#allocation3 + $0x20] sm:$0xff] %vm1642_vm13, %v1555_v36  ;;  %v374_v36 = vld [vmem:[#allocation2 + $0x1a8] sm:$0x3] }
 0x2a4   : > { %1586 = vrot.lane.b32.xlu2 %v4116_v37, %s2264_s28  ;;  %v1542_v37 = vrot.slane %v373_v8, 2 }
 0x2a5   : > { %1305 = vrot.lane.b32.xlu0 %v4115_v4, %s2262_s26  ;;  %v1410_v4 = vrot.slane %v374_v36, 1 }
 0x2a6   : > { %v1569_v0 = vpop.permute.xlu2 %1568 }
 0x2a7   : > { %v1433_v40 = vpop.permute.xlu0 %1432  ;;  %1307 = vrot.lane.b32.xlu1 %v4117_v39, %s2262_s26  ;;  %v1411_v39 = vsel %vm455_vm2, %v1408_v62, %v1410_v4 }
 0x2a8   : > { %1519 = vst.msk [vmem:[#allocation3 + $0x50] sm:$0xff] %vm1508_vm12, %v1433_v40 }
 0x2a9   : > { %v1435_v52 = vpop.permute.xlu1 %1434 }
 0x2aa   : > { %1520 = vst.msk [vmem:[#allocation3 + $0x58] sm:$0xff] %vm1508_vm12, %v1435_v52  ;;  %v1679_v58 = vld [vmem:[#allocation3 + $0x20] sm:$0xff]  ;;  %v3608_v52 = vld [vmem:[%s3916_s2] ss:$0 sm:$0xff] }
 0x2ab   : > { %1654 = vst.msk [vmem:[#allocation3 + $0x58] sm:$0xff] %vm1642_vm13, %v1569_v0  ;;  %v1544_v0 = vrot.slane %v374_v36, 2 }
 0x2ac   : > { %1600 = vrot.lane.b32.xlu2 %v4119_v45, %s2264_s28 }
 0x2ad   : > { %1442 = vrot.lane.b32.xlu0 %v4118_v6, %s2263_s27 }
 0x2ae   : > { %v1326_v32 = vpop.permute.xlu2 %1325 }
 0x2af   : > { %v1557_v60 = vpop.permute.xlu0 %1556  ;;  %1574 = vrot.lane.b32.xlu1 %v4120_v49, %s2264_s28  ;;  %1398 = vst.msk [vmem:[#allocation3 + $0xc0] sm:$0xff] %vm1373_vm11, %v1326_v32 }
 0x2b0   : > { %1648 = vst.msk [vmem:[#allocation3 + $0x28] sm:$0xff] %vm1642_vm13, %v1557_v60  ;;  %v1545_v60 = vsel %vm665_vm5, %v1542_v37, %v1544_v0 }
 0x2b1   : > { %v1567_v18 = vpop.permute.xlu1 %1566 }
 0x2b2   : > { %1653 = vst.msk [vmem:[#allocation3 + $0x50] sm:$0xff] %vm1642_vm13, %v1567_v18  ;;  %v1686_v12 = vld [vmem:[#allocation3 + $0x58] sm:$0xff] }
 0x2b4   : > { %1440 = vrot.lane.b32.xlu2 %v4121_v24, %s2263_s27 }
 0x2b5   : > { %1202 = vrot.lane.b32.xlu0 %v4114_v35, %s2261_s25 }
 0x2b6   : > { %v1451_v27 = vpop.permute.xlu2 %1450 }
 0x2b7   : > { %v1314_v7 = vpop.permute.xlu0 %1313  ;;  %v1680_v46 = vld [vmem:[#allocation3 + $0x28] sm:$0xff]  ;;  %1204 = vrot.lane.b32.xlu1 %v4119_v45, %s2261_s25 }
 0x2b8   : > { %1392 = vst.msk [vmem:[#allocation3 + $0x90] sm:$0xff] %vm1373_vm11, %v1314_v7  ;;  %v1709_v53 = vpack.c.bf16 %v1680_v46, %v1679_v58  ;;  %v1541_v58 = vrot.slane %v372_v22, 2 }
 0x2b9   : > { %v1316_v42 = vpop.permute.xlu1 %1315  ;;  %v1685_v38 = vld [vmem:[#allocation3 + $0x50] sm:$0xff] }
 0x2ba   : > { %2201 = vmatmul.msk.bf16.gmra.mxu0 %vm1747_vm14, %v1709_v53  ;;  %1393 = vst.msk [vmem:[#allocation3 + $0x98] sm:$0xff] %vm1373_vm11, %v1316_v42  ;;  %v1712_v54 = vpack.c.bf16 %v1686_v12, %v1685_v38  ;;  %v1543_v53 = vsel %vm665_vm5, %v1541_v58, %v1542_v37 }
 0x2bb   : > { %1528 = vst.msk [vmem:[#allocation3 + $0x98] sm:$0xff] %vm1508_vm12, %v1451_v27 }
 0x2bc   : > { %2204 = vmatmul.msk.bf16.gmra.mxu1 %vm1747_vm14, %v1712_v54  ;;  %1576 = vrot.lane.b32.xlu2 %v4123_v23, %s2264_s28 }
 0x2bd   : > { %1323 = vrot.lane.b32.xlu0 %v4122_v48, %s2262_s26 }
 0x2be   : > { %v1583_v25 = vpop.permute.xlu2 %1582 }
 0x2bf   : > { %v1328_v20 = vpop.permute.xlu0 %1327  ;;  %1333 = vrot.lane.b32.xlu1 %v4124_v30, %s2262_s26 }
 0x2c0   : > { %1399 = vst.msk [vmem:[#allocation3 + $0xc8] sm:$0xff] %vm1373_vm11, %v1328_v20 }
 0x2c1   : > { %v1449_v10 = vpop.permute.xlu1 %1448 }
 0x2c2   : > { %1527 = vst.msk [vmem:[#allocation3 + $0x90] sm:$0xff] %vm1508_vm12, %v1449_v10 }
 0x2c3   : > { %1661 = vst.msk [vmem:[#allocation3 + $0x90] sm:$0xff] %vm1642_vm13, %v1583_v25 }
 0x2c4   : > { %1321 = vrot.lane.b32.xlu2 %v4126_v59, %s2262_s26 }
 0x2c5   : > { %1456 = vrot.lane.b32.xlu0 %v4125_v5, %s2263_s27 }
 0x2c6   : > { %v1597_v31 = vpop.permute.xlu2 %1596 }
 0x2c7   : > { %v1461_v14 = vpop.permute.xlu0 %1460  ;;  %1458 = vrot.lane.b32.xlu1 %v4127_v34, %s2263_s27 }
 0x2c8   : > { %1533 = vst.msk [vmem:[#allocation3 + $0xc0] sm:$0xff] %vm1508_vm12, %v1461_v14 }
 0x2c9   : > { %v1463_v26 = vpop.permute.xlu1 %1462 }
 0x2ca   : > { %1534 = vst.msk [vmem:[#allocation3 + $0xc8] sm:$0xff] %vm1508_vm12, %v1463_v26  ;;  %v1693_v41 = vld [vmem:[#allocation3 + $0x90] sm:$0xff] }
 0x2cb   : > { %1668 = vst.msk [vmem:[#allocation3 + $0xc8] sm:$0xff] %vm1642_vm13, %v1597_v31 }
 0x2cc   : > { %1335 = vrot.lane.b32.xlu2 %v4129_v43, %s2262_s26 }
 0x2cd   : > { %1470 = vrot.lane.b32.xlu0 %v4128_v50, %s2263_s27 }
 0x2ce   : > { %v1302_v15 = vpop.permute.xlu2 %1301 }
 0x2cf   : > { %v1585_v3 = vpop.permute.xlu0 %1584  ;;  %1590 = vrot.lane.b32.xlu1 %v4102_v47, %s2264_s28  ;;  %1386 = vst.msk [vmem:[#allocation3 + $0x60] sm:$0xff] %vm1373_vm11, %v1302_v15 }
 0x2d0   : > { %1662 = vst.msk [vmem:[#allocation3 + $0x98] sm:$0xff] %vm1642_vm13, %v1585_v3 }
 0x2d1   : > { %v1595_v57 = vpop.permute.xlu1 %1594 }
 0x2d2   : > { %1667 = vst.msk [vmem:[#allocation3 + $0xc0] sm:$0xff] %vm1642_vm13, %v1595_v57  ;;  %v1700_v33 = vld [vmem:[#allocation3 + $0xc8] sm:$0xff] }
 0x2d4   : > { %1468 = vrot.lane.b32.xlu2 %v4131_v44, %s2263_s27 }
 0x2d5   : > { %1602 = vrot.lane.b32.xlu0 %v1143_v21, %s2264_s28 }
 0x2d6   : > { %v1427_v55 = vpop.permute.xlu2 %1426 }
 0x2d7   : > { %v1290_v2 = vpop.permute.xlu0 %1289  ;;  %v1694_v63 = vld [vmem:[#allocation3 + $0x98] sm:$0xff]  ;;  %1604 = vrot.lane.b32.xlu1 %v1145_v29, %s2264_s28 }
 0x2d8   : > { %1380 = vst.msk [vmem:[#allocation3 + $0x30] sm:$0xff] %vm1373_vm11, %v1290_v2  ;;  %v1716_v47 = vpack.c.bf16 %v1694_v63, %v1693_v41 }
 0x2d9   : > { %v1292_v61 = vpop.permute.xlu1 %1291  ;;  %v1699_v9 = vld [vmem:[#allocation3 + $0xc0] sm:$0xff] }
 0x2da   : > { %2208 = vmatmul.msk.bf16.gmra.mxu2 %vm1747_vm14, %v1716_v47  ;;  %1381 = vst.msk [vmem:[#allocation3 + $0x38] sm:$0xff] %vm1373_vm11, %v1292_v61  ;;  %v1719_v1 = vpack.c.bf16 %v1700_v33, %v1699_v9 }
 0x2db   : > { %1516 = vst.msk [vmem:[#allocation3 + $0x38] sm:$0xff] %vm1508_vm12, %v1427_v55 }
 0x2dc   : > { %2211 = vmatmul.msk.bf16.vlgmr.msra.gmra.mxu3 %vm1747_vm14, %v1719_v1  ;;  %1592 = vrot.lane.b32.xlu2 %v2989_v56, %s2264_s28 }
 0x2dd   : > { %1208 = vrot.lane.b32.xlu0 %v1145_v29, %s2261_s25 }
 0x2de   : > { %v1559_v35 = vpop.permute.xlu2 %1558 }
 0x2df   : > { %v1304_v13 = vpop.permute.xlu0 %1303  ;;  %1337 = vrot.lane.b32.xlu1 %v372_v22, %s2262_s26 }
 0x2e0   : > { %1387 = vst.msk [vmem:[#allocation3 + $0x68] sm:$0xff] %vm1373_vm11, %v1304_v13 }
 0x2e1   : > { %v1425_v40 = vpop.permute.xlu1 %1424 }
 0x2e2   : > { %1515 = vst.msk [vmem:[#allocation3 + $0x30] sm:$0xff] %vm1508_vm12, %v1425_v40 }
 0x2e3   : > { %1649 = vst.msk [vmem:[#allocation3 + $0x30] sm:$0xff] %vm1642_vm13, %v1559_v35 }
 0x2e4   : > { %1206 = vrot.lane.b32.xlu2 %v1143_v21, %s2261_s25 }
 0x2e5   : > { %1472 = vrot.lane.b32.xlu0 %v1409_v11, %s2263_s27 }
 0x2e6   : > { %v1573_v6 = vpop.permute.xlu2 %1572 }
 0x2e7   : > { %v1437_v56 = vpop.permute.xlu0 %1436  ;;  %1474 = vrot.lane.b32.xlu1 %v1411_v39, %s2263_s27 }
 0x2e8   : > { %1521 = vst.msk [vmem:[#allocation3 + $0x60] sm:$0xff] %vm1508_vm12, %v1437_v56 }
 0x2e9   : > { %v1809_v45 = vpop.f32.mrf.mxu0  ;;  %v1439_v32 = vpop.permute.xlu1 %1438 }
 0x2ea   : > { %v1810_v49 = vadd.f32 %v3608_v52, %v1809_v45  ;;  %1522 = vst.msk [vmem:[#allocation3 + $0x68] sm:$0xff] %vm1508_vm12, %v1439_v32  ;;  %v1681_v42 = vld [vmem:[#allocation3 + $0x30] sm:$0xff] }
 0x2eb   : > { %1656 = vst.msk [vmem:[#allocation3 + $0x68] sm:$0xff] %vm1642_vm13, %v1573_v6 }
 0x2ec   : > { %1890 = vst.msk [vmem:[%s3617_s13] sm:$0xff] %vm1889_vm15, %v1810_v49  ;;  %1339 = vrot.lane.b32.xlu2 %v373_v8, %s2262_s26  ;;  %v1993_v27 = vmul.f32 %v1810_v49, %v1810_v49  ;;  %v1922_v38 = vsel %vm1889_vm15, %v1810_v49, 0.0 }
 0x2ed   : > { %1608 = vrot.lane.b32.xlu0 %v1545_v60, %s2264_s28 }
 0x2ee   : > { %v1330_v7 = vpop.permute.xlu2 %1329  ;;  %v2025_v10 = vsel %vm1889_vm15, %v1993_v27, 0.0 }
 0x2ef   : > { %v1561_v18 = vpop.permute.xlu0 %1560  ;;  %1400 = vst.msk [vmem:[#allocation3 + $0xd0] sm:$0xff] %vm1373_vm11, %v1330_v7 }
 0x2f0   : > { %1650 = vst.msk [vmem:[#allocation3 + $0x38] sm:$0xff] %vm1642_vm13, %v1561_v18 }
 0x2f1   : > { %v1811_v46 = vpop.f32.mrf.mxu0  ;;  %v1571_v24 = vpop.permute.xlu1 %1570 }
 0x2f2   : > { %v1812_v12 = vadd.f32 %v3608_v52, %v1811_v46  ;;  %1655 = vst.msk [vmem:[#allocation3 + $0x60] sm:$0xff] %vm1642_vm13, %v1571_v24  ;;  %v1688_v31 = vld [vmem:[#allocation3 + $0x68] sm:$0xff] }
 0x2f4   : > { %1891 = vst.msk [vmem:[%s3617_s13 + $0x8] sm:$0xff] %vm1889_vm15, %v1812_v12  ;;  %v1923_v48 = vsel %vm1889_vm15, %v1812_v12, 0.0  ;;  %v1994_v54 = vmul.f32 %v1812_v12, %v1812_v12  ;;  %1606 = vrot.lane.b32.xlu2 %v1543_v53, %s2264_s28 }
 0x2f5   : > { %v1924_v25 = vadd.f32 %v1923_v48, %v1922_v38 }
 0x2f6   : > { %v2026_v5 = vsel %vm1889_vm15, %v1994_v54, 0.0  ;;  %v1455_v14 = vpop.permute.xlu2 %1454 }
 0x2f7   : > { %v1318_v20 = vpop.permute.xlu0 %1317  ;;  %v1682_v23 = vld [vmem:[#allocation3 + $0x38] sm:$0xff]  ;;  %v2027_v59 = vadd.f32 %v2026_v5, %v2025_v10 }
 0x2f8   : > { %1394 = vst.msk [vmem:[#allocation3 + $0xa0] sm:$0xff] %vm1373_vm11, %v1318_v20  ;;  %v1710_v30 = vpack.c.bf16 %v1682_v23, %v1681_v42 }
 0x2f9   : > { %v1320_v34 = vpop.permute.xlu1 %1319  ;;  %v1687_v26 = vld [vmem:[#allocation3 + $0x60] sm:$0xff] }
 0x2fa   : > { %2202 = vmatmul.msk.bf16.gmra.mxu0 %vm1747_vm14, %v1710_v30  ;;  %1395 = vst.msk [vmem:[#allocation3 + $0xa8] sm:$0xff] %vm1373_vm11, %v1320_v34  ;;  %v1713_v50 = vpack.c.bf16 %v1688_v31, %v1687_v26 }
 0x2fb   : > { %1530 = vst.msk [vmem:[#allocation3 + $0xa8] sm:$0xff] %vm1508_vm12, %v1455_v14 }
 0x2fc   : > { %2205 = vmatmul.msk.bf16.gmra.mxu1 %vm1747_vm14, %v1713_v50 }
 0x2fe   : > { %v1587_v43 = vpop.permute.xlu2 %1586 }
 0x2ff   : > { %v1332_v51 = vpop.permute.xlu0 %1331 }
 0x300   : > { %1401 = vst.msk [vmem:[#allocation3 + $0xd8] sm:$0xff] %vm1373_vm11, %v1332_v51 }
 0x301   : > { %v1453_v16 = vpop.permute.xlu1 %1452 }
 0x302   : > { %1529 = vst.msk [vmem:[#allocation3 + $0xa0] sm:$0xff] %vm1508_vm12, %v1453_v16 }
 0x303   : > { %1663 = vst.msk [vmem:[#allocation3 + $0xa0] sm:$0xff] %vm1642_vm13, %v1587_v43 }
 0x306   : > { %v1601_v28 = vpop.permute.xlu2 %1600 }
 0x307   : > { %v1465_v3 = vpop.permute.xlu0 %1464  ;;  %v1814_v15 = vpop.f32.mrf.mxu0 }
 0x308   : > { %1535 = vst.msk [vmem:[#allocation3 + $0xd0] sm:$0xff] %vm1508_vm12, %v1465_v3  ;;  %v1815_v21 = vadd.f32 %v3608_v52, %v1814_v15 }
 0x309   : > { %v1829_v29 = vpop.f32.mrf.mxu1  ;;  %v1467_v63 = vpop.permute.xlu1 %1466 }
 0x30a   : > { %1892 = vst.msk [vmem:[%s3617_s13 + $0x10] sm:$0xff] %vm1889_vm15, %v1815_v21  ;;  %v1925_v19 = vsel %vm1889_vm15, %v1815_v21, 0.0  ;;  %v1995_v57 = vmul.f32 %v1815_v21, %v1815_v21  ;;  %v3653_v47 = vadd.f32 %v3608_v52, %v1829_v29  ;;  %v1695_v11 = vld [vmem:[#allocation3 + $0xa0] sm:$0xff] }
 0x30b   : > { %v1926_v41 = vadd.f32 %v1925_v19, %v1924_v25  ;;  %1536 = vst.msk [vmem:[#allocation3 + $0xd8] sm:$0xff] %vm1508_vm12, %v1467_v63 }
 0x30c   : > { %v2028_v2 = vsel %vm1889_vm15, %v1995_v57, 0.0  ;;  %1670 = vst.msk [vmem:[#allocation3 + $0xd8] sm:$0xff] %vm1642_vm13, %v1601_v28 }
 0x30d   : > { %v2029_v44 = vadd.f32 %v2028_v2, %v2027_v59  ;;  %1898 = vst.msk [vmem:[%s3617_s13 + $0x40] sm:$0xff] %vm1889_vm15, %v3653_v47 }
 0x30e   : > { %v1441_v8 = vpop.permute.xlu2 %1440 }
 0x30f   : > { %v1589_v55 = vpop.permute.xlu0 %1588  ;;  %v1816_v33 = vpop.f32.mrf.mxu0 }
 0x310   : > { %1664 = vst.msk [vmem:[#allocation3 + $0xa8] sm:$0xff] %vm1642_vm13, %v1589_v55  ;;  %v1817_v22 = vadd.f32 %v3608_v52, %v1816_v33 }
 0x311   : > { %v1831_v62 = vpop.f32.mrf.mxu1  ;;  %v1599_v13 = vpop.permute.xlu1 %1598 }
 0x312   : > { %1893 = vst.msk [vmem:[%s3617_s13 + $0x18] sm:$0xff] %vm1889_vm15, %v1817_v22  ;;  %v1927_v61 = vsel %vm1889_vm15, %v1817_v22, 0.0  ;;  %v1996_v9 = vmul.f32 %v1817_v22, %v1817_v22  ;;  %v3667_v35 = vadd.f32 %v3608_v52, %v1831_v62 }
 0x313   : > { %v1928_v1 = vadd.f32 %v1927_v61, %v1926_v41  ;;  %1669 = vst.msk [vmem:[#allocation3 + $0xd0] sm:$0xff] %vm1642_vm13, %v1599_v13  ;;  %v1702_v56 = vld [vmem:[#allocation3 + $0xd8] sm:$0xff] }
 0x314   : > { %v2030_v17 = vsel %vm1889_vm15, %v1996_v9, 0.0  ;;  %1899 = vst.msk [vmem:[%s3617_s13 + $0x48] sm:$0xff] %vm1889_vm15, %v3667_v35 }
 0x315   : > { %v2031_v36 = vadd.f32 %v2030_v17, %v2029_v44 }
 0x316   : > { %v1577_v0 = vpop.permute.xlu2 %1576 }
 0x317   : > { %v1306_v4 = vpop.permute.xlu0 %1305  ;;  %v1696_v40 = vld [vmem:[#allocation3 + $0xa8] sm:$0xff] }
 0x318   : > { %1388 = vst.msk [vmem:[#allocation3 + $0x70] sm:$0xff] %vm1373_vm11, %v1306_v4  ;;  %v1717_v37 = vpack.c.bf16 %v1696_v40, %v1695_v11 }
 0x319   : > { %1523 = vst.msk [vmem:[#allocation3 + $0x70] sm:$0xff] %vm1508_vm12, %v1441_v8  ;;  %v1308_v39 = vpop.permute.xlu1 %1307 }
 0x31a   : > { %2209 = vmatmul.msk.bf16.gmra.mxu2 %vm1747_vm14, %v1717_v37  ;;  %v1701_v6 = vld [vmem:[#allocation3 + $0xd0] sm:$0xff]  ;;  %1389 = vst.msk [vmem:[#allocation3 + $0x78] sm:$0xff] %vm1373_vm11, %v1308_v39 }
 0x31b   : > { %v1720_v60 = vpack.c.bf16 %v1702_v56, %v1701_v6 }
 0x31d   : > { %2212 = vmatmul.msk.bf16.gmra.mxu3 %vm1747_vm14, %v1720_v60 }
 0x31e   : > { %v1322_v32 = vpop.permute.xlu2 %1321 }
 0x31f   : > { %v1443_v45 = vpop.permute.xlu0 %1442  ;;  %v1849_v49 = vpop.f32.mrf.mxu2  ;;  %1396 = vst.msk [vmem:[#allocation3 + $0xb0] sm:$0xff] %vm1373_vm11, %v1322_v32 }
 0x320   : > { %1524 = vst.msk [vmem:[#allocation3 + $0x78] sm:$0xff] %vm1508_vm12, %v1443_v45  ;;  %v3682_v18 = vadd.f32 %v3608_v52, %v1849_v49 }
 0x321   : > { %1658 = vst.msk [vmem:[#allocation3 + $0x78] sm:$0xff] %vm1642_vm13, %v1577_v0  ;;  %v1575_v58 = vpop.permute.xlu1 %1574 }
 0x322   : > { %1906 = vst.msk [vmem:[%s3617_s13 + $0x80] sm:$0xff] %vm1889_vm15, %v3682_v18 }
 0x323   : > { %1657 = vst.msk [vmem:[#allocation3 + $0x70] sm:$0xff] %vm1642_vm13, %v1575_v58 }
 0x326   : > { %v1336_v46 = vpop.permute.xlu2 %1335 }
 0x327   : > { %v1203_v7 = vpop.permute.xlu0 %1202  ;;  %v1851_v24 = vpop.f32.mrf.mxu2 }
 0x328   : > { %1271 = vst.msk [vmem:[#allocation3 + $0xe0] sm:$0xff] %vm1242_vm9, %v1203_v7  ;;  %v3690_v53 = vadd.f32 %v3608_v52, %v1851_v24  ;;  %v1690_v27 = vld [vmem:[#allocation3 + $0x78] sm:$0xff] }
 0x329   : > { %v1205_v12 = vpop.permute.xlu1 %1204 }
 0x32a   : > { %1907 = vst.msk [vmem:[%s3617_s13 + $0x88] sm:$0xff] %vm1889_vm15, %v3690_v53  ;;  %v1689_v42 = vld [vmem:[#allocation3 + $0x70] sm:$0xff] }
 0x32b   : > { %1272 = vst.msk [vmem:[#allocation3 + $0xe8] sm:$0xff] %vm1242_vm9, %v1205_v12  ;;  %v1714_v38 = vpack.c.bf16 %v1690_v27, %v1689_v42 }
 0x32c   : > { %1403 = vst.msk [vmem:[#allocation3 + $0xe8] sm:$0xff] %vm1373_vm11, %v1336_v46 }
 0x32d   : > { %2206 = vmatmul.msk.bf16.gmra.mxu1 %vm1747_vm14, %v1714_v38 }
 0x32e   : > { %v1469_v54 = vpop.permute.xlu2 %1468 }
 0x32f   : > { %v1324_v48 = vpop.permute.xlu0 %1323 }
 0x330   : > { %1397 = vst.msk [vmem:[#allocation3 + $0xb8] sm:$0xff] %vm1373_vm11, %v1324_v48 }
 0x331   : > { %v1334_v20 = vpop.permute.xlu1 %1333 }
 0x332   : > { %1402 = vst.msk [vmem:[#allocation3 + $0xe0] sm:$0xff] %vm1373_vm11, %v1334_v20 }
 0x333   : > { %1537 = vst.msk [vmem:[#allocation3 + $0xe0] sm:$0xff] %vm1508_vm12, %v1469_v54 }
 0x336   : > { %v1593_v10 = vpop.permute.xlu2 %1592 }
 0x337   : > { %v1457_v23 = vpop.permute.xlu0 %1456  ;;  %v1819_v25 = vpop.f32.mrf.mxu0 }
 0x338   : > { %1531 = vst.msk [vmem:[#allocation3 + $0xb0] sm:$0xff] %vm1508_vm12, %v1457_v23  ;;  %v1820_v30 = vadd.f32 %v3608_v52, %v1819_v25 }
 0x339   : > { %v1834_v34 = vpop.f32.mrf.mxu1  ;;  %v1459_v26 = vpop.permute.xlu1 %1458 }
 0x33a   : > { %1894 = vst.msk [vmem:[%s3617_s13 + $0x20] sm:$0xff] %vm1889_vm15, %v1820_v30  ;;  %v1929_v5 = vsel %vm1889_vm15, %v1820_v30, 0.0  ;;  %v1997_v14 = vmul.f32 %v1820_v30, %v1820_v30  ;;  %v3708_v51 = vadd.f32 %v3608_v52, %v1834_v34  ;;  %v2001_v30 = vmul.f32 %v3653_v47, %v3653_v47 }
 0x33b   : > { %v1930_v59 = vadd.f32 %v1929_v5, %v1928_v1  ;;  %1532 = vst.msk [vmem:[#allocation3 + $0xb8] sm:$0xff] %vm1508_vm12, %v1459_v26 }
 0x33c   : > { %v2032_v31 = vsel %vm1889_vm15, %v1997_v14, 0.0  ;;  %1666 = vst.msk [vmem:[#allocation3 + $0xb8] sm:$0xff] %vm1642_vm13, %v1593_v10 }
 0x33d   : > { %v2033_v50 = vadd.f32 %v2032_v31, %v2031_v36  ;;  %1900 = vst.msk [vmem:[%s3617_s13 + $0x50] sm:$0xff] %vm1889_vm15, %v3708_v51  ;;  %v2002_v31 = vmul.f32 %v3667_v35, %v3667_v35 }
 0x33e   : > { %v1207_v15 = vpop.permute.xlu2 %1206 }
 0x33f   : > { %v1471_v43 = vpop.permute.xlu0 %1470  ;;  %v1821_v16 = vpop.f32.mrf.mxu0  ;;  %1273 = vst.msk [vmem:[#allocation3 + $0xf0] sm:$0xff] %vm1242_vm9, %v1207_v15  ;;  %v1939_v15 = vsel %vm1889_vm15, %v3667_v35, 0.0 }
 0x340   : > { %1538 = vst.msk [vmem:[#allocation3 + $0xe8] sm:$0xff] %vm1508_vm12, %v1471_v43  ;;  %v1822_v3 = vadd.f32 %v3608_v52, %v1821_v16 }
 0x341   : > { %v1836_v41 = vpop.f32.mrf.mxu1  ;;  %v1591_v2 = vpop.permute.xlu1 %1590 }
 0x342   : > { %1895 = vst.msk [vmem:[%s3617_s13 + $0x28] sm:$0xff] %vm1889_vm15, %v1822_v3  ;;  %v1931_v21 = vsel %vm1889_vm15, %v1822_v3, 0.0  ;;  %v1998_v28 = vmul.f32 %v1822_v3, %v1822_v3  ;;  %v3723_v63 = vadd.f32 %v3608_v52, %v1836_v41  ;;  %v2040_v3 = vsel %vm1889_vm15, %v2001_v30, 0.0 }
 0x343   : > { %v1932_v19 = vadd.f32 %v1931_v21, %v1930_v59  ;;  %1665 = vst.msk [vmem:[#allocation3 + $0xb0] sm:$0xff] %vm1642_vm13, %v1591_v2  ;;  %v1698_v55 = vld [vmem:[#allocation3 + $0xb8] sm:$0xff]  ;;  %v1937_v59 = vsel %vm1889_vm15, %v3653_v47, 0.0  ;;  %v2003_v21 = vmul.f32 %v3708_v51, %v3708_v51 }
 0x344   : > { %v2034_v57 = vsel %vm1889_vm15, %v1998_v28, 0.0  ;;  %1901 = vst.msk [vmem:[%s3617_s13 + $0x58] sm:$0xff] %vm1889_vm15, %v3723_v63  ;;  %v2004_v41 = vmul.f32 %v3723_v63, %v3723_v63  ;;  %v1943_v35 = vsel %vm1889_vm15, %v3723_v63, 0.0 }
 0x345   : > { %v2035_v29 = vadd.f32 %v2034_v57, %v2033_v50  ;;  %v1941_v57 = vsel %vm1889_vm15, %v3708_v51, 0.0 }
 0x346   : > { %v1340_v8 = vpop.permute.xlu2 %1339 }
 0x347   : > { %v1603_v44 = vpop.permute.xlu0 %1602 }
 0x348   : > { %1671 = vst.msk [vmem:[#allocation3 + $0xe0] sm:$0xff] %vm1642_vm13, %v1603_v44  ;;  %v2044_v44 = vsel %vm1889_vm15, %v2003_v21, 0.0 }
 0x349   : > { %v1605_v33 = vpop.permute.xlu1 %1604 }
 0x34a   : > { %v1697_v22 = vld [vmem:[#allocation3 + $0xb0] sm:$0xff]  ;;  %1672 = vst.msk [vmem:[#allocation3 + $0xe8] sm:$0xff] %vm1642_vm13, %v1605_v33 }
 0x34b   : > { %v1718_v61 = vpack.c.bf16 %v1698_v55, %v1697_v22 }
 0x34d   : > { %2210 = vmatmul.msk.bf16.gmra.mxu2 %vm1747_vm14, %v1718_v61 }
 0x34e   : > { %v1607_v36 = vpop.permute.xlu2 %1606 }
 0x34f   : > { %v1209_v9 = vpop.permute.xlu0 %1208  ;;  %v1703_v17 = vld [vmem:[#allocation3 + $0xe0] sm:$0xff] }
 0x350   : > { %1274 = vst.msk [vmem:[#allocation3 + $0xf8] sm:$0xff] %vm1242_vm9, %v1209_v9 }
 0x351   : > { %1405 = vst.msk [vmem:[#allocation3 + $0xf8] sm:$0xff] %vm1373_vm11, %v1340_v8  ;;  %v1338_v1 = vpop.permute.xlu1 %1337  ;;  %v1704_v62 = vld [vmem:[#allocation3 + $0xe8] sm:$0xff]  ;;  %v2046_v8 = vsel %vm1889_vm15, %v2004_v41, 0.0 }
 0x352   : > { %1404 = vst.msk [vmem:[#allocation3 + $0xf0] sm:$0xff] %vm1373_vm11, %v1338_v1  ;;  %v1721_v13 = vpack.c.bf16 %v1704_v62, %v1703_v17 }
 0x354   : > { %2213 = vmatmul.msk.bf16.gmra.mxu3 %vm1747_vm14, %v1721_v13 }
 0x357   : > { %v1473_v11 = vpop.permute.xlu0 %1472 }
 0x358   : > { %1539 = vst.msk [vmem:[#allocation3 + $0xf0] sm:$0xff] %vm1508_vm12, %v1473_v11 }
 0x359   : > { %1673 = vst.msk [vmem:[#allocation3 + $0xf0] sm:$0xff] %vm1642_vm13, %v1607_v36  ;;  %v1475_v4 = vpop.permute.xlu1 %1474 }
 0x35a   : > { %1540 = vst.msk [vmem:[#allocation3 + $0xf8] sm:$0xff] %vm1508_vm12, %v1475_v4 }
 0x35d   : > { %v1854_v40 = vpop.f32.mrf.mxu2 }
 0x35e   : > { %v3740_v37 = vadd.f32 %v3608_v52, %v1854_v40 }
 0x35f   : > { %v1609_v0 = vpop.permute.xlu0 %1608  ;;  %v1869_v56 = vpop.f32.mrf.mxu3 }
 0x360   : > { %1908 = vst.msk [vmem:[%s3617_s13 + $0x90] sm:$0xff] %vm1889_vm15, %v3740_v37  ;;  %v3747_v39 = vadd.f32 %v3608_v52, %v1869_v56  ;;  %v1705_v45 = vld [vmem:[#allocation3 + $0xf0] sm:$0xff] }
 0x361   : > { %1674 = vst.msk [vmem:[#allocation3 + $0xf8] sm:$0xff] %vm1642_vm13, %v1609_v0 }
 0x362   : > { %1914 = vst.msk [vmem:[%s3617_s13 + $0xc0] sm:$0xff] %vm1889_vm15, %v3747_v39 }
 0x365   : > { %v1856_v6 = vpop.f32.mrf.mxu2 }
 0x366   : > { %v3753_v60 = vadd.f32 %v3608_v52, %v1856_v6 }
 0x367   : > { %v1871_v58 = vpop.f32.mrf.mxu3 }
 0x368   : > { %1909 = vst.msk [vmem:[%s3617_s13 + $0x98] sm:$0xff] %vm1889_vm15, %v3753_v60  ;;  %v1706_v32 = vld [vmem:[#allocation3 + $0xf8] sm:$0xff]  ;;  %v3759_v7 = vadd.f32 %v3608_v52, %v1871_v58 }
 0x369   : > { %v1722_v49 = vpack.c.bf16 %v1706_v32, %v1705_v45 }
 0x36a   : > { %1915 = vst.msk [vmem:[%s3617_s13 + $0xc8] sm:$0xff] %vm1889_vm15, %v3759_v7 }
 0x36b   : > { %2214 = vmatmul.msk.bf16.gmra.mxu3 %vm1747_vm14, %v1722_v49 }
 0x377   : > { %v1824_v46 = vpop.f32.mrf.mxu0 }
 0x378   : > { %v1825_v24 = vadd.f32 %v3608_v52, %v1824_v46 }
 0x379   : > { %v1839_v48 = vpop.f32.mrf.mxu1 }
 0x37a   : > { %1896 = vst.msk [vmem:[%s3617_s13 + $0x30] sm:$0xff] %vm1889_vm15, %v1825_v24  ;;  %v1933_v27 = vsel %vm1889_vm15, %v1825_v24, 0.0  ;;  %v1999_v12 = vmul.f32 %v1825_v24, %v1825_v24  ;;  %v1840_v20 = vadd.f32 %v3608_v52, %v1839_v48 }
 0x37b   : > { %v1934_v42 = vadd.f32 %v1933_v27, %v1932_v19  ;;  %v2042_v19 = vsel %vm1889_vm15, %v2002_v31, 0.0 }
 0x37c   : > { %v2036_v38 = vsel %vm1889_vm15, %v1999_v12, 0.0  ;;  %1902 = vst.msk [vmem:[%s3617_s13 + $0x60] sm:$0xff] %vm1889_vm15, %v1840_v20  ;;  %v2005_v55 = vmul.f32 %v1840_v20, %v1840_v20  ;;  %v1945_v61 = vsel %vm1889_vm15, %v1840_v20, 0.0 }
 0x37d   : > { %v2037_v54 = vadd.f32 %v2036_v38, %v2035_v29 }
 0x37e   : > { %v2048_v17 = vsel %vm1889_vm15, %v2005_v55, 0.0 }
 0x37f   : > { %v1826_v23 = vpop.f32.mrf.mxu0 }
 0x380   : > { %v1827_v25 = vadd.f32 %v3608_v52, %v1826_v23 }
 0x381   : > { %v1841_v26 = vpop.f32.mrf.mxu1 }
 0x382   : > { %1897 = vst.msk [vmem:[%s3617_s13 + $0x38] sm:$0xff] %vm1889_vm15, %v1827_v25  ;;  %v1935_v10 = vsel %vm1889_vm15, %v1827_v25, 0.0  ;;  %v2000_v5 = vmul.f32 %v1827_v25, %v1827_v25  ;;  %v1842_v16 = vadd.f32 %v3608_v52, %v1841_v26  ;;  %v1955_v26 = vsel %vm1889_vm15, %v3690_v53, 0.0 }
 0x383   : > { %v1936_v14 = vadd.f32 %v1935_v10, %v1934_v42  ;;  %v1953_v10 = vsel %vm1889_vm15, %v3682_v18, 0.0 }
 0x384   : > { %v2038_v34 = vsel %vm1889_vm15, %v2000_v5, 0.0  ;;  %1903 = vst.msk [vmem:[%s3617_s13 + $0x68] sm:$0xff] %vm1889_vm15, %v1842_v16  ;;  %v2006_v51 = vmul.f32 %v1842_v16, %v1842_v16  ;;  %v1947_v62 = vsel %vm1889_vm15, %v1842_v16, 0.0  ;;  %v2010_v5 = vmul.f32 %v3690_v53, %v3690_v53 }
 0x385   : > { %v1938_v50 = vadd.f32 %v1937_v59, %v1936_v14  ;;  %v2039_v43 = vadd.f32 %v2038_v34, %v2037_v54  ;;  %v2009_v54 = vmul.f32 %v3682_v18, %v3682_v18  ;;  %v1957_v18 = vsel %vm1889_vm15, %v3740_v37, 0.0 }
 0x386   : > { %v2050_v36 = vsel %vm1889_vm15, %v2006_v51, 0.0  ;;  %v1959_v53 = vsel %vm1889_vm15, %v3753_v60, 0.0 }
 0x387   : > { %v1940_v28 = vadd.f32 %v1939_v15, %v1938_v50  ;;  %v2041_v47 = vadd.f32 %v2040_v3, %v2039_v43  ;;  %v2056_v34 = vsel %vm1889_vm15, %v2009_v54, 0.0  ;;  %v2011_v50 = vmul.f32 %v3740_v37, %v3740_v37 }
 0x388   : > { %v2058_v3 = vsel %vm1889_vm15, %v2010_v5, 0.0  ;;  %v2012_v15 = vmul.f32 %v3753_v60, %v3753_v60 }
 0x389   : > { %v2043_v2 = vadd.f32 %v2042_v19, %v2041_v47  ;;  %v1942_v29 = vadd.f32 %v1941_v57, %v1940_v28  ;;  %v2060_v47 = vsel %vm1889_vm15, %v2011_v50, 0.0 }
 0x38b   : > { %v1944_v33 = vadd.f32 %v1943_v35, %v1942_v29  ;;  %v2045_v22 = vadd.f32 %v2044_v44, %v2043_v2  ;;  %v2062_v2 = vsel %vm1889_vm15, %v2012_v15, 0.0 }
 0x38d   : > { %v1946_v9 = vadd.f32 %v1945_v61, %v1944_v33  ;;  %v2047_v1 = vadd.f32 %v2046_v8, %v2045_v22 }
 0x38f   : > { %v1948_v13 = vadd.f32 %v1947_v62, %v1946_v9  ;;  %v2049_v63 = vadd.f32 %v2048_v17, %v2047_v1 }
 0x391   : > { %v2051_v11 = vadd.f32 %v2050_v36, %v2049_v63 }
 0x39d   : > { %v1859_v4 = vpop.f32.mrf.mxu2 }
 0x39e   : > { %v1860_v40 = vadd.f32 %v3608_v52, %v1859_v4 }
 0x3a0   : > { %1910 = vst.msk [vmem:[%s3617_s13 + $0xa0] sm:$0xff] %vm1889_vm15, %v1860_v40  ;;  %v1874_v0 = vpop.f32.mrf.mxu3  ;;  %v2013_v19 = vmul.f32 %v1860_v40, %v1860_v40  ;;  %v1961_v29 = vsel %vm1889_vm15, %v1860_v40, 0.0  ;;  %v2017_v40 = vmul.f32 %v3747_v39, %v3747_v39 }
 0x3a1   : > { %v3809_v56 = vadd.f32 %v3608_v52, %v1874_v0 }
 0x3a2   : > { %v2064_v35 = vsel %vm1889_vm15, %v2013_v19, 0.0 }
 0x3a3   : > { %1916 = vst.msk [vmem:[%s3617_s13 + $0xd0] sm:$0xff] %vm1889_vm15, %v3809_v56 }
 0x3a5   : > { %v1861_v6 = vpop.f32.mrf.mxu2 }
 0x3a6   : > { %v1862_v45 = vadd.f32 %v3608_v52, %v1861_v6 }
 0x3a8   : > { %1911 = vst.msk [vmem:[%s3617_s13 + $0xa8] sm:$0xff] %vm1889_vm15, %v1862_v45  ;;  %v1876_v32 = vpop.f32.mrf.mxu3  ;;  %v2014_v8 = vmul.f32 %v1862_v45, %v1862_v45  ;;  %v1963_v61 = vsel %vm1889_vm15, %v1862_v45, 0.0 }
 0x3a9   : > { %v3818_v49 = vadd.f32 %v3608_v52, %v1876_v32 }
 0x3aa   : > { %v1844_v58 = vpop.f32.mrf.mxu1  ;;  %v2066_v62 = vsel %vm1889_vm15, %v2014_v8, 0.0 }
 0x3ab   : > { %1917 = vst.msk [vmem:[%s3617_s13 + $0xd8] sm:$0xff] %vm1889_vm15, %v3818_v49  ;;  %v1845_v46 = vadd.f32 %v3608_v52, %v1844_v58  ;;  %v1969_v58 = vsel %vm1889_vm15, %v3747_v39, 0.0 }
 0x3ad   : > { %1904 = vst.msk [vmem:[%s3617_s13 + $0x70] sm:$0xff] %vm1889_vm15, %v1845_v46  ;;  %v2007_v24 = vmul.f32 %v1845_v46, %v1845_v46  ;;  %v1949_v27 = vsel %vm1889_vm15, %v1845_v46, 0.0  ;;  %v2018_v46 = vmul.f32 %v3759_v7, %v3759_v7 }
 0x3ae   : > { %v1950_v48 = vadd.f32 %v1949_v27, %v1948_v13 }
 0x3af   : > { %v2052_v42 = vsel %vm1889_vm15, %v2007_v24, 0.0  ;;  %v2074_v39 = vsel %vm1889_vm15, %v2018_v46, 0.0 }
 0x3b0   : > { %v2053_v25 = vadd.f32 %v2052_v42, %v2051_v11  ;;  %v2072_v42 = vsel %vm1889_vm15, %v2017_v40, 0.0 }
 0x3b2   : > { %v1846_v12 = vpop.f32.mrf.mxu1 }
 0x3b3   : > { %v1847_v38 = vadd.f32 %v3608_v52, %v1846_v12 }
 0x3b5   : > { %1905 = vst.msk [vmem:[%s3617_s13 + $0x78] sm:$0xff] %vm1889_vm15, %v1847_v38  ;;  %v1951_v20 = vsel %vm1889_vm15, %v1847_v38, 0.0  ;;  %v2008_v23 = vmul.f32 %v1847_v38, %v1847_v38  ;;  %v1971_v38 = vsel %vm1889_vm15, %v3759_v7, 0.0 }
 0x3b6   : > { %v1952_v30 = vadd.f32 %v1951_v20, %v1950_v48  ;;  %v2019_v48 = vmul.f32 %v3809_v56, %v3809_v56 }
 0x3b7   : > { %v2054_v14 = vsel %vm1889_vm15, %v2008_v23, 0.0 }
 0x3b8   : > { %v1954_v59 = vadd.f32 %v1953_v10, %v1952_v30  ;;  %v2055_v31 = vadd.f32 %v2054_v14, %v2053_v25  ;;  %v1973_v25 = vsel %vm1889_vm15, %v3809_v56, 0.0  ;;  %v2020_v30 = vmul.f32 %v3818_v49, %v3818_v49 }
 0x3b9   : > { %v2076_v7 = vsel %vm1889_vm15, %v2019_v48, 0.0 }
 0x3ba   : > { %v1956_v43 = vadd.f32 %v1955_v26, %v1954_v59  ;;  %v2057_v16 = vadd.f32 %v2056_v34, %v2055_v31  ;;  %v1975_v59 = vsel %vm1889_vm15, %v3818_v49, 0.0  ;;  %v2078_v26 = vsel %vm1889_vm15, %v2020_v30, 0.0 }
 0x3bc   : > { %v1958_v21 = vadd.f32 %v1957_v18, %v1956_v43  ;;  %v2059_v28 = vadd.f32 %v2058_v3, %v2057_v16 }
 0x3be   : > { %v2061_v57 = vadd.f32 %v2060_v47, %v2059_v28  ;;  %v1960_v41 = vadd.f32 %v1959_v53, %v1958_v21 }
 0x3c0   : > { %v1962_v44 = vadd.f32 %v1961_v29, %v1960_v41  ;;  %v2063_v37 = vadd.f32 %v2062_v2, %v2061_v57 }
 0x3c2   : > { %v2065_v55 = vadd.f32 %v2064_v35, %v2063_v37  ;;  %v1964_v9 = vadd.f32 %v1963_v61, %v1962_v44 }
 0x3c4   : > { %v2067_v4 = vadd.f32 %v2066_v62, %v2065_v55 }
 0x3d0   : > { %v1864_v33 = vpop.f32.mrf.mxu2 }
 0x3d1   : > { %v1865_v22 = vadd.f32 %v3608_v52, %v1864_v33 }
 0x3d3   : > { %1912 = vst.msk [vmem:[%s3617_s13 + $0xb0] sm:$0xff] %vm1889_vm15, %v1865_v22  ;;  %v2015_v60 = vmul.f32 %v1865_v22, %v1865_v22  ;;  %v1965_v51 = vsel %vm1889_vm15, %v1865_v22, 0.0 }
 0x3d4   : > { %v1966_v11 = vadd.f32 %v1965_v51, %v1964_v9 }
 0x3d5   : > { %v2068_v13 = vsel %vm1889_vm15, %v2015_v60, 0.0 }
 0x3d6   : > { %v2069_v45 = vadd.f32 %v2068_v13, %v2067_v4 }
 0x3d7   : > { %v1879_v17 = vpop.f32.mrf.mxu3 }
 0x3d8   : > { %v1866_v1 = vpop.f32.mrf.mxu2  ;;  %v1880_v36 = vadd.f32 %v3608_v52, %v1879_v17 }
 0x3d9   : > { %v1867_v63 = vadd.f32 %v3608_v52, %v1866_v1 }
 0x3da   : > { %1918 = vst.msk [vmem:[%s3617_s13 + $0xe0] sm:$0xff] %vm1889_vm15, %v1880_v36  ;;  %v2021_v43 = vmul.f32 %v1880_v36, %v1880_v36  ;;  %v1977_v3 = vsel %vm1889_vm15, %v1880_v36, 0.0 }
 0x3db   : > { %1913 = vst.msk [vmem:[%s3617_s13 + $0xb8] sm:$0xff] %vm1889_vm15, %v1867_v63  ;;  %v1967_v0 = vsel %vm1889_vm15, %v1867_v63, 0.0  ;;  %v2016_v6 = vmul.f32 %v1867_v63, %v1867_v63 }
 0x3dc   : > { %v1968_v32 = vadd.f32 %v1967_v0, %v1966_v11  ;;  %v2080_v15 = vsel %vm1889_vm15, %v2021_v43, 0.0 }
 0x3dd   : > { %v2070_v24 = vsel %vm1889_vm15, %v2016_v6, 0.0 }
 0x3de   : > { %v1970_v27 = vadd.f32 %v1969_v58, %v1968_v32  ;;  %v2071_v12 = vadd.f32 %v2070_v24, %v2069_v45 }
 0x3df   : > { %v1881_v23 = vpop.f32.mrf.mxu3 }
 0x3e0   : > { %v1972_v54 = vadd.f32 %v1971_v38, %v1970_v27  ;;  %v2073_v20 = vadd.f32 %v2072_v42, %v2071_v12  ;;  %v1882_v10 = vadd.f32 %v3608_v52, %v1881_v23 }
 0x3e2   : > { %v2075_v5 = vadd.f32 %v2074_v39, %v2073_v20  ;;  %v1974_v14 = vadd.f32 %v1973_v25, %v1972_v54  ;;  %1919 = vst.msk [vmem:[%s3617_s13 + $0xe8] sm:$0xff] %vm1889_vm15, %v1882_v10  ;;  %v2022_v49 = vmul.f32 %v1882_v10, %v1882_v10  ;;  %v1979_v47 = vsel %vm1889_vm15, %v1882_v10, 0.0 }
 0x3e4   : > { %v1976_v31 = vadd.f32 %v1975_v59, %v1974_v14  ;;  %v2077_v34 = vadd.f32 %v2076_v7, %v2075_v5  ;;  %v2082_v41 = vsel %vm1889_vm15, %v2022_v49, 0.0 }
 0x3e6   : > { %v2079_v56 = vadd.f32 %v2078_v26, %v2077_v34  ;;  %v1978_v18 = vadd.f32 %v1977_v3, %v1976_v31 }
 0x3e8   : > { %v2081_v28 = vadd.f32 %v2080_v15, %v2079_v56  ;;  %v1980_v19 = vadd.f32 %v1979_v47, %v1978_v18 }
 0x3ea   : > { %v2083_v44 = vadd.f32 %v2082_v41, %v2081_v28 }
 0x3ee   : > { %v1884_v50 = vpop.f32.mrf.mxu3 }
 0x3ef   : > { %v1885_v16 = vadd.f32 %v3608_v52, %v1884_v50 }
 0x3f1   : > { %1920 = vst.msk [vmem:[%s3617_s13 + $0xf0] sm:$0xff] %vm1889_vm15, %v1885_v16  ;;  %v2023_v21 = vmul.f32 %v1885_v16, %v1885_v16  ;;  %v1981_v53 = vsel %vm1889_vm15, %v1885_v16, 0.0 }
 0x3f2   : > { %v1982_v37 = vadd.f32 %v1981_v53, %v1980_v19 }
 0x3f3   : > { %v2084_v2 = vsel %vm1889_vm15, %v2023_v21, 0.0 }
 0x3f4   : > { %v2085_v33 = vadd.f32 %v2084_v2, %v2083_v44 }
 0x3f6   : > { %v1886_v57 = vpop.f32.mrf.mxu3 }
 0x3f7   : > { %v1887_v29 = vadd.f32 %v3608_v52, %v1886_v57 }
 0x3f9   : > { %1921 = vst.msk [vmem:[%s3617_s13 + $0xf8] sm:$0xff] %vm1889_vm15, %v1887_v29  ;;  %v1983_v35 = vsel %vm1889_vm15, %v1887_v29, 0.0  ;;  %v2024_v55 = vmul.f32 %v1887_v29, %v1887_v29 }
 0x3fa   : > { %v1984_v22 = vadd.f32 %v1983_v35, %v1982_v37 }
 0x3fb   : > { %v2086_v8 = vsel %vm1889_vm15, %v2024_v55, 0.0 }
 0x3fc   : > { %v1985_v60 = vrot.slane %v1984_v22, 4  ;;  %v2087_v61 = vadd.f32 %v2086_v8, %v2085_v33 }
 0x3fe   : > { %v1986_v51 = vadd.f32 %v1985_v60, %v1984_v22  ;;  %v2088_v9 = vrot.slane %v2087_v61, 4 }
 0x400   : > { %v1987_v1 = vrot.slane %v1986_v51, 2  ;;  %v2089_v17 = vadd.f32 %v2088_v9, %v2087_v61 }
 0x402   : > { %v1988_v62 = vadd.f32 %v1987_v1, %v1986_v51  ;;  %v2090_v52 = vrot.slane %v2089_v17, 2 }
 0x404   : > { %v1989_v13 = vrot.slane %v1988_v62, 1  ;;  %v2091_v63 = vadd.f32 %v2090_v52, %v2089_v17 }
 0x406   : > { %v1990_v36 = vadd.f32 %v1989_v13, %v1988_v62  ;;  %v2092_v11 = vrot.slane %v2091_v63, 1 }
 0x408   : > { %1992 = vst.msk [vmem:[%s208_s19] sm:$0x1] %vm1991_vm0, %v1990_v36  ;;  %v2093_v4 = vadd.f32 %v2092_v11, %v2091_v63 }
 0x40a   : > { %2094 = vst.msk [vmem:[%s208_s19 + $0x1] sm:$0x1] %vm1991_vm0, %v2093_v4 }
 0x40b PF: > { %s15_s15 = sadd.s32 1, %s2254_s15  }
 0x40c   : > { %p12_p4 = scmp.ge.s32.totalorder %s15_s15, 4  }
 0x40e   :  { %14 = sbr.rel (!%p12_p4) target bundleno = 1 (0x1), region = 76 }

// kernel: double_conv.4
= control target key start
LH: loop header
LB: loop body
LE: loop exit
PB: predicated region body
PF: predicated region fallthrough
CT: control target
= control target key end

     0   :  { %s2494_s21 = smov 0   ;;  %s4271_s0 = inlined_call_operand.vmem [shape: f32[2,16,16,8], index: 0, kind: input, shape index: {}]   ;;  %s4272_s1 = inlined_call_operand.vmem [shape: f32[1,8], index: 1, kind: input, shape index: {}]   ;;  %s4273_s2 = inlined_call_operand.vmem [shape: f32[1,8], index: 2, kind: input, shape index: {}]   ;;  %s4274_s3 = inlined_call_operand.vmem [shape: bf16[72,8], index: 3, kind: input, shape index: {}]   ;;  %s4275_s4 = inlined_call_operand.vmem [shape: f32[1,8], index: 4, kind: input, shape index: {}]   ;;  %s4276_s5 = inlined_call_operand.vmem [shape: f32[2,16,16,8], index: 5, kind: output, shape index: {0}]   ;;  %s4277_s6 = inlined_call_operand.vmem [shape: f32[2,2,8], index: 6, kind: output, shape index: {1}]  }
   0x1 LB: > { %s2353_s22 = sadd.s32 4294967295, %s2448_s21   ;;  %p2357_p0 = scmp.ge.s32.totalorder %s2448_s21, 1  ;;  %s2448_s21 = sphi %s2494_s21, %s17_s21  }
   0x2   : > { %p215_p1 = scmp.lt.s32.totalorder %s2448_s21, 3 }
   0x4   : > { %p216_p2 = pnand %p2357_p0, %p215_p1 }
   0x6   : > { %219 = sbr.rel (%p216_p2) target bundleno = 1030 (0x406), region = 40 }
   0xb   : > { %vm400_vm0 = vcmask 64512   ;;  %vm409_vm1 = vcmask 57344   ;;  %v2450_v0 = vmov 0.0   ;;  %vm613_vm2 = vcmask 1046528   ;;  %s2451_s23 = smov 8   ;;  %p249_p3 = scmp.lt.s32.totalorder %s2353_s22, 1 }
   0xc   : > { %401 = vst.msk [vmem:[#allocation2] sm:$0xff] %vm400_vm0, %v2450_v0  ;;  %v2585_v6 = vld [vmem:[%s4272_s1] ss:$0 sm:$0xff]  ;;  %vm403_vm3 = vcmask 58368   ;;  %vm823_vm4 = vcmask 1045504   ;;  %vm790_vm5 = vcmask 130112  }
   0xd   : > { %402 = vst.msk [vmem:[#allocation2 + $0x8] sm:$0xff] %vm400_vm0, %v2450_v0  ;;  %s4494_s22 = smov (!%p249_p3, %s2353_s22), 1  ;;  %v2601_v10 = vld [vmem:[%s4273_s2] ss:$0 sm:$0xff]  ;;  %s2452_s8 = smov 16   ;;  %vm1000_vm6 = vcmask 195712  }
   0xe   : > { %410 = vst.msk [vmem:[#allocation2] sm:$0x1] %vm409_vm1, %v2450_v0  ;;  %s2397_s24 = sshll.u32 %s4494_s22, 8  ;;  %s2453_s9 = smov 24   ;;  %vm1131_vm7 = vcmask 261312   ;;  %vm1266_vm8 = vcmask 326912  }
   0xf   : > { %406 = vst.msk [vmem:[#allocation2 + $0x198] sm:$0xff] %vm400_vm0, %v2450_v0  ;;  %s2576_s27 = scalar_lea.vmem %s4271_s0, %s2397_s24  ;;  %s2454_s14 = smov 32   ;;  %vm1400_vm9 = vcmask 392512   ;;  %vm1970_vm10 = vcmask 1043456   ;;  %vm1531_vm11 = vcmask 458112   ;;  %vm1666_vm12 = vcmask 523712  }
  0x10   : > { %407 = vst.msk [vmem:[#allocation2 + $0x1a0] sm:$0xff] %vm400_vm0, %v2450_v0  ;;  %v266_v7 = vld [vmem:[%s2576_s27] sm:$0xff]  ;;  %v267_v8 = vld [vmem:[%s2576_s27 + $0x8] sm:$0xff]  ;;  %v272_v14 = vld [vmem:[%s2576_s27 + $0x30] sm:$0xff]  ;;  %s2455_s15 = smov 40   ;;  %s2456_s16 = smov 48  }
  0x11   : > { %411 = vst.msk [vmem:[#allocation2 + $0x18] sm:$0x1] %vm409_vm1, %v2450_v0  ;;  %v301_v9 = vmul.f32 %v2585_v6, %v266_v7  ;;  %v270_v11 = vld [vmem:[%s2576_s27 + $0x20] sm:$0xff]  ;;  %v302_v12 = vmul.f32 %v2585_v6, %v267_v8  ;;  %v271_v13 = vld [vmem:[%s2576_s27 + $0x28] sm:$0xff]  ;;  %v273_v16 = vld [vmem:[%s2576_s27 + $0x38] sm:$0xff]  ;;  %v307_v21 = vmul.f32 %v2585_v6, %v272_v14  ;;  %s2457_s17 = smov 56   ;;  %s3969_s12 = scalar_lea.vmem %s4276_s5, %s2397_s24 }
  0x12   : > { %412 = vst.msk [vmem:[#allocation2 + $0x30] sm:$0x1] %vm409_vm1, %v2450_v0  ;;  %v305_v15 = vmul.f32 %v2585_v6, %v270_v11  ;;  %v306_v18 = vmul.f32 %v2585_v6, %v271_v13  ;;  %v276_v19 = vld [vmem:[%s2576_s27 + $0x50] sm:$0xff]  ;;  %v308_v22 = vmul.f32 %v2585_v6, %v273_v16  ;;  %v277_v24 = vld [vmem:[%s2576_s27 + $0x58] sm:$0xff]  ;;  %v274_v41 = vld [vmem:[%s2576_s27 + $0x40] sm:$0xff]  ;;  %s2458_s18 = smov 64  }
  0x13   : > { %413 = vst.msk [vmem:[#allocation2 + $0x48] sm:$0x1] %vm409_vm1, %v2450_v0  ;;  %v336_v17 = vadd.f32 %v2601_v10, %v301_v9  ;;  %v337_v20 = vadd.f32 %v2601_v10, %v302_v12  ;;  %v311_v25 = vmul.f32 %v2585_v6, %v276_v19  ;;  %v342_v29 = vadd.f32 %v2601_v10, %v307_v21  ;;  %v268_v32 = vld [vmem:[%s2576_s27 + $0x10] sm:$0xff]  ;;  %v269_v37 = vld [vmem:[%s2576_s27 + $0x18] sm:$0xff]  ;;  %v275_v45 = vld [vmem:[%s2576_s27 + $0x48] sm:$0xff]  ;;  %s2362_s24 = sshll.u32 %s4494_s22, 1 }
  0x14   : > { %v2518_v1 = vld [vmem:[#allocation2 + $0x8] sm:$0xff]  ;;  %414 = vst.msk [vmem:[#allocation2 + $0x60] sm:$0x1] %vm409_vm1, %v2450_v0  ;;  %v340_v23 = vadd.f32 %v2601_v10, %v305_v15  ;;  %v341_v27 = vadd.f32 %v2601_v10, %v306_v18  ;;  %v343_v30 = vadd.f32 %v2601_v10, %v308_v22  ;;  %v312_v31 = vmul.f32 %v2585_v6, %v277_v24  ;;  %v278_v49 = vld [vmem:[%s2576_s27 + $0x60] sm:$0xff]  ;;  %v280_v18 = vld [vmem:[%s2576_s27 + $0x70] sm:$0xff] }
  0x15   : > { %v2522_v2 = vld [vmem:[#allocation2] sm:$0xff]  ;;  %v615_v3 = vrot.slane %v2518_v1, 1  ;;  %415 = vst.msk [vmem:[#allocation2 + $0x78] sm:$0x1] %vm409_vm1, %v2450_v0  ;;  %v368_v26 = vmax.f32 %v336_v17, 0.0  ;;  %v369_v28 = vmax.f32 %v337_v20, 0.0  ;;  %v346_v34 = vadd.f32 %v2601_v10, %v311_v25 }
  0x16   : > { %v614_v4 = vrot.slane %v2522_v2, 1  ;;  %416 = vst.msk [vmem:[#allocation2 + $0x90] sm:$0x1] %vm409_vm1, %v2450_v0  ;;  %v372_v33 = vmax.f32 %v340_v23, 0.0  ;;  %v373_v35 = vmax.f32 %v341_v27, 0.0  ;;  %v374_v36 = vmax.f32 %v342_v29, 0.0 }
  0x17   : > { %417 = vst.msk [vmem:[#allocation2 + $0xa8] sm:$0x1] %vm409_vm1, %v2450_v0  ;;  %v303_v38 = vmul.f32 %v2585_v6, %v268_v32  ;;  %v375_v39 = vmax.f32 %v343_v30, 0.0  ;;  %v347_v40 = vadd.f32 %v2601_v10, %v312_v31  ;;  %v378_v42 = vmax.f32 %v346_v34, 0.0  ;;  %v279_v54 = vld [vmem:[%s2576_s27 + $0x68] sm:$0xff]  ;;  %v282_v59 = vld [vmem:[%s2576_s27 + $0x80] sm:$0xff] }
  0x18   : > { %v616_v5 = vsel %vm613_vm2, %v614_v4, %v615_v3  ;;  %418 = vst.msk [vmem:[#allocation2 + $0xc0] sm:$0x1] %vm409_vm1, %v2450_v0  ;;  %v304_v44 = vmul.f32 %v2585_v6, %v269_v37  ;;  %v309_v48 = vmul.f32 %v2585_v6, %v274_v41  ;;  %v310_v53 = vmul.f32 %v2585_v6, %v275_v45  ;;  %v283_v9 = vld [vmem:[%s2576_s27 + $0x88] sm:$0xff]  ;;  %v281_v32 = vld [vmem:[%s2576_s27 + $0x78] sm:$0xff] }
  0x19   : > { %694 = vrot.lane.b32.xlu0 %v616_v5, %s2451_s23  ;;  %419 = vst.msk [vmem:[#allocation2 + $0xd8] sm:$0x1] %vm409_vm1, %v2450_v0  ;;  %v338_v47 = vadd.f32 %v2601_v10, %v303_v38  ;;  %v379_v50 = vmax.f32 %v347_v40, 0.0  ;;  %v313_v58 = vmul.f32 %v2585_v6, %v278_v49  ;;  %v317_v11 = vmul.f32 %v2585_v6, %v282_v59  ;;  %v285_v41 = vld [vmem:[%s2576_s27 + $0x98] sm:$0xff] }
  0x1a   : > { %420 = vst.msk [vmem:[#allocation2 + $0xf0] sm:$0x1] %vm409_vm1, %v2450_v0  ;;  %v339_v57 = vadd.f32 %v2601_v10, %v304_v44  ;;  %v344_v62 = vadd.f32 %v2601_v10, %v309_v48  ;;  %v345_v8 = vadd.f32 %v2601_v10, %v310_v53  ;;  %v318_v23 = vmul.f32 %v2585_v6, %v283_v9 }
  0x1b   : > { %421 = vst.msk [vmem:[#allocation2 + $0x108] sm:$0x1] %vm409_vm1, %v2450_v0  ;;  %v370_v61 = vmax.f32 %v338_v47, 0.0  ;;  %v348_v14 = vadd.f32 %v2601_v10, %v313_v58  ;;  %v352_v25 = vadd.f32 %v2601_v10, %v317_v11  ;;  %v315_v27 = vmul.f32 %v2585_v6, %v280_v18 }
  0x1c   : > { %422 = vst.msk [vmem:[#allocation2 + $0x120] sm:$0x1] %vm409_vm1, %v2450_v0  ;;  %v371_v13 = vmax.f32 %v339_v57, 0.0  ;;  %v376_v17 = vmax.f32 %v344_v62, 0.0  ;;  %v377_v24 = vmax.f32 %v345_v8, 0.0  ;;  %vm1800_vm13 = vcmask 589312  }
  0x1d   : > { %423 = vst.msk [vmem:[#allocation2 + $0x138] sm:$0x1] %vm409_vm1, %v2450_v0  ;;  %v384_v37 = vmax.f32 %v352_v25, 0.0  ;;  %v350_v40 = vadd.f32 %v2601_v10, %v315_v27  ;;  %vm1921_vm14 = vcmask 588800  }
  0x1e   : > { %424 = vst.msk [vmem:[#allocation2 + $0x150] sm:$0x1] %vm409_vm1, %v2450_v0 }
  0x1f   : > { %425 = vst.msk [vmem:[#allocation2 + $0x168] sm:$0x1] %vm409_vm1, %v2450_v0  ;;  %v382_v57 = vmax.f32 %v350_v40, 0.0 }
  0x20   : > { %426 = vst.msk [vmem:[#allocation2 + $0x180] sm:$0x1] %vm409_vm1, %v2450_v0 }
  0x21   : > { %429 = vst.msk [vmem:[#allocation2 + $0x29] sm:$0x1] %vm409_vm1, %v2450_v0 }
  0x22   : > { %430 = vst.msk [vmem:[#allocation2 + $0x41] sm:$0x1] %vm409_vm1, %v2450_v0 }
  0x23   : > { %431 = vst.msk [vmem:[#allocation2 + $0x59] sm:$0x1] %vm409_vm1, %v2450_v0 }
  0x24   : > { %432 = vst.msk [vmem:[#allocation2 + $0x71] sm:$0x1] %vm409_vm1, %v2450_v0 }
  0x25   : > { %433 = vst.msk [vmem:[#allocation2 + $0x89] sm:$0x1] %vm409_vm1, %v2450_v0 }
  0x26   : > { %434 = vst.msk [vmem:[#allocation2 + $0xa1] sm:$0x1] %vm409_vm1, %v2450_v0 }
  0x27   : > { %435 = vst.msk [vmem:[#allocation2 + $0xb9] sm:$0x1] %vm409_vm1, %v2450_v0 }
  0x28   : > { %436 = vst.msk [vmem:[#allocation2 + $0xd1] sm:$0x1] %vm409_vm1, %v2450_v0 }
  0x29   : > { %437 = vst.msk [vmem:[#allocation2 + $0xe9] sm:$0x1] %vm409_vm1, %v2450_v0 }
  0x2a   : > { %438 = vst.msk [vmem:[#allocation2 + $0x101] sm:$0x1] %vm409_vm1, %v2450_v0 }
  0x2b   : > { %439 = vst.msk [vmem:[#allocation2 + $0x119] sm:$0x1] %vm409_vm1, %v2450_v0 }
  0x2c   : > { %440 = vst.msk [vmem:[#allocation2 + $0x131] sm:$0x1] %vm409_vm1, %v2450_v0 }
  0x2d   : > { %441 = vst.msk [vmem:[#allocation2 + $0x149] sm:$0x1] %vm409_vm1, %v2450_v0 }
  0x2e   : > { %442 = vst.msk [vmem:[#allocation2 + $0x161] sm:$0x1] %vm409_vm1, %v2450_v0 }
  0x2f   : > { %443 = vst.msk [vmem:[#allocation2 + $0x179] sm:$0x1] %vm409_vm1, %v2450_v0 }
  0x30   : > { %444 = vst.msk [vmem:[#allocation2 + $0x191] sm:$0x1] %vm409_vm1, %v2450_v0 }
  0x31   : > { %533 = vst.msk [vmem:[#allocation3] sm:$0xff] %vm400_vm0, %v2522_v2 }
  0x32   : > { %534 = vst.msk [vmem:[#allocation3 + $0x8] sm:$0xff] %vm400_vm0, %v2518_v1 }
  0x33   : > { %404 = vst.msk [vmem:[#allocation2 + $0x10] sm:$0x3] %vm403_vm3, %v2450_v0 }
  0x34   : > { %428 = vst.msk [vmem:[#allocation2 + $0x11] sm:$0x1] %vm409_vm1, %v2450_v0 }
  0x35   : > { %408 = vst.msk [vmem:[#allocation2 + $0x1a8] sm:$0x3] %vm403_vm3, %v2450_v0 }
  0x36   : > { %427 = vst.msk [vmem:[#allocation2 + $0x198] sm:$0x1] %vm409_vm1, %v2450_v0 }
  0x37   : > { %447 = vst.msk [vmem:[#allocation2 + $0x19] sm:$0xff] %vm400_vm0, %v368_v26  ;;  %v380_v26 = vmax.f32 %v348_v14, 0.0  ;;  %v287_v14 = vld [vmem:[%s2576_s27 + $0xa8] sm:$0xff] }
  0x38   : > { %448 = vst.msk [vmem:[#allocation2 + $0x21] sm:$0xff] %vm400_vm0, %v369_v28 }
  0x39   : > { %445 = vst.msk [vmem:[#allocation2 + $0x1a9] sm:$0x1] %vm409_vm1, %v2450_v0 }
  0x3a   : > { %451 = vst.msk [vmem:[#allocation2 + $0x49] sm:$0xff] %vm400_vm0, %v372_v33 }
  0x3b   : > { %v2653_v43 = vld [vmem:[#allocation2 + $0x10] sm:$0x3]  ;;  %452 = vst.msk [vmem:[#allocation2 + $0x51] sm:$0xff] %vm400_vm0, %v373_v35  ;;  %v353_v35 = vadd.f32 %v2601_v10, %v318_v23 }
  0x3c   : > { %v617_v46 = vrot.slane %v2653_v43, 1  ;;  %453 = vst.msk [vmem:[#allocation2 + $0x61] sm:$0xff] %vm400_vm0, %v374_v36  ;;  %v284_v36 = vld [vmem:[%s2576_s27 + $0x90] sm:$0xff] }
  0x3d   : > { %454 = vst.msk [vmem:[#allocation2 + $0x69] sm:$0xff] %vm400_vm0, %v375_v39  ;;  %v316_v39 = vmul.f32 %v2585_v6, %v281_v32  ;;  %v319_v45 = vmul.f32 %v2585_v6, %v284_v36  ;;  %v385_v48 = vmax.f32 %v353_v35, 0.0  ;;  %v322_v35 = vmul.f32 %v2585_v6, %v287_v14  ;;  %v290_v36 = vld [vmem:[%s2576_s27 + $0xc0] sm:$0xff] }
  0x3e   : > { %v618_v51 = vsel %vm613_vm2, %v615_v3, %v617_v46  ;;  %v2667_v52 = vld [vmem:[#allocation2 + $0x18] sm:$0xff]  ;;  %457 = vst.msk [vmem:[#allocation2 + $0x91] sm:$0xff] %vm400_vm0, %v378_v42  ;;  %v314_v3 = vmul.f32 %v2585_v6, %v279_v54  ;;  %v288_v46 = vld [vmem:[%s2576_s27 + $0xb0] sm:$0xff] }
  0x3f   : > { %696 = vrot.lane.b32.xlu0 %v618_v51, %s2451_s23  ;;  %v2673_v55 = vld [vmem:[#allocation2 + $0x20] sm:$0xff]  ;;  %v619_v56 = vrot.slane %v2667_v52, 1  ;;  %535 = vst.msk [vmem:[#allocation3 + $0x10] sm:$0xff] %vm400_vm0, %v2667_v52  ;;  %v2687_v0 = vld [vmem:[#allocation2 + $0x28] sm:$0x3]  ;;  %v289_v51 = vld [vmem:[%s2576_s27 + $0xb8] sm:$0xff]  ;;  %v323_v58 = vmul.f32 %v2585_v6, %v288_v46 }
  0x40   : > { %v620_v60 = vrot.slane %v2673_v55, 1  ;;  %536 = vst.msk [vmem:[#allocation3 + $0x18] sm:$0xff] %vm400_vm0, %v2673_v55  ;;  %v622_v15 = vrot.slane %v2687_v0, 1  ;;  %v349_v22 = vadd.f32 %v2601_v10, %v314_v3  ;;  %v354_v3 = vadd.f32 %v2601_v10, %v319_v45  ;;  %v291_v45 = vld [vmem:[%s2576_s27 + $0xc8] sm:$0xff] }
  0x41   : > { %v2685_v63 = vld [vmem:[#allocation2 + $0x48] sm:$0xff]  ;;  %458 = vst.msk [vmem:[#allocation2 + $0x99] sm:$0xff] %vm400_vm0, %v379_v50  ;;  %v320_v50 = vmul.f32 %v2585_v6, %v285_v41  ;;  %v324_v11 = vmul.f32 %v2585_v6, %v289_v51  ;;  %v358_v18 = vadd.f32 %v2601_v10, %v323_v58  ;;  %v325_v51 = vmul.f32 %v2585_v6, %v290_v36  ;;  %v293_v36 = vld [vmem:[%s2576_s27 + $0xd8] sm:$0xff] }
  0x42   : > { %v2692_v4 = vsel %vm613_vm2, %v619_v56, %v620_v60  ;;  %v2694_v5 = vld [vmem:[#allocation2 + $0x50] sm:$0xff]  ;;  %v629_v7 = vrot.slane %v2685_v63, 1  ;;  %539 = vst.msk [vmem:[#allocation3 + $0x30] sm:$0xff] %vm400_vm0, %v2685_v63  ;;  %v2732_v28 = vsel %vm613_vm2, %v620_v60, %v622_v15  ;;  %v2740_v33 = vld [vmem:[#allocation2 + $0x58] sm:$0x3]  ;;  %v381_v34 = vmax.f32 %v349_v22, 0.0 }
  0x43   : > { %698 = vrot.lane.b32.xlu1 %v2692_v4, %s2451_s23  ;;  %v630_v12 = vrot.slane %v2694_v5, 1  ;;  %540 = vst.msk [vmem:[#allocation3 + $0x38] sm:$0xff] %vm400_vm0, %v2694_v5  ;;  %v632_v44 = vrot.slane %v2740_v33, 1  ;;  %v351_v56 = vadd.f32 %v2601_v10, %v316_v39  ;;  %v386_v27 = vmax.f32 %v354_v3, 0.0 }
  0x44   : > { %v2709_v16 = vld [vmem:[#allocation2 + $0x68] sm:$0xff]  ;;  %449 = vst.msk [vmem:[#allocation2 + $0x31] sm:$0xff] %vm400_vm0, %v370_v61  ;;  %v2716_v20 = vld [vmem:[#allocation2 + $0x70] sm:$0x3]  ;;  %v390_v41 = vmax.f32 %v358_v18, 0.0  ;;  %v326_v58 = vmul.f32 %v2585_v6, %v291_v45 }
  0x45   : > { %v2714_v19 = vsel %vm613_vm2, %v629_v7, %v630_v12  ;;  %542 = vst.msk [vmem:[#allocation3 + $0x48] sm:$0xff] %vm400_vm0, %v2709_v16  ;;  %v2720_v21 = vld [vmem:[#allocation2 + $0x90] sm:$0xff]  ;;  %v635_v29 = vrot.slane %v2709_v16, 1  ;;  %v637_v30 = vrot.slane %v2716_v20, 1  ;;  %v2782_v59 = vsel %vm613_vm2, %v630_v12, %v632_v44  ;;  %v286_v7 = vld [vmem:[%s2576_s27 + $0xa0] sm:$0xff] }
  0x46   : > { %545 = vst.msk [vmem:[#allocation3 + $0x60] sm:$0xff] %vm400_vm0, %v2720_v21  ;;  %v644_v60 = vrot.slane %v2720_v21, 1  ;;  %v2803_v12 = vld [vmem:[#allocation2 + $0x60] sm:$0xff]  ;;  %v321_v22 = vmul.f32 %v2585_v6, %v286_v7 }
  0x47   : > { %706 = vrot.lane.b32.xlu0 %v2714_v19, %s2451_s23  ;;  %450 = vst.msk [vmem:[#allocation2 + $0x39] sm:$0xff] %vm400_vm0, %v371_v13  ;;  %v2758_v42 = vsel %vm613_vm2, %v635_v29, %v637_v30  ;;  %v355_v13 = vadd.f32 %v2601_v10, %v320_v50  ;;  %v634_v3 = vrot.slane %v2803_v12, 1 }
  0x48   : > { %v2736_v31 = vld [vmem:[#allocation2 + $0x98] sm:$0xff]  ;;  %455 = vst.msk [vmem:[#allocation2 + $0x79] sm:$0xff] %vm400_vm0, %v376_v17  ;;  %v383_v17 = vmax.f32 %v351_v56, 0.0  ;;  %v2840_v40 = vld [vmem:[#allocation2 + $0xa0] sm:$0x3]  ;;  %v356_v44 = vadd.f32 %v2601_v10, %v321_v22 }
  0x49   : > { %546 = vst.msk [vmem:[#allocation3 + $0x68] sm:$0xff] %vm400_vm0, %v2736_v31  ;;  %v645_v61 = vrot.slane %v2736_v31, 1 }
  0x4a   : > { %456 = vst.msk [vmem:[#allocation2 + $0x81] sm:$0xff] %vm400_vm0, %v377_v24 }
  0x4b   : > { %700 = vrot.lane.b32.xlu1 %v2732_v28, %s2451_s23  ;;  %v2749_v38 = vld [vmem:[#allocation2 + $0x30] sm:$0xff]  ;;  %459 = vst.msk [vmem:[#allocation2 + $0xa9] sm:$0xff] %vm400_vm0, %v380_v26  ;;  %v2817_v23 = vsel %vm613_vm2, %v644_v60, %v645_v61  ;;  %v647_v60 = vrot.slane %v2840_v40, 1 }
  0x4c   : > { %4372 = vst [vmem:[#allocation4_spill] sm:$0xff] %v2758_v42  ;;  %v624_v47 = vrot.slane %v2749_v38, 1 }
  0x4d   : > { %537 = vst.msk [vmem:[#allocation3 + $0x20] sm:$0xff] %vm400_vm0, %v2749_v38 }
  0x4e   : > { %460 = vst.msk [vmem:[#allocation2 + $0xb1] sm:$0xff] %vm400_vm0, %v381_v34  ;;  %v2767_v49 = vld [vmem:[#allocation2 + $0x38] sm:$0xff]  ;;  %v2788_v62 = vld [vmem:[#allocation2 + $0x40] sm:$0x3]  ;;  %v359_v34 = vadd.f32 %v2601_v10, %v324_v11  ;;  %v295_v11 = vld [vmem:[%s2576_s27 + $0xe8] sm:$0xff] }
  0x4f   : > { %463 = vst.msk [vmem:[#allocation2 + $0xd9] sm:$0xff] %vm400_vm0, %v384_v37  ;;  %712 = vrot.lane.b32.xlu0 %v2758_v42, %s2451_s23  ;;  %v625_v53 = vrot.slane %v2767_v49, 1  ;;  %v2777_v54 = vld [vmem:[#allocation2 + $0x78] sm:$0xff]  ;;  %v627_v15 = vrot.slane %v2788_v62, 1  ;;  %v387_v37 = vmax.f32 %v355_v13, 0.0 }
  0x50   : > { %538 = vst.msk [vmem:[#allocation3 + $0x28] sm:$0xff] %vm400_vm0, %v2767_v49  ;;  %v639_v24 = vrot.slane %v2777_v54, 1  ;;  %v391_v56 = vmax.f32 %v359_v34, 0.0  ;;  %v361_v34 = vadd.f32 %v2601_v10, %v326_v58 }
  0x51   : > { %4373 = vst [vmem:[#allocation5_spill] sm:$0xff] %v2782_v59  ;;  %v2793_v8 = vsel %vm613_vm2, %v624_v47, %v625_v53  ;;  %v2795_v9 = vld [vmem:[#allocation2 + $0x80] sm:$0xff]  ;;  %v2838_v39 = vsel %vm613_vm2, %v625_v53, %v627_v15  ;;  %v388_v15 = vmax.f32 %v356_v44, 0.0 }
  0x52   : > { %543 = vst.msk [vmem:[#allocation3 + $0x50] sm:$0xff] %vm400_vm0, %v2777_v54  ;;  %702 = vrot.lane.b32.xlu2 %v2793_v8, %s2451_s23  ;;  %v640_v25 = vrot.slane %v2795_v9, 1  ;;  %v294_v53 = vld [vmem:[%s2576_s27 + $0xe0] sm:$0xff]  ;;  %v2882_v18 = vld [vmem:[#allocation2 + $0xa8] sm:$0xff]  ;;  %v393_v58 = vmax.f32 %v361_v34, 0.0 }
  0x53   : > { %4374 = vst [vmem:[#allocation6_spill] sm:$0xff] %v2793_v8  ;;  %708 = vrot.lane.b32.xlu1 %v2782_v59, %s2451_s23  ;;  %v329_v13 = vmul.f32 %v2585_v6, %v294_v53 }
  0x54   : > { %464 = vst.msk [vmem:[#allocation2 + $0xe1] sm:$0xff] %vm400_vm0, %v385_v48  ;;  %v2848_v46 = vsel %vm613_vm2, %v639_v24, %v640_v25  ;;  %v292_v24 = vld [vmem:[%s2576_s27 + $0xd0] sm:$0xff] }
  0x55   : > { %544 = vst.msk [vmem:[#allocation3 + $0x58] sm:$0xff] %vm400_vm0, %v2795_v9  ;;  %v2821_v26 = vld [vmem:[#allocation2 + $0xb0] sm:$0xff]  ;;  %v2824_v30 = vld [vmem:[#allocation2 + $0xb8] sm:$0x3]  ;;  %v364_v44 = vadd.f32 %v2601_v10, %v329_v13  ;;  %v327_v53 = vmul.f32 %v2585_v6, %v292_v24 }
  0x56   : > { %541 = vst.msk [vmem:[#allocation3 + $0x40] sm:$0xff] %vm400_vm0, %v2803_v12  ;;  %v2828_v32 = vld [vmem:[#allocation2 + $0xd8] sm:$0xff]  ;;  %v650_v47 = vrot.slane %v2821_v26, 1  ;;  %v652_v48 = vrot.slane %v2824_v30, 1 }
  0x57   : > { %4375 = vst [vmem:[#allocation7_spill] sm:$0xff] %v2817_v23  ;;  %718 = vrot.lane.b32.xlu0 %v2817_v23, %s2451_s23  ;;  %v659_v45 = vrot.slane %v2828_v32, 1 }
  0x58   : > { %461 = vst.msk [vmem:[#allocation2 + $0xc1] sm:$0xff] %vm400_vm0, %v382_v57  ;;  %v357_v57 = vadd.f32 %v2601_v10, %v322_v35  ;;  %v2876_v14 = vsel %vm613_vm2, %v650_v47, %v652_v48  ;;  %v330_v35 = vmul.f32 %v2585_v6, %v295_v11 }
  0x59   : > { %548 = vst.msk [vmem:[#allocation3 + $0x78] sm:$0xff] %vm400_vm0, %v2821_v26 }
  0x5a   : > { %4376 = vst [vmem:[#allocation8_spill] sm:$0xff] %v2828_v32  ;;  %704 = vrot.lane.b32.xlu2 %v2838_v39, %s2451_s23  ;;  %v389_v22 = vmax.f32 %v357_v57, 0.0 }
  0x5b   : > { %551 = vst.msk [vmem:[#allocation3 + $0x90] sm:$0xff] %vm400_vm0, %v2828_v32  ;;  %v2852_v50 = vld [vmem:[#allocation2 + $0xe0] sm:$0xff]  ;;  %714 = vrot.lane.b32.xlu1 %v2848_v46, %s2451_s23 }
  0x5c   : > { %462 = vst.msk [vmem:[#allocation2 + $0xc9] sm:$0xff] %vm400_vm0, %v383_v17  ;;  %v360_v17 = vadd.f32 %v2601_v10, %v325_v51  ;;  %v660_v48 = vrot.slane %v2852_v50, 1  ;;  %v2909_v51 = vld [vmem:[#allocation2 + $0x88] sm:$0x3] }
  0x5d   : > { %4377 = vst [vmem:[#allocation9_spill] sm:$0xff] %v2848_v46 }
  0x5e   : > { %4378 = vst [vmem:[#allocation10_spill] sm:$0xff] %v2852_v50  ;;  %v2930_v11 = vsel %vm613_vm2, %v659_v45, %v660_v48 }
  0x5f   : > { %465 = vst.msk [vmem:[#allocation2 + $0xf1] sm:$0xff] %vm400_vm0, %v386_v27  ;;  %v2868_v7 = vld [vmem:[#allocation2 + $0xc0] sm:$0xff]  ;;  %724 = vrot.lane.b32.xlu0 %v2876_v14, %s2451_s23 }
  0x60   : > { %552 = vst.msk [vmem:[#allocation3 + $0x98] sm:$0xff] %vm400_vm0, %v2852_v50  ;;  %v654_v13 = vrot.slane %v2868_v7, 1 }
  0x61   : > { %466 = vst.msk [vmem:[#allocation2 + $0xf9] sm:$0xff] %vm400_vm0, %v387_v37  ;;  %v2897_v37 = vsel %vm613_vm2, %v645_v61, %v647_v60  ;;  %v392_v61 = vmax.f32 %v360_v17, 0.0  ;;  %v365_v60 = vadd.f32 %v2601_v10, %v330_v35 }
  0x62   : > { %469 = vst.msk [vmem:[#allocation2 + $0x121] sm:$0xff] %vm400_vm0, %v390_v41  ;;  %v2902_v41 = vsel %vm613_vm2, %v634_v3, %v635_v29  ;;  %v328_v29 = vmul.f32 %v2585_v6, %v293_v36  ;;  %v642_v3 = vrot.slane %v2909_v51, 1  ;;  %v396_v6 = vmax.f32 %v364_v44, 0.0 }
  0x63   : > { %4379 = vst [vmem:[#allocation11_spill] sm:$0xff] %v2876_v14  ;;  %v2885_v27 = vld [vmem:[#allocation2 + $0xc8] sm:$0xff]  ;;  %710 = vrot.lane.b32.xlu2 %v2902_v41, %s2451_s23  ;;  %720 = vrot.lane.b32.xlu1 %v2897_v37, %s2451_s23  ;;  %v397_v35 = vmax.f32 %v365_v60, 0.0 }
  0x64   : > { %549 = vst.msk [vmem:[#allocation3 + $0x80] sm:$0xff] %vm400_vm0, %v2868_v7  ;;  %v363_v34 = vadd.f32 %v2601_v10, %v328_v29  ;;  %v2949_v36 = vsel %vm613_vm2, %v640_v25, %v642_v3  ;;  %v649_v3 = vrot.slane %v2882_v18, 1 }
  0x65   : > { %470 = vst.msk [vmem:[#allocation2 + $0x129] sm:$0xff] %vm400_vm0, %v391_v56 }
  0x66   : > { %547 = vst.msk [vmem:[#allocation3 + $0x70] sm:$0xff] %vm400_vm0, %v2882_v18  ;;  %v395_v25 = vmax.f32 %v363_v34, 0.0  ;;  %v2970_v60 = vld [vmem:[#allocation2 + $0xf0] sm:$0xff] }
  0x67   : > { %4380 = vst [vmem:[#allocation12_spill] sm:$0xff] %v2897_v37  ;;  %730 = vrot.lane.b32.xlu0 %v2930_v11, %s2451_s23 }
  0x68   : > { %550 = vst.msk [vmem:[#allocation3 + $0x88] sm:$0xff] %vm400_vm0, %v2885_v27  ;;  %v2913_v56 = vld [vmem:[#allocation2 + $0xf8] sm:$0xff]  ;;  %v2938_v24 = vld [vmem:[#allocation2 + $0x100] sm:$0x3] }
  0x69   : > { %467 = vst.msk [vmem:[#allocation2 + $0x109] sm:$0xff] %vm400_vm0, %v388_v15  ;;  %v2921_v57 = vld [vmem:[#allocation2 + $0x120] sm:$0xff]  ;;  %v655_v15 = vrot.slane %v2885_v27, 1 }
  0x6a   : > { %468 = vst.msk [vmem:[#allocation2 + $0x111] sm:$0xff] %vm400_vm0, %v389_v22  ;;  %v362_v22 = vadd.f32 %v2601_v10, %v327_v53  ;;  %v665_v10 = vrot.slane %v2913_v56, 1 }
  0x6b   : > { %554 = vst.msk [vmem:[#allocation3 + $0xa8] sm:$0xff] %vm400_vm0, %v2913_v56  ;;  %v2955_v45 = vsel %vm613_vm2, %v654_v13, %v655_v15  ;;  %716 = vrot.lane.b32.xlu2 %v2949_v36, %s2451_s23 }
  0x6c   : > { %4381 = vst [vmem:[#allocation13_spill] sm:$0xff] %v2921_v57  ;;  %v2934_v17 = vld [vmem:[#allocation2 + $0x128] sm:$0xff]  ;;  %v394_v29 = vmax.f32 %v362_v22, 0.0  ;;  %726 = vrot.lane.b32.xlu1 %v2955_v45, %s2451_s23 }
  0x6d   : > { %557 = vst.msk [vmem:[#allocation3 + $0xc0] sm:$0xff] %vm400_vm0, %v2921_v57 }
  0x6e   : > { %4382 = vst [vmem:[#allocation14_spill] sm:$0xff] %v2930_v11 }
  0x6f   : > { %4383 = vst [vmem:[#allocation15_spill] sm:$0xff] %v2934_v17 }
  0x70   : > { %471 = vst.msk [vmem:[#allocation2 + $0x139] sm:$0xff] %vm400_vm0, %v392_v61  ;;  %v2951_v44 = vld [vmem:[#allocation2 + $0x108] sm:$0xff]  ;;  %v667_v61 = vrot.slane %v2938_v24, 1 }
  0x71   : > { %558 = vst.msk [vmem:[#allocation3 + $0xc8] sm:$0xff] %vm400_vm0, %v2934_v17  ;;  %v2959_v53 = vld [vmem:[#allocation2 + $0x110] sm:$0xff]  ;;  %v3064_v8 = vld [vmem:[#allocation2 + $0x118] sm:$0x3] }
  0x72   : > { %472 = vst.msk [vmem:[#allocation2 + $0x141] sm:$0xff] %vm400_vm0, %v393_v58  ;;  %v2963_v58 = vld [vmem:[#allocation2 + $0xe8] sm:$0x3] }
  0x73   : > { %4384 = vst [vmem:[#allocation16_spill] sm:$0xff] %v2949_v36  ;;  %v662_v13 = vrot.slane %v2963_v58, 1 }
  0x74   : > { %475 = vst.msk [vmem:[#allocation2 + $0x169] sm:$0xff] %vm400_vm0, %v396_v6  ;;  %v2978_v6 = vsel %vm613_vm2, %v665_v10, %v667_v61 }
  0x75   : > { %4385 = vst [vmem:[#allocation17_spill] sm:$0xff] %v2955_v45  ;;  %736 = vrot.lane.b32.xlu0 %v2978_v6, %s2451_s23  ;;  %v2999_v61 = vsel %vm613_vm2, %v660_v48, %v662_v13  ;;  %v3003_v45 = vld [vmem:[#allocation2 + $0xd0] sm:$0x3]  ;;  %v669_v13 = vrot.slane %v2951_v44, 1 }
  0x76   : > { %555 = vst.msk [vmem:[#allocation3 + $0xb0] sm:$0xff] %vm400_vm0, %v2951_v44  ;;  %732 = vrot.lane.b32.xlu1 %v2999_v61, %s2451_s23 }
  0x77   : > { %556 = vst.msk [vmem:[#allocation3 + $0xb8] sm:$0xff] %vm400_vm0, %v2959_v53 }
  0x78   : > { %476 = vst.msk [vmem:[#allocation2 + $0x171] sm:$0xff] %vm400_vm0, %v397_v35  ;;  %v2994_v35 = vsel %vm613_vm2, %v649_v3, %v650_v47  ;;  %v657_v47 = vrot.slane %v3003_v45, 1 }
  0x79   : > { %553 = vst.msk [vmem:[#allocation3 + $0xa0] sm:$0xff] %vm400_vm0, %v2970_v60  ;;  %v2982_v22 = vld [vmem:[#allocation2 + $0x140] sm:$0xff]  ;;  %722 = vrot.lane.b32.xlu2 %v2994_v35, %s2451_s23  ;;  %v3025_v14 = vld [vmem:[#allocation2 + $0x148] sm:$0x3] }
  0x7a   : > { %4386 = vst [vmem:[#allocation18_spill] sm:$0xff] %v2978_v6  ;;  %v670_v6 = vrot.slane %v2959_v53, 1  ;;  %v680_v23 = vrot.slane %v2982_v22, 1  ;;  %v682_v59 = vrot.slane %v3025_v14, 1 }
  0x7b   : > { %473 = vst.msk [vmem:[#allocation2 + $0x151] sm:$0xff] %vm400_vm0, %v394_v29  ;;  %v2987_v34 = vld [vmem:[#allocation2 + $0x168] sm:$0xff]  ;;  %v674_v29 = vrot.slane %v2921_v57, 1 }
  0x7c   : > { %4387 = vst [vmem:[#allocation19_spill] sm:$0xff] %v2982_v22  ;;  %v3039_v46 = vsel %vm613_vm2, %v669_v13, %v670_v6 }
  0x7d   : > { %474 = vst.msk [vmem:[#allocation2 + $0x159] sm:$0xff] %vm400_vm0, %v395_v25  ;;  %v675_v25 = vrot.slane %v2934_v17, 1 }
  0x7e   : > { %560 = vst.msk [vmem:[#allocation3 + $0xd8] sm:$0xff] %vm400_vm0, %v2982_v22  ;;  %738 = vrot.lane.b32.xlu1 %v3039_v46, %s2451_s23 }
  0x7f   : > { %4388 = vst [vmem:[#allocation20_spill] sm:$0xff] %v2987_v34  ;;  %v3005_v11 = vld [vmem:[#allocation2 + $0x170] sm:$0xff]  ;;  %v3017_v3 = vsel %vm613_vm2, %v674_v29, %v675_v25  ;;  %v3036_v29 = vsel %vm613_vm2, %v655_v15, %v657_v47  ;;  %v3051_v15 = vsel %vm613_vm2, %v680_v23, %v682_v59  ;;  %v672_v59 = vrot.slane %v3064_v8, 1 }
  0x80   : > { %4389 = vst [vmem:[#allocation21_spill] sm:$0xff] %v2994_v35  ;;  %742 = vrot.lane.b32.xlu0 %v3017_v3, %s2451_s23  ;;  %v3043_v35 = vld [vmem:[#allocation2 + $0x130] sm:$0x3] }
  0x81   : > { %563 = vst.msk [vmem:[#allocation3 + $0xf0] sm:$0xff] %vm400_vm0, %v2987_v34  ;;  %728 = vrot.lane.b32.xlu2 %v3036_v29, %s2451_s23  ;;  %v677_v47 = vrot.slane %v3043_v35, 1 }
  0x82   : > { %4390 = vst [vmem:[#allocation22_spill] sm:$0xff] %v2999_v61  ;;  %v3014_v48 = vld [vmem:[#allocation2 + $0x150] sm:$0xff]  ;;  %v3029_v61 = vld [vmem:[#allocation2 + $0x138] sm:$0xff] }
  0x83   : > { %4391 = vst [vmem:[#allocation23_spill] sm:$0xff] %v3005_v11  ;;  %v3060_v42 = vsel %vm613_vm2, %v675_v25, %v677_v47  ;;  %v684_v25 = vrot.slane %v3014_v48, 1  ;;  %v3079_v47 = vsel %vm613_vm2, %v670_v6, %v672_v59  ;;  %v679_v6 = vrot.slane %v3029_v61, 1 }
  0x84   : > { %564 = vst.msk [vmem:[#allocation3 + $0xf8] sm:$0xff] %vm400_vm0, %v3005_v11  ;;  %v3021_v37 = vld [vmem:[#allocation2 + $0x158] sm:$0xff]  ;;  %v3105_v36 = vld [vmem:[#allocation2 + $0x160] sm:$0x3] }
  0x85   : > { %4392 = vst [vmem:[#allocation24_spill] sm:$0xff] %v3017_v3  ;;  %v664_v3 = vrot.slane %v2970_v60, 1 }
  0x86   : > { %561 = vst.msk [vmem:[#allocation3 + $0xe0] sm:$0xff] %vm400_vm0, %v3014_v48  ;;  %744 = vrot.lane.b32.xlu1 %v3060_v42, %s2451_s23 }
  0x87   : > { %562 = vst.msk [vmem:[#allocation3 + $0xe8] sm:$0xff] %vm400_vm0, %v3021_v37  ;;  %v3057_v13 = vsel %vm613_vm2, %v664_v3, %v665_v10  ;;  %v685_v3 = vrot.slane %v3021_v37, 1 }
  0x88   : > { %4393 = vst [vmem:[#allocation25_spill] sm:$0xff] %v3029_v61  ;;  %748 = vrot.lane.b32.xlu0 %v3051_v15, %s2451_s23 }
  0x89   : > { %559 = vst.msk [vmem:[#allocation3 + $0xd0] sm:$0xff] %vm400_vm0, %v3029_v61  ;;  %734 = vrot.lane.b32.xlu2 %v3057_v13, %s2451_s23 }
  0x8a   : > { %4394 = vst [vmem:[#allocation26_spill] sm:$0xff] %v3036_v29  ;;  %v689_v29 = vrot.slane %v2987_v34, 1 }
  0x8b   : > { %4395 = vst [vmem:[#allocation27_spill] sm:$0xff] %v3039_v46  ;;  %v690_v46 = vrot.slane %v3005_v11, 1  ;;  %v695_v59 = vpop.permute.xlu0 %694 }
  0x8c   : > { %4396 = vst [vmem:[#allocation28_spill] sm:$0xff] %v3051_v15  ;;  %v3082_v15 = vsel %vm613_vm2, %v684_v25, %v685_v3 }
  0x8d   : > { %4397 = vst [vmem:[#allocation29_spill] sm:$0xff] %v3057_v13  ;;  %v3072_v10 = vsel %vm613_vm2, %v689_v29, %v690_v46  ;;  %v827_v13 = vrot.slane %v2653_v43, 2  ;;  %v3086_v29 = vld [vmem:[#allocation2 + $0x178] sm:$0x3] }
  0x8e   : > { %4398 = vst [vmem:[#allocation30_spill] sm:$0xff] %v3060_v42  ;;  %v825_v42 = vrot.slane %v2518_v1, 2  ;;  %750 = vrot.lane.b32.xlu1 %v3082_v15, %s2451_s23  ;;  %v3098_v1 = vsel %vm613_vm2, %v679_v6, %v680_v23 }
  0x8f   : > { %4399 = vst [vmem:[#allocation31_spill] sm:$0xff] %v3072_v10 }
  0x90   : > { %754 = vrot.lane.b32.xlu0 %v3072_v10, %s2451_s23  ;;  %4400 = vst [vmem:[#allocation32_spill] sm:$0xff] %v3079_v47  ;;  %v828_v25 = vsel %vm823_vm4, %v825_v42, %v827_v13  ;;  %v692_v10 = vrot.slane %v3086_v29, 1  ;;  %v687_v13 = vrot.slane %v3105_v36, 1 }
  0x91   : > { %4401 = vst [vmem:[#allocation33_spill] sm:$0xff] %v3082_v15  ;;  %740 = vrot.lane.b32.xlu2 %v3079_v47, %s2451_s23  ;;  %v834_v15 = vrot.slane %v2749_v38, 2  ;;  %v835_v47 = vrot.slane %v2767_v49, 2 }
  0x92   : > { %791 = vst.msk [vmem:[#allocation3] sm:$0xff] %vm790_vm5, %v695_v59  ;;  %v3101_v43 = vsel %vm613_vm2, %v690_v46, %v692_v10  ;;  %v829_v46 = vrot.slane %v2667_v52, 2  ;;  %v830_v10 = vrot.slane %v2673_v55, 2  ;;  %v3120_v6 = vsel %vm613_vm2, %v685_v3, %v687_v13 }
  0x93   : > { %4402 = vst [vmem:[#allocation34_spill] sm:$0xff] %v3098_v1  ;;  %v3113_v23 = vsel %vm823_vm4, %v834_v15, %v835_v47  ;;  %v824_v15 = vrot.slane %v2522_v2, 2  ;;  %v837_v3 = vrot.slane %v2788_v62, 2  ;;  %v832_v2 = vrot.slane %v2687_v0, 2 }
  0x94   : > { %4403 = vst [vmem:[#allocation35_spill] sm:$0xff] %v3101_v43  ;;  %v3123_v59 = vsel %vm823_vm4, %v829_v46, %v830_v10  ;;  %v849_v46 = vrot.slane %v2777_v54, 2  ;;  %v857_v0 = vrot.slane %v2840_v40, 2 }
  0x95   : > { %4404 = vst [vmem:[#allocation36_spill] sm:$0xff] %v3113_v23  ;;  %v826_v13 = vsel %vm823_vm4, %v824_v15, %v825_v42  ;;  %v845_v42 = vrot.slane %v2709_v16, 2 }
  0x96   : > { %756 = vrot.lane.b32.xlu1 %v3101_v43, %s2451_s23  ;;  %4405 = vst [vmem:[#allocation37_spill] sm:$0xff] %v3120_v6  ;;  %v842_v43 = vrot.slane %v2740_v33, 2  ;;  %v3140_v33 = vsel %vm823_vm4, %v835_v47, %v837_v3  ;;  %v3156_v47 = vsel %vm823_vm4, %v830_v10, %v832_v2  ;;  %v855_v3 = vrot.slane %v2736_v31, 2 }
  0x97   : > { %v852_v2 = vrot.slane %v2909_v51, 2  ;;  %v847_v51 = vrot.slane %v2716_v20, 2 }
  0x98   : > { %906 = vrot.lane.b32.xlu0 %v828_v25, %s2452_s8  ;;  %v840_v25 = vrot.slane %v2694_v5, 2 }
  0x99   : > { %746 = vrot.lane.b32.xlu2 %v3098_v1, %s2451_s23 }
  0x9e   : > { %908 = vrot.lane.b32.xlu1 %v3123_v59, %s2452_s8 }
  0xa0   : > { %912 = vrot.lane.b32.xlu0 %v3113_v23, %s2452_s8  ;;  %v3133_v23 = vsel %vm823_vm4, %v840_v25, %v842_v43  ;;  %v844_v43 = vrot.slane %v2803_v12, 2 }
  0xa1   : > { %752 = vrot.lane.b32.xlu2 %v3120_v6, %s2451_s23  ;;  %v850_v6 = vrot.slane %v2795_v9, 2 }
  0xa2   : > { %v3159_v15 = vsel %vm823_vm4, %v844_v43, %v845_v42 }
  0xa3   : > { %v3149_v62 = vsel %vm823_vm4, %v849_v46, %v850_v6  ;;  %4407 = vst [vmem:[#allocation39_spill] sm:$0xff] %v3159_v15  ;;  %v3169_v46 = vsel %vm823_vm4, %v855_v3, %v857_v0  ;;  %v3179_v43 = vsel %vm823_vm4, %v850_v6, %v852_v2 }
  0xa4   : > { %4406 = vst [vmem:[#allocation38_spill] sm:$0xff] %v3149_v62 }
  0xa5   : > { %4408 = vst [vmem:[#allocation40_spill] sm:$0xff] %v3169_v46 }
  0xa6   : > { %914 = vrot.lane.b32.xlu1 %v3140_v33, %s2452_s8  ;;  %4409 = vst [vmem:[#allocation41_spill] sm:$0xff] %v3179_v43 }
  0xa8   : > { %918 = vrot.lane.b32.xlu0 %v3133_v23, %s2452_s8 }
  0xa9   : > { %904 = vrot.lane.b32.xlu2 %v826_v13, %s2452_s8  ;;  %v839_v13 = vrot.slane %v2685_v63, 2 }
  0xab   : > { %v3176_v40 = vsel %vm823_vm4, %v839_v13, %v840_v25  ;;  %v859_v13 = vrot.slane %v2882_v18, 2 }
  0xac   : > { %v703_v10 = vpop.permute.xlu2 %702 }
  0xad   : > { %795 = vst.msk [vmem:[#allocation3 + $0x20] sm:$0xff] %vm790_vm5, %v703_v10  ;;  %v860_v10 = vrot.slane %v2821_v26, 2 }
  0xae   : > { %920 = vrot.lane.b32.xlu1 %v3159_v15, %s2452_s8  ;;  %v864_v15 = vrot.slane %v2868_v7, 2 }
  0xaf   : > { %v3202_v20 = vsel %vm823_vm4, %v859_v13, %v860_v10  ;;  %v867_v13 = vrot.slane %v3003_v45, 2  ;;  %v862_v45 = vrot.slane %v2824_v30, 2 }
  0xb0   : > { %924 = vrot.lane.b32.xlu0 %v3149_v62, %s2452_s8  ;;  %v865_v62 = vrot.slane %v2885_v27, 2  ;;  %4411 = vst [vmem:[#allocation43_spill] sm:$0xff] %v3202_v20 }
  0xb1   : > { %910 = vrot.lane.b32.xlu2 %v3156_v47, %s2452_s8  ;;  %v697_v0 = vpop.permute.xlu0 %696 }
  0xb2   : > { %792 = vst.msk [vmem:[#allocation3 + $0x8] sm:$0xff] %vm790_vm5, %v697_v0  ;;  %v3190_v25 = vsel %vm823_vm4, %v864_v15, %v865_v62  ;;  %v3199_v0 = vsel %vm823_vm4, %v845_v42, %v847_v51  ;;  %v870_v15 = vrot.slane %v2852_v50, 2 }
  0xb3   : > { %4410 = vst [vmem:[#allocation42_spill] sm:$0xff] %v3190_v25 }
  0xb4   : > { %v705_v6 = vpop.permute.xlu2 %704 }
  0xb5   : > { %v699_v2 = vpop.permute.xlu1 %698  ;;  %796 = vst.msk [vmem:[#allocation3 + $0x28] sm:$0xff] %vm790_vm5, %v705_v6  ;;  %v854_v6 = vrot.slane %v2720_v21, 2 }
  0xb6   : > { %926 = vrot.lane.b32.xlu1 %v3179_v43, %s2452_s8  ;;  %793 = vst.msk [vmem:[#allocation3 + $0x10] sm:$0xff] %vm790_vm5, %v699_v2  ;;  %v872_v43 = vrot.slane %v2963_v58, 2 }
  0xb7   : > { %v3221_v58 = vsel %vm823_vm4, %v854_v6, %v855_v3  ;;  %v874_v6 = vrot.slane %v2970_v60, 2 }
  0xb8   : > { %930 = vrot.lane.b32.xlu0 %v3169_v46, %s2452_s8  ;;  %v3213_v42 = vsel %vm823_vm4, %v870_v15, %v872_v43  ;;  %v879_v43 = vrot.slane %v2951_v44, 2 }
  0xb9   : > { %916 = vrot.lane.b32.xlu2 %v3176_v40, %s2452_s8  ;;  %v707_v46 = vpop.permute.xlu0 %706  ;;  %4412 = vst [vmem:[#allocation44_spill] sm:$0xff] %v3213_v42 }
  0xba   : > { %797 = vst.msk [vmem:[#allocation3 + $0x30] sm:$0xff] %vm790_vm5, %v707_v46  ;;  %v3224_v46 = vsel %vm823_vm4, %v865_v62, %v867_v13 }
  0xbb   : > { %4413 = vst [vmem:[#allocation45_spill] sm:$0xff] %v3224_v46 }
  0xbd   : > { %v711_v51 = vpop.permute.xlu2 %710  ;;  %v701_v2 = vpop.permute.xlu1 %700 }
  0xbe   : > { %932 = vrot.lane.b32.xlu1 %v3202_v20, %s2452_s8  ;;  %799 = vst.msk [vmem:[#allocation3 + $0x40] sm:$0xff] %vm790_vm5, %v711_v51  ;;  %v880_v20 = vrot.slane %v2959_v53, 2  ;;  %v875_v51 = vrot.slane %v2913_v56, 2 }
  0xbf   : > { %794 = vst.msk [vmem:[#allocation3 + $0x18] sm:$0xff] %vm790_vm5, %v701_v2  ;;  %v885_v2 = vrot.slane %v2934_v17, 2 }
  0xc0   : > { %936 = vrot.lane.b32.xlu0 %v3190_v25, %s2452_s8  ;;  %v3235_v3 = vsel %vm823_vm4, %v879_v43, %v880_v20  ;;  %v3247_v30 = vsel %vm823_vm4, %v874_v6, %v875_v51  ;;  %v887_v43 = vrot.slane %v3043_v35, 2  ;;  %v882_v6 = vrot.slane %v3064_v8, 2 }
  0xc1   : > { %922 = vrot.lane.b32.xlu2 %v3199_v0, %s2452_s8  ;;  %v713_v25 = vpop.permute.xlu0 %712  ;;  %4414 = vst [vmem:[#allocation46_spill] sm:$0xff] %v3235_v3  ;;  %v877_v8 = vrot.slane %v2938_v24, 2 }
  0xc2   : > { %800 = vst.msk [vmem:[#allocation3 + $0x48] sm:$0xff] %vm790_vm5, %v713_v25  ;;  %v3244_v25 = vsel %vm823_vm4, %v860_v10, %v862_v45  ;;  %v3258_v10 = vsel %vm823_vm4, %v885_v2, %v887_v43  ;;  %v894_v43 = vrot.slane %v3014_v48, 2 }
  0xc3   : > { %4415 = vst [vmem:[#allocation47_spill] sm:$0xff] %v3247_v30 }
  0xc5   : > { %v717_v62 = vpop.permute.xlu2 %716  ;;  %v709_v13 = vpop.permute.xlu1 %708 }
  0xc6   : > { %938 = vrot.lane.b32.xlu1 %v3224_v46, %s2452_s8  ;;  %802 = vst.msk [vmem:[#allocation3 + $0x58] sm:$0xff] %vm790_vm5, %v717_v62  ;;  %v869_v62 = vrot.slane %v2828_v32, 2 }
  0xc7   : > { %798 = vst.msk [vmem:[#allocation3 + $0x38] sm:$0xff] %vm790_vm5, %v709_v13 }
  0xc8   : > { %942 = vrot.lane.b32.xlu0 %v3213_v42, %s2452_s8  ;;  %v3266_v35 = vsel %vm823_vm4, %v869_v62, %v870_v15  ;;  %v889_v62 = vrot.slane %v3029_v61, 2 }
  0xc9   : > { %928 = vrot.lane.b32.xlu2 %v3221_v58, %s2452_s8  ;;  %v719_v46 = vpop.permute.xlu0 %718  ;;  %4416 = vst [vmem:[#allocation48_spill] sm:$0xff] %v3266_v35 }
  0xca   : > { %803 = vst.msk [vmem:[#allocation3 + $0x60] sm:$0xff] %vm790_vm5, %v719_v46  ;;  %v3269_v46 = vsel %vm823_vm4, %v880_v20, %v882_v6 }
  0xcb   : > { %4417 = vst [vmem:[#allocation49_spill] sm:$0xff] %v3269_v46 }
  0xcd   : > { %v715_v13 = vpop.permute.xlu1 %714 }
  0xce   : > { %944 = vrot.lane.b32.xlu1 %v3247_v30, %s2452_s8  ;;  %801 = vst.msk [vmem:[#allocation3 + $0x50] sm:$0xff] %vm790_vm5, %v715_v13  ;;  %v895_v30 = vrot.slane %v3021_v37, 2  ;;  %v900_v13 = vrot.slane %v3005_v11, 2 }
  0xd0   : > { %948 = vrot.lane.b32.xlu0 %v3235_v3, %s2452_s8  ;;  %v3280_v15 = vsel %vm823_vm4, %v894_v43, %v895_v30  ;;  %v902_v43 = vrot.slane %v3086_v29, 2 }
  0xd1   : > { %934 = vrot.lane.b32.xlu2 %v3244_v25, %s2452_s8  ;;  %v725_v3 = vpop.permute.xlu0 %724 }
  0xd2   : > { %806 = vst.msk [vmem:[#allocation3 + $0x78] sm:$0xff] %vm790_vm5, %v725_v3  ;;  %v3289_v3 = vsel %vm823_vm4, %v875_v51, %v877_v8  ;;  %v3303_v51 = vsel %vm823_vm4, %v900_v13, %v902_v43 }
  0xd3   : > { %v723_v45 = vpop.permute.xlu2 %722  ;;  %4419 = vst [vmem:[#allocation51_spill] sm:$0xff] %v3303_v51 }
  0xd4   : > { %805 = vst.msk [vmem:[#allocation3 + $0x70] sm:$0xff] %vm790_vm5, %v723_v45  ;;  %v890_v45 = vrot.slane %v2982_v22, 2 }
  0xd5   : > { %v721_v6 = vpop.permute.xlu1 %720 }
  0xd6   : > { %950 = vrot.lane.b32.xlu1 %v3269_v46, %s2452_s8  ;;  %804 = vst.msk [vmem:[#allocation3 + $0x68] sm:$0xff] %vm790_vm5, %v721_v6  ;;  %v3292_v24 = vsel %vm823_vm4, %v889_v62, %v890_v45  ;;  %v897_v62 = vrot.slane %v3105_v36, 2  ;;  %v892_v36 = vrot.slane %v3025_v14, 2  ;;  %v899_v14 = vrot.slane %v2987_v34, 2 }
  0xd7   : > { %4418 = vst [vmem:[#allocation50_spill] sm:$0xff] %v3292_v24 }
  0xd8   : > { %954 = vrot.lane.b32.xlu0 %v3258_v10, %s2452_s8 }
  0xd9   : > { %940 = vrot.lane.b32.xlu2 %v3266_v35, %s2452_s8  ;;  %v731_v46 = vpop.permute.xlu0 %730 }
  0xda   : > { %809 = vst.msk [vmem:[#allocation3 + $0x90] sm:$0xff] %vm790_vm5, %v731_v46  ;;  %v3314_v46 = vsel %vm823_vm4, %v895_v30, %v897_v62  ;;  %v3327_v30 = vsel %vm823_vm4, %v890_v45, %v892_v36  ;;  %v3340_v45 = vsel %vm823_vm4, %v899_v14, %v900_v13 }
  0xdb   : > { %v729_v20 = vpop.permute.xlu2 %728  ;;  %4421 = vst [vmem:[#allocation53_spill] sm:$0xff] %v3327_v30 }
  0xdc   : > { %808 = vst.msk [vmem:[#allocation3 + $0x88] sm:$0xff] %vm790_vm5, %v729_v20  ;;  %v884_v20 = vrot.slane %v2921_v57, 2 }
  0xdd   : > { %4422 = vst [vmem:[#allocation54_spill] sm:$0xff] %v3340_v45 }
  0xde   : > { %956 = vrot.lane.b32.xlu1 %v3292_v24, %s2452_s8  ;;  %v727_v6 = vpop.permute.xlu1 %726  ;;  %v3311_v29 = vsel %vm823_vm4, %v884_v20, %v885_v2 }
  0xdf   : > { %807 = vst.msk [vmem:[#allocation3 + $0x80] sm:$0xff] %vm790_vm5, %v727_v6 }
  0xe0   : > { %960 = vrot.lane.b32.xlu0 %v3280_v15, %s2452_s8  ;;  %4420 = vst [vmem:[#allocation52_spill] sm:$0xff] %v3311_v29 }
  0xe1   : > { %946 = vrot.lane.b32.xlu2 %v3289_v3, %s2452_s8 }
  0xe3   : > { %v735_v8 = vpop.permute.xlu2 %734 }
  0xe4   : > { %811 = vst.msk [vmem:[#allocation3 + $0xa0] sm:$0xff] %vm790_vm5, %v735_v8 }
  0xe6   : > { %962 = vrot.lane.b32.xlu1 %v3314_v46, %s2452_s8 }
  0xe7   : > { %v737_v24 = vpop.permute.xlu0 %736 }
  0xe8   : > { %966 = vrot.lane.b32.xlu0 %v3303_v51, %s2452_s8  ;;  %812 = vst.msk [vmem:[#allocation3 + $0xa8] sm:$0xff] %vm790_vm5, %v737_v24  ;;  %v733_v8 = vpop.permute.xlu1 %732  ;;  %v4436_v51 = vld [vmem:[#allocation14_spill] sm:$0xff] }
  0xe9   : > { %952 = vrot.lane.b32.xlu2 %v3311_v29, %s2452_s8  ;;  %810 = vst.msk [vmem:[#allocation3 + $0x98] sm:$0xff] %vm790_vm5, %v733_v8 }
  0xeb   : > { %v741_v43 = vpop.permute.xlu2 %740 }
  0xec   : > { %814 = vst.msk [vmem:[#allocation3 + $0xb8] sm:$0xff] %vm790_vm5, %v741_v43 }
  0xee   : > { %1035 = vrot.lane.b32.xlu1 %v2667_v52, %s2453_s9 }
  0xf0   : > { %1039 = vrot.lane.b32.xlu0 %v2749_v38, %s2453_s9  ;;  %v739_v20 = vpop.permute.xlu1 %738 }
  0xf1   : > { %958 = vrot.lane.b32.xlu2 %v3327_v30, %s2452_s8  ;;  %813 = vst.msk [vmem:[#allocation3 + $0xb0] sm:$0xff] %vm790_vm5, %v739_v20  ;;  %v296_v20 = vld [vmem:[%s2576_s27 + $0xf0] sm:$0xff] }
  0xf2   : > { %v743_v2 = vpop.permute.xlu0 %742 }
  0xf3   : > { %815 = vst.msk [vmem:[#allocation3 + $0xc0] sm:$0xff] %vm790_vm5, %v743_v2  ;;  %v747_v24 = vpop.permute.xlu2 %746 }
  0xf4   : > { %817 = vst.msk [vmem:[#allocation3 + $0xd0] sm:$0xff] %vm790_vm5, %v747_v24 }
  0xf6   : > { %1041 = vrot.lane.b32.xlu1 %v2767_v49, %s2453_s9 }
  0xf8   : > { %1045 = vrot.lane.b32.xlu0 %v2694_v5, %s2453_s9  ;;  %v745_v6 = vpop.permute.xlu1 %744 }
  0xf9   : > { %964 = vrot.lane.b32.xlu2 %v3340_v45, %s2452_s8  ;;  %816 = vst.msk [vmem:[#allocation3 + $0xc8] sm:$0xff] %vm790_vm5, %v745_v6 }
  0xfa   : > { %v749_v62 = vpop.permute.xlu0 %748 }
  0xfb   : > { %818 = vst.msk [vmem:[#allocation3 + $0xd8] sm:$0xff] %vm790_vm5, %v749_v62  ;;  %v753_v52 = vpop.permute.xlu2 %752 }
  0xfc   : > { %820 = vst.msk [vmem:[#allocation3 + $0xe8] sm:$0xff] %vm790_vm5, %v753_v52  ;;  %v2438_v52 = vld [vmem:[%s4272_s1] ss:$0 sm:$0xff] }
  0xfd   : > { %v331_v6 = vmul.f32 %v2438_v52, %v296_v20 }
  0xfe   : > { %1047 = vrot.lane.b32.xlu1 %v2803_v12, %s2453_s9 }
 0x100   : > { %1051 = vrot.lane.b32.xlu0 %v2777_v54, %s2453_s9  ;;  %v751_v43 = vpop.permute.xlu1 %750 }
 0x101   : > { %1037 = vrot.lane.b32.xlu2 %v2673_v55, %s2453_s9  ;;  %819 = vst.msk [vmem:[#allocation3 + $0xe0] sm:$0xff] %vm790_vm5, %v751_v43 }
 0x102   : > { %v755_v13 = vpop.permute.xlu0 %754 }
 0x103   : > { %821 = vst.msk [vmem:[#allocation3 + $0xf0] sm:$0xff] %vm790_vm5, %v755_v13  ;;  %v905_v36 = vpop.permute.xlu2 %904  ;;  %v2439_v13 = vld [vmem:[%s4273_s2] ss:$0 sm:$0xff] }
 0x104   : > { %1001 = vst.msk [vmem:[#allocation3] sm:$0xff] %vm1000_vm6, %v905_v36  ;;  %v366_v36 = vadd.f32 %v2439_v13, %v331_v6  ;;  %v297_v6 = vld [vmem:[%s2576_s27 + $0xf8] sm:$0xff] }
 0x106   : > { %1053 = vrot.lane.b32.xlu1 %v2795_v9, %s2453_s9 }
 0x108   : > { %1057 = vrot.lane.b32.xlu0 %v2736_v31, %s2453_s9  ;;  %v757_v2 = vpop.permute.xlu1 %756 }
 0x109   : > { %1043 = vrot.lane.b32.xlu2 %v2685_v63, %s2453_s9  ;;  %822 = vst.msk [vmem:[#allocation3 + $0xf8] sm:$0xff] %vm790_vm5, %v757_v2 }
 0x10a   : > { %v907_v8 = vpop.permute.xlu0 %906 }
 0x10b   : > { %1002 = vst.msk [vmem:[#allocation3 + $0x8] sm:$0xff] %vm1000_vm6, %v907_v8  ;;  %v911_v55 = vpop.permute.xlu2 %910  ;;  %v398_v8 = vmax.f32 %v366_v36, 0.0  ;;  %v332_v36 = vmul.f32 %v2438_v52, %v297_v6 }
 0x10c   : > { %1004 = vst.msk [vmem:[#allocation3 + $0x18] sm:$0xff] %vm1000_vm6, %v911_v55 }
 0x10d   : > { %477 = vst.msk [vmem:[#allocation2 + $0x181] sm:$0xff] %vm400_vm0, %v398_v8  ;;  %v367_v8 = vadd.f32 %v2439_v13, %v332_v36 }
 0x10e   : > { %1059 = vrot.lane.b32.xlu1 %v2882_v18, %s2453_s9 }
 0x110   : > { %1063 = vrot.lane.b32.xlu0 %v2868_v7, %s2453_s9  ;;  %v909_v62 = vpop.permute.xlu1 %908 }
 0x111   : > { %1049 = vrot.lane.b32.xlu2 %v2709_v16, %s2453_s9  ;;  %1003 = vst.msk [vmem:[#allocation3 + $0x10] sm:$0xff] %vm1000_vm6, %v909_v62 }
 0x112   : > { %v913_v14 = vpop.permute.xlu0 %912 }
 0x113   : > { %1005 = vst.msk [vmem:[#allocation3 + $0x20] sm:$0xff] %vm1000_vm6, %v913_v14  ;;  %v917_v24 = vpop.permute.xlu2 %916 }
 0x114   : > { %1007 = vst.msk [vmem:[#allocation3 + $0x30] sm:$0xff] %vm1000_vm6, %v917_v24  ;;  %v3433_v6 = vld [vmem:[#allocation2 + $0x180] sm:$0xff] }
 0x115   : > { %4423 = vst [vmem:[#allocation55_spill] sm:$0xff] %v3433_v6 }
 0x116   : > { %1065 = vrot.lane.b32.xlu1 %v2885_v27, %s2453_s9 }
 0x118   : > { %1069 = vrot.lane.b32.xlu0 %v2852_v50, %s2453_s9  ;;  %v915_v2 = vpop.permute.xlu1 %914 }
 0x119   : > { %1055 = vrot.lane.b32.xlu2 %v2720_v21, %s2453_s9  ;;  %1006 = vst.msk [vmem:[#allocation3 + $0x28] sm:$0xff] %vm1000_vm6, %v915_v2  ;;  %v399_v2 = vmax.f32 %v367_v8, 0.0 }
 0x11a   : > { %v919_v43 = vpop.permute.xlu0 %918 }
 0x11b   : > { %1008 = vst.msk [vmem:[#allocation3 + $0x38] sm:$0xff] %vm1000_vm6, %v919_v43  ;;  %v923_v55 = vpop.permute.xlu2 %922 }
 0x11c   : > { %1010 = vst.msk [vmem:[#allocation3 + $0x48] sm:$0xff] %vm1000_vm6, %v923_v55 }
 0x11d   : > { %478 = vst.msk [vmem:[#allocation2 + $0x189] sm:$0xff] %vm400_vm0, %v399_v2 }
 0x11e   : > { %1071 = vrot.lane.b32.xlu1 %v2970_v60, %s2453_s9 }
 0x120   : > { %1075 = vrot.lane.b32.xlu0 %v2951_v44, %s2453_s9  ;;  %v921_v20 = vpop.permute.xlu1 %920 }
 0x121   : > { %1061 = vrot.lane.b32.xlu2 %v2821_v26, %s2453_s9  ;;  %1009 = vst.msk [vmem:[#allocation3 + $0x40] sm:$0xff] %vm1000_vm6, %v921_v20 }
 0x122   : > { %v925_v14 = vpop.permute.xlu0 %924 }
 0x123   : > { %1011 = vst.msk [vmem:[#allocation3 + $0x50] sm:$0xff] %vm1000_vm6, %v925_v14  ;;  %v929_v24 = vpop.permute.xlu2 %928 }
 0x124   : > { %1013 = vst.msk [vmem:[#allocation3 + $0x60] sm:$0xff] %vm1000_vm6, %v929_v24 }
 0x126   : > { %1077 = vrot.lane.b32.xlu1 %v2959_v53, %s2453_s9 }
 0x128   : > { %1081 = vrot.lane.b32.xlu0 %v2934_v17, %s2453_s9  ;;  %v927_v55 = vpop.permute.xlu1 %926 }
 0x129   : > { %1067 = vrot.lane.b32.xlu2 %v2828_v32, %s2453_s9  ;;  %1012 = vst.msk [vmem:[#allocation3 + $0x58] sm:$0xff] %vm1000_vm6, %v927_v55  ;;  %v4439_v32 = vld [vmem:[#allocation18_spill] sm:$0xff] }
 0x12a   : > { %v931_v62 = vpop.permute.xlu0 %930 }
 0x12b   : > { %1014 = vst.msk [vmem:[#allocation3 + $0x68] sm:$0xff] %vm1000_vm6, %v931_v62  ;;  %v935_v43 = vpop.permute.xlu2 %934 }
 0x12c   : > { %1016 = vst.msk [vmem:[#allocation3 + $0x78] sm:$0xff] %vm1000_vm6, %v935_v43 }
 0x12e   : > { %1083 = vrot.lane.b32.xlu1 %v3029_v61, %s2453_s9 }
 0x130   : > { %1087 = vrot.lane.b32.xlu0 %v3014_v48, %s2453_s9  ;;  %v933_v13 = vpop.permute.xlu1 %932 }
 0x131   : > { %1073 = vrot.lane.b32.xlu2 %v2913_v56, %s2453_s9  ;;  %1015 = vst.msk [vmem:[#allocation3 + $0x70] sm:$0xff] %vm1000_vm6, %v933_v13 }
 0x132   : > { %v937_v14 = vpop.permute.xlu0 %936 }
 0x133   : > { %1017 = vst.msk [vmem:[#allocation3 + $0x80] sm:$0xff] %vm1000_vm6, %v937_v14  ;;  %v941_v52 = vpop.permute.xlu2 %940  ;;  %v3453_v14 = vld [vmem:[#allocation2 + $0x188] sm:$0xff] }
 0x134   : > { %1019 = vst.msk [vmem:[#allocation3 + $0x90] sm:$0xff] %vm1000_vm6, %v941_v52 }
 0x135   : > { %4424 = vst [vmem:[#allocation56_spill] sm:$0xff] %v3453_v14 }
 0x136   : > { %1089 = vrot.lane.b32.xlu1 %v3021_v37, %s2453_s9 }
 0x138   : > { %1093 = vrot.lane.b32.xlu0 %v3005_v11, %s2453_s9  ;;  %v939_v62 = vpop.permute.xlu1 %938 }
 0x139   : > { %1079 = vrot.lane.b32.xlu2 %v2921_v57, %s2453_s9  ;;  %1018 = vst.msk [vmem:[#allocation3 + $0x88] sm:$0xff] %vm1000_vm6, %v939_v62  ;;  %v4426_v62 = vld [vmem:[#allocation6_spill] sm:$0xff] }
 0x13a   : > { %v943_v24 = vpop.permute.xlu0 %942 }
 0x13b   : > { %1020 = vst.msk [vmem:[#allocation3 + $0x98] sm:$0xff] %vm1000_vm6, %v943_v24  ;;  %v947_v20 = vpop.permute.xlu2 %946  ;;  %v4425_v24 = vld [vmem:[#allocation16_spill] sm:$0xff] }
 0x13c   : > { %1022 = vst.msk [vmem:[#allocation3 + $0xa8] sm:$0xff] %vm1000_vm6, %v947_v20 }
 0x13e   : > { %1095 = vrot.lane.b32.xlu1 %v3433_v6, %s2453_s9 }
 0x140   : > { %1170 = vrot.lane.b32.xlu0 %v2692_v4, %s2454_s14  ;;  %v945_v8 = vpop.permute.xlu1 %944 }
 0x141   : > { %1085 = vrot.lane.b32.xlu2 %v2982_v22, %s2453_s9  ;;  %1021 = vst.msk [vmem:[#allocation3 + $0xa0] sm:$0xff] %vm1000_vm6, %v945_v8 }
 0x142   : > { %v949_v36 = vpop.permute.xlu0 %948 }
 0x143   : > { %1023 = vst.msk [vmem:[#allocation3 + $0xb0] sm:$0xff] %vm1000_vm6, %v949_v36  ;;  %v953_v43 = vpop.permute.xlu2 %952  ;;  %v4427_v36 = vld [vmem:[#allocation4_spill] sm:$0xff] }
 0x144   : > { %1025 = vst.msk [vmem:[#allocation3 + $0xc0] sm:$0xff] %vm1000_vm6, %v953_v43 }
 0x146   : > { %1172 = vrot.lane.b32.xlu1 %v2732_v28, %s2454_s14 }
 0x148   : > { %1176 = vrot.lane.b32.xlu0 %v2838_v39, %s2454_s14  ;;  %v951_v2 = vpop.permute.xlu1 %950 }
 0x149   : > { %1091 = vrot.lane.b32.xlu2 %v2987_v34, %s2453_s9  ;;  %1024 = vst.msk [vmem:[#allocation3 + $0xb8] sm:$0xff] %vm1000_vm6, %v951_v2  ;;  %v4429_v2 = vld [vmem:[#allocation5_spill] sm:$0xff] }
 0x14a   : > { %v955_v4 = vpop.permute.xlu0 %954 }
 0x14b   : > { %1026 = vst.msk [vmem:[#allocation3 + $0xc8] sm:$0xff] %vm1000_vm6, %v955_v4  ;;  %v959_v55 = vpop.permute.xlu2 %958  ;;  %v4428_v4 = vld [vmem:[#allocation21_spill] sm:$0xff] }
 0x14c   : > { %1028 = vst.msk [vmem:[#allocation3 + $0xd8] sm:$0xff] %vm1000_vm6, %v959_v55 }
 0x14e   : > { %1178 = vrot.lane.b32.xlu1 %v2714_v19, %s2454_s14 }
 0x150   : > { %1182 = vrot.lane.b32.xlu0 %v2902_v41, %s2454_s14  ;;  %v957_v13 = vpop.permute.xlu1 %956 }
 0x151   : > { %1097 = vrot.lane.b32.xlu2 %v3453_v14, %s2453_s9  ;;  %1027 = vst.msk [vmem:[#allocation3 + $0xd0] sm:$0xff] %vm1000_vm6, %v957_v13 }
 0x152   : > { %v961_v52 = vpop.permute.xlu0 %960 }
 0x153   : > { %1029 = vst.msk [vmem:[#allocation3 + $0xe0] sm:$0xff] %vm1000_vm6, %v961_v52  ;;  %v965_v28 = vpop.permute.xlu2 %964  ;;  %v4430_v52 = vld [vmem:[#allocation7_spill] sm:$0xff] }
 0x154   : > { %1031 = vst.msk [vmem:[#allocation3 + $0xf0] sm:$0xff] %vm1000_vm6, %v965_v28 }
 0x156   : > { %1184 = vrot.lane.b32.xlu1 %v4427_v36, %s2454_s14 }
 0x158   : > { %1188 = vrot.lane.b32.xlu0 %v4425_v24, %s2454_s14  ;;  %v963_v8 = vpop.permute.xlu1 %962 }
 0x159   : > { %1174 = vrot.lane.b32.xlu2 %v4426_v62, %s2454_s14  ;;  %1030 = vst.msk [vmem:[#allocation3 + $0xe8] sm:$0xff] %vm1000_vm6, %v963_v8  ;;  %v4432_v8 = vld [vmem:[#allocation9_spill] sm:$0xff] }
 0x15a   : > { %v967_v20 = vpop.permute.xlu0 %966 }
 0x15b   : > { %1032 = vst.msk [vmem:[#allocation3 + $0xf8] sm:$0xff] %vm1000_vm6, %v967_v20  ;;  %v1038_v43 = vpop.permute.xlu2 %1037  ;;  %v4431_v20 = vld [vmem:[#allocation26_spill] sm:$0xff] }
 0x15c   : > { %1133 = vst.msk [vmem:[#allocation3 + $0x8] sm:$0xff] %vm1131_vm7, %v1038_v43 }
 0x15e   : > { %1190 = vrot.lane.b32.xlu1 %v4430_v52, %s2454_s14 }
 0x160   : > { %1194 = vrot.lane.b32.xlu0 %v4428_v4, %s2454_s14  ;;  %v1036_v13 = vpop.permute.xlu1 %1035 }
 0x161   : > { %1180 = vrot.lane.b32.xlu2 %v4429_v2, %s2454_s14  ;;  %1132 = vst.msk [vmem:[#allocation3] sm:$0xff] %vm1131_vm7, %v1036_v13 }
 0x162   : > { %v1040_v55 = vpop.permute.xlu0 %1039 }
 0x163   : > { %1134 = vst.msk [vmem:[#allocation3 + $0x10] sm:$0xff] %vm1131_vm7, %v1040_v55  ;;  %v1044_v28 = vpop.permute.xlu2 %1043  ;;  %v4433_v55 = vld [vmem:[#allocation11_spill] sm:$0xff] }
 0x164   : > { %1136 = vst.msk [vmem:[#allocation3 + $0x20] sm:$0xff] %vm1131_vm7, %v1044_v28  ;;  %v4434_v28 = vld [vmem:[#allocation29_spill] sm:$0xff] }
 0x166   : > { %1196 = vrot.lane.b32.xlu1 %v4433_v55, %s2454_s14 }
 0x168   : > { %1200 = vrot.lane.b32.xlu0 %v4431_v20, %s2454_s14  ;;  %v1042_v22 = vpop.permute.xlu1 %1041 }
 0x169   : > { %1186 = vrot.lane.b32.xlu2 %v4432_v8, %s2454_s14  ;;  %1135 = vst.msk [vmem:[#allocation3 + $0x18] sm:$0xff] %vm1131_vm7, %v1042_v22  ;;  %v4437_v22 = vld [vmem:[#allocation32_spill] sm:$0xff] }
 0x16a   : > { %v1046_v43 = vpop.permute.xlu0 %1045 }
 0x16b   : > { %1137 = vst.msk [vmem:[#allocation3 + $0x28] sm:$0xff] %vm1131_vm7, %v1046_v43  ;;  %v1050_v61 = vpop.permute.xlu2 %1049  ;;  %v4435_v43 = vld [vmem:[#allocation12_spill] sm:$0xff] }
 0x16c   : > { %1139 = vst.msk [vmem:[#allocation3 + $0x38] sm:$0xff] %vm1131_vm7, %v1050_v61 }
 0x16e   : > { %1202 = vrot.lane.b32.xlu1 %v4436_v51, %s2454_s14 }
 0x170   : > { %1206 = vrot.lane.b32.xlu0 %v4434_v28, %s2454_s14  ;;  %v1048_v45 = vpop.permute.xlu1 %1047 }
 0x171   : > { %1192 = vrot.lane.b32.xlu2 %v4435_v43, %s2454_s14  ;;  %1138 = vst.msk [vmem:[#allocation3 + $0x30] sm:$0xff] %vm1131_vm7, %v1048_v45  ;;  %v4440_v45 = vld [vmem:[#allocation22_spill] sm:$0xff] }
 0x172   : > { %v1052_v13 = vpop.permute.xlu0 %1051 }
 0x173   : > { %1140 = vst.msk [vmem:[#allocation3 + $0x40] sm:$0xff] %vm1131_vm7, %v1052_v13  ;;  %v1056_v50 = vpop.permute.xlu2 %1055  ;;  %v4438_v13 = vld [vmem:[#allocation17_spill] sm:$0xff] }
 0x174   : > { %1142 = vst.msk [vmem:[#allocation3 + $0x50] sm:$0xff] %vm1131_vm7, %v1056_v50 }
 0x176   : > { %1208 = vrot.lane.b32.xlu1 %v4439_v32, %s2454_s14 }
 0x178   : > { %1212 = vrot.lane.b32.xlu0 %v4437_v22, %s2454_s14  ;;  %v1054_v51 = vpop.permute.xlu1 %1053 }
 0x179   : > { %1198 = vrot.lane.b32.xlu2 %v4438_v13, %s2454_s14  ;;  %1141 = vst.msk [vmem:[#allocation3 + $0x48] sm:$0xff] %vm1131_vm7, %v1054_v51  ;;  %v1165_v51 = vrot.slane %v3433_v6, 1  ;;  %v4447_v6 = vld [vmem:[#allocation30_spill] sm:$0xff] }
 0x17a   : > { %v1058_v61 = vpop.permute.xlu0 %1057 }
 0x17b   : > { %1143 = vst.msk [vmem:[#allocation3 + $0x58] sm:$0xff] %vm1131_vm7, %v1058_v61  ;;  %v1062_v34 = vpop.permute.xlu2 %1061  ;;  %v4441_v61 = vld [vmem:[#allocation24_spill] sm:$0xff] }
 0x17c   : > { %1145 = vst.msk [vmem:[#allocation3 + $0x68] sm:$0xff] %vm1131_vm7, %v1062_v34  ;;  %v4442_v34 = vld [vmem:[#allocation37_spill] sm:$0xff] }
 0x17e   : > { %1214 = vrot.lane.b32.xlu1 %v4441_v61, %s2454_s14  ;;  %v4444_v61 = vld [vmem:[#allocation28_spill] sm:$0xff] }
 0x180   : > { %1218 = vrot.lane.b32.xlu0 %v3098_v1, %s2454_s14  ;;  %v1060_v11 = vpop.permute.xlu1 %1059  ;;  %v1166_v1 = vrot.slane %v3453_v14, 1 }
 0x181   : > { %1204 = vrot.lane.b32.xlu2 %v4440_v45, %s2454_s14  ;;  %1144 = vst.msk [vmem:[#allocation3 + $0x60] sm:$0xff] %vm1131_vm7, %v1060_v11  ;;  %v4443_v45 = vld [vmem:[#allocation27_spill] sm:$0xff] }
 0x182   : > { %v1064_v50 = vpop.permute.xlu0 %1063 }
 0x183   : > { %1146 = vst.msk [vmem:[#allocation3 + $0x70] sm:$0xff] %vm1131_vm7, %v1064_v50  ;;  %v1068_v17 = vpop.permute.xlu2 %1067 }
 0x184   : > { %1148 = vst.msk [vmem:[#allocation3 + $0x80] sm:$0xff] %vm1131_vm7, %v1068_v17  ;;  %v3526_v17 = vsel %vm613_vm2, %v1165_v51, %v1166_v1  ;;  %v4448_v51 = vld [vmem:[#allocation31_spill] sm:$0xff] }
 0x185   : > { %4445 = vst [vmem:[#allocation6_spill] sm:$0xff] %v3526_v17 }
 0x186   : > { %1220 = vrot.lane.b32.xlu1 %v4444_v61, %s2454_s14 }
 0x188   : > { %1224 = vrot.lane.b32.xlu0 %v4442_v34, %s2454_s14  ;;  %v1066_v24 = vpop.permute.xlu1 %1065 }
 0x189   : > { %1210 = vrot.lane.b32.xlu2 %v4443_v45, %s2454_s14  ;;  %1147 = vst.msk [vmem:[#allocation3 + $0x78] sm:$0xff] %vm1131_vm7, %v1066_v24 }
 0x18a   : > { %v1070_v50 = vpop.permute.xlu0 %1069 }
 0x18b   : > { %1149 = vst.msk [vmem:[#allocation3 + $0x88] sm:$0xff] %vm1131_vm7, %v1070_v50  ;;  %v1074_v11 = vpop.permute.xlu2 %1073  ;;  %v3532_v50 = vld [vmem:[#allocation2 + $0x190] sm:$0x3] }
 0x18c   : > { %1151 = vst.msk [vmem:[#allocation3 + $0x98] sm:$0xff] %vm1131_vm7, %v1074_v11  ;;  %v1168_v57 = vrot.slane %v3532_v50, 1 }
 0x18d   : > { %4446 = vst [vmem:[#allocation4_spill] sm:$0xff] %v3532_v50 }
 0x18e   : > { %1226 = vrot.lane.b32.xlu1 %v4448_v51, %s2454_s14 }
 0x190   : > { %1230 = vrot.lane.b32.xlu0 %v3526_v17, %s2454_s14  ;;  %v1072_v11 = vpop.permute.xlu1 %1071  ;;  %v4450_v17 = vld [vmem:[#allocation33_spill] sm:$0xff] }
 0x191   : > { %1216 = vrot.lane.b32.xlu2 %v4447_v6, %s2454_s14  ;;  %1150 = vst.msk [vmem:[#allocation3 + $0x90] sm:$0xff] %vm1131_vm7, %v1072_v11 }
 0x192   : > { %v1076_v14 = vpop.permute.xlu0 %1075 }
 0x193   : > { %1152 = vst.msk [vmem:[#allocation3 + $0xa0] sm:$0xff] %vm1131_vm7, %v1076_v14  ;;  %v1080_v61 = vpop.permute.xlu2 %1079  ;;  %v3545_v14 = vsel %vm613_vm2, %v1166_v1, %v1168_v57  ;;  %v4451_v1 = vld [vmem:[#allocation35_spill] sm:$0xff] }
 0x194   : > { %1154 = vst.msk [vmem:[#allocation3 + $0xb0] sm:$0xff] %vm1131_vm7, %v1080_v61 }
 0x195   : > { %4449 = vst [vmem:[#allocation21_spill] sm:$0xff] %v3545_v14 }
 0x196   : > { %1232 = vrot.lane.b32.xlu1 %v3545_v14, %s2454_s14 }
 0x198   : > { %1306 = vrot.lane.b32.xlu0 %v3156_v47, %s2455_s15  ;;  %v1078_v61 = vpop.permute.xlu1 %1077  ;;  %v4452_v47 = vld [vmem:[#allocation36_spill] sm:$0xff] }
 0x199   : > { %1222 = vrot.lane.b32.xlu2 %v4450_v17, %s2454_s14  ;;  %1153 = vst.msk [vmem:[#allocation3 + $0xa8] sm:$0xff] %vm1131_vm7, %v1078_v61 }
 0x19a   : > { %v1082_v24 = vpop.permute.xlu0 %1081 }
 0x19b   : > { %1155 = vst.msk [vmem:[#allocation3 + $0xb8] sm:$0xff] %vm1131_vm7, %v1082_v24  ;;  %v1086_v50 = vpop.permute.xlu2 %1085 }
 0x19c   : > { %1157 = vst.msk [vmem:[#allocation3 + $0xc8] sm:$0xff] %vm1131_vm7, %v1086_v50 }
 0x19e   : > { %1308 = vrot.lane.b32.xlu1 %v4452_v47, %s2455_s15 }
 0x1a0   : > { %1312 = vrot.lane.b32.xlu0 %v3176_v40, %s2455_s15  ;;  %v1084_v24 = vpop.permute.xlu1 %1083 }
 0x1a1   : > { %1228 = vrot.lane.b32.xlu2 %v4451_v1, %s2454_s14  ;;  %1156 = vst.msk [vmem:[#allocation3 + $0xc0] sm:$0xff] %vm1131_vm7, %v1084_v24 }
 0x1a2   : > { %v1088_v57 = vpop.permute.xlu0 %1087 }
 0x1a3   : > { %1158 = vst.msk [vmem:[#allocation3 + $0xd0] sm:$0xff] %vm1131_vm7, %v1088_v57  ;;  %v1092_v11 = vpop.permute.xlu2 %1091 }
 0x1a4   : > { %1160 = vst.msk [vmem:[#allocation3 + $0xe0] sm:$0xff] %vm1131_vm7, %v1092_v11 }
 0x1a6   : > { %1314 = vrot.lane.b32.xlu1 %v3133_v23, %s2455_s15 }
 0x1a8   : > { %1318 = vrot.lane.b32.xlu0 %v3199_v0, %s2455_s15  ;;  %v1090_v57 = vpop.permute.xlu1 %1089 }
 0x1a9   : > { %1304 = vrot.lane.b32.xlu2 %v3123_v59, %s2455_s15  ;;  %1159 = vst.msk [vmem:[#allocation3 + $0xd8] sm:$0xff] %vm1131_vm7, %v1090_v57  ;;  %v4453_v59 = vld [vmem:[#allocation38_spill] sm:$0xff]  ;;  %v4454_v57 = vld [vmem:[#allocation39_spill] sm:$0xff] }
 0x1aa   : > { %v1094_v50 = vpop.permute.xlu0 %1093 }
 0x1ab   : > { %1161 = vst.msk [vmem:[#allocation3 + $0xe8] sm:$0xff] %vm1131_vm7, %v1094_v50  ;;  %v1098_v61 = vpop.permute.xlu2 %1097 }
 0x1ac   : > { %1163 = vst.msk [vmem:[#allocation3 + $0xf8] sm:$0xff] %vm1131_vm7, %v1098_v61 }
 0x1ae   : > { %1320 = vrot.lane.b32.xlu1 %v4453_v59, %s2455_s15 }
 0x1b0   : > { %1324 = vrot.lane.b32.xlu0 %v3221_v58, %s2455_s15  ;;  %v1096_v50 = vpop.permute.xlu1 %1095 }
 0x1b1   : > { %1310 = vrot.lane.b32.xlu2 %v3140_v33, %s2455_s15  ;;  %1162 = vst.msk [vmem:[#allocation3 + $0xf0] sm:$0xff] %vm1131_vm7, %v1096_v50  ;;  %v4456_v50 = vld [vmem:[#allocation41_spill] sm:$0xff] }
 0x1b2   : > { %v1171_v11 = vpop.permute.xlu0 %1170 }
 0x1b3   : > { %1267 = vst.msk [vmem:[#allocation3] sm:$0xff] %vm1266_vm8, %v1171_v11  ;;  %v1175_v24 = vpop.permute.xlu2 %1174  ;;  %v4455_v11 = vld [vmem:[#allocation40_spill] sm:$0xff] }
 0x1b4   : > { %1269 = vst.msk [vmem:[#allocation3 + $0x10] sm:$0xff] %vm1266_vm8, %v1175_v24 }
 0x1b6   : > { %1326 = vrot.lane.b32.xlu1 %v4455_v11, %s2455_s15 }
 0x1b8   : > { %1330 = vrot.lane.b32.xlu0 %v3244_v25, %s2455_s15  ;;  %v1173_v6 = vpop.permute.xlu1 %1172 }
 0x1b9   : > { %1316 = vrot.lane.b32.xlu2 %v4454_v57, %s2455_s15  ;;  %1268 = vst.msk [vmem:[#allocation3 + $0x8] sm:$0xff] %vm1266_vm8, %v1173_v6 }
 0x1ba   : > { %v1177_v61 = vpop.permute.xlu0 %1176 }
 0x1bb   : > { %1270 = vst.msk [vmem:[#allocation3 + $0x18] sm:$0xff] %vm1266_vm8, %v1177_v61  ;;  %v1181_v14 = vpop.permute.xlu2 %1180  ;;  %v4457_v61 = vld [vmem:[#allocation42_spill] sm:$0xff] }
 0x1bc   : > { %1272 = vst.msk [vmem:[#allocation3 + $0x28] sm:$0xff] %vm1266_vm8, %v1181_v14  ;;  %v4458_v14 = vld [vmem:[#allocation43_spill] sm:$0xff] }
 0x1be   : > { %1332 = vrot.lane.b32.xlu1 %v4457_v61, %s2455_s15 }
 0x1c0   : > { %1336 = vrot.lane.b32.xlu0 %v3266_v35, %s2455_s15  ;;  %v1179_v51 = vpop.permute.xlu1 %1178 }
 0x1c1   : > { %1322 = vrot.lane.b32.xlu2 %v4456_v50, %s2455_s15  ;;  %1271 = vst.msk [vmem:[#allocation3 + $0x20] sm:$0xff] %vm1266_vm8, %v1179_v51 }
 0x1c2   : > { %v1183_v24 = vpop.permute.xlu0 %1182 }
 0x1c3   : > { %1273 = vst.msk [vmem:[#allocation3 + $0x30] sm:$0xff] %vm1266_vm8, %v1183_v24  ;;  %v1187_v1 = vpop.permute.xlu2 %1186 }
 0x1c4   : > { %1275 = vst.msk [vmem:[#allocation3 + $0x40] sm:$0xff] %vm1266_vm8, %v1187_v1  ;;  %v4459_v1 = vld [vmem:[#allocation45_spill] sm:$0xff] }
 0x1c6   : > { %1338 = vrot.lane.b32.xlu1 %v3213_v42, %s2455_s15 }
 0x1c8   : > { %1342 = vrot.lane.b32.xlu0 %v3289_v3, %s2455_s15  ;;  %v1185_v35 = vpop.permute.xlu1 %1184 }
 0x1c9   : > { %1328 = vrot.lane.b32.xlu2 %v4458_v14, %s2455_s15  ;;  %1274 = vst.msk [vmem:[#allocation3 + $0x38] sm:$0xff] %vm1266_vm8, %v1185_v35 }
 0x1ca   : > { %v1189_v6 = vpop.permute.xlu0 %1188 }
 0x1cb   : > { %1276 = vst.msk [vmem:[#allocation3 + $0x48] sm:$0xff] %vm1266_vm8, %v1189_v6  ;;  %v1193_v24 = vpop.permute.xlu2 %1192  ;;  %v4460_v6 = vld [vmem:[#allocation46_spill] sm:$0xff] }
 0x1cc   : > { %1278 = vst.msk [vmem:[#allocation3 + $0x58] sm:$0xff] %vm1266_vm8, %v1193_v24  ;;  %v4461_v24 = vld [vmem:[#allocation47_spill] sm:$0xff] }
 0x1ce   : > { %1344 = vrot.lane.b32.xlu1 %v4460_v6, %s2455_s15 }
 0x1d0   : > { %1348 = vrot.lane.b32.xlu0 %v3311_v29, %s2455_s15  ;;  %v1191_v42 = vpop.permute.xlu1 %1190 }
 0x1d1   : > { %1334 = vrot.lane.b32.xlu2 %v4459_v1, %s2455_s15  ;;  %1277 = vst.msk [vmem:[#allocation3 + $0x50] sm:$0xff] %vm1266_vm8, %v1191_v42 }
 0x1d2   : > { %v1195_v51 = vpop.permute.xlu0 %1194 }
 0x1d3   : > { %1279 = vst.msk [vmem:[#allocation3 + $0x60] sm:$0xff] %vm1266_vm8, %v1195_v51  ;;  %v1199_v59 = vpop.permute.xlu2 %1198 }
 0x1d4   : > { %1281 = vst.msk [vmem:[#allocation3 + $0x70] sm:$0xff] %vm1266_vm8, %v1199_v59  ;;  %v4462_v59 = vld [vmem:[#allocation49_spill] sm:$0xff] }
 0x1d6   : > { %1350 = vrot.lane.b32.xlu1 %v3258_v10, %s2455_s15 }
 0x1d8   : > { %1354 = vrot.lane.b32.xlu0 %v3327_v30, %s2455_s15  ;;  %v1197_v29 = vpop.permute.xlu1 %1196 }
 0x1d9   : > { %1340 = vrot.lane.b32.xlu2 %v4461_v24, %s2455_s15  ;;  %1280 = vst.msk [vmem:[#allocation3 + $0x68] sm:$0xff] %vm1266_vm8, %v1197_v29  ;;  %v4463_v29 = vld [vmem:[#allocation50_spill] sm:$0xff] }
 0x1da   : > { %v1201_v35 = vpop.permute.xlu0 %1200 }
 0x1db   : > { %1282 = vst.msk [vmem:[#allocation3 + $0x78] sm:$0xff] %vm1266_vm8, %v1201_v35  ;;  %v1205_v51 = vpop.permute.xlu2 %1204 }
 0x1dc   : > { %1284 = vst.msk [vmem:[#allocation3 + $0x88] sm:$0xff] %vm1266_vm8, %v1205_v51 }
 0x1de   : > { %1356 = vrot.lane.b32.xlu1 %v3280_v15, %s2455_s15 }
 0x1e0   : > { %1435 = vrot.lane.b32.xlu0 %v2749_v38, %s2456_s16  ;;  %v1203_v30 = vpop.permute.xlu1 %1202 }
 0x1e1   : > { %1346 = vrot.lane.b32.xlu2 %v4462_v59, %s2455_s15  ;;  %1283 = vst.msk [vmem:[#allocation3 + $0x80] sm:$0xff] %vm1266_vm8, %v1203_v30 }
 0x1e2   : > { %v1207_v42 = vpop.permute.xlu0 %1206 }
 0x1e3   : > { %1285 = vst.msk [vmem:[#allocation3 + $0x90] sm:$0xff] %vm1266_vm8, %v1207_v42  ;;  %v1211_v35 = vpop.permute.xlu2 %1210 }
 0x1e4   : > { %1287 = vst.msk [vmem:[#allocation3 + $0xa0] sm:$0xff] %vm1266_vm8, %v1211_v35 }
 0x1e6   : > { %1437 = vrot.lane.b32.xlu1 %v2767_v49, %s2456_s16 }
 0x1e8   : > { %1572 = vrot.lane.b32.xlu0 %v2838_v39, %s2457_s17  ;;  %v1209_v42 = vpop.permute.xlu1 %1208 }
 0x1e9   : > { %1352 = vrot.lane.b32.xlu2 %v4463_v29, %s2455_s15  ;;  %1286 = vst.msk [vmem:[#allocation3 + $0x98] sm:$0xff] %vm1266_vm8, %v1209_v42 }
 0x1ea   : > { %v1213_v38 = vpop.permute.xlu0 %1212 }
 0x1eb   : > { %1288 = vst.msk [vmem:[#allocation3 + $0xa8] sm:$0xff] %vm1266_vm8, %v1213_v38  ;;  %v1217_v51 = vpop.permute.xlu2 %1216 }
 0x1ec   : > { %1290 = vst.msk [vmem:[#allocation3 + $0xb8] sm:$0xff] %vm1266_vm8, %v1217_v51 }
 0x1ee   : > { %1704 = vrot.lane.b32.xlu1 %v4452_v47, %s2458_s18 }
 0x1f0   : > { %1439 = vrot.lane.b32.xlu0 %v2685_v63, %s2456_s16  ;;  %v1215_v39 = vpop.permute.xlu1 %1214 }
 0x1f1   : > { %1358 = vrot.lane.b32.xlu2 %v3314_v46, %s2455_s15  ;;  %1289 = vst.msk [vmem:[#allocation3 + $0xb0] sm:$0xff] %vm1266_vm8, %v1215_v39 }
 0x1f2   : > { %v1219_v30 = vpop.permute.xlu0 %1218 }
 0x1f3   : > { %1291 = vst.msk [vmem:[#allocation3 + $0xc0] sm:$0xff] %vm1266_vm8, %v1219_v30  ;;  %v1223_v49 = vpop.permute.xlu2 %1222 }
 0x1f4   : > { %1293 = vst.msk [vmem:[#allocation3 + $0xd0] sm:$0xff] %vm1266_vm8, %v1223_v49 }
 0x1f6   : > { %1441 = vrot.lane.b32.xlu1 %v2694_v5, %s2456_s16 }
 0x1f8   : > { %1453 = vrot.lane.b32.xlu0 %v2736_v31, %s2456_s16  ;;  %v1221_v47 = vpop.permute.xlu1 %1220 }
 0x1f9   : > { %1570 = vrot.lane.b32.xlu2 %v4426_v62, %s2457_s17  ;;  %1292 = vst.msk [vmem:[#allocation3 + $0xc8] sm:$0xff] %vm1266_vm8, %v1221_v47 }
 0x1fa   : > { %v1225_v63 = vpop.permute.xlu0 %1224 }
 0x1fb   : > { %1294 = vst.msk [vmem:[#allocation3 + $0xd8] sm:$0xff] %vm1266_vm8, %v1225_v63  ;;  %v1229_v35 = vpop.permute.xlu2 %1228 }
 0x1fc   : > { %1296 = vst.msk [vmem:[#allocation3 + $0xe8] sm:$0xff] %vm1266_vm8, %v1229_v35 }
 0x1fe   : > { %1574 = vrot.lane.b32.xlu1 %v2714_v19, %s2457_s17 }
 0x200   : > { %1586 = vrot.lane.b32.xlu0 %v4430_v52, %s2457_s17  ;;  %v1227_v31 = vpop.permute.xlu1 %1226 }
 0x201   : > { %1706 = vrot.lane.b32.xlu2 %v3140_v33, %s2458_s18  ;;  %1295 = vst.msk [vmem:[#allocation3 + $0xe0] sm:$0xff] %vm1266_vm8, %v1227_v31  ;;  %v4464_v31 = vld [vmem:[#allocation13_spill] sm:$0xff] }
 0x202   : > { %v1231_v38 = vpop.permute.xlu0 %1230 }
 0x203   : > { %1297 = vst.msk [vmem:[#allocation3 + $0xf0] sm:$0xff] %vm1266_vm8, %v1231_v38  ;;  %v1305_v5 = vpop.permute.xlu2 %1304 }
 0x204   : > { %1401 = vst.msk [vmem:[#allocation3] sm:$0xff] %vm1400_vm9, %v1305_v5 }
 0x206   : > { %1588 = vrot.lane.b32.xlu1 %v4435_v43, %s2457_s17 }
 0x208   : > { %1710 = vrot.lane.b32.xlu0 %v3133_v23, %s2458_s18  ;;  %v1233_v19 = vpop.permute.xlu1 %1232 }
 0x209   : > { %1451 = vrot.lane.b32.xlu2 %v2720_v21, %s2456_s16  ;;  %1298 = vst.msk [vmem:[#allocation3 + $0xf8] sm:$0xff] %vm1266_vm8, %v1233_v19 }
 0x20a   : > { %v1307_v62 = vpop.permute.xlu0 %1306 }
 0x20b   : > { %1402 = vst.msk [vmem:[#allocation3 + $0x8] sm:$0xff] %vm1400_vm9, %v1307_v62  ;;  %v1311_v33 = vpop.permute.xlu2 %1310 }
 0x20c   : > { %1404 = vst.msk [vmem:[#allocation3 + $0x18] sm:$0xff] %vm1400_vm9, %v1311_v33 }
 0x20e   : > { %1720 = vrot.lane.b32.xlu1 %v3221_v58, %s2458_s18 }
 0x210   : > { %1467 = vrot.lane.b32.xlu0 %v2970_v60, %s2456_s16  ;;  %v1309_v23 = vpop.permute.xlu1 %1308 }
 0x211   : > { %1576 = vrot.lane.b32.xlu2 %v4429_v2, %s2457_s17  ;;  %1403 = vst.msk [vmem:[#allocation3 + $0x10] sm:$0xff] %vm1400_vm9, %v1309_v23 }
 0x212   : > { %v1313_v52 = vpop.permute.xlu0 %1312 }
 0x213   : > { %1405 = vst.msk [vmem:[#allocation3 + $0x20] sm:$0xff] %vm1400_vm9, %v1313_v52  ;;  %v1317_v21 = vpop.permute.xlu2 %1316 }
 0x214   : > { %1407 = vst.msk [vmem:[#allocation3 + $0x30] sm:$0xff] %vm1400_vm9, %v1317_v21  ;;  %v4466_v21 = vld [vmem:[#allocation23_spill] sm:$0xff] }
 0x216   : > { %1469 = vrot.lane.b32.xlu1 %v2913_v56, %s2456_s16 }
 0x218   : > { %1604 = vrot.lane.b32.xlu0 %v4439_v32, %s2457_s17  ;;  %v1315_v58 = vpop.permute.xlu1 %1314 }
 0x219   : > { %1708 = vrot.lane.b32.xlu2 %v3176_v40, %s2458_s18  ;;  %1406 = vst.msk [vmem:[#allocation3 + $0x28] sm:$0xff] %vm1400_vm9, %v1315_v58 }
 0x21a   : > { %v1319_v43 = vpop.permute.xlu0 %1318 }
 0x21b   : > { %1408 = vst.msk [vmem:[#allocation3 + $0x38] sm:$0xff] %vm1400_vm9, %v1319_v43  ;;  %v1323_v60 = vpop.permute.xlu2 %1322  ;;  %v4467_v43 = vld [vmem:[#allocation38_spill] sm:$0xff] }
 0x21c   : > { %1410 = vst.msk [vmem:[#allocation3 + $0x48] sm:$0xff] %vm1400_vm9, %v1323_v60  ;;  %v4468_v60 = vld [vmem:[#allocation15_spill] sm:$0xff] }
 0x21e   : > { %1736 = vrot.lane.b32.xlu1 %v4461_v24, %s2458_s18 }
 0x220   : > { %1443 = vrot.lane.b32.xlu0 %v2803_v12, %s2456_s16  ;;  %v1321_v56 = vpop.permute.xlu1 %1320 }
 0x221   : > { %1722 = vrot.lane.b32.xlu2 %v4455_v11, %s2458_s18  ;;  %1409 = vst.msk [vmem:[#allocation3 + $0x40] sm:$0xff] %vm1400_vm9, %v1321_v56 }
 0x222   : > { %v1325_v2 = vpop.permute.xlu0 %1324 }
 0x223   : > { %1411 = vst.msk [vmem:[#allocation3 + $0x50] sm:$0xff] %vm1400_vm9, %v1325_v2  ;;  %v1329_v32 = vpop.permute.xlu2 %1328 }
 0x224   : > { %1413 = vst.msk [vmem:[#allocation3 + $0x60] sm:$0xff] %vm1400_vm9, %v1329_v32 }
 0x226   : > { %1445 = vrot.lane.b32.xlu1 %v2709_v16, %s2456_s16 }
 0x228   : > { %1457 = vrot.lane.b32.xlu0 %v2821_v26, %s2456_s16  ;;  %v1327_v11 = vpop.permute.xlu1 %1326 }
 0x229   : > { %1602 = vrot.lane.b32.xlu2 %v4434_v28, %s2457_s17  ;;  %1412 = vst.msk [vmem:[#allocation3 + $0x58] sm:$0xff] %vm1400_vm9, %v1327_v11  ;;  %v4470_v11 = vld [vmem:[#allocation24_spill] sm:$0xff] }
 0x22a   : > { %v1331_v40 = vpop.permute.xlu0 %1330 }
 0x22b   : > { %1414 = vst.msk [vmem:[#allocation3 + $0x68] sm:$0xff] %vm1400_vm9, %v1331_v40  ;;  %v1335_v12 = vpop.permute.xlu2 %1334  ;;  %v4469_v40 = vld [vmem:[#allocation31_spill] sm:$0xff] }
 0x22c   : > { %1416 = vst.msk [vmem:[#allocation3 + $0x78] sm:$0xff] %vm1400_vm9, %v1335_v12 }
 0x22e   : > { %1578 = vrot.lane.b32.xlu1 %v2902_v41, %s2457_s17 }
 0x230   : > { %1590 = vrot.lane.b32.xlu0 %v4428_v4, %s2457_s17  ;;  %v1333_v16 = vpop.permute.xlu1 %1332  ;;  %v1889_v4 = vld [vmem:[%s4274_s3 + $0x20] sm:$0xf] }
 0x231   : > { %1738 = vrot.lane.b32.xlu2 %v3289_v3, %s2458_s18  ;;  %1415 = vst.msk [vmem:[#allocation3 + $0x70] sm:$0xff] %vm1400_vm9, %v1333_v16  ;;  %v1911_v28 = vunpack.c.l.b16 %v1889_v4  ;;  %v4471_v4 = vld [vmem:[#allocation20_spill] sm:$0xff] }
 0x232   : > { %v1337_v24 = vpop.permute.xlu0 %1336 }
 0x233   : > { %1417 = vst.msk [vmem:[#allocation3 + $0x80] sm:$0xff] %vm1400_vm9, %v1337_v24  ;;  %v1341_v26 = vpop.permute.xlu2 %1340  ;;  %v1916_v41 = vpack.c.b16 %v1911_v28, %v1911_v28 }
 0x234   : > { %1419 = vst.msk [vmem:[#allocation3 + $0x90] sm:$0xff] %vm1400_vm9, %v1341_v26 }
 0x235   : > { %v1972_v42 = vsel %vm1970_vm10, %v1916_v41, 0 }
 0x236   : > { %1592 = vrot.lane.b32.xlu1 %v4433_v55, %s2457_s17  ;;  %1977 = vmatpush.bf16.msra.mxu0 %v1972_v42 }
 0x237   : > { %2403 = vmatpush.bf16.msra.mxu1 %v1972_v42  ;;  %2404 = vmatpush.bf16.msra.mxu2 %v1972_v42 }
 0x238   : > { %1714 = vrot.lane.b32.xlu0 %v3199_v0, %s2458_s18  ;;  %v1339_v30 = vpop.permute.xlu1 %1338  ;;  %2405 = vmatpush.bf16.msra.mxu3 %v1972_v42 }
 0x239   : > { %1455 = vrot.lane.b32.xlu2 %v2882_v18, %s2456_s16  ;;  %1418 = vst.msk [vmem:[#allocation3 + $0x88] sm:$0xff] %vm1400_vm9, %v1339_v30  ;;  %v2402_v18 = vld [vmem:[%s4274_s3 + $0x18] sm:$0xff] }
 0x23a   : > { %v1343_v51 = vpop.permute.xlu0 %1342  ;;  %1978 = vmatpush.bf16.msra.mxu0 %v2402_v18 }
 0x23b   : > { %1420 = vst.msk [vmem:[#allocation3 + $0x98] sm:$0xff] %vm1400_vm9, %v1343_v51  ;;  %v1347_v3 = vpop.permute.xlu2 %1346  ;;  %2406 = vmatpush.bf16.msra.mxu1 %v2402_v18  ;;  %2407 = vmatpush.bf16.msra.mxu2 %v2402_v18 }
 0x23c   : > { %1422 = vst.msk [vmem:[#allocation3 + $0xa8] sm:$0xff] %vm1400_vm9, %v1347_v3  ;;  %2408 = vmatpush.bf16.msra.mxu3 %v2402_v18  ;;  %v4474_v18 = vld [vmem:[#allocation30_spill] sm:$0xff] }
 0x23e   : > { %1724 = vrot.lane.b32.xlu1 %v4458_v14, %s2458_s18 }
 0x240   : > { %1471 = vrot.lane.b32.xlu0 %v2951_v44, %s2456_s16  ;;  %v2401_v44 = vld [vmem:[%s4274_s3 + $0x10] sm:$0xff]  ;;  %v1345_v49 = vpop.permute.xlu1 %1344 }
 0x241   : > { %1580 = vrot.lane.b32.xlu2 %v4427_v36, %s2457_s17  ;;  %1979 = vmatpush.bf16.msra.mxu0 %v2401_v44  ;;  %1421 = vst.msk [vmem:[#allocation3 + $0xa0] sm:$0xff] %vm1400_vm9, %v1345_v49  ;;  %v2400_v36 = vld [vmem:[%s4274_s3 + $0x8] sm:$0xff]  ;;  %v4476_v49 = vld [vmem:[#allocation22_spill] sm:$0xff] }
 0x242   : > { %v1349_v0 = vpop.permute.xlu0 %1348  ;;  %2409 = vmatpush.bf16.msra.mxu1 %v2401_v44  ;;  %2410 = vmatpush.bf16.msra.mxu2 %v2401_v44 }
 0x243   : > { %1423 = vst.msk [vmem:[#allocation3 + $0xb0] sm:$0xff] %vm1400_vm9, %v1349_v0  ;;  %v1353_v55 = vpop.permute.xlu2 %1352  ;;  %2411 = vmatpush.bf16.msra.mxu3 %v2401_v44  ;;  %v4475_v0 = vld [vmem:[#allocation54_spill] sm:$0xff] }
 0x244   : > { %1425 = vst.msk [vmem:[#allocation3 + $0xc0] sm:$0xff] %vm1400_vm9, %v1353_v55 }
 0x245   : > { %1980 = vmatpush.bf16.msra.mxu0 %v2400_v36 }
 0x246   : > { %2412 = vmatpush.bf16.msra.mxu1 %v2400_v36  ;;  %2413 = vmatpush.bf16.msra.mxu2 %v2400_v36 }
 0x247   : > { %1473 = vrot.lane.b32.xlu1 %v2959_v53, %s2456_s16  ;;  %2414 = vmatpush.bf16.msra.mxu3 %v2400_v36 }
 0x248   : > { %1485 = vrot.lane.b32.xlu0 %v3021_v37, %s2456_s16  ;;  %v2399_v37 = vld [vmem:[%s4274_s3] sm:$0xff]  ;;  %v1351_v63 = vpop.permute.xlu1 %1350 }
 0x249   : > { %1712 = vrot.lane.b32.xlu2 %v4454_v57, %s2458_s18  ;;  %1981 = vmatpush.bf16.msra.mxu0 %v2399_v37  ;;  %1424 = vst.msk [vmem:[#allocation3 + $0xb8] sm:$0xff] %vm1400_vm9, %v1351_v63 }
 0x24a   : > { %v1355_v14 = vpop.permute.xlu0 %1354  ;;  %2415 = vmatpush.bf16.msra.mxu1 %v2399_v37  ;;  %2416 = vmatpush.bf16.msra.mxu2 %v2399_v37 }
 0x24b   : > { %1426 = vst.msk [vmem:[#allocation3 + $0xc8] sm:$0xff] %vm1400_vm9, %v1355_v14  ;;  %v1359_v39 = vpop.permute.xlu2 %1358  ;;  %2417 = vmatpush.bf16.msra.mxu3 %v2399_v37  ;;  %v4477_v14 = vld [vmem:[#allocation52_spill] sm:$0xff]  ;;  %v4478_v37 = vld [vmem:[#allocation10_spill] sm:$0xff] }
 0x24c   : > { %1428 = vst.msk [vmem:[#allocation3 + $0xd8] sm:$0xff] %vm1400_vm9, %v1359_v39 }
 0x24f   : > { %1606 = vrot.lane.b32.xlu1 %v4443_v45, %s2457_s17 }
 0x250   : > { %1618 = vrot.lane.b32.xlu0 %v4450_v17, %s2457_s17  ;;  %v1357_v35 = vpop.permute.xlu1 %1356 }
 0x251   : > { %1726 = vrot.lane.b32.xlu2 %v3244_v25, %s2458_s18  ;;  %1427 = vst.msk [vmem:[#allocation3 + $0xd0] sm:$0xff] %vm1400_vm9, %v1357_v35 }
 0x252   : > { %v1436_v53 = vpop.permute.xlu0 %1435 }
 0x253   : > { %1532 = vst.msk [vmem:[#allocation3] sm:$0xff] %vm1531_vm11, %v1436_v53  ;;  %v1571_v57 = vpop.permute.xlu2 %1570 }
 0x254   : > { %1667 = vst.msk [vmem:[#allocation3] sm:$0xff] %vm1666_vm12, %v1571_v57 }
 0x257   : > { %1620 = vrot.lane.b32.xlu1 %v4442_v34, %s2457_s17 }
 0x258   : > { %1742 = vrot.lane.b32.xlu0 %v4462_v59, %s2458_s18  ;;  %v1438_v47 = vpop.permute.xlu1 %1437 }
 0x259   : > { %1483 = vrot.lane.b32.xlu2 %v3014_v48, %s2456_s16  ;;  %1533 = vst.msk [vmem:[#allocation3 + $0x8] sm:$0xff] %vm1531_vm11, %v1438_v47  ;;  %v4480_v47 = vld [vmem:[#allocation48_spill] sm:$0xff] }
 0x25a   : > { %v1573_v17 = vpop.permute.xlu0 %1572 }
 0x25b   : > { %v1707_v25 = vpop.permute.xlu2 %1706  ;;  %1668 = vst.msk [vmem:[#allocation3 + $0x8] sm:$0xff] %vm1666_vm12, %v1573_v17 }
 0x25c   : > { %1802 = vst.msk [vmem:[#allocation3 + $0x8] sm:$0xff] %vm1800_vm13, %v1707_v25  ;;  %v4479_v25 = vld [vmem:[#allocation51_spill] sm:$0xff] }
 0x25f   : > { %1752 = vrot.lane.b32.xlu1 %v3280_v15, %s2458_s18 }
 0x260   : > { %1447 = vrot.lane.b32.xlu0 %v2777_v54, %s2456_s16  ;;  %v1705_v34 = vpop.permute.xlu1 %1704 }
 0x261   : > { %1608 = vrot.lane.b32.xlu2 %v4437_v22, %s2457_s17  ;;  %1801 = vst.msk [vmem:[#allocation3] sm:$0xff] %vm1800_vm13, %v1705_v34  ;;  %v4481_v34 = vld [vmem:[#allocation19_spill] sm:$0xff] }
 0x262   : > { %v1440_v45 = vpop.permute.xlu0 %1439 }
 0x263   : > { %1534 = vst.msk [vmem:[#allocation3 + $0x10] sm:$0xff] %vm1531_vm11, %v1440_v45  ;;  %v1452_v48 = vpop.permute.xlu2 %1451  ;;  %v1834_v22 = vld [vmem:[#allocation3 + $0x8] sm:$0xff] }
 0x264   : > { %1540 = vst.msk [vmem:[#allocation3 + $0x40] sm:$0xff] %vm1531_vm11, %v1452_v48 }
 0x267   : > { %1449 = vrot.lane.b32.xlu1 %v2795_v9, %s2456_s16 }
 0x268   : > { %1461 = vrot.lane.b32.xlu0 %v2885_v27, %s2456_s16  ;;  %v1442_v59 = vpop.permute.xlu1 %1441  ;;  %v1833_v38 = vld [vmem:[#allocation3] sm:$0xff] }
 0x269   : > { %1740 = vrot.lane.b32.xlu2 %v4460_v6, %s2458_s18  ;;  %1535 = vst.msk [vmem:[#allocation3 + $0x18] sm:$0xff] %vm1531_vm11, %v1442_v59  ;;  %v1865_v5 = vpack.c.bf16 %v1834_v22, %v1833_v38  ;;  %v4482_v22 = vld [vmem:[#allocation14_spill] sm:$0xff] }
 0x26a   : > { %v1454_v54 = vpop.permute.xlu0 %1453 }
 0x26b   : > { %1541 = vst.msk [vmem:[#allocation3 + $0x48] sm:$0xff] %vm1531_vm11, %v1454_v54  ;;  %v1577_v15 = vpop.permute.xlu2 %1576  ;;  %2379 = vmatmul.msk.bf16.vlgmr.msra.gmra.mxu0 %vm1921_vm14, %v1865_v5 }
 0x26c   : > { %1670 = vst.msk [vmem:[#allocation3 + $0x18] sm:$0xff] %vm1666_vm12, %v1577_v15 }
 0x26f   : > { %1582 = vrot.lane.b32.xlu1 %v4432_v8, %s2457_s17 }
 0x270   : > { %1594 = vrot.lane.b32.xlu0 %v4438_v13, %s2457_s17  ;;  %v1575_v6 = vpop.permute.xlu1 %1574 }
 0x271   : > { %1754 = vrot.lane.b32.xlu2 %v3314_v46, %s2458_s18  ;;  %1669 = vst.msk [vmem:[#allocation3 + $0x10] sm:$0xff] %vm1666_vm12, %v1575_v6 }
 0x272   : > { %v1587_v27 = vpop.permute.xlu0 %1586 }
 0x273   : > { %1675 = vst.msk [vmem:[#allocation3 + $0x40] sm:$0xff] %vm1666_vm12, %v1587_v27  ;;  %v1709_v9 = vpop.permute.xlu2 %1708 }
 0x274   : > { %1803 = vst.msk [vmem:[#allocation3 + $0x10] sm:$0xff] %vm1800_vm13, %v1709_v9  ;;  %v4483_v9 = vld [vmem:[#allocation34_spill] sm:$0xff] }
 0x277   : > { %1596 = vrot.lane.b32.xlu1 %v4431_v20, %s2457_s17 }
 0x278   : > { %1718 = vrot.lane.b32.xlu0 %v4456_v50, %s2458_s18  ;;  %v1589_v8 = vpop.permute.xlu1 %1588 }
 0x279   : > { %1459 = vrot.lane.b32.xlu2 %v2868_v7, %s2456_s16  ;;  %1676 = vst.msk [vmem:[#allocation3 + $0x48] sm:$0xff] %vm1666_vm12, %v1589_v8  ;;  %v4465_v7 = vld [vmem:[#allocation16_spill] sm:$0xff] }
 0x27a   : > { %v1711_v13 = vpop.permute.xlu0 %1710 }
 0x27b   : > { %1804 = vst.msk [vmem:[#allocation3 + $0x18] sm:$0xff] %vm1800_vm13, %v1711_v13  ;;  %v1723_v46 = vpop.permute.xlu2 %1722  ;;  %v1835_v50 = vld [vmem:[#allocation3 + $0x10] sm:$0xff]  ;;  %v4484_v13 = vld [vmem:[#allocation44_spill] sm:$0xff] }
 0x27c   : > { %1810 = vst.msk [vmem:[#allocation3 + $0x48] sm:$0xff] %vm1800_vm13, %v1723_v46  ;;  %v4485_v46 = vld [vmem:[#allocation55_spill] sm:$0xff] }
 0x27f   : > { %1728 = vrot.lane.b32.xlu1 %v4457_v61, %s2458_s18 }
 0x280   : > { %1475 = vrot.lane.b32.xlu0 %v4464_v31, %s2456_s16  ;;  %v1721_v52 = vpop.permute.xlu1 %1720 }
 0x281   : > { %1584 = vrot.lane.b32.xlu2 %v4465_v7, %s2457_s17  ;;  %1809 = vst.msk [vmem:[#allocation3 + $0x40] sm:$0xff] %vm1800_vm13, %v1721_v52  ;;  %v4488_v52 = vld [vmem:[#allocation25_spill] sm:$0xff] }
 0x282   : > { %v1468_v62 = vpop.permute.xlu0 %1467  ;;  %v1836_v33 = vld [vmem:[#allocation3 + $0x18] sm:$0xff] }
 0x283   : > { %1548 = vst.msk [vmem:[#allocation3 + $0x80] sm:$0xff] %vm1531_vm11, %v1468_v62  ;;  %v1866_v19 = vpack.c.bf16 %v1836_v33, %v1835_v50  ;;  %v1603_v20 = vpop.permute.xlu2 %1602  ;;  %v1842_v58 = vld [vmem:[#allocation3 + $0x48] sm:$0xff]  ;;  %v2440_v62 = vld [vmem:[#allocation2 + $0x180] sm:$0xff] }
 0x284   : > { %1683 = vst.msk [vmem:[#allocation3 + $0x80] sm:$0xff] %vm1666_vm12, %v1603_v20  ;;  %v4486_v50 = vld [vmem:[#allocation21_spill] sm:$0xff]  ;;  %v1299_v33 = vrot.slane %v2440_v62, 2 }
 0x285   : > { %2380 = vmatmul.msk.bf16.gmra.mxu0 %vm1921_vm14, %v1866_v19  ;;  %v4487_v19 = vld [vmem:[#allocation56_spill] sm:$0xff] }
 0x286   : > { %v1300_v7 = vrot.slane %v4487_v19, 2 }
 0x287   : > { %1477 = vrot.lane.b32.xlu1 %v4468_v60, %s2456_s16 }
 0x288   : > { %1489 = vrot.lane.b32.xlu0 %v4466_v21, %s2456_s16  ;;  %v1470_v2 = vpop.permute.xlu1 %1469  ;;  %v1841_v32 = vld [vmem:[#allocation3 + $0x40] sm:$0xff] }
 0x289   : > { %1716 = vrot.lane.b32.xlu2 %v4467_v43, %s2458_s18  ;;  %1549 = vst.msk [vmem:[#allocation3 + $0x88] sm:$0xff] %vm1531_vm11, %v1470_v2  ;;  %v1869_v56 = vpack.c.bf16 %v1842_v58, %v1841_v32  ;;  %v4489_v21 = vld [vmem:[#allocation28_spill] sm:$0xff]  ;;  %v1301_v43 = vsel %vm823_vm4, %v1299_v33, %v1300_v7 }
 0x28a   : > { %v1605_v23 = vpop.permute.xlu0 %1604 }
 0x28b   : > { %v1739_v61 = vpop.permute.xlu2 %1738  ;;  %1684 = vst.msk [vmem:[#allocation3 + $0x88] sm:$0xff] %vm1666_vm12, %v1605_v23  ;;  %2383 = vmatmul.msk.bf16.vlgmr.msra.gmra.mxu1 %vm1921_vm14, %v1869_v56 }
 0x28c   : > { %1818 = vst.msk [vmem:[#allocation3 + $0x88] sm:$0xff] %vm1800_vm13, %v1739_v61  ;;  %v4490_v61 = vld [vmem:[#allocation4_spill] sm:$0xff] }
 0x28d   : > { %v1302_v2 = vrot.slane %v4490_v61, 2 }
 0x28f   : > { %1610 = vrot.lane.b32.xlu1 %v4470_v11, %s2457_s17 }
 0x290   : > { %1622 = vrot.lane.b32.xlu0 %v4469_v40, %s2457_s17  ;;  %v1737_v26 = vpop.permute.xlu1 %1736 }
 0x291   : > { %1730 = vrot.lane.b32.xlu2 %v4459_v1, %s2458_s18  ;;  %1817 = vst.msk [vmem:[#allocation3 + $0x80] sm:$0xff] %vm1800_vm13, %v1737_v26  ;;  %v4472_v1 = vld [vmem:[#allocation35_spill] sm:$0xff] }
 0x292   : > { %v1444_v12 = vpop.permute.xlu0 %1443 }
 0x293   : > { %1536 = vst.msk [vmem:[#allocation3 + $0x20] sm:$0xff] %vm1531_vm11, %v1444_v12  ;;  %v1456_v24 = vpop.permute.xlu2 %1455  ;;  %v1850_v28 = vld [vmem:[#allocation3 + $0x88] sm:$0xff]  ;;  %v2441_v12 = vld [vmem:[#allocation2 + $0x188] sm:$0xff] }
 0x294   : > { %1542 = vst.msk [vmem:[#allocation3 + $0x50] sm:$0xff] %vm1531_vm11, %v1456_v24  ;;  %v1303_v24 = vsel %vm823_vm4, %v1300_v7, %v1302_v2 }
 0x297   : > { %1624 = vrot.lane.b32.xlu1 %v4472_v1, %s2457_s17 }
 0x298   : > { %1746 = vrot.lane.b32.xlu0 %v3258_v10, %s2458_s18  ;;  %v1446_v41 = vpop.permute.xlu1 %1445  ;;  %v1849_v3 = vld [vmem:[#allocation3 + $0x80] sm:$0xff] }
 0x299   : > { %1487 = vrot.lane.b32.xlu2 %v4471_v4, %s2456_s16  ;;  %1537 = vst.msk [vmem:[#allocation3 + $0x28] sm:$0xff] %vm1531_vm11, %v1446_v41  ;;  %v1873_v42 = vpack.c.bf16 %v1850_v28, %v1849_v3  ;;  %v4473_v10 = vld [vmem:[#allocation8_spill] sm:$0xff]  ;;  %v3930_v4 = vld [vmem:[#allocation2 + $0x1a0] sm:$0xff] }
 0x29a   : > { %v1458_v16 = vpop.permute.xlu0 %1457 }
 0x29b   : > { %1543 = vst.msk [vmem:[#allocation3 + $0x58] sm:$0xff] %vm1531_vm11, %v1458_v16  ;;  %v1581_v51 = vpop.permute.xlu2 %1580  ;;  %2387 = vmatmul.msk.bf16.vlgmr.msra.gmra.mxu2 %vm1921_vm14, %v1873_v42  ;;  %v3928_v16 = vld [vmem:[#allocation2 + $0x198] sm:$0xff] }
 0x29c   : > { %1672 = vst.msk [vmem:[#allocation3 + $0x28] sm:$0xff] %vm1666_vm12, %v1581_v51  ;;  %v1565_v1 = vrot.slane %v3928_v16, 1  ;;  %v4491_v51 = vld [vmem:[#allocation6_spill] sm:$0xff] }
 0x29f   : > { %1756 = vrot.lane.b32.xlu1 %v4475_v0, %s2458_s18 }
 0x2a0   : > { %1463 = vrot.lane.b32.xlu0 %v4473_v10, %s2456_s16  ;;  %v1579_v55 = vpop.permute.xlu1 %1578 }
 0x2a1   : > { %1612 = vrot.lane.b32.xlu2 %v4474_v18, %s2457_s17  ;;  %1671 = vst.msk [vmem:[#allocation3 + $0x20] sm:$0xff] %vm1666_vm12, %v1579_v55  ;;  %v532_v18 = vld [vmem:[#allocation2 + $0x1a8] sm:$0x3] }
 0x2a2   : > { %v1591_v30 = vpop.permute.xlu0 %1590  ;;  %v1702_v55 = vrot.slane %v532_v18, 2 }
 0x2a3   : > { %1677 = vst.msk [vmem:[#allocation3 + $0x50] sm:$0xff] %vm1666_vm12, %v1591_v30  ;;  %v1713_v44 = vpop.permute.xlu2 %1712 }
 0x2a4   : > { %1805 = vst.msk [vmem:[#allocation3 + $0x20] sm:$0xff] %vm1800_vm13, %v1713_v44  ;;  %v1700_v44 = vrot.slane %v3930_v4, 2 }
 0x2a7   : > { %1465 = vrot.lane.b32.xlu1 %v4478_v37, %s2456_s16  ;;  %v1568_v37 = vrot.slane %v532_v18, 1 }
 0x2a8   : > { %1600 = vrot.lane.b32.xlu0 %v4476_v49, %s2457_s17  ;;  %v1593_v63 = vpop.permute.xlu1 %1592 }
 0x2a9   : > { %1744 = vrot.lane.b32.xlu2 %v4477_v14, %s2458_s18  ;;  %1678 = vst.msk [vmem:[#allocation3 + $0x58] sm:$0xff] %vm1666_vm12, %v1593_v63 }
 0x2aa   : > { %v1715_v36 = vpop.permute.xlu0 %1714 }
 0x2ab   : > { %1806 = vst.msk [vmem:[#allocation3 + $0x28] sm:$0xff] %vm1800_vm13, %v1715_v36  ;;  %v1727_v39 = vpop.permute.xlu2 %1726  ;;  %v1837_v53 = vld [vmem:[#allocation3 + $0x20] sm:$0xff]  ;;  %v4492_v36 = vld [vmem:[#allocation53_spill] sm:$0xff] }
 0x2ac   : > { %1812 = vst.msk [vmem:[#allocation3 + $0x58] sm:$0xff] %vm1800_vm13, %v1727_v39  ;;  %v1703_v39 = vsel %vm823_vm4, %v1700_v44, %v1702_v55 }
 0x2af   : > { %1732 = vrot.lane.b32.xlu1 %v4480_v47, %s2458_s18 }
 0x2b0   : > { %1360 = vrot.lane.b32.xlu0 %v4475_v0, %s2455_s15  ;;  %v1725_v48 = vpop.permute.xlu1 %1724 }
 0x2b1   : > { %1758 = vrot.lane.b32.xlu2 %v4479_v25, %s2458_s18  ;;  %1811 = vst.msk [vmem:[#allocation3 + $0x50] sm:$0xff] %vm1800_vm13, %v1725_v48 }
 0x2b2   : > { %v1472_v57 = vpop.permute.xlu0 %1471  ;;  %v1838_v35 = vld [vmem:[#allocation3 + $0x28] sm:$0xff] }
 0x2b3   : > { %1550 = vst.msk [vmem:[#allocation3 + $0x90] sm:$0xff] %vm1531_vm11, %v1472_v57  ;;  %v1867_v17 = vpack.c.bf16 %v1838_v35, %v1837_v53  ;;  %v1484_v45 = vpop.permute.xlu2 %1483  ;;  %v1844_v15 = vld [vmem:[#allocation3 + $0x58] sm:$0xff]  ;;  %v3960_v35 = vld [vmem:[%s4275_s4] ss:$0 sm:$0xff] }
 0x2b4   : > { %1556 = vst.msk [vmem:[#allocation3 + $0xc0] sm:$0xff] %vm1531_vm11, %v1484_v45 }
 0x2b5   : > { %2381 = vmatmul.msk.bf16.gmra.mxu0 %vm1921_vm14, %v1867_v17 }
 0x2b7   : > { %1362 = vrot.lane.b32.xlu1 %v4479_v25, %s2455_s15 }
 0x2b8   : > { %1481 = vrot.lane.b32.xlu0 %v4481_v34, %s2456_s16  ;;  %v1843_v5 = vld [vmem:[#allocation3 + $0x50] sm:$0xff] }
 0x2b9   : > { %1598 = vrot.lane.b32.xlu2 %v4482_v22, %s2457_s17  ;;  %v1474_v38 = vpop.permute.xlu1 %1473  ;;  %v1870_v27 = vpack.c.bf16 %v1844_v15, %v1843_v5  ;;  %v1699_v15 = vrot.slane %v3928_v16, 2 }
 0x2ba   : > { %v1486_v54 = vpop.permute.xlu0 %1485  ;;  %1551 = vst.msk [vmem:[#allocation3 + $0x98] sm:$0xff] %vm1531_vm11, %v1474_v38 }
 0x2bb   : > { %1557 = vst.msk [vmem:[#allocation3 + $0xc8] sm:$0xff] %vm1531_vm11, %v1486_v54  ;;  %v1609_v59 = vpop.permute.xlu2 %1608  ;;  %2384 = vmatmul.msk.bf16.gmra.mxu1 %vm1921_vm14, %v1870_v27 }
 0x2bc   : > { %1686 = vst.msk [vmem:[#allocation3 + $0x98] sm:$0xff] %vm1666_vm12, %v1609_v59 }
 0x2bf   : > { %1491 = vrot.lane.b32.xlu1 %v4485_v46, %s2456_s16 }
 0x2c0   : > { %1614 = vrot.lane.b32.xlu0 %v4483_v9, %s2457_s17 }
 0x2c1   : > { %1734 = vrot.lane.b32.xlu2 %v4484_v13, %s2458_s18  ;;  %v1607_v31 = vpop.permute.xlu1 %1606 }
 0x2c2   : > { %v1619_v6 = vpop.permute.xlu0 %1618  ;;  %1685 = vst.msk [vmem:[#allocation3 + $0x90] sm:$0xff] %vm1666_vm12, %v1607_v31 }
 0x2c3   : > { %1691 = vst.msk [vmem:[#allocation3 + $0xc0] sm:$0xff] %vm1666_vm12, %v1619_v6  ;;  %v1741_v8 = vpop.permute.xlu2 %1740  ;;  %v1701_v6 = vsel %vm823_vm4, %v1699_v15, %v1700_v44 }
 0x2c4   : > { %1819 = vst.msk [vmem:[#allocation3 + $0x90] sm:$0xff] %vm1800_vm13, %v1741_v8 }
 0x2c7   : > { %1616 = vrot.lane.b32.xlu1 %v4489_v21, %s2457_s17 }
 0x2c8   : > { %1628 = vrot.lane.b32.xlu0 %v4486_v50, %s2457_s17 }
 0x2c9   : > { %1479 = vrot.lane.b32.xlu2 %v4488_v52, %s2456_s16  ;;  %v1621_v60 = vpop.permute.xlu1 %1620 }
 0x2ca   : > { %v1743_v20 = vpop.permute.xlu0 %1742  ;;  %1692 = vst.msk [vmem:[#allocation3 + $0xc8] sm:$0xff] %vm1666_vm12, %v1621_v60 }
 0x2cb   : > { %1820 = vst.msk [vmem:[#allocation3 + $0x98] sm:$0xff] %vm1800_vm13, %v1743_v20  ;;  %v1755_v23 = vpop.permute.xlu2 %1754  ;;  %v1851_v58 = vld [vmem:[#allocation3 + $0x90] sm:$0xff] }
 0x2cc   : > { %1826 = vst.msk [vmem:[#allocation3 + $0xc8] sm:$0xff] %vm1800_vm13, %v1755_v23 }
 0x2cf   : > { %1748 = vrot.lane.b32.xlu1 %v4463_v29, %s2458_s18  ;;  %v1566_v29 = vrot.slane %v3930_v4, 1 }
 0x2d0   : > { %1760 = vrot.lane.b32.xlu0 %v1301_v43, %s2458_s18 }
 0x2d1   : > { %1493 = vrot.lane.b32.xlu2 %v2441_v12, %s2456_s16  ;;  %v1753_v26 = vpop.permute.xlu1 %1752  ;;  %v1567_v42 = vsel %vm613_vm2, %v1565_v1, %v1566_v29  ;;  %v1569_v53 = vsel %vm613_vm2, %v1566_v29, %v1568_v37 }
 0x2d2   : > { %v1448_v32 = vpop.permute.xlu0 %1447  ;;  %v1852_v56 = vld [vmem:[#allocation3 + $0x98] sm:$0xff]  ;;  %1825 = vst.msk [vmem:[#allocation3 + $0xc0] sm:$0xff] %vm1800_vm13, %v1753_v26 }
 0x2d3   : > { %1538 = vst.msk [vmem:[#allocation3 + $0x30] sm:$0xff] %vm1531_vm11, %v1448_v32  ;;  %v1874_v40 = vpack.c.bf16 %v1852_v56, %v1851_v58  ;;  %v1460_v11 = vpop.permute.xlu2 %1459  ;;  %v1858_v41 = vld [vmem:[#allocation3 + $0xc8] sm:$0xff] }
 0x2d4   : > { %1544 = vst.msk [vmem:[#allocation3 + $0x60] sm:$0xff] %vm1531_vm11, %v1460_v11 }
 0x2d5   : > { %2388 = vmatmul.msk.bf16.gmra.mxu2 %vm1921_vm14, %v1874_v40 }
 0x2d7   : > { %1762 = vrot.lane.b32.xlu1 %v1303_v24, %s2458_s18 }
 0x2d8   : > { %1366 = vrot.lane.b32.xlu0 %v1303_v24, %s2455_s15 }
 0x2d9   : > { %1626 = vrot.lane.b32.xlu2 %v4491_v51, %s2457_s17  ;;  %v1450_v10 = vpop.permute.xlu1 %1449  ;;  %v1857_v30 = vld [vmem:[#allocation3 + $0xc0] sm:$0xff] }
 0x2da   : > { %v1462_v28 = vpop.permute.xlu0 %1461  ;;  %1539 = vst.msk [vmem:[#allocation3 + $0x38] sm:$0xff] %vm1531_vm11, %v1450_v10  ;;  %v1877_v0 = vpack.c.bf16 %v1858_v41, %v1857_v30 }
 0x2db   : > { %1545 = vst.msk [vmem:[#allocation3 + $0x68] sm:$0xff] %vm1531_vm11, %v1462_v28  ;;  %v1585_v3 = vpop.permute.xlu2 %1584 }
 0x2dc   : > { %1674 = vst.msk [vmem:[#allocation3 + $0x38] sm:$0xff] %vm1666_vm12, %v1585_v3  ;;  %2391 = vmatmul.msk.bf16.vlgmr.msra.gmra.mxu3 %vm1921_vm14, %v1877_v0 }
 0x2df   : > { %1495 = vrot.lane.b32.xlu1 %v3928_v16, %s2456_s16 }
 0x2e0   : > { %1630 = vrot.lane.b32.xlu0 %v1567_v42, %s2457_s17 }
 0x2e1   : > { %1750 = vrot.lane.b32.xlu2 %v4492_v36, %s2458_s18  ;;  %v1583_v63 = vpop.permute.xlu1 %1582 }
 0x2e2   : > { %v1595_v49 = vpop.permute.xlu0 %1594  ;;  %1673 = vst.msk [vmem:[#allocation3 + $0x30] sm:$0xff] %vm1666_vm12, %v1583_v63 }
 0x2e3   : > { %1679 = vst.msk [vmem:[#allocation3 + $0x60] sm:$0xff] %vm1666_vm12, %v1595_v49  ;;  %v1717_v14 = vpop.permute.xlu2 %1716 }
 0x2e4   : > { %1807 = vst.msk [vmem:[#allocation3 + $0x30] sm:$0xff] %vm1800_vm13, %v1717_v14 }
 0x2e7   : > { %1632 = vrot.lane.b32.xlu1 %v1569_v53, %s2457_s17 }
 0x2e8   : > { %1766 = vrot.lane.b32.xlu0 %v1703_v39, %s2458_s18  ;;  %v1983_v25 = vpop.f32.mrf.mxu0 }
 0x2e9   : > { %1364 = vrot.lane.b32.xlu2 %v1301_v43, %s2455_s15  ;;  %v1597_v47 = vpop.permute.xlu1 %1596  ;;  %v1984_v45 = vadd.f32 %v3960_v35, %v1983_v25  ;;  %s262_s15 = scalar_lea.vmem %s4277_s6, %s2362_s24 }
 0x2ea   : > { %v1719_v57 = vpop.permute.xlu0 %1718  ;;  %1680 = vst.msk [vmem:[#allocation3 + $0x68] sm:$0xff] %vm1666_vm12, %v1597_v47 }
 0x2eb   : > { %1808 = vst.msk [vmem:[#allocation3 + $0x38] sm:$0xff] %vm1800_vm13, %v1719_v57  ;;  %v1731_v17 = vpop.permute.xlu2 %1730  ;;  %v1839_v48 = vld [vmem:[#allocation3 + $0x30] sm:$0xff]  ;;  %v2165_v27 = vmul.f32 %v1984_v45, %v1984_v45  ;;  %v2095_v13 = vsel %vm400_vm0, %v1984_v45, 0.0 }
 0x2ec   : > { %1814 = vst.msk [vmem:[#allocation3 + $0x68] sm:$0xff] %vm1800_vm13, %v1731_v17 }
 0x2ed   : > { %2063 = vst.msk [vmem:[%s3969_s12] sm:$0xff] %vm400_vm0, %v1984_v45  ;;  %v2197_v62 = vsel %vm400_vm0, %v2165_v27, 0.0 }
 0x2f0   : > { %v1985_v38 = vpop.f32.mrf.mxu0 }
 0x2f1   : > { %1497 = vrot.lane.b32.xlu2 %v3930_v4, %s2456_s16  ;;  %v1729_v5 = vpop.permute.xlu1 %1728  ;;  %v1986_v9 = vadd.f32 %v3960_v35, %v1985_v38 }
 0x2f2   : > { %v1476_v34 = vpop.permute.xlu0 %1475  ;;  %v1840_v54 = vld [vmem:[#allocation3 + $0x38] sm:$0xff]  ;;  %1813 = vst.msk [vmem:[#allocation3 + $0x60] sm:$0xff] %vm1800_vm13, %v1729_v5 }
 0x2f3   : > { %1552 = vst.msk [vmem:[#allocation3 + $0xa0] sm:$0xff] %vm1531_vm11, %v1476_v34  ;;  %v1868_v22 = vpack.c.bf16 %v1840_v54, %v1839_v48  ;;  %v1488_v59 = vpop.permute.xlu2 %1487  ;;  %v2096_v46 = vsel %vm400_vm0, %v1986_v9, 0.0  ;;  %v2166_v8 = vmul.f32 %v1986_v9, %v1986_v9  ;;  %v1846_v7 = vld [vmem:[#allocation3 + $0x68] sm:$0xff] }
 0x2f4   : > { %1558 = vst.msk [vmem:[#allocation3 + $0xd0] sm:$0xff] %vm1531_vm11, %v1488_v59  ;;  %v2097_v31 = vadd.f32 %v2096_v46, %v2095_v13 }
 0x2f5   : > { %2382 = vmatmul.msk.bf16.gmra.mxu0 %vm1921_vm14, %v1868_v22  ;;  %2064 = vst.msk [vmem:[%s3969_s12 + $0x8] sm:$0xff] %vm400_vm0, %v1986_v9  ;;  %v2198_v33 = vsel %vm400_vm0, %v2166_v8, 0.0 }
 0x2f6   : > { %v2199_v19 = vadd.f32 %v2198_v33, %v2197_v62 }
 0x2f9   : > { %1764 = vrot.lane.b32.xlu2 %v1701_v6, %s2458_s18  ;;  %v1478_v52 = vpop.permute.xlu1 %1477  ;;  %v1845_v21 = vld [vmem:[#allocation3 + $0x60] sm:$0xff] }
 0x2fa   : > { %v1490_v50 = vpop.permute.xlu0 %1489  ;;  %1553 = vst.msk [vmem:[#allocation3 + $0xa8] sm:$0xff] %vm1531_vm11, %v1478_v52  ;;  %v1871_v23 = vpack.c.bf16 %v1846_v7, %v1845_v21 }
 0x2fb   : > { %1559 = vst.msk [vmem:[#allocation3 + $0xd8] sm:$0xff] %vm1531_vm11, %v1490_v50  ;;  %v1613_v20 = vpop.permute.xlu2 %1612 }
 0x2fc   : > { %1688 = vst.msk [vmem:[#allocation3 + $0xa8] sm:$0xff] %vm1666_vm12, %v1613_v20  ;;  %2385 = vmatmul.msk.bf16.gmra.mxu1 %vm1921_vm14, %v1871_v23 }
 0x301   : > { %v1611_v40 = vpop.permute.xlu1 %1610 }
 0x302   : > { %v1623_v43 = vpop.permute.xlu0 %1622  ;;  %v1988_v60 = vpop.f32.mrf.mxu0  ;;  %1687 = vst.msk [vmem:[#allocation3 + $0xa0] sm:$0xff] %vm1666_vm12, %v1611_v40 }
 0x303   : > { %1693 = vst.msk [vmem:[#allocation3 + $0xd0] sm:$0xff] %vm1666_vm12, %v1623_v43  ;;  %v1989_v58 = vadd.f32 %v3960_v35, %v1988_v60  ;;  %v1745_v32 = vpop.permute.xlu2 %1744 }
 0x304   : > { %1821 = vst.msk [vmem:[#allocation3 + $0xa0] sm:$0xff] %vm1800_vm13, %v1745_v32 }
 0x305   : > { %2065 = vst.msk [vmem:[%s3969_s12 + $0x10] sm:$0xff] %vm400_vm0, %v1989_v58  ;;  %v2098_v61 = vsel %vm400_vm0, %v1989_v58, 0.0  ;;  %v2167_v2 = vmul.f32 %v1989_v58, %v1989_v58 }
 0x306   : > { %v2099_v56 = vadd.f32 %v2098_v61, %v2097_v31 }
 0x307   : > { %v2200_v12 = vsel %vm400_vm0, %v2167_v2, 0.0 }
 0x308   : > { %v2201_v11 = vadd.f32 %v2200_v12, %v2199_v19  ;;  %v2003_v51 = vpop.f32.mrf.mxu1 }
 0x309   : > { %v1625_v41 = vpop.permute.xlu1 %1624  ;;  %v4011_v42 = vadd.f32 %v3960_v35, %v2003_v51 }
 0x30a   : > { %v1747_v24 = vpop.permute.xlu0 %1746  ;;  %v1990_v26 = vpop.f32.mrf.mxu0  ;;  %1694 = vst.msk [vmem:[#allocation3 + $0xd8] sm:$0xff] %vm1666_vm12, %v1625_v41 }
 0x30b   : > { %1822 = vst.msk [vmem:[#allocation3 + $0xa8] sm:$0xff] %vm1800_vm13, %v1747_v24  ;;  %v1991_v16 = vadd.f32 %v3960_v35, %v1990_v26  ;;  %v1759_v29 = vpop.permute.xlu2 %1758  ;;  %v1853_v30 = vld [vmem:[#allocation3 + $0xa0] sm:$0xff] }
 0x30c   : > { %1828 = vst.msk [vmem:[#allocation3 + $0xd8] sm:$0xff] %vm1800_vm13, %v1759_v29 }
 0x30d   : > { %2066 = vst.msk [vmem:[%s3969_s12 + $0x18] sm:$0xff] %vm400_vm0, %v1991_v16  ;;  %v2100_v4 = vsel %vm400_vm0, %v1991_v16, 0.0  ;;  %v2168_v1 = vmul.f32 %v1991_v16, %v1991_v16 }
 0x30e   : > { %v2101_v28 = vadd.f32 %v2100_v4, %v2099_v56  ;;  %2071 = vst.msk [vmem:[%s3969_s12 + $0x40] sm:$0xff] %vm400_vm0, %v4011_v42 }
 0x30f   : > { %v2202_v3 = vsel %vm400_vm0, %v2168_v1, 0.0 }
 0x310   : > { %v2203_v10 = vadd.f32 %v2202_v3, %v2201_v11  ;;  %v2005_v49 = vpop.f32.mrf.mxu1 }
 0x311   : > { %v1757_v36 = vpop.permute.xlu1 %1756  ;;  %v4022_v14 = vadd.f32 %v3960_v35, %v2005_v49 }
 0x312   : > { %v1854_v18 = vld [vmem:[#allocation3 + $0xa8] sm:$0xff]  ;;  %v1464_v0 = vpop.permute.xlu0 %1463  ;;  %1827 = vst.msk [vmem:[#allocation3 + $0xd0] sm:$0xff] %vm1800_vm13, %v1757_v36 }
 0x313   : > { %v1875_v44 = vpack.c.bf16 %v1854_v18, %v1853_v30  ;;  %1546 = vst.msk [vmem:[#allocation3 + $0x70] sm:$0xff] %vm1531_vm11, %v1464_v0  ;;  %v1599_v55 = vpop.permute.xlu2 %1598  ;;  %v1860_v39 = vld [vmem:[#allocation3 + $0xd8] sm:$0xff] }
 0x314   : > { %1681 = vst.msk [vmem:[#allocation3 + $0x70] sm:$0xff] %vm1666_vm12, %v1599_v55 }
 0x315   : > { %2389 = vmatmul.msk.bf16.gmra.mxu2 %vm1921_vm14, %v1875_v44  ;;  %2072 = vst.msk [vmem:[%s3969_s12 + $0x48] sm:$0xff] %vm400_vm0, %v4022_v14 }
 0x319   : > { %v1466_v53 = vpop.permute.xlu1 %1465  ;;  %v1859_v57 = vld [vmem:[#allocation3 + $0xd0] sm:$0xff] }
 0x31a   : > { %v1601_v37 = vpop.permute.xlu0 %1600  ;;  %1547 = vst.msk [vmem:[#allocation3 + $0x78] sm:$0xff] %vm1531_vm11, %v1466_v53  ;;  %v1878_v17 = vpack.c.bf16 %v1860_v39, %v1859_v57 }
 0x31b   : > { %v1735_v63 = vpop.permute.xlu2 %1734  ;;  %1682 = vst.msk [vmem:[#allocation3 + $0x78] sm:$0xff] %vm1666_vm12, %v1601_v37 }
 0x31c   : > { %2392 = vmatmul.msk.bf16.gmra.mxu3 %vm1921_vm14, %v1878_v17  ;;  %1816 = vst.msk [vmem:[#allocation3 + $0x78] sm:$0xff] %vm1800_vm13, %v1735_v63 }
 0x31e   : > { %v2023_v47 = vpop.f32.mrf.mxu2 }
 0x31f   : > { %v4034_v45 = vadd.f32 %v3960_v35, %v2023_v47 }
 0x321   : > { %v1733_v34 = vpop.permute.xlu1 %1732  ;;  %2079 = vst.msk [vmem:[%s3969_s12 + $0x80] sm:$0xff] %vm400_vm0, %v4034_v45 }
 0x322   : > { %v1361_v25 = vpop.permute.xlu0 %1360  ;;  %1815 = vst.msk [vmem:[#allocation3 + $0x70] sm:$0xff] %vm1800_vm13, %v1733_v34 }
 0x323   : > { %1429 = vst.msk [vmem:[#allocation3 + $0xe0] sm:$0xff] %vm1400_vm9, %v1361_v25  ;;  %v1480_v48 = vpop.permute.xlu2 %1479  ;;  %v1848_v59 = vld [vmem:[#allocation3 + $0x78] sm:$0xff] }
 0x324   : > { %1554 = vst.msk [vmem:[#allocation3 + $0xb0] sm:$0xff] %vm1531_vm11, %v1480_v48 }
 0x326   : > { %v2025_v22 = vpop.f32.mrf.mxu2 }
 0x327   : > { %v4043_v15 = vadd.f32 %v3960_v35, %v2025_v22 }
 0x329   : > { %v1363_v5 = vpop.permute.xlu1 %1362  ;;  %2080 = vst.msk [vmem:[%s3969_s12 + $0x88] sm:$0xff] %vm400_vm0, %v4043_v15  ;;  %v1847_v27 = vld [vmem:[#allocation3 + $0x70] sm:$0xff] }
 0x32a   : > { %v1482_v54 = vpop.permute.xlu0 %1481  ;;  %1430 = vst.msk [vmem:[#allocation3 + $0xe8] sm:$0xff] %vm1400_vm9, %v1363_v5  ;;  %v1872_v9 = vpack.c.bf16 %v1848_v59, %v1847_v27 }
 0x32b   : > { %1555 = vst.msk [vmem:[#allocation3 + $0xb8] sm:$0xff] %vm1531_vm11, %v1482_v54  ;;  %v1494_v38 = vpop.permute.xlu2 %1493 }
 0x32c   : > { %1561 = vst.msk [vmem:[#allocation3 + $0xe8] sm:$0xff] %vm1531_vm11, %v1494_v38  ;;  %2386 = vmatmul.msk.bf16.gmra.mxu1 %vm1921_vm14, %v1872_v9 }
 0x331   : > { %v1492_v33 = vpop.permute.xlu1 %1491 }
 0x332   : > { %v1993_v6 = vpop.f32.mrf.mxu0  ;;  %v1615_v13 = vpop.permute.xlu0 %1614  ;;  %1560 = vst.msk [vmem:[#allocation3 + $0xe0] sm:$0xff] %vm1531_vm11, %v1492_v33  ;;  %v2110_v33 = vsel %vm400_vm0, %v4011_v42, 0.0 }
 0x333   : > { %v1994_v46 = vadd.f32 %v3960_v35, %v1993_v6  ;;  %1689 = vst.msk [vmem:[#allocation3 + $0xb0] sm:$0xff] %vm1666_vm12, %v1615_v13  ;;  %v1627_v50 = vpop.permute.xlu2 %1626 }
 0x334   : > { %1695 = vst.msk [vmem:[#allocation3 + $0xe0] sm:$0xff] %vm1666_vm12, %v1627_v50 }
 0x335   : > { %2067 = vst.msk [vmem:[%s3969_s12 + $0x20] sm:$0xff] %vm400_vm0, %v1994_v46  ;;  %v2102_v8 = vsel %vm400_vm0, %v1994_v46, 0.0  ;;  %v2169_v31 = vmul.f32 %v1994_v46, %v1994_v46  ;;  %v2173_v46 = vmul.f32 %v4011_v42, %v4011_v42 }
 0x336   : > { %v2103_v62 = vadd.f32 %v2102_v8, %v2101_v28 }
 0x337   : > { %v2204_v19 = vsel %vm400_vm0, %v2169_v31, 0.0 }
 0x338   : > { %v2205_v7 = vadd.f32 %v2204_v19, %v2203_v10  ;;  %v2008_v61 = vpop.f32.mrf.mxu1  ;;  %v2174_v19 = vmul.f32 %v4022_v14, %v4022_v14 }
 0x339   : > { %v1617_v2 = vpop.permute.xlu1 %1616  ;;  %v4068_v56 = vadd.f32 %v3960_v35, %v2008_v61 }
 0x33a   : > { %v1995_v20 = vpop.f32.mrf.mxu0  ;;  %v1629_v52 = vpop.permute.xlu0 %1628  ;;  %1690 = vst.msk [vmem:[#allocation3 + $0xb8] sm:$0xff] %vm1666_vm12, %v1617_v2  ;;  %v2214_v61 = vsel %vm400_vm0, %v2174_v19, 0.0 }
 0x33b   : > { %v1996_v21 = vadd.f32 %v3960_v35, %v1995_v20  ;;  %1696 = vst.msk [vmem:[#allocation3 + $0xe8] sm:$0xff] %vm1666_vm12, %v1629_v52  ;;  %v1751_v60 = vpop.permute.xlu2 %1750  ;;  %v2114_v2 = vsel %vm400_vm0, %v4068_v56, 0.0 }
 0x33c   : > { %1824 = vst.msk [vmem:[#allocation3 + $0xb8] sm:$0xff] %vm1800_vm13, %v1751_v60  ;;  %v2175_v60 = vmul.f32 %v4068_v56, %v4068_v56 }
 0x33d   : > { %2068 = vst.msk [vmem:[%s3969_s12 + $0x28] sm:$0xff] %vm400_vm0, %v1996_v21  ;;  %v2104_v23 = vsel %vm400_vm0, %v1996_v21, 0.0  ;;  %v2170_v43 = vmul.f32 %v1996_v21, %v1996_v21 }
 0x33e   : > { %v4064_v58 = vadd.f32 %v2104_v23, %v2103_v62  ;;  %2073 = vst.msk [vmem:[%s3969_s12 + $0x50] sm:$0xff] %vm400_vm0, %v4068_v56  ;;  %v2212_v23 = vsel %vm400_vm0, %v2173_v46, 0.0 }
 0x33f   : > { %v2206_v32 = vsel %vm400_vm0, %v2170_v43, 0.0  ;;  %v2112_v43 = vsel %vm400_vm0, %v4022_v14, 0.0  ;;  %v2216_v14 = vsel %vm400_vm0, %v2175_v60, 0.0 }
 0x340   : > { %v2207_v40 = vadd.f32 %v2206_v32, %v2205_v7  ;;  %v2010_v24 = vpop.f32.mrf.mxu1 }
 0x341   : > { %v1749_v26 = vpop.permute.xlu1 %1748  ;;  %v4078_v16 = vadd.f32 %v3960_v35, %v2010_v24 }
 0x342   : > { %v1761_v12 = vpop.permute.xlu0 %1760  ;;  %1823 = vst.msk [vmem:[#allocation3 + $0xb0] sm:$0xff] %vm1800_vm13, %v1749_v26 }
 0x343   : > { %1829 = vst.msk [vmem:[#allocation3 + $0xe0] sm:$0xff] %vm1800_vm13, %v1761_v12  ;;  %v1365_v11 = vpop.permute.xlu2 %1364  ;;  %v1856_v1 = vld [vmem:[#allocation3 + $0xb8] sm:$0xff]  ;;  %v2176_v32 = vmul.f32 %v4078_v16, %v4078_v16 }
 0x344   : > { %1431 = vst.msk [vmem:[#allocation3 + $0xf0] sm:$0xff] %vm1400_vm9, %v1365_v11  ;;  %v2116_v11 = vsel %vm400_vm0, %v4078_v16, 0.0 }
 0x345   : > { %2074 = vst.msk [vmem:[%s3969_s12 + $0x58] sm:$0xff] %vm400_vm0, %v4078_v16 }
 0x349   : > { %v1763_v28 = vpop.permute.xlu1 %1762  ;;  %v1855_v51 = vld [vmem:[#allocation3 + $0xb0] sm:$0xff] }
 0x34a   : > { %v1367_v4 = vpop.permute.xlu0 %1366  ;;  %1830 = vst.msk [vmem:[#allocation3 + $0xe8] sm:$0xff] %vm1800_vm13, %v1763_v28  ;;  %v1876_v41 = vpack.c.bf16 %v1856_v1, %v1855_v51  ;;  %v1861_v30 = vld [vmem:[#allocation3 + $0xe0] sm:$0xff] }
 0x34b   : > { %1432 = vst.msk [vmem:[#allocation3 + $0xf8] sm:$0xff] %vm1400_vm9, %v1367_v4  ;;  %v1498_v29 = vpop.permute.xlu2 %1497 }
 0x34c   : > { %1563 = vst.msk [vmem:[#allocation3 + $0xf8] sm:$0xff] %vm1531_vm11, %v1498_v29  ;;  %2390 = vmatmul.msk.bf16.gmra.mxu2 %vm1921_vm14, %v1876_v41  ;;  %v2218_v29 = vsel %vm400_vm0, %v2176_v32, 0.0 }
 0x351   : > { %v1496_v10 = vpop.permute.xlu1 %1495  ;;  %v1862_v18 = vld [vmem:[#allocation3 + $0xe8] sm:$0xff] }
 0x352   : > { %v1631_v3 = vpop.permute.xlu0 %1630  ;;  %1562 = vst.msk [vmem:[#allocation3 + $0xf0] sm:$0xff] %vm1531_vm11, %v1496_v10  ;;  %v1879_v44 = vpack.c.bf16 %v1862_v18, %v1861_v30 }
 0x353   : > { %v1765_v0 = vpop.permute.xlu2 %1764  ;;  %1697 = vst.msk [vmem:[#allocation3 + $0xf0] sm:$0xff] %vm1666_vm12, %v1631_v3 }
 0x354   : > { %2393 = vmatmul.msk.bf16.gmra.mxu3 %vm1921_vm14, %v1879_v44  ;;  %1831 = vst.msk [vmem:[#allocation3 + $0xf0] sm:$0xff] %vm1800_vm13, %v1765_v0 }
 0x358   : > { %v2028_v55 = vpop.f32.mrf.mxu2 }
 0x359   : > { %v4091_v49 = vadd.f32 %v3960_v35, %v2028_v55  ;;  %v1633_v37 = vpop.permute.xlu1 %1632 }
 0x35a   : > { %v1767_v36 = vpop.permute.xlu0 %1766  ;;  %1698 = vst.msk [vmem:[#allocation3 + $0xf8] sm:$0xff] %vm1666_vm12, %v1633_v37 }
 0x35b   : > { %2081 = vst.msk [vmem:[%s3969_s12 + $0x90] sm:$0xff] %vm400_vm0, %v4091_v49  ;;  %v1863_v17 = vld [vmem:[#allocation3 + $0xf0] sm:$0xff] }
 0x35c   : > { %1832 = vst.msk [vmem:[#allocation3 + $0xf8] sm:$0xff] %vm1800_vm13, %v1767_v36 }
 0x35f   : > { %v2043_v53 = vpop.f32.mrf.mxu3 }
 0x360   : > { %v2030_v39 = vpop.f32.mrf.mxu2  ;;  %v4107_v57 = vadd.f32 %v3960_v35, %v2043_v53 }
 0x361   : > { %v4101_v63 = vadd.f32 %v3960_v35, %v2030_v39 }
 0x362   : > { %2087 = vst.msk [vmem:[%s3969_s12 + $0xc0] sm:$0xff] %vm400_vm0, %v4107_v57 }
 0x363   : > { %2082 = vst.msk [vmem:[%s3969_s12 + $0x98] sm:$0xff] %vm400_vm0, %v4101_v63  ;;  %v1864_v25 = vld [vmem:[#allocation3 + $0xf8] sm:$0xff] }
 0x364   : > { %v1880_v47 = vpack.c.bf16 %v1864_v25, %v1863_v17 }
 0x366   : > { %2394 = vmatmul.msk.bf16.gmra.mxu3 %vm1921_vm14, %v1880_v47 }
 0x367   : > { %v2045_v48 = vpop.f32.mrf.mxu3 }
 0x368   : > { %v4114_v34 = vadd.f32 %v3960_v35, %v2045_v48 }
 0x36a   : > { %2088 = vst.msk [vmem:[%s3969_s12 + $0xc8] sm:$0xff] %vm400_vm0, %v4114_v34 }
 0x372   : > { %v1998_v54 = vpop.f32.mrf.mxu0 }
 0x373   : > { %v1999_v22 = vadd.f32 %v3960_v35, %v1998_v54 }
 0x375   : > { %2069 = vst.msk [vmem:[%s3969_s12 + $0x30] sm:$0xff] %vm400_vm0, %v1999_v22  ;;  %v2106_v59 = vsel %vm400_vm0, %v1999_v22, 0.0  ;;  %v2171_v38 = vmul.f32 %v1999_v22, %v1999_v22 }
 0x376   : > { %v2107_v5 = vadd.f32 %v2106_v59, %v4064_v58 }
 0x377   : > { %v2208_v27 = vsel %vm400_vm0, %v2171_v38, 0.0 }
 0x378   : > { %v2209_v9 = vadd.f32 %v2208_v27, %v2207_v40 }
 0x379   : > { %v2013_v62 = vpop.f32.mrf.mxu1 }
 0x37a   : > { %v2000_v6 = vpop.f32.mrf.mxu0  ;;  %v2014_v20 = vadd.f32 %v3960_v35, %v2013_v62  ;;  %v2182_v62 = vmul.f32 %v4043_v15, %v4043_v15 }
 0x37b   : > { %v2001_v13 = vadd.f32 %v3960_v35, %v2000_v6  ;;  %v2181_v6 = vmul.f32 %v4034_v45, %v4034_v45 }
 0x37c   : > { %2075 = vst.msk [vmem:[%s3969_s12 + $0x60] sm:$0xff] %vm400_vm0, %v2014_v20  ;;  %v2177_v24 = vmul.f32 %v2014_v20, %v2014_v20  ;;  %v2118_v56 = vsel %vm400_vm0, %v2014_v20, 0.0  ;;  %v2230_v60 = vsel %vm400_vm0, %v2182_v62, 0.0 }
 0x37d   : > { %2070 = vst.msk [vmem:[%s3969_s12 + $0x38] sm:$0xff] %vm400_vm0, %v2001_v13  ;;  %v2108_v8 = vsel %vm400_vm0, %v2001_v13, 0.0  ;;  %v2172_v31 = vmul.f32 %v2001_v13, %v2001_v13  ;;  %v2228_v20 = vsel %vm400_vm0, %v2181_v6, 0.0 }
 0x37e   : > { %v2109_v50 = vadd.f32 %v2108_v8, %v2107_v5  ;;  %v2220_v3 = vsel %vm400_vm0, %v2177_v24, 0.0 }
 0x37f   : > { %v2210_v7 = vsel %vm400_vm0, %v2172_v31, 0.0 }
 0x380   : > { %v2111_v52 = vadd.f32 %v2110_v33, %v2109_v50  ;;  %v2211_v21 = vadd.f32 %v2210_v7, %v2209_v9  ;;  %v2126_v50 = vsel %vm400_vm0, %v4034_v45, 0.0  ;;  %v2130_v45 = vsel %vm400_vm0, %v4091_v49, 0.0 }
 0x381   : > { %v2015_v1 = vpop.f32.mrf.mxu1 }
 0x382   : > { %v2113_v42 = vadd.f32 %v2112_v43, %v2111_v52  ;;  %v2213_v58 = vadd.f32 %v2212_v23, %v2211_v21  ;;  %v2016_v28 = vadd.f32 %v3960_v35, %v2015_v1  ;;  %v2128_v52 = vsel %vm400_vm0, %v4043_v15, 0.0 }
 0x383   : > { %v2183_v21 = vmul.f32 %v4091_v49, %v4091_v49  ;;  %v2132_v15 = vsel %vm400_vm0, %v4101_v63, 0.0 }
 0x384   : > { %v2215_v40 = vadd.f32 %v2214_v61, %v2213_v58  ;;  %v2115_v12 = vadd.f32 %v2114_v2, %v2113_v42  ;;  %2076 = vst.msk [vmem:[%s3969_s12 + $0x68] sm:$0xff] %vm400_vm0, %v2016_v28  ;;  %v2120_v16 = vsel %vm400_vm0, %v2016_v28, 0.0  ;;  %v2178_v10 = vmul.f32 %v2016_v28, %v2016_v28 }
 0x385   : > { %v2184_v42 = vmul.f32 %v4101_v63, %v4101_v63  ;;  %v2232_v2 = vsel %vm400_vm0, %v2183_v21, 0.0 }
 0x386   : > { %v2117_v26 = vadd.f32 %v2116_v11, %v2115_v12  ;;  %v2217_v4 = vadd.f32 %v2216_v14, %v2215_v40  ;;  %v2222_v0 = vsel %vm400_vm0, %v2178_v10, 0.0 }
 0x387   : > { %v2234_v14 = vsel %vm400_vm0, %v2184_v42, 0.0 }
 0x388   : > { %v2119_v51 = vadd.f32 %v2118_v56, %v2117_v26  ;;  %v2219_v41 = vadd.f32 %v2218_v29, %v2217_v4 }
 0x38a   : > { %v2221_v30 = vadd.f32 %v2220_v3, %v2219_v41  ;;  %v2121_v18 = vadd.f32 %v2120_v16, %v2119_v51 }
 0x38c   : > { %v2223_v44 = vadd.f32 %v2222_v0, %v2221_v30 }
 0x398   : > { %v2033_v55 = vpop.f32.mrf.mxu2 }
 0x399   : > { %v2034_v36 = vadd.f32 %v3960_v35, %v2033_v55 }
 0x39b   : > { %2083 = vst.msk [vmem:[%s3969_s12 + $0xa0] sm:$0xff] %vm400_vm0, %v2034_v36  ;;  %v2185_v32 = vmul.f32 %v2034_v36, %v2034_v36  ;;  %v2134_v11 = vsel %vm400_vm0, %v2034_v36, 0.0  ;;  %v2189_v36 = vmul.f32 %v4107_v57, %v4107_v57 }
 0x39d   : > { %v2236_v4 = vsel %vm400_vm0, %v2185_v32, 0.0 }
 0x39f   : > { %v2048_v53 = vpop.f32.mrf.mxu3 }
 0x3a0   : > { %v2035_v37 = vpop.f32.mrf.mxu2  ;;  %v4167_v17 = vadd.f32 %v3960_v35, %v2048_v53 }
 0x3a1   : > { %v2036_v39 = vadd.f32 %v3960_v35, %v2035_v37 }
 0x3a2   : > { %2089 = vst.msk [vmem:[%s3969_s12 + $0xd0] sm:$0xff] %vm400_vm0, %v4167_v17 }
 0x3a3   : > { %2084 = vst.msk [vmem:[%s3969_s12 + $0xa8] sm:$0xff] %vm400_vm0, %v2036_v39  ;;  %v2186_v24 = vmul.f32 %v2036_v39, %v2036_v39  ;;  %v2136_v1 = vsel %vm400_vm0, %v2036_v39, 0.0 }
 0x3a5   : > { %v2238_v63 = vsel %vm400_vm0, %v2186_v24, 0.0 }
 0x3a7   : > { %v2050_v25 = vpop.f32.mrf.mxu3 }
 0x3a8   : > { %v4173_v47 = vadd.f32 %v3960_v35, %v2050_v25 }
 0x3a9   : > { %v2018_v48 = vpop.f32.mrf.mxu1 }
 0x3aa   : > { %2090 = vst.msk [vmem:[%s3969_s12 + $0xd8] sm:$0xff] %vm400_vm0, %v4173_v47  ;;  %v2019_v54 = vadd.f32 %v3960_v35, %v2018_v48  ;;  %v2142_v48 = vsel %vm400_vm0, %v4107_v57, 0.0 }
 0x3ac   : > { %2077 = vst.msk [vmem:[%s3969_s12 + $0x70] sm:$0xff] %vm400_vm0, %v2019_v54  ;;  %v2179_v22 = vmul.f32 %v2019_v54, %v2019_v54  ;;  %v2122_v59 = vsel %vm400_vm0, %v2019_v54, 0.0  ;;  %v2190_v54 = vmul.f32 %v4114_v34, %v4114_v34 }
 0x3ad   : > { %v2123_v9 = vadd.f32 %v2122_v59, %v2121_v18 }
 0x3ae   : > { %v2224_v5 = vsel %vm400_vm0, %v2179_v22, 0.0  ;;  %v2246_v57 = vsel %vm400_vm0, %v2190_v54, 0.0 }
 0x3af   : > { %v2225_v8 = vadd.f32 %v2224_v5, %v2223_v44  ;;  %v2244_v5 = vsel %vm400_vm0, %v2189_v36, 0.0 }
 0x3b1   : > { %v2020_v38 = vpop.f32.mrf.mxu1 }
 0x3b2   : > { %v2021_v27 = vadd.f32 %v3960_v35, %v2020_v38 }
 0x3b4   : > { %2078 = vst.msk [vmem:[%s3969_s12 + $0x78] sm:$0xff] %vm400_vm0, %v2021_v27  ;;  %v2124_v13 = vsel %vm400_vm0, %v2021_v27, 0.0  ;;  %v2180_v46 = vmul.f32 %v2021_v27, %v2021_v27  ;;  %v2144_v27 = vsel %vm400_vm0, %v4114_v34, 0.0 }
 0x3b5   : > { %v2125_v31 = vadd.f32 %v2124_v13, %v2123_v9  ;;  %v2191_v9 = vmul.f32 %v4167_v17, %v4167_v17 }
 0x3b6   : > { %v2226_v33 = vsel %vm400_vm0, %v2180_v46, 0.0 }
 0x3b7   : > { %v2127_v19 = vadd.f32 %v2126_v50, %v2125_v31  ;;  %v2227_v7 = vadd.f32 %v2226_v33, %v2225_v8  ;;  %v2146_v8 = vsel %vm400_vm0, %v4167_v17, 0.0  ;;  %v2192_v31 = vmul.f32 %v4173_v47, %v4173_v47 }
 0x3b8   : > { %v2248_v34 = vsel %vm400_vm0, %v2191_v9, 0.0 }
 0x3b9   : > { %v2129_v23 = vadd.f32 %v2128_v52, %v2127_v19  ;;  %v2229_v43 = vadd.f32 %v2228_v20, %v2227_v7  ;;  %v2148_v19 = vsel %vm400_vm0, %v4173_v47, 0.0  ;;  %v2250_v52 = vsel %vm400_vm0, %v2192_v31, 0.0 }
 0x3bb   : > { %v2131_v58 = vadd.f32 %v2130_v45, %v2129_v23  ;;  %v2231_v61 = vadd.f32 %v2230_v60, %v2229_v43 }
 0x3bd   : > { %v2233_v40 = vadd.f32 %v2232_v2, %v2231_v61  ;;  %v2133_v12 = vadd.f32 %v2132_v15, %v2131_v58 }
 0x3bf   : > { %v2135_v49 = vadd.f32 %v2134_v11, %v2133_v12  ;;  %v2235_v26 = vadd.f32 %v2234_v14, %v2233_v40 }
 0x3c1   : > { %v2137_v29 = vadd.f32 %v2136_v1, %v2135_v49  ;;  %v2237_v56 = vadd.f32 %v2236_v4, %v2235_v26 }
 0x3c3   : > { %v2239_v28 = vadd.f32 %v2238_v63, %v2237_v56 }
 0x3cf   : > { %v2038_v51 = vpop.f32.mrf.mxu2 }
 0x3d0   : > { %v2039_v41 = vadd.f32 %v3960_v35, %v2038_v51 }
 0x3d2   : > { %2085 = vst.msk [vmem:[%s3969_s12 + $0xb0] sm:$0xff] %vm400_vm0, %v2039_v41  ;;  %v2187_v3 = vmul.f32 %v2039_v41, %v2039_v41  ;;  %v2138_v16 = vsel %vm400_vm0, %v2039_v41, 0.0 }
 0x3d3   : > { %v2139_v55 = vadd.f32 %v2138_v16, %v2137_v29 }
 0x3d4   : > { %v2240_v18 = vsel %vm400_vm0, %v2187_v3, 0.0 }
 0x3d5   : > { %v2241_v53 = vadd.f32 %v2240_v18, %v2239_v28 }
 0x3d7   : > { %v2040_v10 = vpop.f32.mrf.mxu2  ;;  %v2053_v30 = vpop.f32.mrf.mxu3 }
 0x3d8   : > { %v2041_v0 = vadd.f32 %v3960_v35, %v2040_v10  ;;  %v2054_v44 = vadd.f32 %v3960_v35, %v2053_v30 }
 0x3da   : > { %2086 = vst.msk [vmem:[%s3969_s12 + $0xb8] sm:$0xff] %vm400_vm0, %v2041_v0  ;;  %v2140_v37 = vsel %vm400_vm0, %v2041_v0, 0.0  ;;  %v2188_v39 = vmul.f32 %v2041_v0, %v2041_v0  ;;  %v2193_v23 = vmul.f32 %v2054_v44, %v2054_v44  ;;  %v2150_v60 = vsel %vm400_vm0, %v2054_v44, 0.0 }
 0x3db   : > { %v2141_v25 = vadd.f32 %v2140_v37, %v2139_v55  ;;  %2091 = vst.msk [vmem:[%s3969_s12 + $0xe0] sm:$0xff] %vm400_vm0, %v2054_v44 }
 0x3dc   : > { %v2242_v22 = vsel %vm400_vm0, %v2188_v39, 0.0  ;;  %v2252_v42 = vsel %vm400_vm0, %v2193_v23, 0.0 }
 0x3dd   : > { %v2143_v59 = vadd.f32 %v2142_v48, %v2141_v25  ;;  %v2243_v38 = vadd.f32 %v2242_v22, %v2241_v53 }
 0x3df   : > { %v2145_v6 = vadd.f32 %v2144_v27, %v2143_v59  ;;  %v2245_v13 = vadd.f32 %v2244_v5, %v2243_v38  ;;  %v2055_v46 = vpop.f32.mrf.mxu3 }
 0x3e0   : > { %v2056_v50 = vadd.f32 %v3960_v35, %v2055_v46 }
 0x3e1   : > { %v2247_v62 = vadd.f32 %v2246_v57, %v2245_v13  ;;  %v2147_v33 = vadd.f32 %v2146_v8, %v2145_v6 }
 0x3e2   : > { %2092 = vst.msk [vmem:[%s3969_s12 + $0xe8] sm:$0xff] %vm400_vm0, %v2056_v50  ;;  %v2194_v47 = vmul.f32 %v2056_v50, %v2056_v50  ;;  %v2152_v2 = vsel %vm400_vm0, %v2056_v50, 0.0 }
 0x3e3   : > { %v2149_v7 = vadd.f32 %v2148_v19, %v2147_v33  ;;  %v2249_v20 = vadd.f32 %v2248_v34, %v2247_v62 }
 0x3e4   : > { %v2254_v12 = vsel %vm400_vm0, %v2194_v47, 0.0 }
 0x3e5   : > { %v2251_v17 = vadd.f32 %v2250_v52, %v2249_v20  ;;  %v2151_v45 = vadd.f32 %v2150_v60, %v2149_v7 }
 0x3e7   : > { %v2253_v61 = vadd.f32 %v2252_v42, %v2251_v17  ;;  %v2153_v32 = vadd.f32 %v2152_v2, %v2151_v45 }
 0x3e9   : > { %v2058_v21 = vpop.f32.mrf.mxu3  ;;  %v2255_v24 = vadd.f32 %v2254_v12, %v2253_v61 }
 0x3ea   : > { %v2059_v43 = vadd.f32 %v3960_v35, %v2058_v21 }
 0x3ec   : > { %2093 = vst.msk [vmem:[%s3969_s12 + $0xf0] sm:$0xff] %vm400_vm0, %v2059_v43  ;;  %v2195_v58 = vmul.f32 %v2059_v43, %v2059_v43  ;;  %v2154_v15 = vsel %vm400_vm0, %v2059_v43, 0.0 }
 0x3ed   : > { %v2155_v49 = vadd.f32 %v2154_v15, %v2153_v32 }
 0x3ee   : > { %v2256_v14 = vsel %vm400_vm0, %v2195_v58, 0.0 }
 0x3ef   : > { %v2257_v1 = vadd.f32 %v2256_v14, %v2255_v24 }
 0x3f1   : > { %v2060_v40 = vpop.f32.mrf.mxu3 }
 0x3f2   : > { %v2061_v11 = vadd.f32 %v3960_v35, %v2060_v40 }
 0x3f4   : > { %2094 = vst.msk [vmem:[%s3969_s12 + $0xf8] sm:$0xff] %vm400_vm0, %v2061_v11  ;;  %v2156_v26 = vsel %vm400_vm0, %v2061_v11, 0.0  ;;  %v2196_v4 = vmul.f32 %v2061_v11, %v2061_v11 }
 0x3f5   : > { %v2157_v29 = vadd.f32 %v2156_v26, %v2155_v49 }
 0x3f6   : > { %v2258_v56 = vsel %vm400_vm0, %v2196_v4, 0.0 }
 0x3f7   : > { %v2158_v63 = vrot.slane %v2157_v29, 4  ;;  %v2259_v28 = vadd.f32 %v2258_v56, %v2257_v1 }
 0x3f9   : > { %v2159_v51 = vadd.f32 %v2158_v63, %v2157_v29  ;;  %v2260_v41 = vrot.slane %v2259_v28, 4 }
 0x3fb   : > { %v2160_v3 = vrot.slane %v2159_v51, 2  ;;  %v2261_v16 = vadd.f32 %v2260_v41, %v2259_v28 }
 0x3fd   : > { %v2161_v10 = vadd.f32 %v2160_v3, %v2159_v51  ;;  %v2262_v35 = vrot.slane %v2261_v16, 2 }
 0x3ff   : > { %v2162_v30 = vrot.slane %v2161_v10, 1  ;;  %v2263_v18 = vadd.f32 %v2262_v35, %v2261_v16 }
 0x401   : > { %v2163_v0 = vadd.f32 %v2162_v30, %v2161_v10  ;;  %v2264_v44 = vrot.slane %v2263_v18, 1 }
 0x403   : > { %2164 = vst.msk [vmem:[%s262_s15] sm:$0x1] %vm409_vm1, %v2163_v0  ;;  %v2265_v55 = vadd.f32 %v2264_v44, %v2263_v18 }
 0x405   : > { %2266 = vst.msk [vmem:[%s262_s15 + $0x1] sm:$0x1] %vm409_vm1, %v2265_v55 }
 0x406 PF: > { %s17_s21 = sadd.s32 1, %s2448_s21  }
 0x407   : > { %p14_p4 = scmp.ge.s32.totalorder %s17_s21, 4  }
 0x409   :  { %16 = sbr.rel (!%p14_p4) target bundleno = 1 (0x1), region = 84 }

</bundles_post_ra>
